<compile_context>
chip_gen: v6e
topology: v6e:2x2x1
jax: 0.10.0
libtpu: 0.0.40
codegen_flags: <defaults>
</compile_context>

<pallas_src>
import functools
import math

import jax
import jax.numpy as jnp
from jax.experimental import pallas as pl
from jax.experimental.pallas import tpu as pltpu

# ----------------------------- small config (scaled-down Pali) -----------------------------
IMAGE_SIZE = 32
PATCH_SIZE = 8
NUM_PATCHES = (IMAGE_SIZE // PATCH_SIZE) ** 2          # 16
PATCH_DIM = 3 * PATCH_SIZE * PATCH_SIZE                # 192
DIM = 32
VIT_DEPTH = 2
VIT_HEADS = 4
ENC_NUM_TOKENS = 256
DEC_NUM_TOKENS = 256
ENC_DEPTH = 2
DEC_DEPTH = 2
ENC_HEADS = 4
DEC_HEADS = 4
ENC_MAX_SEQ_LEN = 64
DEC_MAX_SEQ_LEN = 64
FF_MULT = 4
BATCH = 2
ENC_SEQ = 8
DEC_SEQ = 8

NEG_INF = -1e30
LN_EPS = 1e-5


# =============================== in-kernel helpers ===============================
def _ln(x, g, b, eps):
    """LayerNorm over the last axis.  x: [S, D] f32, g/b: [1, D]."""
    mu = jnp.mean(x, axis=-1, keepdims=True)
    var = jnp.mean(jnp.square(x - mu), axis=-1, keepdims=True)
    return (x - mu) * jax.lax.rsqrt(var + eps) * g + b


# =============================== Pallas kernels ===============================
def _attn_kernel(*refs, heads, scale, causal, has_bias, is_cross, eps):
    """Fused pre-LN multi-head attention + output projection + residual add.

    Per grid step (one batch element):
      h   = LN(x)
      q   = h @ Wq ; kv = (ctx if cross else h) @ Wkv
      per head: softmax(q_h k_h^T * scale + bias) v_h, accumulated through Wo slices
      out = acc + bo + x
    """
    refs = list(refs)
    x_ref = refs.pop(0)
    ctx_ref = refs.pop(0) if is_cross else None
    bias_ref = refs.pop(0) if has_bias else None
    g_ref, b_ref, wq_ref, wkv_ref, wo_ref, bo_ref, o_ref = refs

    x = x_ref[0].astype(jnp.float32)                                   # [Sq, D]
    h = _ln(x, g_ref[...].astype(jnp.float32), b_ref[...].astype(jnp.float32), eps)

    wq = wq_ref[...].astype(jnp.float32)                               # [D, inner]
    wkv = wkv_ref[...].astype(jnp.float32)                             # [Dc, 2*inner]
    wo = wo_ref[...].astype(jnp.float32)                               # [inner, D]

    q = jnp.dot(h, wq, preferred_element_type=jnp.float32)             # [Sq, inner]
    kv_in = ctx_ref[0].astype(jnp.float32) if is_cross else h
    kv = jnp.dot(kv_in, wkv, preferred_element_type=jnp.float32)       # [Sk, 2*inner]

    inner = wq.shape[1]
    dh = inner // heads
    Sq = q.shape[0]
    Sk = kv.shape[0]

    if has_bias:
        bias = bias_ref[0]                                             # [1, Sk] f32 additive
    if causal:
        rows = jax.lax.broadcasted_iota(jnp.int32, (Sq, Sk), 0)
        cols = jax.lax.broadcasted_iota(jnp.int32, (Sq, Sk), 1)
        causal_ok = rows >= cols

    acc = None
    for hd in range(heads):
        qh = q[:, hd * dh:(hd + 1) * dh]                               # [Sq, dh]
        kh = kv[:, hd * dh:(hd + 1) * dh]                              # [Sk, dh]
        vh = kv[:, inner + hd * dh: inner + (hd + 1) * dh]             # [Sk, dh]
        # q @ k^T without materializing a transpose.
        s = jax.lax.dot_general(qh, kh, (((1,), (1,)), ((), ())),
                                preferred_element_type=jnp.float32) * scale
        if has_bias:
            s = s + bias
        if causal:
            s = jnp.where(causal_ok, s, NEG_INF)
        m = jnp.max(s, axis=-1, keepdims=True)
        p = jnp.exp(s - m)
        inv = pl.reciprocal(jnp.sum(p, axis=-1, keepdims=True), approx=True)
        oh = jnp.dot(p, vh, preferred_element_type=jnp.float32) * inv  # [Sq, dh]
        # fold the head back through its slice of Wo (avoids a lane-axis concat).
        contrib = jnp.dot(oh, wo[hd * dh:(hd + 1) * dh, :],
                          preferred_element_type=jnp.float32)          # [Sq, D]
        acc = contrib if acc is None else acc + contrib

    out = acc + bo_ref[...].astype(jnp.float32) + x                    # residual
    o_ref[0] = out.astype(o_ref.dtype)


def _ff_kernel(x_ref, g_ref, b_ref, w1_ref, b1_ref, w2_ref, b2_ref, o_ref, *, eps):
    """Fused pre-LN feed-forward: LN -> W1 -> GELU -> W2 -> residual add."""
    x = x_ref[0].astype(jnp.float32)                                   # [S, D]
    h = _ln(x, g_ref[...].astype(jnp.float32), b_ref[...].astype(jnp.float32), eps)
    h = jnp.dot(h, w1_ref[...].astype(jnp.float32),
                preferred_element_type=jnp.float32) + b1_ref[...].astype(jnp.float32)
    # TODO(synk): PyTorch nn.GELU defaults to the exact erf form; tanh approximation used here.
    h = jax.nn.gelu(h, approximate=True)
    out = jnp.dot(h, w2_ref[...].astype(jnp.float32),
                  preferred_element_type=jnp.float32) + b2_ref[...].astype(jnp.float32) + x
    o_ref[0] = out.astype(o_ref.dtype)


def _patch_embed_kernel(x_ref, g1_ref, b1_ref, w_ref, bw_ref, g2_ref, b2_ref, pos_ref,
                        o_ref, *, eps):
    """Fused ViT patch embedding: LN -> linear -> LN -> + pos_emb."""
    x = x_ref[0].astype(jnp.float32)                                   # [NP, PATCH_DIM]
    h = _ln(x, g1_ref[...].astype(jnp.float32), b1_ref[...].astype(jnp.float32), eps)
    h = jnp.dot(h, w_ref[...].astype(jnp.float32),
                preferred_element_type=jnp.float32) + bw_ref[...].astype(jnp.float32)
    h = _ln(h, g2_ref[...].astype(jnp.float32), b2_ref[...].astype(jnp.float32), eps)
    o_ref[0] = (h + pos_ref[0].astype(jnp.float32)).astype(o_ref.dtype)


def _ln_kernel(x_ref, g_ref, b_ref, o_ref, *, eps):
    x = x_ref[0].astype(jnp.float32)
    o_ref[0] = _ln(x, g_ref[...].astype(jnp.float32),
                   b_ref[...].astype(jnp.float32), eps).astype(o_ref.dtype)


def _ln_linear_kernel(x_ref, g_ref, b_ref, w_ref, o_ref, *, eps):
    """Fused final LN + (bias-free) projection to logits (lane-dense 256 output)."""
    x = x_ref[0].astype(jnp.float32)
    h = _ln(x, g_ref[...].astype(jnp.float32), b_ref[...].astype(jnp.float32), eps)
    o_ref[0] = jnp.dot(h, w_ref[...].astype(jnp.float32),
                       preferred_element_type=jnp.float32).astype(o_ref.dtype)


# =============================== kernel wrappers ===============================
def _rep2d_spec(a):
    # whole (small) 2-D parameter array, replicated across the batch grid.
    return pl.BlockSpec(a.shape, lambda b: (0, 0))


def fused_attention(x, p, heads, context=None, key_mask=None, causal=False):
    """x: [B, Sq, D].  Residual-added attention block output, one pallas_call."""
    B, Sq, D = x.shape
    is_cross = context is not None
    Sk = context.shape[1] if is_cross else Sq
    inner = p["wq"].shape[1]
    dh = inner // heads
    scale = 1.0 / math.sqrt(dh)
    has_bias = key_mask is not None

    inputs = [x]
    in_specs = [pl.BlockSpec((1, Sq, D), lambda b: (b, 0, 0))]
    if is_cross:
        Dc = context.shape[2]
        inputs.append(context)
        in_specs.append(pl.BlockSpec((1, Sk, Dc), lambda b: (b, 0, 0)))
    if has_bias:
        # single additive-bias row per batch element; broadcast over Sq in-kernel.
        bias = jnp.where(key_mask, 0.0, NEG_INF).astype(jnp.float32)[:, None, :]   # [B, 1, Sk]
        inputs.append(bias)
        in_specs.append(pl.BlockSpec((1, 1, Sk), lambda b: (b, 0, 0)))

    params = [p["ln_g"].reshape(1, D), p["ln_b"].reshape(1, D),
              p["wq"], p["wkv"], p["wo"], p["bo"].reshape(1, D)]
    inputs += params
    in_specs += [_rep2d_spec(a) for a in params]

    return pl.pallas_call(
        functools.partial(_attn_kernel, heads=heads, scale=scale, causal=causal,
                          has_bias=has_bias, is_cross=is_cross, eps=LN_EPS),
        out_shape=jax.ShapeDtypeStruct((B, Sq, D), x.dtype),
        grid=(B,),
        in_specs=in_specs,
        out_specs=pl.BlockSpec((1, Sq, D), lambda b: (b, 0, 0)),
        compiler_params=pltpu.CompilerParams(dimension_semantics=("parallel",)),
    )(*inputs)


def fused_feed_forward(x, p):
    B, S, D = x.shape
    params = [p["ln_g"].reshape(1, D), p["ln_b"].reshape(1, D),
              p["w1"], p["b1"].reshape(1, -1), p["w2"], p["b2"].reshape(1, D)]
    in_specs = [pl.BlockSpec((1, S, D), lambda b: (b, 0, 0))] + [_rep2d_spec(a) for a in params]
    return pl.pallas_call(
        functools.partial(_ff_kernel, eps=LN_EPS),
        out_shape=jax.ShapeDtypeStruct((B, S, D), x.dtype),
        grid=(B,),
        in_specs=in_specs,
        out_specs=pl.BlockSpec((1, S, D), lambda b: (b, 0, 0)),
        compiler_params=pltpu.CompilerParams(dimension_semantics=("parallel",)),
    )(x, *params)


def patch_embed(patches, p):
    B, NP, PD = patches.shape
    D = p["patch_w"].shape[1]
    params2d = [p["patch_ln1_g"].reshape(1, PD), p["patch_ln1_b"].reshape(1, PD),
                p["patch_w"], p["patch_b"].reshape(1, D),
                p["patch_ln2_g"].reshape(1, D), p["patch_ln2_b"].reshape(1, D)]
    in_specs = ([pl.BlockSpec((1, NP, PD), lambda b: (b, 0, 0))]
                + [_rep2d_spec(a) for a in params2d]
                + [pl.BlockSpec((1, NP, D), lambda b: (0, 0, 0))])
    return pl.pallas_call(
        functools.partial(_patch_embed_kernel, eps=LN_EPS),
        out_shape=jax.ShapeDtypeStruct((B, NP, D), patches.dtype),
        grid=(B,),
        in_specs=in_specs,
        out_specs=pl.BlockSpec((1, NP, D), lambda b: (b, 0, 0)),
        compiler_params=pltpu.CompilerParams(dimension_semantics=("parallel",)),
    )(patches, *params2d, p["pos_emb"])


def layer_norm(x, g, b):
    B, S, D = x.shape
    return pl.pallas_call(
        functools.partial(_ln_kernel, eps=LN_EPS),
        out_shape=jax.ShapeDtypeStruct((B, S, D), x.dtype),
        grid=(B,),
        in_specs=[pl.BlockSpec((1, S, D), lambda i: (i, 0, 0)),
                  _rep2d_spec(g.reshape(1, D)), _rep2d_spec(b.reshape(1, D))],
        out_specs=pl.BlockSpec((1, S, D), lambda i: (i, 0, 0)),
        compiler_params=pltpu.CompilerParams(dimension_semantics=("parallel",)),
    )(x, g.reshape(1, D), b.reshape(1, D))


def ln_linear(x, g, b, w):
    B, S, D = x.shape
    N = w.shape[1]
    return pl.pallas_call(
        functools.partial(_ln_linear_kernel, eps=LN_EPS),
        out_shape=jax.ShapeDtypeStruct((B, S, N), x.dtype),
        grid=(B,),
        in_specs=[pl.BlockSpec((1, S, D), lambda i: (i, 0, 0)),
                  _rep2d_spec(g.reshape(1, D)), _rep2d_spec(b.reshape(1, D)),
                  _rep2d_spec(w)],
        out_specs=pl.BlockSpec((1, S, N), lambda i: (i, 0, 0)),
        compiler_params=pltpu.CompilerParams(dimension_semantics=("parallel",)),
    )(x, g.reshape(1, D), b.reshape(1, D), w)


# =============================== transformer glue ===============================
def encoder_layer(x, lp, heads, key_mask=None):
    x = fused_attention(x, lp["attn"], heads, key_mask=key_mask)
    x = fused_feed_forward(x, lp["ff"])
    return x


def decoder_layer(y, lp, heads, context, context_mask):
    y = fused_attention(y, lp["self_attn"], heads, causal=True)
    y = fused_attention(y, lp["cross_attn"], heads, context=context, key_mask=context_mask)
    y = fused_feed_forward(y, lp["ff"])
    return y


# =============================== model forward ===============================
def vit_forward(img, p):
    """img: [B, 3, H, W] (NCHW) -> patch embeddings [B, num_patches, DIM]."""
    B, C, H, W = img.shape
    hh = H // PATCH_SIZE
    ww = W // PATCH_SIZE
    # b c (h p1) (w p2) -> b (h w) (p1 p2 c)
    x = img.reshape(B, C, hh, PATCH_SIZE, ww, PATCH_SIZE)
    x = x.transpose(0, 2, 4, 3, 5, 1).reshape(B, hh * ww, PATCH_SIZE * PATCH_SIZE * C)

    x = patch_embed(x, p)                         # LN -> linear -> LN -> +pos (fused)
    for lp in p["layers"]:
        x = encoder_layer(x, lp, VIT_HEADS)
    return layer_norm(x, p["final_ln_g"], p["final_ln_b"])   # return_embeddings=True


def ul2_forward(prompt, output, mask, img_embeds, p):
    B, Se = prompt.shape
    # ---- encoder: token emb + pos emb, prepend image embeddings ----
    x = jnp.take(p["enc_tok_emb"], prompt, axis=0)
    x = x + p["enc_pos_emb"][:Se][None]
    x = jnp.concatenate([img_embeds, x], axis=1)
    n_prepend = img_embeds.shape[1]
    full_mask = jnp.concatenate([jnp.ones((B, n_prepend), bool), mask], axis=1)

    for lp in p["enc_layers"]:
        x = encoder_layer(x, lp, ENC_HEADS, key_mask=full_mask)
    enc = layer_norm(x, p["enc_final_ln_g"], p["enc_final_ln_b"])

    # ---- decoder: causal self-attn + cross-attn to encoder output ----
    Sd = output.shape[1]
    y = jnp.take(p["dec_tok_emb"], output, axis=0)
    y = y + p["dec_pos_emb"][:Sd][None]
    for lp in p["dec_layers"]:
        y = decoder_layer(y, lp, DEC_HEADS, enc, full_mask)

    # fused final LN + logits projection ([B, Sd, 256] lane-dense output).
    logits = ln_linear(y, p["dec_final_ln_g"], p["dec_final_ln_b"], p["to_logits_w"])
    # TODO(synk): x-transformers' XTransformer wraps the decoder in an AutoregressiveWrapper
    # (shift tokens, cross-entropy loss); we return the decoder logits instead.
    return logits


def pali_forward(params, img, prompt, output, mask):
    img_embeds = vit_forward(img, params["vit"])
    return ul2_forward(prompt, output, mask, img_embeds, params["ul2"])


# =============================== deterministic parameter init ===============================
def init_params(key):
    counter = [0]

    def nxt():
        counter[0] += 1
        return jax.random.fold_in(key, counter[0])

    def dense(fan_in, fan_out):
        return jax.random.normal(nxt(), (fan_in, fan_out), jnp.float32) / math.sqrt(fan_in)

    def ln(d):
        return jnp.ones((d,), jnp.float32), jnp.zeros((d,), jnp.float32)

    def attn_p(dim, heads, kv_dim=None):
        kv_dim = dim if kv_dim is None else kv_dim
        dh = dim // heads
        inner = heads * dh
        g, b = ln(dim)
        return dict(
            ln_g=g, ln_b=b,
            wq=dense(dim, inner),
            wkv=dense(kv_dim, 2 * inner),            # [Wk | Wv] pre-concatenated
            wo=dense(inner, dim), bo=jnp.zeros((dim,), jnp.float32),
        )

    def ff_p(dim):
        g, b = ln(dim)
        return dict(
            ln_g=g, ln_b=b,
            w1=dense(dim, dim * FF_MULT), b1=jnp.zeros((dim * FF_MULT,), jnp.float32),
            w2=dense(dim * FF_MULT, dim), b2=jnp.zeros((dim,), jnp.float32),
        )

    def enc_layer_p(dim, heads):
        return dict(attn=attn_p(dim, heads), ff=ff_p(dim))

    def dec_layer_p(dim, heads):
        return dict(self_attn=attn_p(dim, heads), cross_attn=attn_p(dim, heads), ff=ff_p(dim))

    pg1, pb1 = ln(PATCH_DIM)
    pg2, pb2 = ln(DIM)
    fg, fb = ln(DIM)
    vit = dict(
        patch_ln1_g=pg1, patch_ln1_b=pb1,
        patch_w=dense(PATCH_DIM, DIM), patch_b=jnp.zeros((DIM,), jnp.float32),
        patch_ln2_g=pg2, patch_ln2_b=pb2,
        pos_emb=0.02 * jax.random.normal(nxt(), (1, NUM_PATCHES, DIM), jnp.float32),
        layers=[enc_layer_p(DIM, VIT_HEADS) for _ in range(VIT_DEPTH)],
        final_ln_g=fg, final_ln_b=fb,
    )

    eg, eb = ln(DIM)
    dg, db = ln(DIM)
    ul2 = dict(
        enc_tok_emb=0.02 * jax.random.normal(nxt(), (ENC_NUM_TOKENS, DIM), jnp.float32),
        enc_pos_emb=0.02 * jax.random.normal(nxt(), (ENC_MAX_SEQ_LEN, DIM), jnp.float32),
        enc_layers=[enc_layer_p(DIM, ENC_HEADS) for _ in range(ENC_DEPTH)],
        enc_final_ln_g=eg, enc_final_ln_b=eb,
        dec_tok_emb=0.02 * jax.random.normal(nxt(), (DEC_NUM_TOKENS, DIM), jnp.float32),
        dec_pos_emb=0.02 * jax.random.normal(nxt(), (DEC_MAX_SEQ_LEN, DIM), jnp.float32),
        dec_layers=[dec_layer_p(DIM, DEC_HEADS) for _ in range(DEC_DEPTH)],
        dec_final_ln_g=dg, dec_final_ln_b=db,
        to_logits_w=dense(DIM, DEC_NUM_TOKENS),
    )
    return dict(vit=vit, ul2=ul2)


# =============================== main ===============================
if __name__ == "__main__":
    root = jax.random.PRNGKey(0)
    k_img, k_prompt, k_output, k_params = jax.random.split(root, 4)

    img = jax.random.normal(k_img, (BATCH, 3, IMAGE_SIZE, IMAGE_SIZE), jnp.float32)
    prompt = jax.random.randint(k_prompt, (BATCH, ENC_SEQ), 0, ENC_NUM_TOKENS, jnp.int32)
    output = jax.random.randint(k_output, (BATCH, DEC_SEQ), 0, DEC_NUM_TOKENS, jnp.int32)
    # prompt padding mask: batch 0 fully valid, batch 1 has 2 padded positions.
    mask = jnp.arange(ENC_SEQ)[None, :] < jnp.array([[ENC_SEQ], [ENC_SEQ - 2]])

    params = init_params(k_params)

    fwd = jax.jit(pali_forward)
    logits = fwd(params, img, prompt, output, mask)
    logits = jax.block_until_ready(logits)

    assert logits.shape == (BATCH, DEC_SEQ, DEC_NUM_TOKENS), logits.shape
    assert bool(jnp.all(jnp.isfinite(logits)))
    print("KERNEL_OK")
</pallas_src>

<mosaic_0001>
module attributes {stable_mosaic.version = 11 : i64} {
  func.func @_patch_embed_kernel(%arg0: i32, %arg1: memref<1x16x192xf32, #tpu.memory_space<vmem>>, %arg2: memref<1x192xf32, #tpu.memory_space<vmem>>, %arg3: memref<1x192xf32, #tpu.memory_space<vmem>>, %arg4: memref<192x32xf32, #tpu.memory_space<vmem>>, %arg5: memref<1x32xf32, #tpu.memory_space<vmem>>, %arg6: memref<1x32xf32, #tpu.memory_space<vmem>>, %arg7: memref<1x32xf32, #tpu.memory_space<vmem>>, %arg8: memref<1x16x32xf32, #tpu.memory_space<vmem>>, %arg9: memref<1x16x32xf32, #tpu.memory_space<vmem>>) attributes {dimension_semantics = [#tpu.dimension_semantics<parallel>], iteration_bounds = array<i64: 2>, scalar_prefetch = 0 : i64, scratch_operands = 0 : i64, tpu.core_type = #tpu.core_type<tc>, window_params = [{transform_indices = @transform_0, window_bounds = array<i64: 1, 16, 192>}, {pipeline_mode = #tpu.pipeline_mode<synchronous>, transform_indices = @transform_1, window_bounds = array<i64: 1, 192>}, {pipeline_mode = #tpu.pipeline_mode<synchronous>, transform_indices = @transform_2, window_bounds = array<i64: 1, 192>}, {pipeline_mode = #tpu.pipeline_mode<synchronous>, transform_indices = @transform_3, window_bounds = array<i64: 192, 32>}, {pipeline_mode = #tpu.pipeline_mode<synchronous>, transform_indices = @transform_4, window_bounds = array<i64: 1, 32>}, {pipeline_mode = #tpu.pipeline_mode<synchronous>, transform_indices = @transform_5, window_bounds = array<i64: 1, 32>}, {pipeline_mode = #tpu.pipeline_mode<synchronous>, transform_indices = @transform_6, window_bounds = array<i64: 1, 32>}, {pipeline_mode = #tpu.pipeline_mode<synchronous>, transform_indices = @transform_7, window_bounds = array<i64: 1, 16, 32>}, {transform_indices = @transform_8, window_bounds = array<i64: 1, 16, 32>}]} {
    %c0 = arith.constant 0 : index
    %c0_0 = arith.constant 0 : index
    %c0_1 = arith.constant 0 : index
    %0 = vector.load %arg1[%c0, %c0_0, %c0_1] : memref<1x16x192xf32, #tpu.memory_space<vmem>>, vector<1x16x192xf32>
    %1 = vector.shape_cast %0 : vector<1x16x192xf32> to vector<16x192xf32>
    %c0_2 = arith.constant 0 : index
    %c0_3 = arith.constant 0 : index
    %2 = vector.load %arg2[%c0_2, %c0_3] : memref<1x192xf32, #tpu.memory_space<vmem>>, vector<1x192xf32>
    %c0_4 = arith.constant 0 : index
    %c0_5 = arith.constant 0 : index
    %3 = vector.load %arg3[%c0_4, %c0_5] : memref<1x192xf32, #tpu.memory_space<vmem>>, vector<1x192xf32>
    %cst = arith.constant dense<0.000000e+00> : vector<16xf32>
    %4 = vector.multi_reduction <add>, %1, %cst [1] : vector<16x192xf32> to vector<16xf32>
    %5 = vector.shape_cast %4 : vector<16xf32> to vector<16x1xf32>
    %cst_6 = arith.constant 1.920000e+02 : f32
    %6 = vector.broadcast %cst_6 : f32 to vector<16x1xf32>
    %7 = arith.divf %5, %6 : vector<16x1xf32>
    %8 = vector.broadcast %7 : vector<16x1xf32> to vector<16x192xf32>
    %9 = arith.subf %1, %8 : vector<16x192xf32>
    %10 = arith.mulf %9, %9 : vector<16x192xf32>
    %cst_7 = arith.constant dense<0.000000e+00> : vector<16xf32>
    %11 = vector.multi_reduction <add>, %10, %cst_7 [1] : vector<16x192xf32> to vector<16xf32>
    %12 = vector.shape_cast %11 : vector<16xf32> to vector<16x1xf32>
    %cst_8 = arith.constant 1.920000e+02 : f32
    %13 = vector.broadcast %cst_8 : f32 to vector<16x1xf32>
    %14 = arith.divf %12, %13 : vector<16x1xf32>
    %15 = vector.broadcast %7 : vector<16x1xf32> to vector<16x192xf32>
    %16 = arith.subf %1, %15 : vector<16x192xf32>
    %cst_9 = arith.constant 9.99999974E-6 : f32
    %17 = vector.broadcast %cst_9 : f32 to vector<16x1xf32>
    %18 = arith.addf %14, %17 : vector<16x1xf32>
    %19 = math.rsqrt %18 : vector<16x1xf32>
    %20 = vector.broadcast %19 : vector<16x1xf32> to vector<16x192xf32>
    %21 = arith.mulf %16, %20 : vector<16x192xf32>
    %22 = vector.broadcast %2 : vector<1x192xf32> to vector<16x192xf32>
    %23 = arith.mulf %21, %22 : vector<16x192xf32>
    %24 = vector.broadcast %3 : vector<1x192xf32> to vector<16x192xf32>
    %25 = arith.addf %23, %24 : vector<16x192xf32>
    %c0_10 = arith.constant 0 : index
    %c0_11 = arith.constant 0 : index
    %26 = vector.load %arg4[%c0_10, %c0_11] : memref<192x32xf32, #tpu.memory_space<vmem>>, vector<192x32xf32>
    %cst_12 = arith.constant dense<0.000000e+00> : vector<16x32xf32>
    %27 = tpu.matmul %25, %26, %cst_12 {dimension_numbers = #tpu.dot_dimension_numbers<[1], [0], [0], [1], [0, 0, 1, 1], [], []>} : vector<16x192xf32>, vector<192x32xf32>, vector<16x32xf32> -> vector<16x32xf32>
    %c0_13 = arith.constant 0 : index
    %c0_14 = arith.constant 0 : index
    %28 = vector.load %arg5[%c0_13, %c0_14] : memref<1x32xf32, #tpu.memory_space<vmem>>, vector<1x32xf32>
    %29 = vector.broadcast %28 : vector<1x32xf32> to vector<16x32xf32>
    %30 = arith.addf %27, %29 : vector<16x32xf32>
    %c0_15 = arith.constant 0 : index
    %c0_16 = arith.constant 0 : index
    %31 = vector.load %arg6[%c0_15, %c0_16] : memref<1x32xf32, #tpu.memory_space<vmem>>, vector<1x32xf32>
    %c0_17 = arith.constant 0 : index
    %c0_18 = arith.constant 0 : index
    %32 = vector.load %arg7[%c0_17, %c0_18] : memref<1x32xf32, #tpu.memory_space<vmem>>, vector<1x32xf32>
    %cst_19 = arith.constant dense<0.000000e+00> : vector<16xf32>
    %33 = vector.multi_reduction <add>, %30, %cst_19 [1] : vector<16x32xf32> to vector<16xf32>
    %34 = vector.shape_cast %33 : vector<16xf32> to vector<16x1xf32>
    %cst_20 = arith.constant 3.200000e+01 : f32
    %35 = vector.broadcast %cst_20 : f32 to vector<16x1xf32>
    %36 = arith.divf %34, %35 : vector<16x1xf32>
    %37 = vector.broadcast %36 : vector<16x1xf32> to vector<16x32xf32>
    %38 = arith.subf %30, %37 : vector<16x32xf32>
    %39 = arith.mulf %38, %38 : vector<16x32xf32>
    %cst_21 = arith.constant dense<0.000000e+00> : vector<16xf32>
    %40 = vector.multi_reduction <add>, %39, %cst_21 [1] : vector<16x32xf32> to vector<16xf32>
    %41 = vector.shape_cast %40 : vector<16xf32> to vector<16x1xf32>
    %cst_22 = arith.constant 3.200000e+01 : f32
    %42 = vector.broadcast %cst_22 : f32 to vector<16x1xf32>
    %43 = arith.divf %41, %42 : vector<16x1xf32>
    %44 = vector.broadcast %36 : vector<16x1xf32> to vector<16x32xf32>
    %45 = arith.subf %30, %44 : vector<16x32xf32>
    %cst_23 = arith.constant 9.99999974E-6 : f32
    %46 = vector.broadcast %cst_23 : f32 to vector<16x1xf32>
    %47 = arith.addf %43, %46 : vector<16x1xf32>
    %48 = math.rsqrt %47 : vector<16x1xf32>
    %49 = vector.broadcast %48 : vector<16x1xf32> to vector<16x32xf32>
    %50 = arith.mulf %45, %49 : vector<16x32xf32>
    %51 = vector.broadcast %31 : vector<1x32xf32> to vector<16x32xf32>
    %52 = arith.mulf %50, %51 : vector<16x32xf32>
    %53 = vector.broadcast %32 : vector<1x32xf32> to vector<16x32xf32>
    %54 = arith.addf %52, %53 : vector<16x32xf32>
    %c0_24 = arith.constant 0 : index
    %c0_25 = arith.constant 0 : index
    %c0_26 = arith.constant 0 : index
    %55 = vector.load %arg8[%c0_24, %c0_25, %c0_26] : memref<1x16x32xf32, #tpu.memory_space<vmem>>, vector<1x16x32xf32>
    %56 = vector.shape_cast %55 : vector<1x16x32xf32> to vector<16x32xf32>
    %57 = arith.addf %54, %56 : vector<16x32xf32>
    %c0_27 = arith.constant 0 : index
    %c0_28 = arith.constant 0 : index
    %c0_29 = arith.constant 0 : index
    %58 = vector.load %arg9[%c0_27, %c0_28, %c0_29] : memref<1x16x32xf32, #tpu.memory_space<vmem>>, vector<1x16x32xf32>
    %59 = vector.shape_cast %58 : vector<1x16x32xf32> to vector<16x32xf32>
    %60 = vector.shape_cast %57 : vector<16x32xf32> to vector<1x16x32xf32>
    tpu.vector_store %arg9[%c0_27, %c0_28, %c0_29], %60 {strides = array<i32>} : memref<1x16x32xf32, #tpu.memory_space<vmem>>, vector<1x16x32xf32>,
    return
  }
  func.func @transform_0(%arg0: i32) -> (i32, i32, i32) {
    %c0_i32 = arith.constant 0 : i32
    %c0_i32_0 = arith.constant 0 : i32
    %c0_i32_1 = arith.constant 0 : i32
    return %arg0, %c0_i32, %c0_i32_0 : i32, i32, i32
  }
  func.func @transform_1(%arg0: i32) -> (i32, i32) {
    %c0_i32 = arith.constant 0 : i32
    %c0_i32_0 = arith.constant 0 : i32
    %c0_i32_1 = arith.constant 0 : i32
    return %c0_i32, %c0_i32_0 : i32, i32
  }
  func.func @transform_2(%arg0: i32) -> (i32, i32) {
    %c0_i32 = arith.constant 0 : i32
    %c0_i32_0 = arith.constant 0 : i32
    %c0_i32_1 = arith.constant 0 : i32
    return %c0_i32, %c0_i32_0 : i32, i32
  }
  func.func @transform_3(%arg0: i32) -> (i32, i32) {
    %c0_i32 = arith.constant 0 : i32
    %c0_i32_0 = arith.constant 0 : i32
    %c0_i32_1 = arith.constant 0 : i32
    return %c0_i32, %c0_i32_0 : i32, i32
  }
  func.func @transform_4(%arg0: i32) -> (i32, i32) {
    %c0_i32 = arith.constant 0 : i32
    %c0_i32_0 = arith.constant 0 : i32
    %c0_i32_1 = arith.constant 0 : i32
    return %c0_i32, %c0_i32_0 : i32, i32
  }
  func.func @transform_5(%arg0: i32) -> (i32, i32) {
    %c0_i32 = arith.constant 0 : i32
    %c0_i32_0 = arith.constant 0 : i32
    %c0_i32_1 = arith.constant 0 : i32
    return %c0_i32, %c0_i32_0 : i32, i32
  }
  func.func @transform_6(%arg0: i32) -> (i32, i32) {
    %c0_i32 = arith.constant 0 : i32
    %c0_i32_0 = arith.constant 0 : i32
    %c0_i32_1 = arith.constant 0 : i32
    return %c0_i32, %c0_i32_0 : i32, i32
  }
  func.func @transform_7(%arg0: i32) -> (i32, i32, i32) {
    %c0_i32 = arith.constant 0 : i32
    %c0_i32_0 = arith.constant 0 : i32
    %c0_i32_1 = arith.constant 0 : i32
    %c0_i32_2 = arith.constant 0 : i32
    return %c0_i32, %c0_i32_0, %c0_i32_1 : i32, i32, i32
  }
  func.func @transform_8(%arg0: i32) -> (i32, i32, i32) {
    %c0_i32 = arith.constant 0 : i32
    %c0_i32_0 = arith.constant 0 : i32
    %c0_i32_1 = arith.constant 0 : i32
    return %arg0, %c0_i32, %c0_i32_0 : i32, i32, i32
  }
}

module attributes {stable_mosaic.version = 11 : i64} {
  func.func @_attn_kernel(%arg0: i32, %arg1: memref<1x16x32xf32, #tpu.memory_space<vmem>>, %arg2: memref<1x32xf32, #tpu.memory_space<vmem>>, %arg3: memref<1x32xf32, #tpu.memory_space<vmem>>, %arg4: memref<32x32xf32, #tpu.memory_space<vmem>>, %arg5: memref<32x64xf32, #tpu.memory_space<vmem>>, %arg6: memref<32x32xf32, #tpu.memory_space<vmem>>, %arg7: memref<1x32xf32, #tpu.memory_space<vmem>>, %arg8: memref<1x16x32xf32, #tpu.memory_space<vmem>>) attributes {dimension_semantics = [#tpu.dimension_semantics<parallel>], iteration_bounds = array<i64: 2>, scalar_prefetch = 0 : i64, scratch_operands = 0 : i64, tpu.core_type = #tpu.core_type<tc>, window_params = [{transform_indices = @transform_0, window_bounds = array<i64: 1, 16, 32>}, {pipeline_mode = #tpu.pipeline_mode<synchronous>, transform_indices = @transform_1, window_bounds = array<i64: 1, 32>}, {pipeline_mode = #tpu.pipeline_mode<synchronous>, transform_indices = @transform_2, window_bounds = array<i64: 1, 32>}, {pipeline_mode = #tpu.pipeline_mode<synchronous>, transform_indices = @transform_3, window_bounds = array<i64: 32, 32>}, {pipeline_mode = #tpu.pipeline_mode<synchronous>, transform_indices = @transform_4, window_bounds = array<i64: 32, 64>}, {pipeline_mode = #tpu.pipeline_mode<synchronous>, transform_indices = @transform_5, window_bounds = array<i64: 32, 32>}, {pipeline_mode = #tpu.pipeline_mode<synchronous>, transform_indices = @transform_6, window_bounds = array<i64: 1, 32>}, {transform_indices = @transform_7, window_bounds = array<i64: 1, 16, 32>}]} {
    %c0 = arith.constant 0 : index
    %c0_0 = arith.constant 0 : index
    %c0_1 = arith.constant 0 : index
    %0 = vector.load %arg1[%c0, %c0_0, %c0_1] : memref<1x16x32xf32, #tpu.memory_space<vmem>>, vector<1x16x32xf32>
    %1 = vector.shape_cast %0 : vector<1x16x32xf32> to vector<16x32xf32>
    %c0_2 = arith.constant 0 : index
    %c0_3 = arith.constant 0 : index
    %2 = vector.load %arg2[%c0_2, %c0_3] : memref<1x32xf32, #tpu.memory_space<vmem>>, vector<1x32xf32>
    %c0_4 = arith.constant 0 : index
    %c0_5 = arith.constant 0 : index
    %3 = vector.load %arg3[%c0_4, %c0_5] : memref<1x32xf32, #tpu.memory_space<vmem>>, vector<1x32xf32>
    %cst = arith.constant dense<0.000000e+00> : vector<16xf32>
    %4 = vector.multi_reduction <add>, %1, %cst [1] : vector<16x32xf32> to vector<16xf32>
    %5 = vector.shape_cast %4 : vector<16xf32> to vector<16x1xf32>
    %cst_6 = arith.constant 3.200000e+01 : f32
    %6 = vector.broadcast %cst_6 : f32 to vector<16x1xf32>
    %7 = arith.divf %5, %6 : vector<16x1xf32>
    %8 = vector.broadcast %7 : vector<16x1xf32> to vector<16x32xf32>
    %9 = arith.subf %1, %8 : vector<16x32xf32>
    %10 = arith.mulf %9, %9 : vector<16x32xf32>
    %cst_7 = arith.constant dense<0.000000e+00> : vector<16xf32>
    %11 = vector.multi_reduction <add>, %10, %cst_7 [1] : vector<16x32xf32> to vector<16xf32>
    %12 = vector.shape_cast %11 : vector<16xf32> to vector<16x1xf32>
    %cst_8 = arith.constant 3.200000e+01 : f32
    %13 = vector.broadcast %cst_8 : f32 to vector<16x1xf32>
    %14 = arith.divf %12, %13 : vector<16x1xf32>
    %15 = vector.broadcast %7 : vector<16x1xf32> to vector<16x32xf32>
    %16 = arith.subf %1, %15 : vector<16x32xf32>
    %cst_9 = arith.constant 9.99999974E-6 : f32
    %17 = vector.broadcast %cst_9 : f32 to vector<16x1xf32>
    %18 = arith.addf %14, %17 : vector<16x1xf32>
    %19 = math.rsqrt %18 : vector<16x1xf32>
    %20 = vector.broadcast %19 : vector<16x1xf32> to vector<16x32xf32>
    %21 = arith.mulf %16, %20 : vector<16x32xf32>
    %22 = vector.broadcast %2 : vector<1x32xf32> to vector<16x32xf32>
    %23 = arith.mulf %21, %22 : vector<16x32xf32>
    %24 = vector.broadcast %3 : vector<1x32xf32> to vector<16x32xf32>
    %25 = arith.addf %23, %24 : vector<16x32xf32>
    %c0_10 = arith.constant 0 : index
    %c0_11 = arith.constant 0 : index
    %26 = vector.load %arg4[%c0_10, %c0_11] : memref<32x32xf32, #tpu.memory_space<vmem>>, vector<32x32xf32>
    %c0_12 = arith.constant 0 : index
    %c0_13 = arith.constant 0 : index
    %27 = vector.load %arg5[%c0_12, %c0_13] : memref<32x64xf32, #tpu.memory_space<vmem>>, vector<32x64xf32>
    %c0_14 = arith.constant 0 : index
    %c0_15 = arith.constant 0 : index
    %28 = vector.load %arg6[%c0_14, %c0_15] : memref<32x32xf32, #tpu.memory_space<vmem>>, vector<32x32xf32>
    %cst_16 = arith.constant dense<0.000000e+00> : vector<16x32xf32>
    %29 = tpu.matmul %25, %26, %cst_16 {dimension_numbers = #tpu.dot_dimension_numbers<[1], [0], [0], [1], [0, 0, 1, 1], [], []>} : vector<16x32xf32>, vector<32x32xf32>, vector<16x32xf32> -> vector<16x32xf32>
    %cst_17 = arith.constant dense<0.000000e+00> : vector<16x64xf32>
    %30 = tpu.matmul %25, %27, %cst_17 {dimension_numbers = #tpu.dot_dimension_numbers<[1], [0], [0], [1], [0, 0, 1, 1], [], []>} : vector<16x32xf32>, vector<32x64xf32>, vector<16x64xf32> -> vector<16x64xf32>
    %31 = vector.extract_strided_slice %29 {offsets = [0, 0], sizes = [16, 8], strides = [1, 1]} : vector<16x32xf32> to vector<16x8xf32>
    %32 = vector.extract_strided_slice %30 {offsets = [0, 0], sizes = [16, 8], strides = [1, 1]} : vector<16x64xf32> to vector<16x8xf32>
    %33 = vector.extract_strided_slice %30 {offsets = [0, 32], sizes = [16, 8], strides = [1, 1]} : vector<16x64xf32> to vector<16x8xf32>
    %cst_18 = arith.constant dense<0.000000e+00> : vector<16x16xf32>
    %34 = tpu.matmul %31, %32, %cst_18 {dimension_numbers = #tpu.dot_dimension_numbers<[1], [1], [0], [0], [0, 0, 1, 0], [], []>} : vector<16x8xf32>, vector<16x8xf32>, vector<16x16xf32> -> vector<16x16xf32>
    %cst_19 = arith.constant 0.353553385 : f32
    %35 = vector.broadcast %cst_19 : f32 to vector<16x16xf32>
    %36 = arith.mulf %34, %35 : vector<16x16xf32>
    %cst_20 = arith.constant dense<0xFF800000> : vector<16xf32>
    %37 = vector.multi_reduction <maximumf>, %36, %cst_20 [1] : vector<16x16xf32> to vector<16xf32>
    %38 = vector.shape_cast %37 : vector<16xf32> to vector<16x1xf32>
    %39 = vector.broadcast %38 : vector<16x1xf32> to vector<16x16xf32>
    %40 = arith.subf %36, %39 : vector<16x16xf32>
    %41 = math.exp %40 : vector<16x16xf32>
    %cst_21 = arith.constant dense<0.000000e+00> : vector<16xf32>
    %42 = vector.multi_reduction <add>, %41, %cst_21 [1] : vector<16x16xf32> to vector<16xf32>
    %43 = vector.shape_cast %42 : vector<16xf32> to vector<16x1xf32>
    %44 = tpu.reciprocal %43 {approx = true} : vector<16x1xf32> -> vector<16x1xf32>
    %cst_22 = arith.constant dense<0.000000e+00> : vector<16x8xf32>
    %45 = tpu.matmul %41, %33, %cst_22 {dimension_numbers = #tpu.dot_dimension_numbers<[1], [0], [0], [1], [0, 0, 1, 1], [], []>} : vector<16x16xf32>, vector<16x8xf32>, vector<16x8xf32> -> vector<16x8xf32>
    %46 = vector.broadcast %44 : vector<16x1xf32> to vector<16x8xf32>
    %47 = arith.mulf %45, %46 : vector<16x8xf32>
    %48 = vector.extract_strided_slice %28 {offsets = [0, 0], sizes = [8, 32], strides = [1, 1]} : vector<32x32xf32> to vector<8x32xf32>
    %cst_23 = arith.constant dense<0.000000e+00> : vector<16x32xf32>
    %49 = tpu.matmul %47, %48, %cst_23 {dimension_numbers = #tpu.dot_dimension_numbers<[1], [0], [0], [1], [0, 0, 1, 1], [], []>} : vector<16x8xf32>, vector<8x32xf32>, vector<16x32xf32> -> vector<16x32xf32>
    %50 = vector.extract_strided_slice %29 {offsets = [0, 8], sizes = [16, 8], strides = [1, 1]} : vector<16x32xf32> to vector<16x8xf32>
    %51 = vector.extract_strided_slice %30 {offsets = [0, 8], sizes = [16, 8], strides = [1, 1]} : vector<16x64xf32> to vector<16x8xf32>
    %52 = vector.extract_strided_slice %30 {offsets = [0, 40], sizes = [16, 8], strides = [1, 1]} : vector<16x64xf32> to vector<16x8xf32>
    %cst_24 = arith.constant dense<0.000000e+00> : vector<16x16xf32>
    %53 = tpu.matmul %50, %51, %cst_24 {dimension_numbers = #tpu.dot_dimension_numbers<[1], [1], [0], [0], [0, 0, 1, 0], [], []>} : vector<16x8xf32>, vector<16x8xf32>, vector<16x16xf32> -> vector<16x16xf32>
    %cst_25 = arith.constant 0.353553385 : f32
    %54 = vector.broadcast %cst_25 : f32 to vector<16x16xf32>
    %55 = arith.mulf %53, %54 : vector<16x16xf32>
    %cst_26 = arith.constant dense<0xFF800000> : vector<16xf32>
    %56 = vector.multi_reduction <maximumf>, %55, %cst_26 [1] : vector<16x16xf32> to vector<16xf32>
    %57 = vector.shape_cast %56 : vector<16xf32> to vector<16x1xf32>
    %58 = vector.broadcast %57 : vector<16x1xf32> to vector<16x16xf32>
    %59 = arith.subf %55, %58 : vector<16x16xf32>
    %60 = math.exp %59 : vector<16x16xf32>
    %cst_27 = arith.constant dense<0.000000e+00> : vector<16xf32>
    %61 = vector.multi_reduction <add>, %60, %cst_27 [1] : vector<16x16xf32> to vector<16xf32>
    %62 = vector.shape_cast %61 : vector<16xf32> to vector<16x1xf32>
    %63 = tpu.reciprocal %62 {approx = true} : vector<16x1xf32> -> vector<16x1xf32>
    %cst_28 = arith.constant dense<0.000000e+00> : vector<16x8xf32>
    %64 = tpu.matmul %60, %52, %cst_28 {dimension_numbers = #tpu.dot_dimension_numbers<[1], [0], [0], [1], [0, 0, 1, 1], [], []>} : vector<16x16xf32>, vector<16x8xf32>, vector<16x8xf32> -> vector<16x8xf32>
    %65 = vector.broadcast %63 : vector<16x1xf32> to vector<16x8xf32>
    %66 = arith.mulf %64, %65 : vector<16x8xf32>
    %67 = vector.extract_strided_slice %28 {offsets = [8, 0], sizes = [8, 32], strides = [1, 1]} : vector<32x32xf32> to vector<8x32xf32>
    %cst_29 = arith.constant dense<0.000000e+00> : vector<16x32xf32>
    %68 = tpu.matmul %66, %67, %cst_29 {dimension_numbers = #tpu.dot_dimension_numbers<[1], [0], [0], [1], [0, 0, 1, 1], [], []>} : vector<16x8xf32>, vector<8x32xf32>, vector<16x32xf32> -> vector<16x32xf32>
    %69 = arith.addf %49, %68 : vector<16x32xf32>
    %70 = vector.extract_strided_slice %29 {offsets = [0, 16], sizes = [16, 8], strides = [1, 1]} : vector<16x32xf32> to vector<16x8xf32>
    %71 = vector.extract_strided_slice %30 {offsets = [0, 16], sizes = [16, 8], strides = [1, 1]} : vector<16x64xf32> to vector<16x8xf32>
    %72 = vector.extract_strided_slice %30 {offsets = [0, 48], sizes = [16, 8], strides = [1, 1]} : vector<16x64xf32> to vector<16x8xf32>
    %cst_30 = arith.constant dense<0.000000e+00> : vector<16x16xf32>
    %73 = tpu.matmul %70, %71, %cst_30 {dimension_numbers = #tpu.dot_dimension_numbers<[1], [1], [0], [0], [0, 0, 1, 0], [], []>} : vector<16x8xf32>, vector<16x8xf32>, vector<16x16xf32> -> vector<16x16xf32>
    %cst_31 = arith.constant 0.353553385 : f32
    %74 = vector.broadcast %cst_31 : f32 to vector<16x16xf32>
    %75 = arith.mulf %73, %74 : vector<16x16xf32>
    %cst_32 = arith.constant dense<0xFF800000> : vector<16xf32>
    %76 = vector.multi_reduction <maximumf>, %75, %cst_32 [1] : vector<16x16xf32> to vector<16xf32>
    %77 = vector.shape_cast %76 : vector<16xf32> to vector<16x1xf32>
    %78 = vector.broadcast %77 : vector<16x1xf32> to vector<16x16xf32>
    %79 = arith.subf %75, %78 : vector<16x16xf32>
    %80 = math.exp %79 : vector<16x16xf32>
    %cst_33 = arith.constant dense<0.000000e+00> : vector<16xf32>
    %81 = vector.multi_reduction <add>, %80, %cst_33 [1] : vector<16x16xf32> to vector<16xf32>
    %82 = vector.shape_cast %81 : vector<16xf32> to vector<16x1xf32>
    %83 = tpu.reciprocal %82 {approx = true} : vector<16x1xf32> -> vector<16x1xf32>
    %cst_34 = arith.constant dense<0.000000e+00> : vector<16x8xf32>
    %84 = tpu.matmul %80, %72, %cst_34 {dimension_numbers = #tpu.dot_dimension_numbers<[1], [0], [0], [1], [0, 0, 1, 1], [], []>} : vector<16x16xf32>, vector<16x8xf32>, vector<16x8xf32> -> vector<16x8xf32>
    %85 = vector.broadcast %83 : vector<16x1xf32> to vector<16x8xf32>
    %86 = arith.mulf %84, %85 : vector<16x8xf32>
    %87 = vector.extract_strided_slice %28 {offsets = [16, 0], sizes = [8, 32], strides = [1, 1]} : vector<32x32xf32> to vector<8x32xf32>
    %cst_35 = arith.constant dense<0.000000e+00> : vector<16x32xf32>
    %88 = tpu.matmul %86, %87, %cst_35 {dimension_numbers = #tpu.dot_dimension_numbers<[1], [0], [0], [1], [0, 0, 1, 1], [], []>} : vector<16x8xf32>, vector<8x32xf32>, vector<16x32xf32> -> vector<16x32xf32>
    %89 = arith.addf %69, %88 : vector<16x32xf32>
    %90 = vector.extract_strided_slice %29 {offsets = [0, 24], sizes = [16, 8], strides = [1, 1]} : vector<16x32xf32> to vector<16x8xf32>
    %91 = vector.extract_strided_slice %30 {offsets = [0, 24], sizes = [16, 8], strides = [1, 1]} : vector<16x64xf32> to vector<16x8xf32>
    %92 = vector.extract_strided_slice %30 {offsets = [0, 56], sizes = [16, 8], strides = [1, 1]} : vector<16x64xf32> to vector<16x8xf32>
    %cst_36 = arith.constant dense<0.000000e+00> : vector<16x16xf32>
    %93 = tpu.matmul %90, %91, %cst_36 {dimension_numbers = #tpu.dot_dimension_numbers<[1], [1], [0], [0], [0, 0, 1, 0], [], []>} : vector<16x8xf32>, vector<16x8xf32>, vector<16x16xf32> -> vector<16x16xf32>
    %cst_37 = arith.constant 0.353553385 : f32
    %94 = vector.broadcast %cst_37 : f32 to vector<16x16xf32>
    %95 = arith.mulf %93, %94 : vector<16x16xf32>
    %cst_38 = arith.constant dense<0xFF800000> : vector<16xf32>
    %96 = vector.multi_reduction <maximumf>, %95, %cst_38 [1] : vector<16x16xf32> to vector<16xf32>
    %97 = vector.shape_cast %96 : vector<16xf32> to vector<16x1xf32>
    %98 = vector.broadcast %97 : vector<16x1xf32> to vector<16x16xf32>
    %99 = arith.subf %95, %98 : vector<16x16xf32>
    %100 = math.exp %99 : vector<16x16xf32>
    %cst_39 = arith.constant dense<0.000000e+00> : vector<16xf32>
    %101 = vector.multi_reduction <add>, %100, %cst_39 [1] : vector<16x16xf32> to vector<16xf32>
    %102 = vector.shape_cast %101 : vector<16xf32> to vector<16x1xf32>
    %103 = tpu.reciprocal %102 {approx = true} : vector<16x1xf32> -> vector<16x1xf32>
    %cst_40 = arith.constant dense<0.000000e+00> : vector<16x8xf32>
    %104 = tpu.matmul %100, %92, %cst_40 {dimension_numbers = #tpu.dot_dimension_numbers<[1], [0], [0], [1], [0, 0, 1, 1], [], []>} : vector<16x16xf32>, vector<16x8xf32>, vector<16x8xf32> -> vector<16x8xf32>
    %105 = vector.broadcast %103 : vector<16x1xf32> to vector<16x8xf32>
    %106 = arith.mulf %104, %105 : vector<16x8xf32>
    %107 = vector.extract_strided_slice %28 {offsets = [24, 0], sizes = [8, 32], strides = [1, 1]} : vector<32x32xf32> to vector<8x32xf32>
    %cst_41 = arith.constant dense<0.000000e+00> : vector<16x32xf32>
    %108 = tpu.matmul %106, %107, %cst_41 {dimension_numbers = #tpu.dot_dimension_numbers<[1], [0], [0], [1], [0, 0, 1, 1], [], []>} : vector<16x8xf32>, vector<8x32xf32>, vector<16x32xf32> -> vector<16x32xf32>
    %109 = arith.addf %89, %108 : vector<16x32xf32>
    %c0_42 = arith.constant 0 : index
    %c0_43 = arith.constant 0 : index
    %110 = vector.load %arg7[%c0_42, %c0_43] : memref<1x32xf32, #tpu.memory_space<vmem>>, vector<1x32xf32>
    %111 = vector.broadcast %110 : vector<1x32xf32> to vector<16x32xf32>
    %112 = arith.addf %109, %111 : vector<16x32xf32>
    %113 = arith.addf %112, %1 : vector<16x32xf32>
    %c0_44 = arith.constant 0 : index
    %c0_45 = arith.constant 0 : index
    %c0_46 = arith.constant 0 : index
    %114 = vector.load %arg8[%c0_44, %c0_45, %c0_46] : memref<1x16x32xf32, #tpu.memory_space<vmem>>, vector<1x16x32xf32>
    %115 = vector.shape_cast %114 : vector<1x16x32xf32> to vector<16x32xf32>
    %116 = vector.shape_cast %113 : vector<16x32xf32> to vector<1x16x32xf32>
    tpu.vector_store %arg8[%c0_44, %c0_45, %c0_46], %116 {strides = array<i32>} : memref<1x16x32xf32, #tpu.memory_space<vmem>>, vector<1x16x32xf32>,
    return
  }
  func.func @transform_0(%arg0: i32) -> (i32, i32, i32) {
    %c0_i32 = arith.constant 0 : i32
    %c0_i32_0 = arith.constant 0 : i32
    %c0_i32_1 = arith.constant 0 : i32
    return %arg0, %c0_i32, %c0_i32_0 : i32, i32, i32
  }
  func.func @transform_1(%arg0: i32) -> (i32, i32) {
    %c0_i32 = arith.constant 0 : i32
    %c0_i32_0 = arith.constant 0 : i32
    %c0_i32_1 = arith.constant 0 : i32
    return %c0_i32, %c0_i32_0 : i32, i32
  }
  func.func @transform_2(%arg0: i32) -> (i32, i32) {
    %c0_i32 = arith.constant 0 : i32
    %c0_i32_0 = arith.constant 0 : i32
    %c0_i32_1 = arith.constant 0 : i32
    return %c0_i32, %c0_i32_0 : i32, i32
  }
  func.func @transform_3(%arg0: i32) -> (i32, i32) {
    %c0_i32 = arith.constant 0 : i32
    %c0_i32_0 = arith.constant 0 : i32
    %c0_i32_1 = arith.constant 0 : i32
    return %c0_i32, %c0_i32_0 : i32, i32
  }
  func.func @transform_4(%arg0: i32) -> (i32, i32) {
    %c0_i32 = arith.constant 0 : i32
    %c0_i32_0 = arith.constant 0 : i32
    %c0_i32_1 = arith.constant 0 : i32
    return %c0_i32, %c0_i32_0 : i32, i32
  }
  func.func @transform_5(%arg0: i32) -> (i32, i32) {
    %c0_i32 = arith.constant 0 : i32
    %c0_i32_0 = arith.constant 0 : i32
    %c0_i32_1 = arith.constant 0 : i32
    return %c0_i32, %c0_i32_0 : i32, i32
  }
  func.func @transform_6(%arg0: i32) -> (i32, i32) {
    %c0_i32 = arith.constant 0 : i32
    %c0_i32_0 = arith.constant 0 : i32
    %c0_i32_1 = arith.constant 0 : i32
    return %c0_i32, %c0_i32_0 : i32, i32
  }
  func.func @transform_7(%arg0: i32) -> (i32, i32, i32) {
    %c0_i32 = arith.constant 0 : i32
    %c0_i32_0 = arith.constant 0 : i32
    %c0_i32_1 = arith.constant 0 : i32
    return %arg0, %c0_i32, %c0_i32_0 : i32, i32, i32
  }
}

module attributes {stable_mosaic.version = 11 : i64} {
  func.func @_ff_kernel(%arg0: i32, %arg1: memref<1x16x32xf32, #tpu.memory_space<vmem>>, %arg2: memref<1x32xf32, #tpu.memory_space<vmem>>, %arg3: memref<1x32xf32, #tpu.memory_space<vmem>>, %arg4: memref<32x128xf32, #tpu.memory_space<vmem>>, %arg5: memref<1x128xf32, #tpu.memory_space<vmem>>, %arg6: memref<128x32xf32, #tpu.memory_space<vmem>>, %arg7: memref<1x32xf32, #tpu.memory_space<vmem>>, %arg8: memref<1x16x32xf32, #tpu.memory_space<vmem>>) attributes {dimension_semantics = [#tpu.dimension_semantics<parallel>], iteration_bounds = array<i64: 2>, scalar_prefetch = 0 : i64, scratch_operands = 0 : i64, tpu.core_type = #tpu.core_type<tc>, window_params = [{transform_indices = @transform_0, window_bounds = array<i64: 1, 16, 32>}, {pipeline_mode = #tpu.pipeline_mode<synchronous>, transform_indices = @transform_1, window_bounds = array<i64: 1, 32>}, {pipeline_mode = #tpu.pipeline_mode<synchronous>, transform_indices = @transform_2, window_bounds = array<i64: 1, 32>}, {pipeline_mode = #tpu.pipeline_mode<synchronous>, transform_indices = @transform_3, window_bounds = array<i64: 32, 128>}, {pipeline_mode = #tpu.pipeline_mode<synchronous>, transform_indices = @transform_4, window_bounds = array<i64: 1, 128>}, {pipeline_mode = #tpu.pipeline_mode<synchronous>, transform_indices = @transform_5, window_bounds = array<i64: 128, 32>}, {pipeline_mode = #tpu.pipeline_mode<synchronous>, transform_indices = @transform_6, window_bounds = array<i64: 1, 32>}, {transform_indices = @transform_7, window_bounds = array<i64: 1, 16, 32>}]} {
    %c0 = arith.constant 0 : index
    %c0_0 = arith.constant 0 : index
    %c0_1 = arith.constant 0 : index
    %0 = vector.load %arg1[%c0, %c0_0, %c0_1] : memref<1x16x32xf32, #tpu.memory_space<vmem>>, vector<1x16x32xf32>
    %1 = vector.shape_cast %0 : vector<1x16x32xf32> to vector<16x32xf32>
    %c0_2 = arith.constant 0 : index
    %c0_3 = arith.constant 0 : index
    %2 = vector.load %arg2[%c0_2, %c0_3] : memref<1x32xf32, #tpu.memory_space<vmem>>, vector<1x32xf32>
    %c0_4 = arith.constant 0 : index
    %c0_5 = arith.constant 0 : index
    %3 = vector.load %arg3[%c0_4, %c0_5] : memref<1x32xf32, #tpu.memory_space<vmem>>, vector<1x32xf32>
    %cst = arith.constant dense<0.000000e+00> : vector<16xf32>
    %4 = vector.multi_reduction <add>, %1, %cst [1] : vector<16x32xf32> to vector<16xf32>
    %5 = vector.shape_cast %4 : vector<16xf32> to vector<16x1xf32>
    %cst_6 = arith.constant 3.200000e+01 : f32
    %6 = vector.broadcast %cst_6 : f32 to vector<16x1xf32>
    %7 = arith.divf %5, %6 : vector<16x1xf32>
    %8 = vector.broadcast %7 : vector<16x1xf32> to vector<16x32xf32>
    %9 = arith.subf %1, %8 : vector<16x32xf32>
    %10 = arith.mulf %9, %9 : vector<16x32xf32>
    %cst_7 = arith.constant dense<0.000000e+00> : vector<16xf32>
    %11 = vector.multi_reduction <add>, %10, %cst_7 [1] : vector<16x32xf32> to vector<16xf32>
    %12 = vector.shape_cast %11 : vector<16xf32> to vector<16x1xf32>
    %cst_8 = arith.constant 3.200000e+01 : f32
    %13 = vector.broadcast %cst_8 : f32 to vector<16x1xf32>
    %14 = arith.divf %12, %13 : vector<16x1xf32>
    %15 = vector.broadcast %7 : vector<16x1xf32> to vector<16x32xf32>
    %16 = arith.subf %1, %15 : vector<16x32xf32>
    %cst_9 = arith.constant 9.99999974E-6 : f32
    %17 = vector.broadcast %cst_9 : f32 to vector<16x1xf32>
    %18 = arith.addf %14, %17 : vector<16x1xf32>
    %19 = math.rsqrt %18 : vector<16x1xf32>
    %20 = vector.broadcast %19 : vector<16x1xf32> to vector<16x32xf32>
    %21 = arith.mulf %16, %20 : vector<16x32xf32>
    %22 = vector.broadcast %2 : vector<1x32xf32> to vector<16x32xf32>
    %23 = arith.mulf %21, %22 : vector<16x32xf32>
    %24 = vector.broadcast %3 : vector<1x32xf32> to vector<16x32xf32>
    %25 = arith.addf %23, %24 : vector<16x32xf32>
    %c0_10 = arith.constant 0 : index
    %c0_11 = arith.constant 0 : index
    %26 = vector.load %arg4[%c0_10, %c0_11] : memref<32x128xf32, #tpu.memory_space<vmem>>, vector<32x128xf32>
    %cst_12 = arith.constant dense<0.000000e+00> : vector<16x128xf32>
    %27 = tpu.matmul %25, %26, %cst_12 {dimension_numbers = #tpu.dot_dimension_numbers<[1], [0], [0], [1], [0, 0, 1, 1], [], []>} : vector<16x32xf32>, vector<32x128xf32>, vector<16x128xf32> -> vector<16x128xf32>
    %c0_13 = arith.constant 0 : index
    %c0_14 = arith.constant 0 : index
    %28 = vector.load %arg5[%c0_13, %c0_14] : memref<1x128xf32, #tpu.memory_space<vmem>>, vector<1x128xf32>
    %29 = vector.broadcast %28 : vector<1x128xf32> to vector<16x128xf32>
    %30 = arith.addf %27, %29 : vector<16x128xf32>
    %31 = arith.mulf %30, %30 : vector<16x128xf32>
    %32 = arith.mulf %30, %31 : vector<16x128xf32>
    %cst_15 = arith.constant 4.471500e-02 : f32
    %33 = vector.broadcast %cst_15 : f32 to vector<16x128xf32>
    %34 = arith.mulf %33, %32 : vector<16x128xf32>
    %35 = arith.addf %30, %34 : vector<16x128xf32>
    %cst_16 = arith.constant 0.797884583 : f32
    %36 = vector.broadcast %cst_16 : f32 to vector<16x128xf32>
    %37 = arith.mulf %36, %35 : vector<16x128xf32>
    %38 = math.tanh %37 : vector<16x128xf32>
    %cst_17 = arith.constant 1.000000e+00 : f32
    %39 = vector.broadcast %cst_17 : f32 to vector<16x128xf32>
    %40 = arith.addf %39, %38 : vector<16x128xf32>
    %cst_18 = arith.constant 5.000000e-01 : f32
    %41 = vector.broadcast %cst_18 : f32 to vector<16x128xf32>
    %42 = arith.mulf %41, %40 : vector<16x128xf32>
    %43 = arith.mulf %30, %42 : vector<16x128xf32>
    %c0_19 = arith.constant 0 : index
    %c0_20 = arith.constant 0 : index
    %44 = vector.load %arg6[%c0_19, %c0_20] : memref<128x32xf32, #tpu.memory_space<vmem>>, vector<128x32xf32>
    %cst_21 = arith.constant dense<0.000000e+00> : vector<16x32xf32>
    %45 = tpu.matmul %43, %44, %cst_21 {dimension_numbers = #tpu.dot_dimension_numbers<[1], [0], [0], [1], [0, 0, 1, 1], [], []>} : vector<16x128xf32>, vector<128x32xf32>, vector<16x32xf32> -> vector<16x32xf32>
    %c0_22 = arith.constant 0 : index
    %c0_23 = arith.constant 0 : index
    %46 = vector.load %arg7[%c0_22, %c0_23] : memref<1x32xf32, #tpu.memory_space<vmem>>, vector<1x32xf32>
    %47 = vector.broadcast %46 : vector<1x32xf32> to vector<16x32xf32>
    %48 = arith.addf %45, %47 : vector<16x32xf32>
    %49 = arith.addf %48, %1 : vector<16x32xf32>
    %c0_24 = arith.constant 0 : index
    %c0_25 = arith.constant 0 : index
    %c0_26 = arith.constant 0 : index
    %50 = vector.load %arg8[%c0_24, %c0_25, %c0_26] : memref<1x16x32xf32, #tpu.memory_space<vmem>>, vector<1x16x32xf32>
    %51 = vector.shape_cast %50 : vector<1x16x32xf32> to vector<16x32xf32>
    %52 = vector.shape_cast %49 : vector<16x32xf32> to vector<1x16x32xf32>
    tpu.vector_store %arg8[%c0_24, %c0_25, %c0_26], %52 {strides = array<i32>} : memref<1x16x32xf32, #tpu.memory_space<vmem>>, vector<1x16x32xf32>,
    return
  }
  func.func @transform_0(%arg0: i32) -> (i32, i32, i32) {
    %c0_i32 = arith.constant 0 : i32
    %c0_i32_0 = arith.constant 0 : i32
    %c0_i32_1 = arith.constant 0 : i32
    return %arg0, %c0_i32, %c0_i32_0 : i32, i32, i32
  }
  func.func @transform_1(%arg0: i32) -> (i32, i32) {
    %c0_i32 = arith.constant 0 : i32
    %c0_i32_0 = arith.constant 0 : i32
    %c0_i32_1 = arith.constant 0 : i32
    return %c0_i32, %c0_i32_0 : i32, i32
  }
  func.func @transform_2(%arg0: i32) -> (i32, i32) {
    %c0_i32 = arith.constant 0 : i32
    %c0_i32_0 = arith.constant 0 : i32
    %c0_i32_1 = arith.constant 0 : i32
    return %c0_i32, %c0_i32_0 : i32, i32
  }
  func.func @transform_3(%arg0: i32) -> (i32, i32) {
    %c0_i32 = arith.constant 0 : i32
    %c0_i32_0 = arith.constant 0 : i32
    %c0_i32_1 = arith.constant 0 : i32
    return %c0_i32, %c0_i32_0 : i32, i32
  }
  func.func @transform_4(%arg0: i32) -> (i32, i32) {
    %c0_i32 = arith.constant 0 : i32
    %c0_i32_0 = arith.constant 0 : i32
    %c0_i32_1 = arith.constant 0 : i32
    return %c0_i32, %c0_i32_0 : i32, i32
  }
  func.func @transform_5(%arg0: i32) -> (i32, i32) {
    %c0_i32 = arith.constant 0 : i32
    %c0_i32_0 = arith.constant 0 : i32
    %c0_i32_1 = arith.constant 0 : i32
    return %c0_i32, %c0_i32_0 : i32, i32
  }
  func.func @transform_6(%arg0: i32) -> (i32, i32) {
    %c0_i32 = arith.constant 0 : i32
    %c0_i32_0 = arith.constant 0 : i32
    %c0_i32_1 = arith.constant 0 : i32
    return %c0_i32, %c0_i32_0 : i32, i32
  }
  func.func @transform_7(%arg0: i32) -> (i32, i32, i32) {
    %c0_i32 = arith.constant 0 : i32
    %c0_i32_0 = arith.constant 0 : i32
    %c0_i32_1 = arith.constant 0 : i32
    return %arg0, %c0_i32, %c0_i32_0 : i32, i32, i32
  }
}

module attributes {stable_mosaic.version = 11 : i64} {
  func.func @_ln_kernel(%arg0: i32, %arg1: memref<1x16x32xf32, #tpu.memory_space<vmem>>, %arg2: memref<1x32xf32, #tpu.memory_space<vmem>>, %arg3: memref<1x32xf32, #tpu.memory_space<vmem>>, %arg4: memref<1x16x32xf32, #tpu.memory_space<vmem>>) attributes {dimension_semantics = [#tpu.dimension_semantics<parallel>], iteration_bounds = array<i64: 2>, scalar_prefetch = 0 : i64, scratch_operands = 0 : i64, tpu.core_type = #tpu.core_type<tc>, window_params = [{transform_indices = @transform_0, window_bounds = array<i64: 1, 16, 32>}, {pipeline_mode = #tpu.pipeline_mode<synchronous>, transform_indices = @transform_1, window_bounds = array<i64: 1, 32>}, {pipeline_mode = #tpu.pipeline_mode<synchronous>, transform_indices = @transform_2, window_bounds = array<i64: 1, 32>}, {transform_indices = @transform_3, window_bounds = array<i64: 1, 16, 32>}]} {
    %c0 = arith.constant 0 : index
    %c0_0 = arith.constant 0 : index
    %c0_1 = arith.constant 0 : index
    %0 = vector.load %arg1[%c0, %c0_0, %c0_1] : memref<1x16x32xf32, #tpu.memory_space<vmem>>, vector<1x16x32xf32>
    %1 = vector.shape_cast %0 : vector<1x16x32xf32> to vector<16x32xf32>
    %c0_2 = arith.constant 0 : index
    %c0_3 = arith.constant 0 : index
    %2 = vector.load %arg2[%c0_2, %c0_3] : memref<1x32xf32, #tpu.memory_space<vmem>>, vector<1x32xf32>
    %c0_4 = arith.constant 0 : index
    %c0_5 = arith.constant 0 : index
    %3 = vector.load %arg3[%c0_4, %c0_5] : memref<1x32xf32, #tpu.memory_space<vmem>>, vector<1x32xf32>
    %cst = arith.constant dense<0.000000e+00> : vector<16xf32>
    %4 = vector.multi_reduction <add>, %1, %cst [1] : vector<16x32xf32> to vector<16xf32>
    %5 = vector.shape_cast %4 : vector<16xf32> to vector<16x1xf32>
    %cst_6 = arith.constant 3.200000e+01 : f32
    %6 = vector.broadcast %cst_6 : f32 to vector<16x1xf32>
    %7 = arith.divf %5, %6 : vector<16x1xf32>
    %8 = vector.broadcast %7 : vector<16x1xf32> to vector<16x32xf32>
    %9 = arith.subf %1, %8 : vector<16x32xf32>
    %10 = arith.mulf %9, %9 : vector<16x32xf32>
    %cst_7 = arith.constant dense<0.000000e+00> : vector<16xf32>
    %11 = vector.multi_reduction <add>, %10, %cst_7 [1] : vector<16x32xf32> to vector<16xf32>
    %12 = vector.shape_cast %11 : vector<16xf32> to vector<16x1xf32>
    %cst_8 = arith.constant 3.200000e+01 : f32
    %13 = vector.broadcast %cst_8 : f32 to vector<16x1xf32>
    %14 = arith.divf %12, %13 : vector<16x1xf32>
    %15 = vector.broadcast %7 : vector<16x1xf32> to vector<16x32xf32>
    %16 = arith.subf %1, %15 : vector<16x32xf32>
    %cst_9 = arith.constant 9.99999974E-6 : f32
    %17 = vector.broadcast %cst_9 : f32 to vector<16x1xf32>
    %18 = arith.addf %14, %17 : vector<16x1xf32>
    %19 = math.rsqrt %18 : vector<16x1xf32>
    %20 = vector.broadcast %19 : vector<16x1xf32> to vector<16x32xf32>
    %21 = arith.mulf %16, %20 : vector<16x32xf32>
    %22 = vector.broadcast %2 : vector<1x32xf32> to vector<16x32xf32>
    %23 = arith.mulf %21, %22 : vector<16x32xf32>
    %24 = vector.broadcast %3 : vector<1x32xf32> to vector<16x32xf32>
    %25 = arith.addf %23, %24 : vector<16x32xf32>
    %c0_10 = arith.constant 0 : index
    %c0_11 = arith.constant 0 : index
    %c0_12 = arith.constant 0 : index
    %26 = vector.load %arg4[%c0_10, %c0_11, %c0_12] : memref<1x16x32xf32, #tpu.memory_space<vmem>>, vector<1x16x32xf32>
    %27 = vector.shape_cast %26 : vector<1x16x32xf32> to vector<16x32xf32>
    %28 = vector.shape_cast %25 : vector<16x32xf32> to vector<1x16x32xf32>
    tpu.vector_store %arg4[%c0_10, %c0_11, %c0_12], %28 {strides = array<i32>} : memref<1x16x32xf32, #tpu.memory_space<vmem>>, vector<1x16x32xf32>,
    return
  }
  func.func @transform_0(%arg0: i32) -> (i32, i32, i32) {
    %c0_i32 = arith.constant 0 : i32
    %c0_i32_0 = arith.constant 0 : i32
    %c0_i32_1 = arith.constant 0 : i32
    return %arg0, %c0_i32, %c0_i32_0 : i32, i32, i32
  }
  func.func @transform_1(%arg0: i32) -> (i32, i32) {
    %c0_i32 = arith.constant 0 : i32
    %c0_i32_0 = arith.constant 0 : i32
    %c0_i32_1 = arith.constant 0 : i32
    return %c0_i32, %c0_i32_0 : i32, i32
  }
  func.func @transform_2(%arg0: i32) -> (i32, i32) {
    %c0_i32 = arith.constant 0 : i32
    %c0_i32_0 = arith.constant 0 : i32
    %c0_i32_1 = arith.constant 0 : i32
    return %c0_i32, %c0_i32_0 : i32, i32
  }
  func.func @transform_3(%arg0: i32) -> (i32, i32, i32) {
    %c0_i32 = arith.constant 0 : i32
    %c0_i32_0 = arith.constant 0 : i32
    %c0_i32_1 = arith.constant 0 : i32
    return %arg0, %c0_i32, %c0_i32_0 : i32, i32, i32
  }
}

module attributes {stable_mosaic.version = 11 : i64} {
  func.func @_attn_kernel(%arg0: i32, %arg1: memref<1x24x32xf32, #tpu.memory_space<vmem>>, %arg2: memref<1x1x24xf32, #tpu.memory_space<vmem>>, %arg3: memref<1x32xf32, #tpu.memory_space<vmem>>, %arg4: memref<1x32xf32, #tpu.memory_space<vmem>>, %arg5: memref<32x32xf32, #tpu.memory_space<vmem>>, %arg6: memref<32x64xf32, #tpu.memory_space<vmem>>, %arg7: memref<32x32xf32, #tpu.memory_space<vmem>>, %arg8: memref<1x32xf32, #tpu.memory_space<vmem>>, %arg9: memref<1x24x32xf32, #tpu.memory_space<vmem>>) attributes {dimension_semantics = [#tpu.dimension_semantics<parallel>], iteration_bounds = array<i64: 2>, scalar_prefetch = 0 : i64, scratch_operands = 0 : i64, tpu.core_type = #tpu.core_type<tc>, window_params = [{transform_indices = @transform_0, window_bounds = array<i64: 1, 24, 32>}, {transform_indices = @transform_1, window_bounds = array<i64: 1, 1, 24>}, {pipeline_mode = #tpu.pipeline_mode<synchronous>, transform_indices = @transform_2, window_bounds = array<i64: 1, 32>}, {pipeline_mode = #tpu.pipeline_mode<synchronous>, transform_indices = @transform_3, window_bounds = array<i64: 1, 32>}, {pipeline_mode = #tpu.pipeline_mode<synchronous>, transform_indices = @transform_4, window_bounds = array<i64: 32, 32>}, {pipeline_mode = #tpu.pipeline_mode<synchronous>, transform_indices = @transform_5, window_bounds = array<i64: 32, 64>}, {pipeline_mode = #tpu.pipeline_mode<synchronous>, transform_indices = @transform_6, window_bounds = array<i64: 32, 32>}, {pipeline_mode = #tpu.pipeline_mode<synchronous>, transform_indices = @transform_7, window_bounds = array<i64: 1, 32>}, {transform_indices = @transform_8, window_bounds = array<i64: 1, 24, 32>}]} {
    %c0 = arith.constant 0 : index
    %c0_0 = arith.constant 0 : index
    %c0_1 = arith.constant 0 : index
    %0 = vector.load %arg1[%c0, %c0_0, %c0_1] : memref<1x24x32xf32, #tpu.memory_space<vmem>>, vector<1x24x32xf32>
    %1 = vector.shape_cast %0 : vector<1x24x32xf32> to vector<24x32xf32>
    %c0_2 = arith.constant 0 : index
    %c0_3 = arith.constant 0 : index
    %2 = vector.load %arg3[%c0_2, %c0_3] : memref<1x32xf32, #tpu.memory_space<vmem>>, vector<1x32xf32>
    %c0_4 = arith.constant 0 : index
    %c0_5 = arith.constant 0 : index
    %3 = vector.load %arg4[%c0_4, %c0_5] : memref<1x32xf32, #tpu.memory_space<vmem>>, vector<1x32xf32>
    %cst = arith.constant dense<0.000000e+00> : vector<24xf32>
    %4 = vector.multi_reduction <add>, %1, %cst [1] : vector<24x32xf32> to vector<24xf32>
    %5 = vector.shape_cast %4 : vector<24xf32> to vector<24x1xf32>
    %cst_6 = arith.constant 3.200000e+01 : f32
    %6 = vector.broadcast %cst_6 : f32 to vector<24x1xf32>
    %7 = arith.divf %5, %6 : vector<24x1xf32>
    %8 = vector.broadcast %7 : vector<24x1xf32> to vector<24x32xf32>
    %9 = arith.subf %1, %8 : vector<24x32xf32>
    %10 = arith.mulf %9, %9 : vector<24x32xf32>
    %cst_7 = arith.constant dense<0.000000e+00> : vector<24xf32>
    %11 = vector.multi_reduction <add>, %10, %cst_7 [1] : vector<24x32xf32> to vector<24xf32>
    %12 = vector.shape_cast %11 : vector<24xf32> to vector<24x1xf32>
    %cst_8 = arith.constant 3.200000e+01 : f32
    %13 = vector.broadcast %cst_8 : f32 to vector<24x1xf32>
    %14 = arith.divf %12, %13 : vector<24x1xf32>
    %15 = vector.broadcast %7 : vector<24x1xf32> to vector<24x32xf32>
    %16 = arith.subf %1, %15 : vector<24x32xf32>
    %cst_9 = arith.constant 9.99999974E-6 : f32
    %17 = vector.broadcast %cst_9 : f32 to vector<24x1xf32>
    %18 = arith.addf %14, %17 : vector<24x1xf32>
    %19 = math.rsqrt %18 : vector<24x1xf32>
    %20 = vector.broadcast %19 : vector<24x1xf32> to vector<24x32xf32>
    %21 = arith.mulf %16, %20 : vector<24x32xf32>
    %22 = vector.broadcast %2 : vector<1x32xf32> to vector<24x32xf32>
    %23 = arith.mulf %21, %22 : vector<24x32xf32>
    %24 = vector.broadcast %3 : vector<1x32xf32> to vector<24x32xf32>
    %25 = arith.addf %23, %24 : vector<24x32xf32>
    %c0_10 = arith.constant 0 : index
    %c0_11 = arith.constant 0 : index
    %26 = vector.load %arg5[%c0_10, %c0_11] : memref<32x32xf32, #tpu.memory_space<vmem>>, vector<32x32xf32>
    %c0_12 = arith.constant 0 : index
    %c0_13 = arith.constant 0 : index
    %27 = vector.load %arg6[%c0_12, %c0_13] : memref<32x64xf32, #tpu.memory_space<vmem>>, vector<32x64xf32>
    %c0_14 = arith.constant 0 : index
    %c0_15 = arith.constant 0 : index
    %28 = vector.load %arg7[%c0_14, %c0_15] : memref<32x32xf32, #tpu.memory_space<vmem>>, vector<32x32xf32>
    %cst_16 = arith.constant dense<0.000000e+00> : vector<24x32xf32>
    %29 = tpu.matmul %25, %26, %cst_16 {dimension_numbers = #tpu.dot_dimension_numbers<[1], [0], [0], [1], [0, 0, 1, 1], [], []>} : vector<24x32xf32>, vector<32x32xf32>, vector<24x32xf32> -> vector<24x32xf32>
    %cst_17 = arith.constant dense<0.000000e+00> : vector<24x64xf32>
    %30 = tpu.matmul %25, %27, %cst_17 {dimension_numbers = #tpu.dot_dimension_numbers<[1], [0], [0], [1], [0, 0, 1, 1], [], []>} : vector<24x32xf32>, vector<32x64xf32>, vector<24x64xf32> -> vector<24x64xf32>
    %c0_18 = arith.constant 0 : index
    %c0_19 = arith.constant 0 : index
    %c0_20 = arith.constant 0 : index
    %31 = vector.load %arg2[%c0_18, %c0_19, %c0_20] : memref<1x1x24xf32, #tpu.memory_space<vmem>>, vector<1x1x24xf32>
    %32 = vector.shape_cast %31 : vector<1x1x24xf32> to vector<1x24xf32>
    %33 = vector.extract_strided_slice %29 {offsets = [0, 0], sizes = [24, 8], strides = [1, 1]} : vector<24x32xf32> to vector<24x8xf32>
    %34 = vector.extract_strided_slice %30 {offsets = [0, 0], sizes = [24, 8], strides = [1, 1]} : vector<24x64xf32> to vector<24x8xf32>
    %35 = vector.extract_strided_slice %30 {offsets = [0, 32], sizes = [24, 8], strides = [1, 1]} : vector<24x64xf32> to vector<24x8xf32>
    %cst_21 = arith.constant dense<0.000000e+00> : vector<24x24xf32>
    %36 = tpu.matmul %33, %34, %cst_21 {dimension_numbers = #tpu.dot_dimension_numbers<[1], [1], [0], [0], [0, 0, 1, 0], [], []>} : vector<24x8xf32>, vector<24x8xf32>, vector<24x24xf32> -> vector<24x24xf32>
    %cst_22 = arith.constant 0.353553385 : f32
    %37 = vector.broadcast %cst_22 : f32 to vector<24x24xf32>
    %38 = arith.mulf %36, %37 : vector<24x24xf32>
    %39 = vector.broadcast %32 : vector<1x24xf32> to vector<24x24xf32>
    %40 = arith.addf %38, %39 : vector<24x24xf32>
    %cst_23 = arith.constant dense<0xFF800000> : vector<24xf32>
    %41 = vector.multi_reduction <maximumf>, %40, %cst_23 [1] : vector<24x24xf32> to vector<24xf32>
    %42 = vector.shape_cast %41 : vector<24xf32> to vector<24x1xf32>
    %43 = vector.broadcast %42 : vector<24x1xf32> to vector<24x24xf32>
    %44 = arith.subf %40, %43 : vector<24x24xf32>
    %45 = math.exp %44 : vector<24x24xf32>
    %cst_24 = arith.constant dense<0.000000e+00> : vector<24xf32>
    %46 = vector.multi_reduction <add>, %45, %cst_24 [1] : vector<24x24xf32> to vector<24xf32>
    %47 = vector.shape_cast %46 : vector<24xf32> to vector<24x1xf32>
    %48 = tpu.reciprocal %47 {approx = true} : vector<24x1xf32> -> vector<24x1xf32>
    %cst_25 = arith.constant dense<0.000000e+00> : vector<24x8xf32>
    %49 = tpu.matmul %45, %35, %cst_25 {dimension_numbers = #tpu.dot_dimension_numbers<[1], [0], [0], [1], [0, 0, 1, 1], [], []>} : vector<24x24xf32>, vector<24x8xf32>, vector<24x8xf32> -> vector<24x8xf32>
    %50 = vector.broadcast %48 : vector<24x1xf32> to vector<24x8xf32>
    %51 = arith.mulf %49, %50 : vector<24x8xf32>
    %52 = vector.extract_strided_slice %28 {offsets = [0, 0], sizes = [8, 32], strides = [1, 1]} : vector<32x32xf32> to vector<8x32xf32>
    %cst_26 = arith.constant dense<0.000000e+00> : vector<24x32xf32>
    %53 = tpu.matmul %51, %52, %cst_26 {dimension_numbers = #tpu.dot_dimension_numbers<[1], [0], [0], [1], [0, 0, 1, 1], [], []>} : vector<24x8xf32>, vector<8x32xf32>, vector<24x32xf32> -> vector<24x32xf32>
    %54 = vector.extract_strided_slice %29 {offsets = [0, 8], sizes = [24, 8], strides = [1, 1]} : vector<24x32xf32> to vector<24x8xf32>
    %55 = vector.extract_strided_slice %30 {offsets = [0, 8], sizes = [24, 8], strides = [1, 1]} : vector<24x64xf32> to vector<24x8xf32>
    %56 = vector.extract_strided_slice %30 {offsets = [0, 40], sizes = [24, 8], strides = [1, 1]} : vector<24x64xf32> to vector<24x8xf32>
    %cst_27 = arith.constant dense<0.000000e+00> : vector<24x24xf32>
    %57 = tpu.matmul %54, %55, %cst_27 {dimension_numbers = #tpu.dot_dimension_numbers<[1], [1], [0], [0], [0, 0, 1, 0], [], []>} : vector<24x8xf32>, vector<24x8xf32>, vector<24x24xf32> -> vector<24x24xf32>
    %cst_28 = arith.constant 0.353553385 : f32
    %58 = vector.broadcast %cst_28 : f32 to vector<24x24xf32>
    %59 = arith.mulf %57, %58 : vector<24x24xf32>
    %60 = vector.broadcast %32 : vector<1x24xf32> to vector<24x24xf32>
    %61 = arith.addf %59, %60 : vector<24x24xf32>
    %cst_29 = arith.constant dense<0xFF800000> : vector<24xf32>
    %62 = vector.multi_reduction <maximumf>, %61, %cst_29 [1] : vector<24x24xf32> to vector<24xf32>
    %63 = vector.shape_cast %62 : vector<24xf32> to vector<24x1xf32>
    %64 = vector.broadcast %63 : vector<24x1xf32> to vector<24x24xf32>
    %65 = arith.subf %61, %64 : vector<24x24xf32>
    %66 = math.exp %65 : vector<24x24xf32>
    %cst_30 = arith.constant dense<0.000000e+00> : vector<24xf32>
    %67 = vector.multi_reduction <add>, %66, %cst_30 [1] : vector<24x24xf32> to vector<24xf32>
    %68 = vector.shape_cast %67 : vector<24xf32> to vector<24x1xf32>
    %69 = tpu.reciprocal %68 {approx = true} : vector<24x1xf32> -> vector<24x1xf32>
    %cst_31 = arith.constant dense<0.000000e+00> : vector<24x8xf32>
    %70 = tpu.matmul %66, %56, %cst_31 {dimension_numbers = #tpu.dot_dimension_numbers<[1], [0], [0], [1], [0, 0, 1, 1], [], []>} : vector<24x24xf32>, vector<24x8xf32>, vector<24x8xf32> -> vector<24x8xf32>
    %71 = vector.broadcast %69 : vector<24x1xf32> to vector<24x8xf32>
    %72 = arith.mulf %70, %71 : vector<24x8xf32>
    %73 = vector.extract_strided_slice %28 {offsets = [8, 0], sizes = [8, 32], strides = [1, 1]} : vector<32x32xf32> to vector<8x32xf32>
    %cst_32 = arith.constant dense<0.000000e+00> : vector<24x32xf32>
    %74 = tpu.matmul %72, %73, %cst_32 {dimension_numbers = #tpu.dot_dimension_numbers<[1], [0], [0], [1], [0, 0, 1, 1], [], []>} : vector<24x8xf32>, vector<8x32xf32>, vector<24x32xf32> -> vector<24x32xf32>
    %75 = arith.addf %53, %74 : vector<24x32xf32>
    %76 = vector.extract_strided_slice %29 {offsets = [0, 16], sizes = [24, 8], strides = [1, 1]} : vector<24x32xf32> to vector<24x8xf32>
    %77 = vector.extract_strided_slice %30 {offsets = [0, 16], sizes = [24, 8], strides = [1, 1]} : vector<24x64xf32> to vector<24x8xf32>
    %78 = vector.extract_strided_slice %30 {offsets = [0, 48], sizes = [24, 8], strides = [1, 1]} : vector<24x64xf32> to vector<24x8xf32>
    %cst_33 = arith.constant dense<0.000000e+00> : vector<24x24xf32>
    %79 = tpu.matmul %76, %77, %cst_33 {dimension_numbers = #tpu.dot_dimension_numbers<[1], [1], [0], [0], [0, 0, 1, 0], [], []>} : vector<24x8xf32>, vector<24x8xf32>, vector<24x24xf32> -> vector<24x24xf32>
    %cst_34 = arith.constant 0.353553385 : f32
    %80 = vector.broadcast %cst_34 : f32 to vector<24x24xf32>
    %81 = arith.mulf %79, %80 : vector<24x24xf32>
    %82 = vector.broadcast %32 : vector<1x24xf32> to vector<24x24xf32>
    %83 = arith.addf %81, %82 : vector<24x24xf32>
    %cst_35 = arith.constant dense<0xFF800000> : vector<24xf32>
    %84 = vector.multi_reduction <maximumf>, %83, %cst_35 [1] : vector<24x24xf32> to vector<24xf32>
    %85 = vector.shape_cast %84 : vector<24xf32> to vector<24x1xf32>
    %86 = vector.broadcast %85 : vector<24x1xf32> to vector<24x24xf32>
    %87 = arith.subf %83, %86 : vector<24x24xf32>
    %88 = math.exp %87 : vector<24x24xf32>
    %cst_36 = arith.constant dense<0.000000e+00> : vector<24xf32>
    %89 = vector.multi_reduction <add>, %88, %cst_36 [1] : vector<24x24xf32> to vector<24xf32>
    %90 = vector.shape_cast %89 : vector<24xf32> to vector<24x1xf32>
    %91 = tpu.reciprocal %90 {approx = true} : vector<24x1xf32> -> vector<24x1xf32>
    %cst_37 = arith.constant dense<0.000000e+00> : vector<24x8xf32>
    %92 = tpu.matmul %88, %78, %cst_37 {dimension_numbers = #tpu.dot_dimension_numbers<[1], [0], [0], [1], [0, 0, 1, 1], [], []>} : vector<24x24xf32>, vector<24x8xf32>, vector<24x8xf32> -> vector<24x8xf32>
    %93 = vector.broadcast %91 : vector<24x1xf32> to vector<24x8xf32>
    %94 = arith.mulf %92, %93 : vector<24x8xf32>
    %95 = vector.extract_strided_slice %28 {offsets = [16, 0], sizes = [8, 32], strides = [1, 1]} : vector<32x32xf32> to vector<8x32xf32>
    %cst_38 = arith.constant dense<0.000000e+00> : vector<24x32xf32>
    %96 = tpu.matmul %94, %95, %cst_38 {dimension_numbers = #tpu.dot_dimension_numbers<[1], [0], [0], [1], [0, 0, 1, 1], [], []>} : vector<24x8xf32>, vector<8x32xf32>, vector<24x32xf32> -> vector<24x32xf32>
    %97 = arith.addf %75, %96 : vector<24x32xf32>
    %98 = vector.extract_strided_slice %29 {offsets = [0, 24], sizes = [24, 8], strides = [1, 1]} : vector<24x32xf32> to vector<24x8xf32>
    %99 = vector.extract_strided_slice %30 {offsets = [0, 24], sizes = [24, 8], strides = [1, 1]} : vector<24x64xf32> to vector<24x8xf32>
    %100 = vector.extract_strided_slice %30 {offsets = [0, 56], sizes = [24, 8], strides = [1, 1]} : vector<24x64xf32> to vector<24x8xf32>
    %cst_39 = arith.constant dense<0.000000e+00> : vector<24x24xf32>
    %101 = tpu.matmul %98, %99, %cst_39 {dimension_numbers = #tpu.dot_dimension_numbers<[1], [1], [0], [0], [0, 0, 1, 0], [], []>} : vector<24x8xf32>, vector<24x8xf32>, vector<24x24xf32> -> vector<24x24xf32>
    %cst_40 = arith.constant 0.353553385 : f32
    %102 = vector.broadcast %cst_40 : f32 to vector<24x24xf32>
    %103 = arith.mulf %101, %102 : vector<24x24xf32>
    %104 = vector.broadcast %32 : vector<1x24xf32> to vector<24x24xf32>
    %105 = arith.addf %103, %104 : vector<24x24xf32>
    %cst_41 = arith.constant dense<0xFF800000> : vector<24xf32>
    %106 = vector.multi_reduction <maximumf>, %105, %cst_41 [1] : vector<24x24xf32> to vector<24xf32>
    %107 = vector.shape_cast %106 : vector<24xf32> to vector<24x1xf32>
    %108 = vector.broadcast %107 : vector<24x1xf32> to vector<24x24xf32>
    %109 = arith.subf %105, %108 : vector<24x24xf32>
    %110 = math.exp %109 : vector<24x24xf32>
    %cst_42 = arith.constant dense<0.000000e+00> : vector<24xf32>
    %111 = vector.multi_reduction <add>, %110, %cst_42 [1] : vector<24x24xf32> to vector<24xf32>
    %112 = vector.shape_cast %111 : vector<24xf32> to vector<24x1xf32>
    %113 = tpu.reciprocal %112 {approx = true} : vector<24x1xf32> -> vector<24x1xf32>
    %cst_43 = arith.constant dense<0.000000e+00> : vector<24x8xf32>
    %114 = tpu.matmul %110, %100, %cst_43 {dimension_numbers = #tpu.dot_dimension_numbers<[1], [0], [0], [1], [0, 0, 1, 1], [], []>} : vector<24x24xf32>, vector<24x8xf32>, vector<24x8xf32> -> vector<24x8xf32>
    %115 = vector.broadcast %113 : vector<24x1xf32> to vector<24x8xf32>
    %116 = arith.mulf %114, %115 : vector<24x8xf32>
    %117 = vector.extract_strided_slice %28 {offsets = [24, 0], sizes = [8, 32], strides = [1, 1]} : vector<32x32xf32> to vector<8x32xf32>
    %cst_44 = arith.constant dense<0.000000e+00> : vector<24x32xf32>
    %118 = tpu.matmul %116, %117, %cst_44 {dimension_numbers = #tpu.dot_dimension_numbers<[1], [0], [0], [1], [0, 0, 1, 1], [], []>} : vector<24x8xf32>, vector<8x32xf32>, vector<24x32xf32> -> vector<24x32xf32>
    %119 = arith.addf %97, %118 : vector<24x32xf32>
    %c0_45 = arith.constant 0 : index
    %c0_46 = arith.constant 0 : index
    %120 = vector.load %arg8[%c0_45, %c0_46] : memref<1x32xf32, #tpu.memory_space<vmem>>, vector<1x32xf32>
    %121 = vector.broadcast %120 : vector<1x32xf32> to vector<24x32xf32>
    %122 = arith.addf %119, %121 : vector<24x32xf32>
    %123 = arith.addf %122, %1 : vector<24x32xf32>
    %c0_47 = arith.constant 0 : index
    %c0_48 = arith.constant 0 : index
    %c0_49 = arith.constant 0 : index
    %124 = vector.load %arg9[%c0_47, %c0_48, %c0_49] : memref<1x24x32xf32, #tpu.memory_space<vmem>>, vector<1x24x32xf32>
    %125 = vector.shape_cast %124 : vector<1x24x32xf32> to vector<24x32xf32>
    %126 = vector.shape_cast %123 : vector<24x32xf32> to vector<1x24x32xf32>
    tpu.vector_store %arg9[%c0_47, %c0_48, %c0_49], %126 {strides = array<i32>} : memref<1x24x32xf32, #tpu.memory_space<vmem>>, vector<1x24x32xf32>,
    return
  }
  func.func @transform_0(%arg0: i32) -> (i32, i32, i32) {
    %c0_i32 = arith.constant 0 : i32
    %c0_i32_0 = arith.constant 0 : i32
    %c0_i32_1 = arith.constant 0 : i32
    return %arg0, %c0_i32, %c0_i32_0 : i32, i32, i32
  }
  func.func @transform_1(%arg0: i32) -> (i32, i32, i32) {
    %c0_i32 = arith.constant 0 : i32
    %c0_i32_0 = arith.constant 0 : i32
    %c0_i32_1 = arith.constant 0 : i32
    return %arg0, %c0_i32, %c0_i32_0 : i32, i32, i32
  }
  func.func @transform_2(%arg0: i32) -> (i32, i32) {
    %c0_i32 = arith.constant 0 : i32
    %c0_i32_0 = arith.constant 0 : i32
    %c0_i32_1 = arith.constant 0 : i32
    return %c0_i32, %c0_i32_0 : i32, i32
  }
  func.func @transform_3(%arg0: i32) -> (i32, i32) {
    %c0_i32 = arith.constant 0 : i32
    %c0_i32_0 = arith.constant 0 : i32
    %c0_i32_1 = arith.constant 0 : i32
    return %c0_i32, %c0_i32_0 : i32, i32
  }
  func.func @transform_4(%arg0: i32) -> (i32, i32) {
    %c0_i32 = arith.constant 0 : i32
    %c0_i32_0 = arith.constant 0 : i32
    %c0_i32_1 = arith.constant 0 : i32
    return %c0_i32, %c0_i32_0 : i32, i32
  }
  func.func @transform_5(%arg0: i32) -> (i32, i32) {
    %c0_i32 = arith.constant 0 : i32
    %c0_i32_0 = arith.constant 0 : i32
    %c0_i32_1 = arith.constant 0 : i32
    return %c0_i32, %c0_i32_0 : i32, i32
  }
  func.func @transform_6(%arg0: i32) -> (i32, i32) {
    %c0_i32 = arith.constant 0 : i32
    %c0_i32_0 = arith.constant 0 : i32
    %c0_i32_1 = arith.constant 0 : i32
    return %c0_i32, %c0_i32_0 : i32, i32
  }
  func.func @transform_7(%arg0: i32) -> (i32, i32) {
    %c0_i32 = arith.constant 0 : i32
    %c0_i32_0 = arith.constant 0 : i32
    %c0_i32_1 = arith.constant 0 : i32
    return %c0_i32, %c0_i32_0 : i32, i32
  }
  func.func @transform_8(%arg0: i32) -> (i32, i32, i32) {
    %c0_i32 = arith.constant 0 : i32
    %c0_i32_0 = arith.constant 0 : i32
    %c0_i32_1 = arith.constant 0 : i32
    return %arg0, %c0_i32, %c0_i32_0 : i32, i32, i32
  }
}

module attributes {stable_mosaic.version = 11 : i64} {
  func.func @_ff_kernel(%arg0: i32, %arg1: memref<1x24x32xf32, #tpu.memory_space<vmem>>, %arg2: memref<1x32xf32, #tpu.memory_space<vmem>>, %arg3: memref<1x32xf32, #tpu.memory_space<vmem>>, %arg4: memref<32x128xf32, #tpu.memory_space<vmem>>, %arg5: memref<1x128xf32, #tpu.memory_space<vmem>>, %arg6: memref<128x32xf32, #tpu.memory_space<vmem>>, %arg7: memref<1x32xf32, #tpu.memory_space<vmem>>, %arg8: memref<1x24x32xf32, #tpu.memory_space<vmem>>) attributes {dimension_semantics = [#tpu.dimension_semantics<parallel>], iteration_bounds = array<i64: 2>, scalar_prefetch = 0 : i64, scratch_operands = 0 : i64, tpu.core_type = #tpu.core_type<tc>, window_params = [{transform_indices = @transform_0, window_bounds = array<i64: 1, 24, 32>}, {pipeline_mode = #tpu.pipeline_mode<synchronous>, transform_indices = @transform_1, window_bounds = array<i64: 1, 32>}, {pipeline_mode = #tpu.pipeline_mode<synchronous>, transform_indices = @transform_2, window_bounds = array<i64: 1, 32>}, {pipeline_mode = #tpu.pipeline_mode<synchronous>, transform_indices = @transform_3, window_bounds = array<i64: 32, 128>}, {pipeline_mode = #tpu.pipeline_mode<synchronous>, transform_indices = @transform_4, window_bounds = array<i64: 1, 128>}, {pipeline_mode = #tpu.pipeline_mode<synchronous>, transform_indices = @transform_5, window_bounds = array<i64: 128, 32>}, {pipeline_mode = #tpu.pipeline_mode<synchronous>, transform_indices = @transform_6, window_bounds = array<i64: 1, 32>}, {transform_indices = @transform_7, window_bounds = array<i64: 1, 24, 32>}]} {
    %c0 = arith.constant 0 : index
    %c0_0 = arith.constant 0 : index
    %c0_1 = arith.constant 0 : index
    %0 = vector.load %arg1[%c0, %c0_0, %c0_1] : memref<1x24x32xf32, #tpu.memory_space<vmem>>, vector<1x24x32xf32>
    %1 = vector.shape_cast %0 : vector<1x24x32xf32> to vector<24x32xf32>
    %c0_2 = arith.constant 0 : index
    %c0_3 = arith.constant 0 : index
    %2 = vector.load %arg2[%c0_2, %c0_3] : memref<1x32xf32, #tpu.memory_space<vmem>>, vector<1x32xf32>
    %c0_4 = arith.constant 0 : index
    %c0_5 = arith.constant 0 : index
    %3 = vector.load %arg3[%c0_4, %c0_5] : memref<1x32xf32, #tpu.memory_space<vmem>>, vector<1x32xf32>
    %cst = arith.constant dense<0.000000e+00> : vector<24xf32>
    %4 = vector.multi_reduction <add>, %1, %cst [1] : vector<24x32xf32> to vector<24xf32>
    %5 = vector.shape_cast %4 : vector<24xf32> to vector<24x1xf32>
    %cst_6 = arith.constant 3.200000e+01 : f32
    %6 = vector.broadcast %cst_6 : f32 to vector<24x1xf32>
    %7 = arith.divf %5, %6 : vector<24x1xf32>
    %8 = vector.broadcast %7 : vector<24x1xf32> to vector<24x32xf32>
    %9 = arith.subf %1, %8 : vector<24x32xf32>
    %10 = arith.mulf %9, %9 : vector<24x32xf32>
    %cst_7 = arith.constant dense<0.000000e+00> : vector<24xf32>
    %11 = vector.multi_reduction <add>, %10, %cst_7 [1] : vector<24x32xf32> to vector<24xf32>
    %12 = vector.shape_cast %11 : vector<24xf32> to vector<24x1xf32>
    %cst_8 = arith.constant 3.200000e+01 : f32
    %13 = vector.broadcast %cst_8 : f32 to vector<24x1xf32>
    %14 = arith.divf %12, %13 : vector<24x1xf32>
    %15 = vector.broadcast %7 : vector<24x1xf32> to vector<24x32xf32>
    %16 = arith.subf %1, %15 : vector<24x32xf32>
    %cst_9 = arith.constant 9.99999974E-6 : f32
    %17 = vector.broadcast %cst_9 : f32 to vector<24x1xf32>
    %18 = arith.addf %14, %17 : vector<24x1xf32>
    %19 = math.rsqrt %18 : vector<24x1xf32>
    %20 = vector.broadcast %19 : vector<24x1xf32> to vector<24x32xf32>
    %21 = arith.mulf %16, %20 : vector<24x32xf32>
    %22 = vector.broadcast %2 : vector<1x32xf32> to vector<24x32xf32>
    %23 = arith.mulf %21, %22 : vector<24x32xf32>
    %24 = vector.broadcast %3 : vector<1x32xf32> to vector<24x32xf32>
    %25 = arith.addf %23, %24 : vector<24x32xf32>
    %c0_10 = arith.constant 0 : index
    %c0_11 = arith.constant 0 : index
    %26 = vector.load %arg4[%c0_10, %c0_11] : memref<32x128xf32, #tpu.memory_space<vmem>>, vector<32x128xf32>
    %cst_12 = arith.constant dense<0.000000e+00> : vector<24x128xf32>
    %27 = tpu.matmul %25, %26, %cst_12 {dimension_numbers = #tpu.dot_dimension_numbers<[1], [0], [0], [1], [0, 0, 1, 1], [], []>} : vector<24x32xf32>, vector<32x128xf32>, vector<24x128xf32> -> vector<24x128xf32>
    %c0_13 = arith.constant 0 : index
    %c0_14 = arith.constant 0 : index
    %28 = vector.load %arg5[%c0_13, %c0_14] : memref<1x128xf32, #tpu.memory_space<vmem>>, vector<1x128xf32>
    %29 = vector.broadcast %28 : vector<1x128xf32> to vector<24x128xf32>
    %30 = arith.addf %27, %29 : vector<24x128xf32>
    %31 = arith.mulf %30, %30 : vector<24x128xf32>
    %32 = arith.mulf %30, %31 : vector<24x128xf32>
    %cst_15 = arith.constant 4.471500e-02 : f32
    %33 = vector.broadcast %cst_15 : f32 to vector<24x128xf32>
    %34 = arith.mulf %33, %32 : vector<24x128xf32>
    %35 = arith.addf %30, %34 : vector<24x128xf32>
    %cst_16 = arith.constant 0.797884583 : f32
    %36 = vector.broadcast %cst_16 : f32 to vector<24x128xf32>
    %37 = arith.mulf %36, %35 : vector<24x128xf32>
    %38 = math.tanh %37 : vector<24x128xf32>
    %cst_17 = arith.constant 1.000000e+00 : f32
    %39 = vector.broadcast %cst_17 : f32 to vector<24x128xf32>
    %40 = arith.addf %39, %38 : vector<24x128xf32>
    %cst_18 = arith.constant 5.000000e-01 : f32
    %41 = vector.broadcast %cst_18 : f32 to vector<24x128xf32>
    %42 = arith.mulf %41, %40 : vector<24x128xf32>
    %43 = arith.mulf %30, %42 : vector<24x128xf32>
    %c0_19 = arith.constant 0 : index
    %c0_20 = arith.constant 0 : index
    %44 = vector.load %arg6[%c0_19, %c0_20] : memref<128x32xf32, #tpu.memory_space<vmem>>, vector<128x32xf32>
    %cst_21 = arith.constant dense<0.000000e+00> : vector<24x32xf32>
    %45 = tpu.matmul %43, %44, %cst_21 {dimension_numbers = #tpu.dot_dimension_numbers<[1], [0], [0], [1], [0, 0, 1, 1], [], []>} : vector<24x128xf32>, vector<128x32xf32>, vector<24x32xf32> -> vector<24x32xf32>
    %c0_22 = arith.constant 0 : index
    %c0_23 = arith.constant 0 : index
    %46 = vector.load %arg7[%c0_22, %c0_23] : memref<1x32xf32, #tpu.memory_space<vmem>>, vector<1x32xf32>
    %47 = vector.broadcast %46 : vector<1x32xf32> to vector<24x32xf32>
    %48 = arith.addf %45, %47 : vector<24x32xf32>
    %49 = arith.addf %48, %1 : vector<24x32xf32>
    %c0_24 = arith.constant 0 : index
    %c0_25 = arith.constant 0 : index
    %c0_26 = arith.constant 0 : index
    %50 = vector.load %arg8[%c0_24, %c0_25, %c0_26] : memref<1x24x32xf32, #tpu.memory_space<vmem>>, vector<1x24x32xf32>
    %51 = vector.shape_cast %50 : vector<1x24x32xf32> to vector<24x32xf32>
    %52 = vector.shape_cast %49 : vector<24x32xf32> to vector<1x24x32xf32>
    tpu.vector_store %arg8[%c0_24, %c0_25, %c0_26], %52 {strides = array<i32>} : memref<1x24x32xf32, #tpu.memory_space<vmem>>, vector<1x24x32xf32>,
    return
  }
  func.func @transform_0(%arg0: i32) -> (i32, i32, i32) {
    %c0_i32 = arith.constant 0 : i32
    %c0_i32_0 = arith.constant 0 : i32
    %c0_i32_1 = arith.constant 0 : i32
    return %arg0, %c0_i32, %c0_i32_0 : i32, i32, i32
  }
  func.func @transform_1(%arg0: i32) -> (i32, i32) {
    %c0_i32 = arith.constant 0 : i32
    %c0_i32_0 = arith.constant 0 : i32
    %c0_i32_1 = arith.constant 0 : i32
    return %c0_i32, %c0_i32_0 : i32, i32
  }
  func.func @transform_2(%arg0: i32) -> (i32, i32) {
    %c0_i32 = arith.constant 0 : i32
    %c0_i32_0 = arith.constant 0 : i32
    %c0_i32_1 = arith.constant 0 : i32
    return %c0_i32, %c0_i32_0 : i32, i32
  }
  func.func @transform_3(%arg0: i32) -> (i32, i32) {
    %c0_i32 = arith.constant 0 : i32
    %c0_i32_0 = arith.constant 0 : i32
    %c0_i32_1 = arith.constant 0 : i32
    return %c0_i32, %c0_i32_0 : i32, i32
  }
  func.func @transform_4(%arg0: i32) -> (i32, i32) {
    %c0_i32 = arith.constant 0 : i32
    %c0_i32_0 = arith.constant 0 : i32
    %c0_i32_1 = arith.constant 0 : i32
    return %c0_i32, %c0_i32_0 : i32, i32
  }
  func.func @transform_5(%arg0: i32) -> (i32, i32) {
    %c0_i32 = arith.constant 0 : i32
    %c0_i32_0 = arith.constant 0 : i32
    %c0_i32_1 = arith.constant 0 : i32
    return %c0_i32, %c0_i32_0 : i32, i32
  }
  func.func @transform_6(%arg0: i32) -> (i32, i32) {
    %c0_i32 = arith.constant 0 : i32
    %c0_i32_0 = arith.constant 0 : i32
    %c0_i32_1 = arith.constant 0 : i32
    return %c0_i32, %c0_i32_0 : i32, i32
  }
  func.func @transform_7(%arg0: i32) -> (i32, i32, i32) {
    %c0_i32 = arith.constant 0 : i32
    %c0_i32_0 = arith.constant 0 : i32
    %c0_i32_1 = arith.constant 0 : i32
    return %arg0, %c0_i32, %c0_i32_0 : i32, i32, i32
  }
}

module attributes {stable_mosaic.version = 11 : i64} {
  func.func @_ln_kernel(%arg0: i32, %arg1: memref<1x24x32xf32, #tpu.memory_space<vmem>>, %arg2: memref<1x32xf32, #tpu.memory_space<vmem>>, %arg3: memref<1x32xf32, #tpu.memory_space<vmem>>, %arg4: memref<1x24x32xf32, #tpu.memory_space<vmem>>) attributes {dimension_semantics = [#tpu.dimension_semantics<parallel>], iteration_bounds = array<i64: 2>, scalar_prefetch = 0 : i64, scratch_operands = 0 : i64, tpu.core_type = #tpu.core_type<tc>, window_params = [{transform_indices = @transform_0, window_bounds = array<i64: 1, 24, 32>}, {pipeline_mode = #tpu.pipeline_mode<synchronous>, transform_indices = @transform_1, window_bounds = array<i64: 1, 32>}, {pipeline_mode = #tpu.pipeline_mode<synchronous>, transform_indices = @transform_2, window_bounds = array<i64: 1, 32>}, {transform_indices = @transform_3, window_bounds = array<i64: 1, 24, 32>}]} {
    %c0 = arith.constant 0 : index
    %c0_0 = arith.constant 0 : index
    %c0_1 = arith.constant 0 : index
    %0 = vector.load %arg1[%c0, %c0_0, %c0_1] : memref<1x24x32xf32, #tpu.memory_space<vmem>>, vector<1x24x32xf32>
    %1 = vector.shape_cast %0 : vector<1x24x32xf32> to vector<24x32xf32>
    %c0_2 = arith.constant 0 : index
    %c0_3 = arith.constant 0 : index
    %2 = vector.load %arg2[%c0_2, %c0_3] : memref<1x32xf32, #tpu.memory_space<vmem>>, vector<1x32xf32>
    %c0_4 = arith.constant 0 : index
    %c0_5 = arith.constant 0 : index
    %3 = vector.load %arg3[%c0_4, %c0_5] : memref<1x32xf32, #tpu.memory_space<vmem>>, vector<1x32xf32>
    %cst = arith.constant dense<0.000000e+00> : vector<24xf32>
    %4 = vector.multi_reduction <add>, %1, %cst [1] : vector<24x32xf32> to vector<24xf32>
    %5 = vector.shape_cast %4 : vector<24xf32> to vector<24x1xf32>
    %cst_6 = arith.constant 3.200000e+01 : f32
    %6 = vector.broadcast %cst_6 : f32 to vector<24x1xf32>
    %7 = arith.divf %5, %6 : vector<24x1xf32>
    %8 = vector.broadcast %7 : vector<24x1xf32> to vector<24x32xf32>
    %9 = arith.subf %1, %8 : vector<24x32xf32>
    %10 = arith.mulf %9, %9 : vector<24x32xf32>
    %cst_7 = arith.constant dense<0.000000e+00> : vector<24xf32>
    %11 = vector.multi_reduction <add>, %10, %cst_7 [1] : vector<24x32xf32> to vector<24xf32>
    %12 = vector.shape_cast %11 : vector<24xf32> to vector<24x1xf32>
    %cst_8 = arith.constant 3.200000e+01 : f32
    %13 = vector.broadcast %cst_8 : f32 to vector<24x1xf32>
    %14 = arith.divf %12, %13 : vector<24x1xf32>
    %15 = vector.broadcast %7 : vector<24x1xf32> to vector<24x32xf32>
    %16 = arith.subf %1, %15 : vector<24x32xf32>
    %cst_9 = arith.constant 9.99999974E-6 : f32
    %17 = vector.broadcast %cst_9 : f32 to vector<24x1xf32>
    %18 = arith.addf %14, %17 : vector<24x1xf32>
    %19 = math.rsqrt %18 : vector<24x1xf32>
    %20 = vector.broadcast %19 : vector<24x1xf32> to vector<24x32xf32>
    %21 = arith.mulf %16, %20 : vector<24x32xf32>
    %22 = vector.broadcast %2 : vector<1x32xf32> to vector<24x32xf32>
    %23 = arith.mulf %21, %22 : vector<24x32xf32>
    %24 = vector.broadcast %3 : vector<1x32xf32> to vector<24x32xf32>
    %25 = arith.addf %23, %24 : vector<24x32xf32>
    %c0_10 = arith.constant 0 : index
    %c0_11 = arith.constant 0 : index
    %c0_12 = arith.constant 0 : index
    %26 = vector.load %arg4[%c0_10, %c0_11, %c0_12] : memref<1x24x32xf32, #tpu.memory_space<vmem>>, vector<1x24x32xf32>
    %27 = vector.shape_cast %26 : vector<1x24x32xf32> to vector<24x32xf32>
    %28 = vector.shape_cast %25 : vector<24x32xf32> to vector<1x24x32xf32>
    tpu.vector_store %arg4[%c0_10, %c0_11, %c0_12], %28 {strides = array<i32>} : memref<1x24x32xf32, #tpu.memory_space<vmem>>, vector<1x24x32xf32>,
    return
  }
  func.func @transform_0(%arg0: i32) -> (i32, i32, i32) {
    %c0_i32 = arith.constant 0 : i32
    %c0_i32_0 = arith.constant 0 : i32
    %c0_i32_1 = arith.constant 0 : i32
    return %arg0, %c0_i32, %c0_i32_0 : i32, i32, i32
  }
  func.func @transform_1(%arg0: i32) -> (i32, i32) {
    %c0_i32 = arith.constant 0 : i32
    %c0_i32_0 = arith.constant 0 : i32
    %c0_i32_1 = arith.constant 0 : i32
    return %c0_i32, %c0_i32_0 : i32, i32
  }
  func.func @transform_2(%arg0: i32) -> (i32, i32) {
    %c0_i32 = arith.constant 0 : i32
    %c0_i32_0 = arith.constant 0 : i32
    %c0_i32_1 = arith.constant 0 : i32
    return %c0_i32, %c0_i32_0 : i32, i32
  }
  func.func @transform_3(%arg0: i32) -> (i32, i32, i32) {
    %c0_i32 = arith.constant 0 : i32
    %c0_i32_0 = arith.constant 0 : i32
    %c0_i32_1 = arith.constant 0 : i32
    return %arg0, %c0_i32, %c0_i32_0 : i32, i32, i32
  }
}

module attributes {stable_mosaic.version = 11 : i64} {
  func.func @_attn_kernel(%arg0: i32, %arg1: memref<1x8x32xf32, #tpu.memory_space<vmem>>, %arg2: memref<1x32xf32, #tpu.memory_space<vmem>>, %arg3: memref<1x32xf32, #tpu.memory_space<vmem>>, %arg4: memref<32x32xf32, #tpu.memory_space<vmem>>, %arg5: memref<32x64xf32, #tpu.memory_space<vmem>>, %arg6: memref<32x32xf32, #tpu.memory_space<vmem>>, %arg7: memref<1x32xf32, #tpu.memory_space<vmem>>, %arg8: memref<1x8x32xf32, #tpu.memory_space<vmem>>) attributes {dimension_semantics = [#tpu.dimension_semantics<parallel>], iteration_bounds = array<i64: 2>, scalar_prefetch = 0 : i64, scratch_operands = 0 : i64, tpu.core_type = #tpu.core_type<tc>, window_params = [{transform_indices = @transform_0, window_bounds = array<i64: 1, 8, 32>}, {pipeline_mode = #tpu.pipeline_mode<synchronous>, transform_indices = @transform_1, window_bounds = array<i64: 1, 32>}, {pipeline_mode = #tpu.pipeline_mode<synchronous>, transform_indices = @transform_2, window_bounds = array<i64: 1, 32>}, {pipeline_mode = #tpu.pipeline_mode<synchronous>, transform_indices = @transform_3, window_bounds = array<i64: 32, 32>}, {pipeline_mode = #tpu.pipeline_mode<synchronous>, transform_indices = @transform_4, window_bounds = array<i64: 32, 64>}, {pipeline_mode = #tpu.pipeline_mode<synchronous>, transform_indices = @transform_5, window_bounds = array<i64: 32, 32>}, {pipeline_mode = #tpu.pipeline_mode<synchronous>, transform_indices = @transform_6, window_bounds = array<i64: 1, 32>}, {transform_indices = @transform_7, window_bounds = array<i64: 1, 8, 32>}]} {
    %c0 = arith.constant 0 : index
    %c0_0 = arith.constant 0 : index
    %c0_1 = arith.constant 0 : index
    %0 = vector.load %arg1[%c0, %c0_0, %c0_1] : memref<1x8x32xf32, #tpu.memory_space<vmem>>, vector<1x8x32xf32>
    %1 = vector.shape_cast %0 : vector<1x8x32xf32> to vector<8x32xf32>
    %c0_2 = arith.constant 0 : index
    %c0_3 = arith.constant 0 : index
    %2 = vector.load %arg2[%c0_2, %c0_3] : memref<1x32xf32, #tpu.memory_space<vmem>>, vector<1x32xf32>
    %c0_4 = arith.constant 0 : index
    %c0_5 = arith.constant 0 : index
    %3 = vector.load %arg3[%c0_4, %c0_5] : memref<1x32xf32, #tpu.memory_space<vmem>>, vector<1x32xf32>
    %cst = arith.constant dense<0.000000e+00> : vector<8xf32>
    %4 = vector.multi_reduction <add>, %1, %cst [1] : vector<8x32xf32> to vector<8xf32>
    %5 = vector.shape_cast %4 : vector<8xf32> to vector<8x1xf32>
    %cst_6 = arith.constant 3.200000e+01 : f32
    %6 = vector.broadcast %cst_6 : f32 to vector<8x1xf32>
    %7 = arith.divf %5, %6 : vector<8x1xf32>
    %8 = vector.broadcast %7 : vector<8x1xf32> to vector<8x32xf32>
    %9 = arith.subf %1, %8 : vector<8x32xf32>
    %10 = arith.mulf %9, %9 : vector<8x32xf32>
    %cst_7 = arith.constant dense<0.000000e+00> : vector<8xf32>
    %11 = vector.multi_reduction <add>, %10, %cst_7 [1] : vector<8x32xf32> to vector<8xf32>
    %12 = vector.shape_cast %11 : vector<8xf32> to vector<8x1xf32>
    %cst_8 = arith.constant 3.200000e+01 : f32
    %13 = vector.broadcast %cst_8 : f32 to vector<8x1xf32>
    %14 = arith.divf %12, %13 : vector<8x1xf32>
    %15 = vector.broadcast %7 : vector<8x1xf32> to vector<8x32xf32>
    %16 = arith.subf %1, %15 : vector<8x32xf32>
    %cst_9 = arith.constant 9.99999974E-6 : f32
    %17 = vector.broadcast %cst_9 : f32 to vector<8x1xf32>
    %18 = arith.addf %14, %17 : vector<8x1xf32>
    %19 = math.rsqrt %18 : vector<8x1xf32>
    %20 = vector.broadcast %19 : vector<8x1xf32> to vector<8x32xf32>
    %21 = arith.mulf %16, %20 : vector<8x32xf32>
    %22 = vector.broadcast %2 : vector<1x32xf32> to vector<8x32xf32>
    %23 = arith.mulf %21, %22 : vector<8x32xf32>
    %24 = vector.broadcast %3 : vector<1x32xf32> to vector<8x32xf32>
    %25 = arith.addf %23, %24 : vector<8x32xf32>
    %c0_10 = arith.constant 0 : index
    %c0_11 = arith.constant 0 : index
    %26 = vector.load %arg4[%c0_10, %c0_11] : memref<32x32xf32, #tpu.memory_space<vmem>>, vector<32x32xf32>
    %c0_12 = arith.constant 0 : index
    %c0_13 = arith.constant 0 : index
    %27 = vector.load %arg5[%c0_12, %c0_13] : memref<32x64xf32, #tpu.memory_space<vmem>>, vector<32x64xf32>
    %c0_14 = arith.constant 0 : index
    %c0_15 = arith.constant 0 : index
    %28 = vector.load %arg6[%c0_14, %c0_15] : memref<32x32xf32, #tpu.memory_space<vmem>>, vector<32x32xf32>
    %cst_16 = arith.constant dense<0.000000e+00> : vector<8x32xf32>
    %29 = tpu.matmul %25, %26, %cst_16 {dimension_numbers = #tpu.dot_dimension_numbers<[1], [0], [0], [1], [0, 0, 1, 1], [], []>} : vector<8x32xf32>, vector<32x32xf32>, vector<8x32xf32> -> vector<8x32xf32>
    %cst_17 = arith.constant dense<0.000000e+00> : vector<8x64xf32>
    %30 = tpu.matmul %25, %27, %cst_17 {dimension_numbers = #tpu.dot_dimension_numbers<[1], [0], [0], [1], [0, 0, 1, 1], [], []>} : vector<8x32xf32>, vector<32x64xf32>, vector<8x64xf32> -> vector<8x64xf32>
    %31 = tpu.iota {dimensions = array<i32: 0>} : vector<8x8xi32>
    %32 = tpu.iota {dimensions = array<i32: 1>} : vector<8x8xi32>
    %33 = arith.cmpi sge, %31, %32 : vector<8x8xi32>
    %34 = vector.extract_strided_slice %29 {offsets = [0, 0], sizes = [8, 8], strides = [1, 1]} : vector<8x32xf32> to vector<8x8xf32>
    %35 = vector.extract_strided_slice %30 {offsets = [0, 0], sizes = [8, 8], strides = [1, 1]} : vector<8x64xf32> to vector<8x8xf32>
    %36 = vector.extract_strided_slice %30 {offsets = [0, 32], sizes = [8, 8], strides = [1, 1]} : vector<8x64xf32> to vector<8x8xf32>
    %cst_18 = arith.constant dense<0.000000e+00> : vector<8x8xf32>
    %37 = tpu.matmul %34, %35, %cst_18 {dimension_numbers = #tpu.dot_dimension_numbers<[1], [1], [0], [0], [0, 0, 1, 0], [], []>} : vector<8x8xf32>, vector<8x8xf32>, vector<8x8xf32> -> vector<8x8xf32>
    %cst_19 = arith.constant 0.353553385 : f32
    %38 = vector.broadcast %cst_19 : f32 to vector<8x8xf32>
    %39 = arith.mulf %37, %38 : vector<8x8xf32>
    %cst_20 = arith.constant -1.000000e+30 : f32
    %40 = vector.broadcast %cst_20 : f32 to vector<8x8xf32>
    %41 = arith.select %33, %39, %40 : vector<8x8xi1>, vector<8x8xf32>
    %cst_21 = arith.constant dense<0xFF800000> : vector<8xf32>
    %42 = vector.multi_reduction <maximumf>, %41, %cst_21 [1] : vector<8x8xf32> to vector<8xf32>
    %43 = vector.shape_cast %42 : vector<8xf32> to vector<8x1xf32>
    %44 = vector.broadcast %43 : vector<8x1xf32> to vector<8x8xf32>
    %45 = arith.subf %41, %44 : vector<8x8xf32>
    %46 = math.exp %45 : vector<8x8xf32>
    %cst_22 = arith.constant dense<0.000000e+00> : vector<8xf32>
    %47 = vector.multi_reduction <add>, %46, %cst_22 [1] : vector<8x8xf32> to vector<8xf32>
    %48 = vector.shape_cast %47 : vector<8xf32> to vector<8x1xf32>
    %49 = tpu.reciprocal %48 {approx = true} : vector<8x1xf32> -> vector<8x1xf32>
    %cst_23 = arith.constant dense<0.000000e+00> : vector<8x8xf32>
    %50 = tpu.matmul %46, %36, %cst_23 {dimension_numbers = #tpu.dot_dimension_numbers<[1], [0], [0], [1], [0, 0, 1, 1], [], []>} : vector<8x8xf32>, vector<8x8xf32>, vector<8x8xf32> -> vector<8x8xf32>
    %51 = vector.broadcast %49 : vector<8x1xf32> to vector<8x8xf32>
    %52 = arith.mulf %50, %51 : vector<8x8xf32>
    %53 = vector.extract_strided_slice %28 {offsets = [0, 0], sizes = [8, 32], strides = [1, 1]} : vector<32x32xf32> to vector<8x32xf32>
    %cst_24 = arith.constant dense<0.000000e+00> : vector<8x32xf32>
    %54 = tpu.matmul %52, %53, %cst_24 {dimension_numbers = #tpu.dot_dimension_numbers<[1], [0], [0], [1], [0, 0, 1, 1], [], []>} : vector<8x8xf32>, vector<8x32xf32>, vector<8x32xf32> -> vector<8x32xf32>
    %55 = vector.extract_strided_slice %29 {offsets = [0, 8], sizes = [8, 8], strides = [1, 1]} : vector<8x32xf32> to vector<8x8xf32>
    %56 = vector.extract_strided_slice %30 {offsets = [0, 8], sizes = [8, 8], strides = [1, 1]} : vector<8x64xf32> to vector<8x8xf32>
    %57 = vector.extract_strided_slice %30 {offsets = [0, 40], sizes = [8, 8], strides = [1, 1]} : vector<8x64xf32> to vector<8x8xf32>
    %cst_25 = arith.constant dense<0.000000e+00> : vector<8x8xf32>
    %58 = tpu.matmul %55, %56, %cst_25 {dimension_numbers = #tpu.dot_dimension_numbers<[1], [1], [0], [0], [0, 0, 1, 0], [], []>} : vector<8x8xf32>, vector<8x8xf32>, vector<8x8xf32> -> vector<8x8xf32>
    %cst_26 = arith.constant 0.353553385 : f32
    %59 = vector.broadcast %cst_26 : f32 to vector<8x8xf32>
    %60 = arith.mulf %58, %59 : vector<8x8xf32>
    %cst_27 = arith.constant -1.000000e+30 : f32
    %61 = vector.broadcast %cst_27 : f32 to vector<8x8xf32>
    %62 = arith.select %33, %60, %61 : vector<8x8xi1>, vector<8x8xf32>
    %cst_28 = arith.constant dense<0xFF800000> : vector<8xf32>
    %63 = vector.multi_reduction <maximumf>, %62, %cst_28 [1] : vector<8x8xf32> to vector<8xf32>
    %64 = vector.shape_cast %63 : vector<8xf32> to vector<8x1xf32>
    %65 = vector.broadcast %64 : vector<8x1xf32> to vector<8x8xf32>
    %66 = arith.subf %62, %65 : vector<8x8xf32>
    %67 = math.exp %66 : vector<8x8xf32>
    %cst_29 = arith.constant dense<0.000000e+00> : vector<8xf32>
    %68 = vector.multi_reduction <add>, %67, %cst_29 [1] : vector<8x8xf32> to vector<8xf32>
    %69 = vector.shape_cast %68 : vector<8xf32> to vector<8x1xf32>
    %70 = tpu.reciprocal %69 {approx = true} : vector<8x1xf32> -> vector<8x1xf32>
    %cst_30 = arith.constant dense<0.000000e+00> : vector<8x8xf32>
    %71 = tpu.matmul %67, %57, %cst_30 {dimension_numbers = #tpu.dot_dimension_numbers<[1], [0], [0], [1], [0, 0, 1, 1], [], []>} : vector<8x8xf32>, vector<8x8xf32>, vector<8x8xf32> -> vector<8x8xf32>
    %72 = vector.broadcast %70 : vector<8x1xf32> to vector<8x8xf32>
    %73 = arith.mulf %71, %72 : vector<8x8xf32>
    %74 = vector.extract_strided_slice %28 {offsets = [8, 0], sizes = [8, 32], strides = [1, 1]} : vector<32x32xf32> to vector<8x32xf32>
    %cst_31 = arith.constant dense<0.000000e+00> : vector<8x32xf32>
    %75 = tpu.matmul %73, %74, %cst_31 {dimension_numbers = #tpu.dot_dimension_numbers<[1], [0], [0], [1], [0, 0, 1, 1], [], []>} : vector<8x8xf32>, vector<8x32xf32>, vector<8x32xf32> -> vector<8x32xf32>
    %76 = arith.addf %54, %75 : vector<8x32xf32>
    %77 = vector.extract_strided_slice %29 {offsets = [0, 16], sizes = [8, 8], strides = [1, 1]} : vector<8x32xf32> to vector<8x8xf32>
    %78 = vector.extract_strided_slice %30 {offsets = [0, 16], sizes = [8, 8], strides = [1, 1]} : vector<8x64xf32> to vector<8x8xf32>
    %79 = vector.extract_strided_slice %30 {offsets = [0, 48], sizes = [8, 8], strides = [1, 1]} : vector<8x64xf32> to vector<8x8xf32>
    %cst_32 = arith.constant dense<0.000000e+00> : vector<8x8xf32>
    %80 = tpu.matmul %77, %78, %cst_32 {dimension_numbers = #tpu.dot_dimension_numbers<[1], [1], [0], [0], [0, 0, 1, 0], [], []>} : vector<8x8xf32>, vector<8x8xf32>, vector<8x8xf32> -> vector<8x8xf32>
    %cst_33 = arith.constant 0.353553385 : f32
    %81 = vector.broadcast %cst_33 : f32 to vector<8x8xf32>
    %82 = arith.mulf %80, %81 : vector<8x8xf32>
    %cst_34 = arith.constant -1.000000e+30 : f32
    %83 = vector.broadcast %cst_34 : f32 to vector<8x8xf32>
    %84 = arith.select %33, %82, %83 : vector<8x8xi1>, vector<8x8xf32>
    %cst_35 = arith.constant dense<0xFF800000> : vector<8xf32>
    %85 = vector.multi_reduction <maximumf>, %84, %cst_35 [1] : vector<8x8xf32> to vector<8xf32>
    %86 = vector.shape_cast %85 : vector<8xf32> to vector<8x1xf32>
    %87 = vector.broadcast %86 : vector<8x1xf32> to vector<8x8xf32>
    %88 = arith.subf %84, %87 : vector<8x8xf32>
    %89 = math.exp %88 : vector<8x8xf32>
    %cst_36 = arith.constant dense<0.000000e+00> : vector<8xf32>
    %90 = vector.multi_reduction <add>, %89, %cst_36 [1] : vector<8x8xf32> to vector<8xf32>
    %91 = vector.shape_cast %90 : vector<8xf32> to vector<8x1xf32>
    %92 = tpu.reciprocal %91 {approx = true} : vector<8x1xf32> -> vector<8x1xf32>
    %cst_37 = arith.constant dense<0.000000e+00> : vector<8x8xf32>
    %93 = tpu.matmul %89, %79, %cst_37 {dimension_numbers = #tpu.dot_dimension_numbers<[1], [0], [0], [1], [0, 0, 1, 1], [], []>} : vector<8x8xf32>, vector<8x8xf32>, vector<8x8xf32> -> vector<8x8xf32>
    %94 = vector.broadcast %92 : vector<8x1xf32> to vector<8x8xf32>
    %95 = arith.mulf %93, %94 : vector<8x8xf32>
    %96 = vector.extract_strided_slice %28 {offsets = [16, 0], sizes = [8, 32], strides = [1, 1]} : vector<32x32xf32> to vector<8x32xf32>
    %cst_38 = arith.constant dense<0.000000e+00> : vector<8x32xf32>
    %97 = tpu.matmul %95, %96, %cst_38 {dimension_numbers = #tpu.dot_dimension_numbers<[1], [0], [0], [1], [0, 0, 1, 1], [], []>} : vector<8x8xf32>, vector<8x32xf32>, vector<8x32xf32> -> vector<8x32xf32>
    %98 = arith.addf %76, %97 : vector<8x32xf32>
    %99 = vector.extract_strided_slice %29 {offsets = [0, 24], sizes = [8, 8], strides = [1, 1]} : vector<8x32xf32> to vector<8x8xf32>
    %100 = vector.extract_strided_slice %30 {offsets = [0, 24], sizes = [8, 8], strides = [1, 1]} : vector<8x64xf32> to vector<8x8xf32>
    %101 = vector.extract_strided_slice %30 {offsets = [0, 56], sizes = [8, 8], strides = [1, 1]} : vector<8x64xf32> to vector<8x8xf32>
    %cst_39 = arith.constant dense<0.000000e+00> : vector<8x8xf32>
    %102 = tpu.matmul %99, %100, %cst_39 {dimension_numbers = #tpu.dot_dimension_numbers<[1], [1], [0], [0], [0, 0, 1, 0], [], []>} : vector<8x8xf32>, vector<8x8xf32>, vector<8x8xf32> -> vector<8x8xf32>
    %cst_40 = arith.constant 0.353553385 : f32
    %103 = vector.broadcast %cst_40 : f32 to vector<8x8xf32>
    %104 = arith.mulf %102, %103 : vector<8x8xf32>
    %cst_41 = arith.constant -1.000000e+30 : f32
    %105 = vector.broadcast %cst_41 : f32 to vector<8x8xf32>
    %106 = arith.select %33, %104, %105 : vector<8x8xi1>, vector<8x8xf32>
    %cst_42 = arith.constant dense<0xFF800000> : vector<8xf32>
    %107 = vector.multi_reduction <maximumf>, %106, %cst_42 [1] : vector<8x8xf32> to vector<8xf32>
    %108 = vector.shape_cast %107 : vector<8xf32> to vector<8x1xf32>
    %109 = vector.broadcast %108 : vector<8x1xf32> to vector<8x8xf32>
    %110 = arith.subf %106, %109 : vector<8x8xf32>
    %111 = math.exp %110 : vector<8x8xf32>
    %cst_43 = arith.constant dense<0.000000e+00> : vector<8xf32>
    %112 = vector.multi_reduction <add>, %111, %cst_43 [1] : vector<8x8xf32> to vector<8xf32>
    %113 = vector.shape_cast %112 : vector<8xf32> to vector<8x1xf32>
    %114 = tpu.reciprocal %113 {approx = true} : vector<8x1xf32> -> vector<8x1xf32>
    %cst_44 = arith.constant dense<0.000000e+00> : vector<8x8xf32>
    %115 = tpu.matmul %111, %101, %cst_44 {dimension_numbers = #tpu.dot_dimension_numbers<[1], [0], [0], [1], [0, 0, 1, 1], [], []>} : vector<8x8xf32>, vector<8x8xf32>, vector<8x8xf32> -> vector<8x8xf32>
    %116 = vector.broadcast %114 : vector<8x1xf32> to vector<8x8xf32>
    %117 = arith.mulf %115, %116 : vector<8x8xf32>
    %118 = vector.extract_strided_slice %28 {offsets = [24, 0], sizes = [8, 32], strides = [1, 1]} : vector<32x32xf32> to vector<8x32xf32>
    %cst_45 = arith.constant dense<0.000000e+00> : vector<8x32xf32>
    %119 = tpu.matmul %117, %118, %cst_45 {dimension_numbers = #tpu.dot_dimension_numbers<[1], [0], [0], [1], [0, 0, 1, 1], [], []>} : vector<8x8xf32>, vector<8x32xf32>, vector<8x32xf32> -> vector<8x32xf32>
    %120 = arith.addf %98, %119 : vector<8x32xf32>
    %c0_46 = arith.constant 0 : index
    %c0_47 = arith.constant 0 : index
    %121 = vector.load %arg7[%c0_46, %c0_47] : memref<1x32xf32, #tpu.memory_space<vmem>>, vector<1x32xf32>
    %122 = vector.broadcast %121 : vector<1x32xf32> to vector<8x32xf32>
    %123 = arith.addf %120, %122 : vector<8x32xf32>
    %124 = arith.addf %123, %1 : vector<8x32xf32>
    %c0_48 = arith.constant 0 : index
    %c0_49 = arith.constant 0 : index
    %c0_50 = arith.constant 0 : index
    %125 = vector.load %arg8[%c0_48, %c0_49, %c0_50] : memref<1x8x32xf32, #tpu.memory_space<vmem>>, vector<1x8x32xf32>
    %126 = vector.shape_cast %125 : vector<1x8x32xf32> to vector<8x32xf32>
    %127 = vector.shape_cast %124 : vector<8x32xf32> to vector<1x8x32xf32>
    tpu.vector_store %arg8[%c0_48, %c0_49, %c0_50], %127 {strides = array<i32>} : memref<1x8x32xf32, #tpu.memory_space<vmem>>, vector<1x8x32xf32>,
    return
  }
  func.func @transform_0(%arg0: i32) -> (i32, i32, i32) {
    %c0_i32 = arith.constant 0 : i32
    %c0_i32_0 = arith.constant 0 : i32
    %c0_i32_1 = arith.constant 0 : i32
    return %arg0, %c0_i32, %c0_i32_0 : i32, i32, i32
  }
  func.func @transform_1(%arg0: i32) -> (i32, i32) {
    %c0_i32 = arith.constant 0 : i32
    %c0_i32_0 = arith.constant 0 : i32
    %c0_i32_1 = arith.constant 0 : i32
    return %c0_i32, %c0_i32_0 : i32, i32
  }
  func.func @transform_2(%arg0: i32) -> (i32, i32) {
    %c0_i32 = arith.constant 0 : i32
    %c0_i32_0 = arith.constant 0 : i32
    %c0_i32_1 = arith.constant 0 : i32
    return %c0_i32, %c0_i32_0 : i32, i32
  }
  func.func @transform_3(%arg0: i32) -> (i32, i32) {
    %c0_i32 = arith.constant 0 : i32
    %c0_i32_0 = arith.constant 0 : i32
    %c0_i32_1 = arith.constant 0 : i32
    return %c0_i32, %c0_i32_0 : i32, i32
  }
  func.func @transform_4(%arg0: i32) -> (i32, i32) {
    %c0_i32 = arith.constant 0 : i32
    %c0_i32_0 = arith.constant 0 : i32
    %c0_i32_1 = arith.constant 0 : i32
    return %c0_i32, %c0_i32_0 : i32, i32
  }
  func.func @transform_5(%arg0: i32) -> (i32, i32) {
    %c0_i32 = arith.constant 0 : i32
    %c0_i32_0 = arith.constant 0 : i32
    %c0_i32_1 = arith.constant 0 : i32
    return %c0_i32, %c0_i32_0 : i32, i32
  }
  func.func @transform_6(%arg0: i32) -> (i32, i32) {
    %c0_i32 = arith.constant 0 : i32
    %c0_i32_0 = arith.constant 0 : i32
    %c0_i32_1 = arith.constant 0 : i32
    return %c0_i32, %c0_i32_0 : i32, i32
  }
  func.func @transform_7(%arg0: i32) -> (i32, i32, i32) {
    %c0_i32 = arith.constant 0 : i32
    %c0_i32_0 = arith.constant 0 : i32
    %c0_i32_1 = arith.constant 0 : i32
    return %arg0, %c0_i32, %c0_i32_0 : i32, i32, i32
  }
}

module attributes {stable_mosaic.version = 11 : i64} {
  func.func @_attn_kernel(%arg0: i32, %arg1: memref<1x8x32xf32, #tpu.memory_space<vmem>>, %arg2: memref<1x24x32xf32, #tpu.memory_space<vmem>>, %arg3: memref<1x1x24xf32, #tpu.memory_space<vmem>>, %arg4: memref<1x32xf32, #tpu.memory_space<vmem>>, %arg5: memref<1x32xf32, #tpu.memory_space<vmem>>, %arg6: memref<32x32xf32, #tpu.memory_space<vmem>>, %arg7: memref<32x64xf32, #tpu.memory_space<vmem>>, %arg8: memref<32x32xf32, #tpu.memory_space<vmem>>, %arg9: memref<1x32xf32, #tpu.memory_space<vmem>>, %arg10: memref<1x8x32xf32, #tpu.memory_space<vmem>>) attributes {dimension_semantics = [#tpu.dimension_semantics<parallel>], iteration_bounds = array<i64: 2>, scalar_prefetch = 0 : i64, scratch_operands = 0 : i64, tpu.core_type = #tpu.core_type<tc>, window_params = [{transform_indices = @transform_0, window_bounds = array<i64: 1, 8, 32>}, {transform_indices = @transform_1, window_bounds = array<i64: 1, 24, 32>}, {transform_indices = @transform_2, window_bounds = array<i64: 1, 1, 24>}, {pipeline_mode = #tpu.pipeline_mode<synchronous>, transform_indices = @transform_3, window_bounds = array<i64: 1, 32>}, {pipeline_mode = #tpu.pipeline_mode<synchronous>, transform_indices = @transform_4, window_bounds = array<i64: 1, 32>}, {pipeline_mode = #tpu.pipeline_mode<synchronous>, transform_indices = @transform_5, window_bounds = array<i64: 32, 32>}, {pipeline_mode = #tpu.pipeline_mode<synchronous>, transform_indices = @transform_6, window_bounds = array<i64: 32, 64>}, {pipeline_mode = #tpu.pipeline_mode<synchronous>, transform_indices = @transform_7, window_bounds = array<i64: 32, 32>}, {pipeline_mode = #tpu.pipeline_mode<synchronous>, transform_indices = @transform_8, window_bounds = array<i64: 1, 32>}, {transform_indices = @transform_9, window_bounds = array<i64: 1, 8, 32>}]} {
    %c0 = arith.constant 0 : index
    %c0_0 = arith.constant 0 : index
    %c0_1 = arith.constant 0 : index
    %0 = vector.load %arg1[%c0, %c0_0, %c0_1] : memref<1x8x32xf32, #tpu.memory_space<vmem>>, vector<1x8x32xf32>
    %1 = vector.shape_cast %0 : vector<1x8x32xf32> to vector<8x32xf32>
    %c0_2 = arith.constant 0 : index
    %c0_3 = arith.constant 0 : index
    %2 = vector.load %arg4[%c0_2, %c0_3] : memref<1x32xf32, #tpu.memory_space<vmem>>, vector<1x32xf32>
    %c0_4 = arith.constant 0 : index
    %c0_5 = arith.constant 0 : index
    %3 = vector.load %arg5[%c0_4, %c0_5] : memref<1x32xf32, #tpu.memory_space<vmem>>, vector<1x32xf32>
    %cst = arith.constant dense<0.000000e+00> : vector<8xf32>
    %4 = vector.multi_reduction <add>, %1, %cst [1] : vector<8x32xf32> to vector<8xf32>
    %5 = vector.shape_cast %4 : vector<8xf32> to vector<8x1xf32>
    %cst_6 = arith.constant 3.200000e+01 : f32
    %6 = vector.broadcast %cst_6 : f32 to vector<8x1xf32>
    %7 = arith.divf %5, %6 : vector<8x1xf32>
    %8 = vector.broadcast %7 : vector<8x1xf32> to vector<8x32xf32>
    %9 = arith.subf %1, %8 : vector<8x32xf32>
    %10 = arith.mulf %9, %9 : vector<8x32xf32>
    %cst_7 = arith.constant dense<0.000000e+00> : vector<8xf32>
    %11 = vector.multi_reduction <add>, %10, %cst_7 [1] : vector<8x32xf32> to vector<8xf32>
    %12 = vector.shape_cast %11 : vector<8xf32> to vector<8x1xf32>
    %cst_8 = arith.constant 3.200000e+01 : f32
    %13 = vector.broadcast %cst_8 : f32 to vector<8x1xf32>
    %14 = arith.divf %12, %13 : vector<8x1xf32>
    %15 = vector.broadcast %7 : vector<8x1xf32> to vector<8x32xf32>
    %16 = arith.subf %1, %15 : vector<8x32xf32>
    %cst_9 = arith.constant 9.99999974E-6 : f32
    %17 = vector.broadcast %cst_9 : f32 to vector<8x1xf32>
    %18 = arith.addf %14, %17 : vector<8x1xf32>
    %19 = math.rsqrt %18 : vector<8x1xf32>
    %20 = vector.broadcast %19 : vector<8x1xf32> to vector<8x32xf32>
    %21 = arith.mulf %16, %20 : vector<8x32xf32>
    %22 = vector.broadcast %2 : vector<1x32xf32> to vector<8x32xf32>
    %23 = arith.mulf %21, %22 : vector<8x32xf32>
    %24 = vector.broadcast %3 : vector<1x32xf32> to vector<8x32xf32>
    %25 = arith.addf %23, %24 : vector<8x32xf32>
    %c0_10 = arith.constant 0 : index
    %c0_11 = arith.constant 0 : index
    %26 = vector.load %arg6[%c0_10, %c0_11] : memref<32x32xf32, #tpu.memory_space<vmem>>, vector<32x32xf32>
    %c0_12 = arith.constant 0 : index
    %c0_13 = arith.constant 0 : index
    %27 = vector.load %arg7[%c0_12, %c0_13] : memref<32x64xf32, #tpu.memory_space<vmem>>, vector<32x64xf32>
    %c0_14 = arith.constant 0 : index
    %c0_15 = arith.constant 0 : index
    %28 = vector.load %arg8[%c0_14, %c0_15] : memref<32x32xf32, #tpu.memory_space<vmem>>, vector<32x32xf32>
    %cst_16 = arith.constant dense<0.000000e+00> : vector<8x32xf32>
    %29 = tpu.matmul %25, %26, %cst_16 {dimension_numbers = #tpu.dot_dimension_numbers<[1], [0], [0], [1], [0, 0, 1, 1], [], []>} : vector<8x32xf32>, vector<32x32xf32>, vector<8x32xf32> -> vector<8x32xf32>
    %c0_17 = arith.constant 0 : index
    %c0_18 = arith.constant 0 : index
    %c0_19 = arith.constant 0 : index
    %30 = vector.load %arg2[%c0_17, %c0_18, %c0_19] : memref<1x24x32xf32, #tpu.memory_space<vmem>>, vector<1x24x32xf32>
    %31 = vector.shape_cast %30 : vector<1x24x32xf32> to vector<24x32xf32>
    %cst_20 = arith.constant dense<0.000000e+00> : vector<24x64xf32>
    %32 = tpu.matmul %31, %27, %cst_20 {dimension_numbers = #tpu.dot_dimension_numbers<[1], [0], [0], [1], [0, 0, 1, 1], [], []>} : vector<24x32xf32>, vector<32x64xf32>, vector<24x64xf32> -> vector<24x64xf32>
    %c0_21 = arith.constant 0 : index
    %c0_22 = arith.constant 0 : index
    %c0_23 = arith.constant 0 : index
    %33 = vector.load %arg3[%c0_21, %c0_22, %c0_23] : memref<1x1x24xf32, #tpu.memory_space<vmem>>, vector<1x1x24xf32>
    %34 = vector.shape_cast %33 : vector<1x1x24xf32> to vector<1x24xf32>
    %35 = vector.extract_strided_slice %29 {offsets = [0, 0], sizes = [8, 8], strides = [1, 1]} : vector<8x32xf32> to vector<8x8xf32>
    %36 = vector.extract_strided_slice %32 {offsets = [0, 0], sizes = [24, 8], strides = [1, 1]} : vector<24x64xf32> to vector<24x8xf32>
    %37 = vector.extract_strided_slice %32 {offsets = [0, 32], sizes = [24, 8], strides = [1, 1]} : vector<24x64xf32> to vector<24x8xf32>
    %cst_24 = arith.constant dense<0.000000e+00> : vector<8x24xf32>
    %38 = tpu.matmul %35, %36, %cst_24 {dimension_numbers = #tpu.dot_dimension_numbers<[1], [1], [0], [0], [0, 0, 1, 0], [], []>} : vector<8x8xf32>, vector<24x8xf32>, vector<8x24xf32> -> vector<8x24xf32>
    %cst_25 = arith.constant 0.353553385 : f32
    %39 = vector.broadcast %cst_25 : f32 to vector<8x24xf32>
    %40 = arith.mulf %38, %39 : vector<8x24xf32>
    %41 = vector.broadcast %34 : vector<1x24xf32> to vector<8x24xf32>
    %42 = arith.addf %40, %41 : vector<8x24xf32>
    %cst_26 = arith.constant dense<0xFF800000> : vector<8xf32>
    %43 = vector.multi_reduction <maximumf>, %42, %cst_26 [1] : vector<8x24xf32> to vector<8xf32>
    %44 = vector.shape_cast %43 : vector<8xf32> to vector<8x1xf32>
    %45 = vector.broadcast %44 : vector<8x1xf32> to vector<8x24xf32>
    %46 = arith.subf %42, %45 : vector<8x24xf32>
    %47 = math.exp %46 : vector<8x24xf32>
    %cst_27 = arith.constant dense<0.000000e+00> : vector<8xf32>
    %48 = vector.multi_reduction <add>, %47, %cst_27 [1] : vector<8x24xf32> to vector<8xf32>
    %49 = vector.shape_cast %48 : vector<8xf32> to vector<8x1xf32>
    %50 = tpu.reciprocal %49 {approx = true} : vector<8x1xf32> -> vector<8x1xf32>
    %cst_28 = arith.constant dense<0.000000e+00> : vector<8x8xf32>
    %51 = tpu.matmul %47, %37, %cst_28 {dimension_numbers = #tpu.dot_dimension_numbers<[1], [0], [0], [1], [0, 0, 1, 1], [], []>} : vector<8x24xf32>, vector<24x8xf32>, vector<8x8xf32> -> vector<8x8xf32>
    %52 = vector.broadcast %50 : vector<8x1xf32> to vector<8x8xf32>
    %53 = arith.mulf %51, %52 : vector<8x8xf32>
    %54 = vector.extract_strided_slice %28 {offsets = [0, 0], sizes = [8, 32], strides = [1, 1]} : vector<32x32xf32> to vector<8x32xf32>
    %cst_29 = arith.constant dense<0.000000e+00> : vector<8x32xf32>
    %55 = tpu.matmul %53, %54, %cst_29 {dimension_numbers = #tpu.dot_dimension_numbers<[1], [0], [0], [1], [0, 0, 1, 1], [], []>} : vector<8x8xf32>, vector<8x32xf32>, vector<8x32xf32> -> vector<8x32xf32>
    %56 = vector.extract_strided_slice %29 {offsets = [0, 8], sizes = [8, 8], strides = [1, 1]} : vector<8x32xf32> to vector<8x8xf32>
    %57 = vector.extract_strided_slice %32 {offsets = [0, 8], sizes = [24, 8], strides = [1, 1]} : vector<24x64xf32> to vector<24x8xf32>
    %58 = vector.extract_strided_slice %32 {offsets = [0, 40], sizes = [24, 8], strides = [1, 1]} : vector<24x64xf32> to vector<24x8xf32>
    %cst_30 = arith.constant dense<0.000000e+00> : vector<8x24xf32>
    %59 = tpu.matmul %56, %57, %cst_30 {dimension_numbers = #tpu.dot_dimension_numbers<[1], [1], [0], [0], [0, 0, 1, 0], [], []>} : vector<8x8xf32>, vector<24x8xf32>, vector<8x24xf32> -> vector<8x24xf32>
    %cst_31 = arith.constant 0.353553385 : f32
    %60 = vector.broadcast %cst_31 : f32 to vector<8x24xf32>
    %61 = arith.mulf %59, %60 : vector<8x24xf32>
    %62 = vector.broadcast %34 : vector<1x24xf32> to vector<8x24xf32>
    %63 = arith.addf %61, %62 : vector<8x24xf32>
    %cst_32 = arith.constant dense<0xFF800000> : vector<8xf32>
    %64 = vector.multi_reduction <maximumf>, %63, %cst_32 [1] : vector<8x24xf32> to vector<8xf32>
    %65 = vector.shape_cast %64 : vector<8xf32> to vector<8x1xf32>
    %66 = vector.broadcast %65 : vector<8x1xf32> to vector<8x24xf32>
    %67 = arith.subf %63, %66 : vector<8x24xf32>
    %68 = math.exp %67 : vector<8x24xf32>
    %cst_33 = arith.constant dense<0.000000e+00> : vector<8xf32>
    %69 = vector.multi_reduction <add>, %68, %cst_33 [1] : vector<8x24xf32> to vector<8xf32>
    %70 = vector.shape_cast %69 : vector<8xf32> to vector<8x1xf32>
    %71 = tpu.reciprocal %70 {approx = true} : vector<8x1xf32> -> vector<8x1xf32>
    %cst_34 = arith.constant dense<0.000000e+00> : vector<8x8xf32>
    %72 = tpu.matmul %68, %58, %cst_34 {dimension_numbers = #tpu.dot_dimension_numbers<[1], [0], [0], [1], [0, 0, 1, 1], [], []>} : vector<8x24xf32>, vector<24x8xf32>, vector<8x8xf32> -> vector<8x8xf32>
    %73 = vector.broadcast %71 : vector<8x1xf32> to vector<8x8xf32>
    %74 = arith.mulf %72, %73 : vector<8x8xf32>
    %75 = vector.extract_strided_slice %28 {offsets = [8, 0], sizes = [8, 32], strides = [1, 1]} : vector<32x32xf32> to vector<8x32xf32>
    %cst_35 = arith.constant dense<0.000000e+00> : vector<8x32xf32>
    %76 = tpu.matmul %74, %75, %cst_35 {dimension_numbers = #tpu.dot_dimension_numbers<[1], [0], [0], [1], [0, 0, 1, 1], [], []>} : vector<8x8xf32>, vector<8x32xf32>, vector<8x32xf32> -> vector<8x32xf32>
    %77 = arith.addf %55, %76 : vector<8x32xf32>
    %78 = vector.extract_strided_slice %29 {offsets = [0, 16], sizes = [8, 8], strides = [1, 1]} : vector<8x32xf32> to vector<8x8xf32>
    %79 = vector.extract_strided_slice %32 {offsets = [0, 16], sizes = [24, 8], strides = [1, 1]} : vector<24x64xf32> to vector<24x8xf32>
    %80 = vector.extract_strided_slice %32 {offsets = [0, 48], sizes = [24, 8], strides = [1, 1]} : vector<24x64xf32> to vector<24x8xf32>
    %cst_36 = arith.constant dense<0.000000e+00> : vector<8x24xf32>
    %81 = tpu.matmul %78, %79, %cst_36 {dimension_numbers = #tpu.dot_dimension_numbers<[1], [1], [0], [0], [0, 0, 1, 0], [], []>} : vector<8x8xf32>, vector<24x8xf32>, vector<8x24xf32> -> vector<8x24xf32>
    %cst_37 = arith.constant 0.353553385 : f32
    %82 = vector.broadcast %cst_37 : f32 to vector<8x24xf32>
    %83 = arith.mulf %81, %82 : vector<8x24xf32>
    %84 = vector.broadcast %34 : vector<1x24xf32> to vector<8x24xf32>
    %85 = arith.addf %83, %84 : vector<8x24xf32>
    %cst_38 = arith.constant dense<0xFF800000> : vector<8xf32>
    %86 = vector.multi_reduction <maximumf>, %85, %cst_38 [1] : vector<8x24xf32> to vector<8xf32>
    %87 = vector.shape_cast %86 : vector<8xf32> to vector<8x1xf32>
    %88 = vector.broadcast %87 : vector<8x1xf32> to vector<8x24xf32>
    %89 = arith.subf %85, %88 : vector<8x24xf32>
    %90 = math.exp %89 : vector<8x24xf32>
    %cst_39 = arith.constant dense<0.000000e+00> : vector<8xf32>
    %91 = vector.multi_reduction <add>, %90, %cst_39 [1] : vector<8x24xf32> to vector<8xf32>
    %92 = vector.shape_cast %91 : vector<8xf32> to vector<8x1xf32>
    %93 = tpu.reciprocal %92 {approx = true} : vector<8x1xf32> -> vector<8x1xf32>
    %cst_40 = arith.constant dense<0.000000e+00> : vector<8x8xf32>
    %94 = tpu.matmul %90, %80, %cst_40 {dimension_numbers = #tpu.dot_dimension_numbers<[1], [0], [0], [1], [0, 0, 1, 1], [], []>} : vector<8x24xf32>, vector<24x8xf32>, vector<8x8xf32> -> vector<8x8xf32>
    %95 = vector.broadcast %93 : vector<8x1xf32> to vector<8x8xf32>
    %96 = arith.mulf %94, %95 : vector<8x8xf32>
    %97 = vector.extract_strided_slice %28 {offsets = [16, 0], sizes = [8, 32], strides = [1, 1]} : vector<32x32xf32> to vector<8x32xf32>
    %cst_41 = arith.constant dense<0.000000e+00> : vector<8x32xf32>
    %98 = tpu.matmul %96, %97, %cst_41 {dimension_numbers = #tpu.dot_dimension_numbers<[1], [0], [0], [1], [0, 0, 1, 1], [], []>} : vector<8x8xf32>, vector<8x32xf32>, vector<8x32xf32> -> vector<8x32xf32>
    %99 = arith.addf %77, %98 : vector<8x32xf32>
    %100 = vector.extract_strided_slice %29 {offsets = [0, 24], sizes = [8, 8], strides = [1, 1]} : vector<8x32xf32> to vector<8x8xf32>
    %101 = vector.extract_strided_slice %32 {offsets = [0, 24], sizes = [24, 8], strides = [1, 1]} : vector<24x64xf32> to vector<24x8xf32>
    %102 = vector.extract_strided_slice %32 {offsets = [0, 56], sizes = [24, 8], strides = [1, 1]} : vector<24x64xf32> to vector<24x8xf32>
    %cst_42 = arith.constant dense<0.000000e+00> : vector<8x24xf32>
    %103 = tpu.matmul %100, %101, %cst_42 {dimension_numbers = #tpu.dot_dimension_numbers<[1], [1], [0], [0], [0, 0, 1, 0], [], []>} : vector<8x8xf32>, vector<24x8xf32>, vector<8x24xf32> -> vector<8x24xf32>
    %cst_43 = arith.constant 0.353553385 : f32
    %104 = vector.broadcast %cst_43 : f32 to vector<8x24xf32>
    %105 = arith.mulf %103, %104 : vector<8x24xf32>
    %106 = vector.broadcast %34 : vector<1x24xf32> to vector<8x24xf32>
    %107 = arith.addf %105, %106 : vector<8x24xf32>
    %cst_44 = arith.constant dense<0xFF800000> : vector<8xf32>
    %108 = vector.multi_reduction <maximumf>, %107, %cst_44 [1] : vector<8x24xf32> to vector<8xf32>
    %109 = vector.shape_cast %108 : vector<8xf32> to vector<8x1xf32>
    %110 = vector.broadcast %109 : vector<8x1xf32> to vector<8x24xf32>
    %111 = arith.subf %107, %110 : vector<8x24xf32>
    %112 = math.exp %111 : vector<8x24xf32>
    %cst_45 = arith.constant dense<0.000000e+00> : vector<8xf32>
    %113 = vector.multi_reduction <add>, %112, %cst_45 [1] : vector<8x24xf32> to vector<8xf32>
    %114 = vector.shape_cast %113 : vector<8xf32> to vector<8x1xf32>
    %115 = tpu.reciprocal %114 {approx = true} : vector<8x1xf32> -> vector<8x1xf32>
    %cst_46 = arith.constant dense<0.000000e+00> : vector<8x8xf32>
    %116 = tpu.matmul %112, %102, %cst_46 {dimension_numbers = #tpu.dot_dimension_numbers<[1], [0], [0], [1], [0, 0, 1, 1], [], []>} : vector<8x24xf32>, vector<24x8xf32>, vector<8x8xf32> -> vector<8x8xf32>
    %117 = vector.broadcast %115 : vector<8x1xf32> to vector<8x8xf32>
    %118 = arith.mulf %116, %117 : vector<8x8xf32>
    %119 = vector.extract_strided_slice %28 {offsets = [24, 0], sizes = [8, 32], strides = [1, 1]} : vector<32x32xf32> to vector<8x32xf32>
    %cst_47 = arith.constant dense<0.000000e+00> : vector<8x32xf32>
    %120 = tpu.matmul %118, %119, %cst_47 {dimension_numbers = #tpu.dot_dimension_numbers<[1], [0], [0], [1], [0, 0, 1, 1], [], []>} : vector<8x8xf32>, vector<8x32xf32>, vector<8x32xf32> -> vector<8x32xf32>
    %121 = arith.addf %99, %120 : vector<8x32xf32>
    %c0_48 = arith.constant 0 : index
    %c0_49 = arith.constant 0 : index
    %122 = vector.load %arg9[%c0_48, %c0_49] : memref<1x32xf32, #tpu.memory_space<vmem>>, vector<1x32xf32>
    %123 = vector.broadcast %122 : vector<1x32xf32> to vector<8x32xf32>
    %124 = arith.addf %121, %123 : vector<8x32xf32>
    %125 = arith.addf %124, %1 : vector<8x32xf32>
    %c0_50 = arith.constant 0 : index
    %c0_51 = arith.constant 0 : index
    %c0_52 = arith.constant 0 : index
    %126 = vector.load %arg10[%c0_50, %c0_51, %c0_52] : memref<1x8x32xf32, #tpu.memory_space<vmem>>, vector<1x8x32xf32>
    %127 = vector.shape_cast %126 : vector<1x8x32xf32> to vector<8x32xf32>
    %128 = vector.shape_cast %125 : vector<8x32xf32> to vector<1x8x32xf32>
    tpu.vector_store %arg10[%c0_50, %c0_51, %c0_52], %128 {strides = array<i32>} : memref<1x8x32xf32, #tpu.memory_space<vmem>>, vector<1x8x32xf32>,
    return
  }
  func.func @transform_0(%arg0: i32) -> (i32, i32, i32) {
    %c0_i32 = arith.constant 0 : i32
    %c0_i32_0 = arith.constant 0 : i32
    %c0_i32_1 = arith.constant 0 : i32
    return %arg0, %c0_i32, %c0_i32_0 : i32, i32, i32
  }
  func.func @transform_1(%arg0: i32) -> (i32, i32, i32) {
    %c0_i32 = arith.constant 0 : i32
    %c0_i32_0 = arith.constant 0 : i32
    %c0_i32_1 = arith.constant 0 : i32
    return %arg0, %c0_i32, %c0_i32_0 : i32, i32, i32
  }
  func.func @transform_2(%arg0: i32) -> (i32, i32, i32) {
    %c0_i32 = arith.constant 0 : i32
    %c0_i32_0 = arith.constant 0 : i32
    %c0_i32_1 = arith.constant 0 : i32
    return %arg0, %c0_i32, %c0_i32_0 : i32, i32, i32
  }
  func.func @transform_3(%arg0: i32) -> (i32, i32) {
    %c0_i32 = arith.constant 0 : i32
    %c0_i32_0 = arith.constant 0 : i32
    %c0_i32_1 = arith.constant 0 : i32
    return %c0_i32, %c0_i32_0 : i32, i32
  }
  func.func @transform_4(%arg0: i32) -> (i32, i32) {
    %c0_i32 = arith.constant 0 : i32
    %c0_i32_0 = arith.constant 0 : i32
    %c0_i32_1 = arith.constant 0 : i32
    return %c0_i32, %c0_i32_0 : i32, i32
  }
  func.func @transform_5(%arg0: i32) -> (i32, i32) {
    %c0_i32 = arith.constant 0 : i32
    %c0_i32_0 = arith.constant 0 : i32
    %c0_i32_1 = arith.constant 0 : i32
    return %c0_i32, %c0_i32_0 : i32, i32
  }
  func.func @transform_6(%arg0: i32) -> (i32, i32) {
    %c0_i32 = arith.constant 0 : i32
    %c0_i32_0 = arith.constant 0 : i32
    %c0_i32_1 = arith.constant 0 : i32
    return %c0_i32, %c0_i32_0 : i32, i32
  }
  func.func @transform_7(%arg0: i32) -> (i32, i32) {
    %c0_i32 = arith.constant 0 : i32
    %c0_i32_0 = arith.constant 0 : i32
    %c0_i32_1 = arith.constant 0 : i32
    return %c0_i32, %c0_i32_0 : i32, i32
  }
  func.func @transform_8(%arg0: i32) -> (i32, i32) {
    %c0_i32 = arith.constant 0 : i32
    %c0_i32_0 = arith.constant 0 : i32
    %c0_i32_1 = arith.constant 0 : i32
    return %c0_i32, %c0_i32_0 : i32, i32
  }
  func.func @transform_9(%arg0: i32) -> (i32, i32, i32) {
    %c0_i32 = arith.constant 0 : i32
    %c0_i32_0 = arith.constant 0 : i32
    %c0_i32_1 = arith.constant 0 : i32
    return %arg0, %c0_i32, %c0_i32_0 : i32, i32, i32
  }
}

module attributes {stable_mosaic.version = 11 : i64} {
  func.func @_ff_kernel(%arg0: i32, %arg1: memref<1x8x32xf32, #tpu.memory_space<vmem>>, %arg2: memref<1x32xf32, #tpu.memory_space<vmem>>, %arg3: memref<1x32xf32, #tpu.memory_space<vmem>>, %arg4: memref<32x128xf32, #tpu.memory_space<vmem>>, %arg5: memref<1x128xf32, #tpu.memory_space<vmem>>, %arg6: memref<128x32xf32, #tpu.memory_space<vmem>>, %arg7: memref<1x32xf32, #tpu.memory_space<vmem>>, %arg8: memref<1x8x32xf32, #tpu.memory_space<vmem>>) attributes {dimension_semantics = [#tpu.dimension_semantics<parallel>], iteration_bounds = array<i64: 2>, scalar_prefetch = 0 : i64, scratch_operands = 0 : i64, tpu.core_type = #tpu.core_type<tc>, window_params = [{transform_indices = @transform_0, window_bounds = array<i64: 1, 8, 32>}, {pipeline_mode = #tpu.pipeline_mode<synchronous>, transform_indices = @transform_1, window_bounds = array<i64: 1, 32>}, {pipeline_mode = #tpu.pipeline_mode<synchronous>, transform_indices = @transform_2, window_bounds = array<i64: 1, 32>}, {pipeline_mode = #tpu.pipeline_mode<synchronous>, transform_indices = @transform_3, window_bounds = array<i64: 32, 128>}, {pipeline_mode = #tpu.pipeline_mode<synchronous>, transform_indices = @transform_4, window_bounds = array<i64: 1, 128>}, {pipeline_mode = #tpu.pipeline_mode<synchronous>, transform_indices = @transform_5, window_bounds = array<i64: 128, 32>}, {pipeline_mode = #tpu.pipeline_mode<synchronous>, transform_indices = @transform_6, window_bounds = array<i64: 1, 32>}, {transform_indices = @transform_7, window_bounds = array<i64: 1, 8, 32>}]} {
    %c0 = arith.constant 0 : index
    %c0_0 = arith.constant 0 : index
    %c0_1 = arith.constant 0 : index
    %0 = vector.load %arg1[%c0, %c0_0, %c0_1] : memref<1x8x32xf32, #tpu.memory_space<vmem>>, vector<1x8x32xf32>
    %1 = vector.shape_cast %0 : vector<1x8x32xf32> to vector<8x32xf32>
    %c0_2 = arith.constant 0 : index
    %c0_3 = arith.constant 0 : index
    %2 = vector.load %arg2[%c0_2, %c0_3] : memref<1x32xf32, #tpu.memory_space<vmem>>, vector<1x32xf32>
    %c0_4 = arith.constant 0 : index
    %c0_5 = arith.constant 0 : index
    %3 = vector.load %arg3[%c0_4, %c0_5] : memref<1x32xf32, #tpu.memory_space<vmem>>, vector<1x32xf32>
    %cst = arith.constant dense<0.000000e+00> : vector<8xf32>
    %4 = vector.multi_reduction <add>, %1, %cst [1] : vector<8x32xf32> to vector<8xf32>
    %5 = vector.shape_cast %4 : vector<8xf32> to vector<8x1xf32>
    %cst_6 = arith.constant 3.200000e+01 : f32
    %6 = vector.broadcast %cst_6 : f32 to vector<8x1xf32>
    %7 = arith.divf %5, %6 : vector<8x1xf32>
    %8 = vector.broadcast %7 : vector<8x1xf32> to vector<8x32xf32>
    %9 = arith.subf %1, %8 : vector<8x32xf32>
    %10 = arith.mulf %9, %9 : vector<8x32xf32>
    %cst_7 = arith.constant dense<0.000000e+00> : vector<8xf32>
    %11 = vector.multi_reduction <add>, %10, %cst_7 [1] : vector<8x32xf32> to vector<8xf32>
    %12 = vector.shape_cast %11 : vector<8xf32> to vector<8x1xf32>
    %cst_8 = arith.constant 3.200000e+01 : f32
    %13 = vector.broadcast %cst_8 : f32 to vector<8x1xf32>
    %14 = arith.divf %12, %13 : vector<8x1xf32>
    %15 = vector.broadcast %7 : vector<8x1xf32> to vector<8x32xf32>
    %16 = arith.subf %1, %15 : vector<8x32xf32>
    %cst_9 = arith.constant 9.99999974E-6 : f32
    %17 = vector.broadcast %cst_9 : f32 to vector<8x1xf32>
    %18 = arith.addf %14, %17 : vector<8x1xf32>
    %19 = math.rsqrt %18 : vector<8x1xf32>
    %20 = vector.broadcast %19 : vector<8x1xf32> to vector<8x32xf32>
    %21 = arith.mulf %16, %20 : vector<8x32xf32>
    %22 = vector.broadcast %2 : vector<1x32xf32> to vector<8x32xf32>
    %23 = arith.mulf %21, %22 : vector<8x32xf32>
    %24 = vector.broadcast %3 : vector<1x32xf32> to vector<8x32xf32>
    %25 = arith.addf %23, %24 : vector<8x32xf32>
    %c0_10 = arith.constant 0 : index
    %c0_11 = arith.constant 0 : index
    %26 = vector.load %arg4[%c0_10, %c0_11] : memref<32x128xf32, #tpu.memory_space<vmem>>, vector<32x128xf32>
    %cst_12 = arith.constant dense<0.000000e+00> : vector<8x128xf32>
    %27 = tpu.matmul %25, %26, %cst_12 {dimension_numbers = #tpu.dot_dimension_numbers<[1], [0], [0], [1], [0, 0, 1, 1], [], []>} : vector<8x32xf32>, vector<32x128xf32>, vector<8x128xf32> -> vector<8x128xf32>
    %c0_13 = arith.constant 0 : index
    %c0_14 = arith.constant 0 : index
    %28 = vector.load %arg5[%c0_13, %c0_14] : memref<1x128xf32, #tpu.memory_space<vmem>>, vector<1x128xf32>
    %29 = vector.broadcast %28 : vector<1x128xf32> to vector<8x128xf32>
    %30 = arith.addf %27, %29 : vector<8x128xf32>
    %31 = arith.mulf %30, %30 : vector<8x128xf32>
    %32 = arith.mulf %30, %31 : vector<8x128xf32>
    %cst_15 = arith.constant 4.471500e-02 : f32
    %33 = vector.broadcast %cst_15 : f32 to vector<8x128xf32>
    %34 = arith.mulf %33, %32 : vector<8x128xf32>
    %35 = arith.addf %30, %34 : vector<8x128xf32>
    %cst_16 = arith.constant 0.797884583 : f32
    %36 = vector.broadcast %cst_16 : f32 to vector<8x128xf32>
    %37 = arith.mulf %36, %35 : vector<8x128xf32>
    %38 = math.tanh %37 : vector<8x128xf32>
    %cst_17 = arith.constant 1.000000e+00 : f32
    %39 = vector.broadcast %cst_17 : f32 to vector<8x128xf32>
    %40 = arith.addf %39, %38 : vector<8x128xf32>
    %cst_18 = arith.constant 5.000000e-01 : f32
    %41 = vector.broadcast %cst_18 : f32 to vector<8x128xf32>
    %42 = arith.mulf %41, %40 : vector<8x128xf32>
    %43 = arith.mulf %30, %42 : vector<8x128xf32>
    %c0_19 = arith.constant 0 : index
    %c0_20 = arith.constant 0 : index
    %44 = vector.load %arg6[%c0_19, %c0_20] : memref<128x32xf32, #tpu.memory_space<vmem>>, vector<128x32xf32>
    %cst_21 = arith.constant dense<0.000000e+00> : vector<8x32xf32>
    %45 = tpu.matmul %43, %44, %cst_21 {dimension_numbers = #tpu.dot_dimension_numbers<[1], [0], [0], [1], [0, 0, 1, 1], [], []>} : vector<8x128xf32>, vector<128x32xf32>, vector<8x32xf32> -> vector<8x32xf32>
    %c0_22 = arith.constant 0 : index
    %c0_23 = arith.constant 0 : index
    %46 = vector.load %arg7[%c0_22, %c0_23] : memref<1x32xf32, #tpu.memory_space<vmem>>, vector<1x32xf32>
    %47 = vector.broadcast %46 : vector<1x32xf32> to vector<8x32xf32>
    %48 = arith.addf %45, %47 : vector<8x32xf32>
    %49 = arith.addf %48, %1 : vector<8x32xf32>
    %c0_24 = arith.constant 0 : index
    %c0_25 = arith.constant 0 : index
    %c0_26 = arith.constant 0 : index
    %50 = vector.load %arg8[%c0_24, %c0_25, %c0_26] : memref<1x8x32xf32, #tpu.memory_space<vmem>>, vector<1x8x32xf32>
    %51 = vector.shape_cast %50 : vector<1x8x32xf32> to vector<8x32xf32>
    %52 = vector.shape_cast %49 : vector<8x32xf32> to vector<1x8x32xf32>
    tpu.vector_store %arg8[%c0_24, %c0_25, %c0_26], %52 {strides = array<i32>} : memref<1x8x32xf32, #tpu.memory_space<vmem>>, vector<1x8x32xf32>,
    return
  }
  func.func @transform_0(%arg0: i32) -> (i32, i32, i32) {
    %c0_i32 = arith.constant 0 : i32
    %c0_i32_0 = arith.constant 0 : i32
    %c0_i32_1 = arith.constant 0 : i32
    return %arg0, %c0_i32, %c0_i32_0 : i32, i32, i32
  }
  func.func @transform_1(%arg0: i32) -> (i32, i32) {
    %c0_i32 = arith.constant 0 : i32
    %c0_i32_0 = arith.constant 0 : i32
    %c0_i32_1 = arith.constant 0 : i32
    return %c0_i32, %c0_i32_0 : i32, i32
  }
  func.func @transform_2(%arg0: i32) -> (i32, i32) {
    %c0_i32 = arith.constant 0 : i32
    %c0_i32_0 = arith.constant 0 : i32
    %c0_i32_1 = arith.constant 0 : i32
    return %c0_i32, %c0_i32_0 : i32, i32
  }
  func.func @transform_3(%arg0: i32) -> (i32, i32) {
    %c0_i32 = arith.constant 0 : i32
    %c0_i32_0 = arith.constant 0 : i32
    %c0_i32_1 = arith.constant 0 : i32
    return %c0_i32, %c0_i32_0 : i32, i32
  }
  func.func @transform_4(%arg0: i32) -> (i32, i32) {
    %c0_i32 = arith.constant 0 : i32
    %c0_i32_0 = arith.constant 0 : i32
    %c0_i32_1 = arith.constant 0 : i32
    return %c0_i32, %c0_i32_0 : i32, i32
  }
  func.func @transform_5(%arg0: i32) -> (i32, i32) {
    %c0_i32 = arith.constant 0 : i32
    %c0_i32_0 = arith.constant 0 : i32
    %c0_i32_1 = arith.constant 0 : i32
    return %c0_i32, %c0_i32_0 : i32, i32
  }
  func.func @transform_6(%arg0: i32) -> (i32, i32) {
    %c0_i32 = arith.constant 0 : i32
    %c0_i32_0 = arith.constant 0 : i32
    %c0_i32_1 = arith.constant 0 : i32
    return %c0_i32, %c0_i32_0 : i32, i32
  }
  func.func @transform_7(%arg0: i32) -> (i32, i32, i32) {
    %c0_i32 = arith.constant 0 : i32
    %c0_i32_0 = arith.constant 0 : i32
    %c0_i32_1 = arith.constant 0 : i32
    return %arg0, %c0_i32, %c0_i32_0 : i32, i32, i32
  }
}

module attributes {stable_mosaic.version = 11 : i64} {
  func.func @_ln_linear_kernel(%arg0: i32, %arg1: memref<1x8x32xf32, #tpu.memory_space<vmem>>, %arg2: memref<1x32xf32, #tpu.memory_space<vmem>>, %arg3: memref<1x32xf32, #tpu.memory_space<vmem>>, %arg4: memref<32x256xf32, #tpu.memory_space<vmem>>, %arg5: memref<1x8x256xf32, #tpu.memory_space<vmem>>) attributes {dimension_semantics = [#tpu.dimension_semantics<parallel>], iteration_bounds = array<i64: 2>, scalar_prefetch = 0 : i64, scratch_operands = 0 : i64, tpu.core_type = #tpu.core_type<tc>, window_params = [{transform_indices = @transform_0, window_bounds = array<i64: 1, 8, 32>}, {pipeline_mode = #tpu.pipeline_mode<synchronous>, transform_indices = @transform_1, window_bounds = array<i64: 1, 32>}, {pipeline_mode = #tpu.pipeline_mode<synchronous>, transform_indices = @transform_2, window_bounds = array<i64: 1, 32>}, {pipeline_mode = #tpu.pipeline_mode<synchronous>, transform_indices = @transform_3, window_bounds = array<i64: 32, 256>}, {transform_indices = @transform_4, window_bounds = array<i64: 1, 8, 256>}]} {
    %c0 = arith.constant 0 : index
    %c0_0 = arith.constant 0 : index
    %c0_1 = arith.constant 0 : index
    %0 = vector.load %arg1[%c0, %c0_0, %c0_1] : memref<1x8x32xf32, #tpu.memory_space<vmem>>, vector<1x8x32xf32>
    %1 = vector.shape_cast %0 : vector<1x8x32xf32> to vector<8x32xf32>
    %c0_2 = arith.constant 0 : index
    %c0_3 = arith.constant 0 : index
    %2 = vector.load %arg2[%c0_2, %c0_3] : memref<1x32xf32, #tpu.memory_space<vmem>>, vector<1x32xf32>
    %c0_4 = arith.constant 0 : index
    %c0_5 = arith.constant 0 : index
    %3 = vector.load %arg3[%c0_4, %c0_5] : memref<1x32xf32, #tpu.memory_space<vmem>>, vector<1x32xf32>
    %cst = arith.constant dense<0.000000e+00> : vector<8xf32>
    %4 = vector.multi_reduction <add>, %1, %cst [1] : vector<8x32xf32> to vector<8xf32>
    %5 = vector.shape_cast %4 : vector<8xf32> to vector<8x1xf32>
    %cst_6 = arith.constant 3.200000e+01 : f32
    %6 = vector.broadcast %cst_6 : f32 to vector<8x1xf32>
    %7 = arith.divf %5, %6 : vector<8x1xf32>
    %8 = vector.broadcast %7 : vector<8x1xf32> to vector<8x32xf32>
    %9 = arith.subf %1, %8 : vector<8x32xf32>
    %10 = arith.mulf %9, %9 : vector<8x32xf32>
    %cst_7 = arith.constant dense<0.000000e+00> : vector<8xf32>
    %11 = vector.multi_reduction <add>, %10, %cst_7 [1] : vector<8x32xf32> to vector<8xf32>
    %12 = vector.shape_cast %11 : vector<8xf32> to vector<8x1xf32>
    %cst_8 = arith.constant 3.200000e+01 : f32
    %13 = vector.broadcast %cst_8 : f32 to vector<8x1xf32>
    %14 = arith.divf %12, %13 : vector<8x1xf32>
    %15 = vector.broadcast %7 : vector<8x1xf32> to vector<8x32xf32>
    %16 = arith.subf %1, %15 : vector<8x32xf32>
    %cst_9 = arith.constant 9.99999974E-6 : f32
    %17 = vector.broadcast %cst_9 : f32 to vector<8x1xf32>
    %18 = arith.addf %14, %17 : vector<8x1xf32>
    %19 = math.rsqrt %18 : vector<8x1xf32>
    %20 = vector.broadcast %19 : vector<8x1xf32> to vector<8x32xf32>
    %21 = arith.mulf %16, %20 : vector<8x32xf32>
    %22 = vector.broadcast %2 : vector<1x32xf32> to vector<8x32xf32>
    %23 = arith.mulf %21, %22 : vector<8x32xf32>
    %24 = vector.broadcast %3 : vector<1x32xf32> to vector<8x32xf32>
    %25 = arith.addf %23, %24 : vector<8x32xf32>
    %c0_10 = arith.constant 0 : index
    %c0_11 = arith.constant 0 : index
    %26 = vector.load %arg4[%c0_10, %c0_11] : memref<32x256xf32, #tpu.memory_space<vmem>>, vector<32x256xf32>
    %cst_12 = arith.constant dense<0.000000e+00> : vector<8x256xf32>
    %27 = tpu.matmul %25, %26, %cst_12 {dimension_numbers = #tpu.dot_dimension_numbers<[1], [0], [0], [1], [0, 0, 1, 1], [], []>} : vector<8x32xf32>, vector<32x256xf32>, vector<8x256xf32> -> vector<8x256xf32>
    %c0_13 = arith.constant 0 : index
    %c0_14 = arith.constant 0 : index
    %c0_15 = arith.constant 0 : index
    %28 = vector.load %arg5[%c0_13, %c0_14, %c0_15] : memref<1x8x256xf32, #tpu.memory_space<vmem>>, vector<1x8x256xf32>
    %29 = vector.shape_cast %28 : vector<1x8x256xf32> to vector<8x256xf32>
    %30 = vector.shape_cast %27 : vector<8x256xf32> to vector<1x8x256xf32>
    tpu.vector_store %arg5[%c0_13, %c0_14, %c0_15], %30 {strides = array<i32>} : memref<1x8x256xf32, #tpu.memory_space<vmem>>, vector<1x8x256xf32>,
    return
  }
  func.func @transform_0(%arg0: i32) -> (i32, i32, i32) {
    %c0_i32 = arith.constant 0 : i32
    %c0_i32_0 = arith.constant 0 : i32
    %c0_i32_1 = arith.constant 0 : i32
    return %arg0, %c0_i32, %c0_i32_0 : i32, i32, i32
  }
  func.func @transform_1(%arg0: i32) -> (i32, i32) {
    %c0_i32 = arith.constant 0 : i32
    %c0_i32_0 = arith.constant 0 : i32
    %c0_i32_1 = arith.constant 0 : i32
    return %c0_i32, %c0_i32_0 : i32, i32
  }
  func.func @transform_2(%arg0: i32) -> (i32, i32) {
    %c0_i32 = arith.constant 0 : i32
    %c0_i32_0 = arith.constant 0 : i32
    %c0_i32_1 = arith.constant 0 : i32
    return %c0_i32, %c0_i32_0 : i32, i32
  }
  func.func @transform_3(%arg0: i32) -> (i32, i32) {
    %c0_i32 = arith.constant 0 : i32
    %c0_i32_0 = arith.constant 0 : i32
    %c0_i32_1 = arith.constant 0 : i32
    return %c0_i32, %c0_i32_0 : i32, i32
  }
  func.func @transform_4(%arg0: i32) -> (i32, i32, i32) {
    %c0_i32 = arith.constant 0 : i32
    %c0_i32_0 = arith.constant 0 : i32
    %c0_i32_1 = arith.constant 0 : i32
    return %arg0, %c0_i32, %c0_i32_0 : i32, i32, i32
  }
}

</mosaic_0001>

<bundles_post_ra>
// kernel: pali_forward.20
= control target key start
LH: loop header
LB: loop body
LE: loop exit
PB: predicated region body
PF: predicated region fallthrough
CT: control target
= control target key end

     0   :  { %s747_s24 = smov 0   ;;  %s861_s0 = inlined_call_operand.vmem [shape: f32[2,16,32], index: 0, kind: input, shape index: {}]   ;;  %s862_s1 = inlined_call_operand.vmem [shape: f32[1,32], index: 1, kind: input, shape index: {}]   ;;  %s863_s2 = inlined_call_operand.vmem [shape: f32[1,32], index: 2, kind: input, shape index: {}]   ;;  %s864_s3 = inlined_call_operand.vmem [shape: f32[32,128], index: 3, kind: input, shape index: {}]   ;;  %s865_s4 = inlined_call_operand.vmem [shape: f32[1,128], index: 4, kind: input, shape index: {}]   ;;  %s866_s5 = inlined_call_operand.vmem [shape: f32[128,32], index: 5, kind: input, shape index: {}]   ;;  %s867_s6 = inlined_call_operand.vmem [shape: f32[1,32], index: 6, kind: input, shape index: {}]   ;;  %s868_s7 = inlined_call_operand.vmem [shape: f32[2,16,32], index: 7, kind: output, shape index: {}]  }
   0x1 LB: > { %s594_s25 = sadd.s32 4294967295, %s705_s24   ;;  %p598_p0 = scmp.ge.s32.totalorder %s705_s24, 1  ;;  %s705_s24 = sphi %s747_s24, %s17_s24  }
   0x2   : > { %p237_p1 = scmp.lt.s32.totalorder %s705_s24, 3 }
   0x4   : > { %p238_p2 = pnand %p598_p0, %p237_p1 }
   0x5   : > { %p269_p3 = scmp.lt.s32.totalorder (!%p238_p2), %s594_s25, 1 }
   0x6   : > { %241 = sbr.rel (%p238_p2) target bundleno = 755 (0x2f3), region = 48 }
   0xb   : > { %s870_s25 = smov (!%p269_p3, %s594_s25), 1  ;;  %vm283_vm0 = vcmask 261120   ;;  %v330_v14 = vld [vmem:[%s864_s3 + $0x18] sm:$0xff]  ;;  %v329_v15 = vld [vmem:[%s864_s3 + $0x10] sm:$0xff]  ;;  %v328_v16 = vld [vmem:[%s864_s3 + $0x8] sm:$0xff] }
   0xc   : > { %s611_s26 = sshll.u32 %s870_s25, 4  ;;  %637 = vmatprep.subr.mxu0 %v330_v14  ;;  %v327_v17 = vld [vmem:[%s864_s3] sm:$0xff]  ;;  %v452_v34 = vld [vmem:[%s866_s5 + $0x78] sm:$0xff]  ;;  %v451_v35 = vld [vmem:[%s866_s5 + $0x70] sm:$0xff] }
   0xd   : > { %s273_s29 = scalar_lea.vmem %s861_s0, %s611_s26  ;;  %638 = vmatpush3.msra.mxu0 %v330_v14  ;;  %v603_v25 = vld [vmem:[%s862_s1] ss:$0 sm:$0xff]  ;;  %648 = vmatprep.subr.mxu1 %v452_v34  ;;  %v450_v36 = vld [vmem:[%s866_s5 + $0x68] sm:$0xff]  ;;  %v448_v38 = vld [vmem:[%s866_s5 + $0x58] sm:$0xff]  ;;  %s278_s17 = scalar_lea.vmem %s868_s7, %s611_s26 }
   0xe   : > { %v763_v0 = vld [vmem:[%s273_s29] sm:$0xff]  ;;  %v765_v1 = vld [vmem:[%s273_s29 + $0x8] sm:$0xff]  ;;  %639 = vmatprep.subr.mxu0 %v329_v15  ;;  %649 = vmatpush3.msra.mxu1 %v452_v34  ;;  %v447_v39 = vld [vmem:[%s866_s5 + $0x50] sm:$0xff] }
   0xf   : > { %v284_v2 = vsel %vm283_vm0, %v763_v0, 0.0  ;;  %v287_v3 = vsel %vm283_vm0, %v765_v1, 0.0  ;;  %640 = vmatpush3.msra.mxu0 %v329_v15  ;;  %v604_v27 = vld [vmem:[%s863_s2] ss:$0 sm:$0xff]  ;;  %650 = vmatprep.subr.mxu1 %v451_v35  ;;  %v446_v40 = vld [vmem:[%s866_s5 + $0x48] sm:$0xff]  ;;  %v444_v42 = vld [vmem:[%s866_s5 + $0x38] sm:$0xff] }
  0x10   : > { %285 = vadd.xlane.f32.xlu0 %v284_v2  ;;  %641 = vmatprep.subr.mxu0 %v328_v16  ;;  %v449_v37 = vld [vmem:[%s866_s5 + $0x60] sm:$0xff]  ;;  %v443_v43 = vld [vmem:[%s866_s5 + $0x30] sm:$0xff]  ;;  %v442_v44 = vld [vmem:[%s866_s5 + $0x28] sm:$0xff] }
  0x11   : > { %642 = vmatpush3.msra.mxu0 %v328_v16  ;;  %651 = vmatpush3.msra.mxu1 %v451_v35  ;;  %v445_v41 = vld [vmem:[%s866_s5 + $0x40] sm:$0xff]  ;;  %v440_v46 = vld [vmem:[%s866_s5 + $0x18] sm:$0xff]  ;;  %v439_v47 = vld [vmem:[%s866_s5 + $0x10] sm:$0xff] }
  0x12   : > { %643 = vmatprep.subr.mxu0 %v327_v17  ;;  %652 = vmatprep.subr.mxu1 %v450_v36  ;;  %v441_v45 = vld [vmem:[%s866_s5 + $0x20] sm:$0xff]  ;;  %v438_v48 = vld [vmem:[%s866_s5 + $0x8] sm:$0xff] }
  0x13   : > { %644 = vmatpush3.msra.mxu0 %v327_v17  ;;  %653 = vmatpush3.msra.mxu1 %v450_v36  ;;  %v437_v49 = vld [vmem:[%s866_s5] sm:$0xff] }
  0x14   : > { %288 = vadd.xlane.f32.xlu0 %v287_v3  ;;  %654 = vmatprep.subr.mxu1 %v449_v37  ;;  %v605_v50 = vld [vmem:[%s865_s4] ss:$0 sm:$0xff] }
  0x15   : > { %655 = vmatpush3.msra.mxu1 %v449_v37 }
  0x16   : > { %656 = vmatprep.subr.mxu1 %v448_v38 }
  0x17   : > { %657 = vmatpush3.msra.mxu1 %v448_v38 }
  0x18   : > { %658 = vmatprep.subr.mxu1 %v447_v39 }
  0x19   : > { %659 = vmatpush3.msra.mxu1 %v447_v39 }
  0x1a   : > { %660 = vmatprep.subr.mxu1 %v446_v40 }
  0x1b   : > { %661 = vmatpush3.msra.mxu1 %v446_v40 }
  0x1c   : > { %662 = vmatprep.subr.mxu1 %v445_v41 }
  0x1d   : > { %663 = vmatpush3.msra.mxu1 %v445_v41 }
  0x1e   : > { %664 = vmatprep.subr.mxu1 %v444_v42 }
  0x1f   : > { %665 = vmatpush3.msra.mxu1 %v444_v42 }
  0x20   : > { %666 = vmatprep.subr.mxu1 %v443_v43 }
  0x21   : > { %667 = vmatpush3.msra.mxu1 %v443_v43 }
  0x22   : > { %668 = vmatprep.subr.mxu1 %v442_v44 }
  0x23   : > { %669 = vmatpush3.msra.mxu1 %v442_v44 }
  0x24   : > { %670 = vmatprep.subr.mxu1 %v441_v45 }
  0x25   : > { %671 = vmatpush3.msra.mxu1 %v441_v45 }
  0x26   : > { %672 = vmatprep.subr.mxu1 %v440_v46 }
  0x27   : > { %673 = vmatpush3.msra.mxu1 %v440_v46 }
  0x28   : > { %674 = vmatprep.subr.mxu1 %v439_v47 }
  0x29   : > { %675 = vmatpush3.msra.mxu1 %v439_v47 }
  0x2a   : > { %676 = vmatprep.subr.mxu1 %v438_v48 }
  0x2b   : > { %677 = vmatpush3.msra.mxu1 %v438_v48 }
  0x2c   : > { %678 = vmatprep.subr.mxu1 %v437_v49 }
  0x2d   : > { %679 = vmatpush3.msra.mxu1 %v437_v49 }
  0x99   : > { %v286_v4 = vpop.xlane.xlu0 %285 }
  0x9a   : > { %v291_v5 = vmul.f32 0.03125, %v286_v4 }
  0x9c   : > { %v293_v6 = vsub.f32 %v763_v0, %v291_v5 }
  0x9d   : > { %v289_v7 = vpop.xlane.xlu0 %288 }
  0x9e   : > { %v292_v8 = vmul.f32 0.03125, %v289_v7  ;;  %v295_v9 = vmul.f32 %v293_v6, %v293_v6 }
  0xa0   : > { %v294_v10 = vsub.f32 %v765_v1, %v292_v8  ;;  %v297_v11 = vsel %vm283_vm0, %v295_v9, 0.0 }
  0xa1   : > { %298 = vadd.xlane.f32.xlu1 %v297_v11  ;;  %v608_v11 = vld [vmem:[%s867_s6] ss:$0 sm:$0xff] }
  0xa2   : > { %v296_v12 = vmul.f32 %v294_v10, %v294_v10 }
  0xa4   : > { %v300_v13 = vsel %vm283_vm0, %v296_v12, 0.0 }
  0xa5   : > { %301 = vadd.xlane.f32.xlu1 %v300_v13 }
 0x12a   : > { %v299_v18 = vpop.xlane.xlu1 %298 }
 0x12b   : > { %v303_v19 = vmul.f32 0.03125, %v299_v18 }
 0x12d   : > { %v305_v20 = vadd.f32 1e-05, %v303_v19 }
 0x12e   : > { %v302_v21 = vpop.xlane.xlu1 %301 }
 0x12f   : > { %691 = vrsqrt.f32 %v305_v20  ;;  %v304_v22 = vmul.f32 0.03125, %v302_v21 }
 0x131   : > { %v306_v23 = vadd.f32 1e-05, %v304_v22 }
 0x133   : > { %693 = vrsqrt.f32 %v306_v23 }
 0x13c   : > { %v692_v24 = vpop.eup %691 }
 0x13d   : > { %v309_v26 = vmul.f32 %v692_v24, %v293_v6 }
 0x13f   : > { %v317_v28 = vmul.f32 %v603_v25, %v309_v26 }
 0x140   : > { %v694_v29 = vpop.eup %693 }
 0x141   : > { %v310_v30 = vmul.f32 %v694_v29, %v294_v10  ;;  %v325_v31 = vadd.f32 %v604_v27, %v317_v28 }
 0x143   : > { %v318_v32 = vmul.f32 %v603_v25, %v310_v30  ;;  %645 = vmatprep.mubr.msk.f32.mxu0 %vm283_vm0, %v325_v31 }
 0x145   : > { %v326_v33 = vadd.f32 %v604_v27, %v318_v32 }
 0x147   : > { %646 = vmatmul.mubr.msk.f32.vlgmr.msra.gmra.mxu0 %vm283_vm0, %v326_v33 }
 0x207   : > { %v647_v51 = vpop.f32.mrf.mxu0 }
 0x208   : > { %v416_v52 = vadd.f32 %v647_v51, %v605_v50 }
 0x209   : > { %v410_v53 = vpop.f32.mrf.mxu0 }
 0x20a   : > { %v420_v54 = vmul.f32 %v416_v52, %v416_v52  ;;  %v411_v55 = vadd.f32 %v605_v50, %v410_v53 }
 0x20c   : > { %v422_v56 = vmul.f32 %v420_v54, %v416_v52  ;;  %v419_v57 = vmul.f32 %v411_v55, %v411_v55 }
 0x20e   : > { %v424_v58 = vmul.f32 0.044715, %v422_v56  ;;  %v421_v59 = vmul.f32 %v419_v57, %v411_v55 }
 0x210   : > { %v426_v60 = vadd.f32 %v424_v58, %v416_v52  ;;  %v423_v61 = vmul.f32 0.044715, %v421_v59 }
 0x212   : > { %v428_v62 = vmul.f32 0.7978846, %v426_v60  ;;  %v425_v63 = vadd.f32 %v423_v61, %v411_v55 }
 0x214   : > { %695 = vtanh.f32 %v428_v62  ;;  %v427_v2 = vmul.f32 0.7978846, %v425_v63 }
 0x216   : > { %697 = vtanh.f32 %v427_v2 }
 0x221   : > { %v696_v3 = vpop.eup %695 }
 0x222   : > { %v432_v4 = vadd.f32 1.0, %v696_v3 }
 0x223   : > { %v698_v5 = vpop.eup %697 }
 0x224   : > { %v431_v6 = vadd.f32 1.0, %v698_v5  ;;  %v434_v7 = vmul.f32 0.5, %v432_v4 }
 0x226   : > { %v433_v8 = vmul.f32 0.5, %v431_v6  ;;  %v436_v10 = vmul.f32 %v434_v7, %v416_v52 }
 0x228   : > { %v435_v9 = vmul.f32 %v433_v8, %v411_v55 }
 0x22a   : > { %680 = vmatprep.mubr.f32.mxu1 %v435_v9 }
 0x22b   : > { %681 = vmatmul.mubr.f32.vlgmr.msra.gmra.mxu1 %v436_v10 }
 0x2eb   : > { %v682_v12 = vpop.f32.mrf.mxu1 }
 0x2ec   : > { %v532_v13 = vadd.f32 %v682_v12, %v608_v11 }
 0x2ed   : > { %v526_v14 = vpop.f32.mrf.mxu1 }
 0x2ee   : > { %v536_v15 = vadd.f32 %v532_v13, %v765_v1  ;;  %v527_v16 = vadd.f32 %v608_v11, %v526_v14 }
 0x2f0   : > { %538 = vst.msk [vmem:[%s278_s17 + $0x8] sm:$0xff] %vm283_vm0, %v536_v15  ;;  %v535_v17 = vadd.f32 %v527_v16, %v763_v0 }
 0x2f2   : > { %537 = vst.msk [vmem:[%s278_s17] sm:$0xff] %vm283_vm0, %v535_v17 }
 0x2f3 PF: > { %s17_s24 = sadd.s32 1, %s705_s24  }
 0x2f4   : > { %p14_p4 = scmp.ge.s32.totalorder %s17_s24, 4  }
 0x2f6   :  { %16 = sbr.rel (!%p14_p4) target bundleno = 1 (0x1), region = 78 }

// kernel: pali_forward.18
= control target key start
LH: loop header
LB: loop body
LE: loop exit
PB: predicated region body
PF: predicated region fallthrough
CT: control target
= control target key end

     0   :  { %s736_s27 = smov 0   ;;  %s946_s0 = inlined_call_operand.vmem [shape: f32[2,16,192], index: 0, kind: input, shape index: {}]   ;;  %s947_s1 = inlined_call_operand.vmem [shape: f32[1,192], index: 1, kind: input, shape index: {}]   ;;  %s948_s2 = inlined_call_operand.vmem [shape: f32[1,192], index: 2, kind: input, shape index: {}]   ;;  %s949_s3 = inlined_call_operand.vmem [shape: f32[192,32], index: 3, kind: input, shape index: {}]   ;;  %s950_s4 = inlined_call_operand.vmem [shape: f32[1,32], index: 4, kind: input, shape index: {}]   ;;  %s951_s5 = inlined_call_operand.vmem [shape: f32[1,32], index: 5, kind: input, shape index: {}]   ;;  %s952_s6 = inlined_call_operand.vmem [shape: f32[1,32], index: 6, kind: input, shape index: {}]   ;;  %s953_s7 = inlined_call_operand.vmem [shape: f32[1,16,32], index: 7, kind: input, shape index: {}]   ;;  %s954_s8 = inlined_call_operand.vmem [shape: f32[2,16,32], index: 8, kind: output, shape index: {}]  }
   0x1 LB: > { %s599_s28 = sadd.s32 4294967295, %s688_s27   ;;  %p603_p0 = scmp.ge.s32.totalorder %s688_s27, 1  ;;  %s688_s27 = sphi %s736_s27, %s18_s27  }
   0x2   : > { %p262_p1 = scmp.lt.s32.totalorder %s688_s27, 3 }
   0x4   : > { %p263_p2 = pnand %p603_p0, %p262_p1 }
   0x5   : > { %p296_p3 = scmp.lt.s32.totalorder (!%p263_p2), %s599_s28, 1 }
   0x6   : > { %266 = sbr.rel (%p263_p2) target bundleno = 838 (0x346), region = 52 }
   0xb   : > { %s956_s28 = smov (!%p296_p3, %s599_s28), 1  ;;  %vm312_vm0 = vcmask 523264   ;;  %v395_v8 = vld [vmem:[%s949_s3 + $0x78] sm:$0xff]  ;;  %v690_v9 = vmov 0.0   ;;  %v394_v10 = vld [vmem:[%s949_s3 + $0x70] sm:$0xff]  ;;  %v393_v11 = vld [vmem:[%s949_s3 + $0x68] sm:$0xff]  ;;  %v351_v54 = vlaneseq }
   0xc   : > { %s615_s29 = sshll.u32 %s956_s28, 5  ;;  %417 = vmatprep.subr.mxu0 %v690_v9  ;;  %617 = vmatprep.subr.mxu1 %v690_v9  ;;  %v392_v12 = vld [vmem:[%s949_s3 + $0x60] sm:$0xff]  ;;  %v391_v13 = vld [vmem:[%s949_s3 + $0x58] sm:$0xff]  ;;  %v390_v14 = vld [vmem:[%s949_s3 + $0x50] sm:$0xff]  ;;  %vm494_vm1 = vcmask 261120   ;;  %s616_s9 = sshll.u32 %s956_s28, 4 }
   0xd   : > { %s300_s10 = scalar_lea.vmem %s946_s0, %s615_s29  ;;  %418 = vmatpush1.msra.mxu0 %v395_v8  ;;  %641 = vmatpush1.msra.mxu1 %v395_v8  ;;  %v389_v15 = vld [vmem:[%s949_s3 + $0x48] sm:$0xff]  ;;  %v388_v16 = vld [vmem:[%s949_s3 + $0x40] sm:$0xff]  ;;  %v387_v17 = vld [vmem:[%s949_s3 + $0x38] sm:$0xff]  ;;  %v352_v56 = vshrl.u32 %v351_v54, 7  ;;  %s305_s14 = scalar_lea.vmem %s954_s8, %s616_s9 }
   0xe   : > { %v750_v0 = vld [vmem:[%s300_s10] sm:$0xff]  ;;  %v752_v1 = vld [vmem:[%s300_s10 + $0x8] sm:$0xff]  ;;  %v756_v3 = vld [vmem:[%s300_s10 + $0x10] sm:$0xff]  ;;  %419 = vmatprep.subr.mxu0 %v690_v9  ;;  %618 = vmatprep.subr.mxu1 %v690_v9 }
   0xf   : > { %v313_v2 = vsel %vm312_vm0, %v752_v1, 0.0  ;;  %v758_v4 = vld [vmem:[%s300_s10 + $0x18] sm:$0xff]  ;;  %420 = vmatpush1.msra.mxu0 %v394_v10  ;;  %642 = vmatpush1.msra.mxu1 %v394_v10  ;;  %v386_v18 = vld [vmem:[%s949_s3 + $0x30] sm:$0xff]  ;;  %v385_v19 = vld [vmem:[%s949_s3 + $0x28] sm:$0xff]  ;;  %v353_v57 = vsub.s32 0, %v352_v56  ;;  %v357_v58 = vsub.s32 1, %v352_v56 }
  0x10   : > { %v314_v5 = vadd.f32 %v313_v2, %v750_v0  ;;  %v317_v6 = vsel %vm312_vm0, %v758_v4, 0.0  ;;  %421 = vmatprep.subr.mxu0 %v690_v9  ;;  %619 = vmatprep.subr.mxu1 %v690_v9  ;;  %v384_v36 = vld [vmem:[%s949_s3 + $0x20] sm:$0xff]  ;;  %v383_v37 = vld [vmem:[%s949_s3 + $0x18] sm:$0xff]  ;;  %v382_v38 = vld [vmem:[%s949_s3 + $0x10] sm:$0xff] }
  0x11   : > { %v318_v7 = vadd.f32 %v317_v6, %v756_v3  ;;  %422 = vmatpush1.msra.mxu0 %v393_v11  ;;  %643 = vmatpush1.msra.mxu1 %v393_v11  ;;  %v381_v39 = vld [vmem:[%s949_s3 + $0x8] sm:$0xff]  ;;  %v380_v40 = vld [vmem:[%s949_s3] sm:$0xff]  ;;  %v403_v41 = vld [vmem:[%s949_s3 + $0xb8] sm:$0xff] }
  0x12   : > { %315 = vadd.xlane.f32.xlu0 %v314_v5  ;;  %423 = vmatprep.subr.mxu0 %v690_v9  ;;  %v402_v42 = vld [vmem:[%s949_s3 + $0xb0] sm:$0xff]  ;;  %v401_v43 = vld [vmem:[%s949_s3 + $0xa8] sm:$0xff]  ;;  %v400_v44 = vld [vmem:[%s949_s3 + $0xa0] sm:$0xff] }
  0x13   : > { %620 = vmatprep.subr.mxu1 %v690_v9  ;;  %424 = vmatpush1.msra.mxu0 %v392_v12  ;;  %v399_v45 = vld [vmem:[%s949_s3 + $0x98] sm:$0xff]  ;;  %v398_v46 = vld [vmem:[%s949_s3 + $0x90] sm:$0xff]  ;;  %v397_v47 = vld [vmem:[%s949_s3 + $0x88] sm:$0xff] }
  0x14   : > { %644 = vmatpush1.msra.mxu1 %v392_v12  ;;  %425 = vmatprep.subr.mxu0 %v690_v9  ;;  %v396_v48 = vld [vmem:[%s949_s3 + $0x80] sm:$0xff] }
  0x15   : > { %621 = vmatprep.subr.mxu1 %v690_v9  ;;  %426 = vmatpush1.msra.mxu0 %v391_v13  ;;  %v310_v59 = vld [vmem:[%s947_s1] sm:$0x3] }
  0x16   : > { %319 = vadd.xlane.f32.xlu0 %v318_v7  ;;  %645 = vmatpush1.msra.mxu1 %v391_v13  ;;  %v311_v60 = vld [vmem:[%s948_s2] sm:$0x3]  ;;  %v354_v61 = vrot.slane %v310_v59, %v353_v57  ;;  %v358_v62 = vrot.slane %v310_v59, %v357_v58 }
  0x17   : > { %427 = vmatprep.subr.mxu0 %v690_v9  ;;  %622 = vmatprep.subr.mxu1 %v690_v9  ;;  %v373_v2 = vrot.slane %v311_v60, %v357_v58 }
  0x18   : > { %428 = vmatpush1.msra.mxu0 %v390_v14  ;;  %646 = vmatpush1.msra.mxu1 %v390_v14 }
  0x19   : > { %429 = vmatprep.subr.mxu0 %v690_v9  ;;  %623 = vmatprep.subr.mxu1 %v690_v9 }
  0x1a   : > { %430 = vmatpush1.msra.mxu0 %v389_v15  ;;  %647 = vmatpush1.msra.mxu1 %v389_v15  ;;  %v608_v15 = vld [vmem:[%s950_s4] ss:$0 sm:$0xff] }
  0x1b   : > { %431 = vmatprep.subr.mxu0 %v690_v9  ;;  %624 = vmatprep.subr.mxu1 %v690_v9 }
  0x1c   : > { %432 = vmatpush1.msra.mxu0 %v388_v16  ;;  %648 = vmatpush1.msra.mxu1 %v388_v16 }
  0x1d   : > { %433 = vmatprep.subr.mxu0 %v690_v9  ;;  %625 = vmatprep.subr.mxu1 %v690_v9 }
  0x1e   : > { %434 = vmatpush1.msra.mxu0 %v387_v17  ;;  %649 = vmatpush1.msra.mxu1 %v387_v17 }
  0x1f   : > { %435 = vmatprep.subr.mxu0 %v690_v9  ;;  %626 = vmatprep.subr.mxu1 %v690_v9 }
  0x20   : > { %436 = vmatpush1.msra.mxu0 %v386_v18  ;;  %650 = vmatpush1.msra.mxu1 %v386_v18 }
  0x21   : > { %437 = vmatprep.subr.mxu0 %v690_v9  ;;  %627 = vmatprep.subr.mxu1 %v690_v9 }
  0x22   : > { %438 = vmatpush1.msra.mxu0 %v385_v19  ;;  %651 = vmatpush1.msra.mxu1 %v385_v19 }
  0x23   : > { %439 = vmatprep.subr.mxu0 %v690_v9  ;;  %628 = vmatprep.subr.mxu1 %v690_v9 }
  0x24   : > { %440 = vmatpush1.msra.mxu0 %v384_v36  ;;  %652 = vmatpush1.msra.mxu1 %v384_v36 }
  0x25   : > { %441 = vmatprep.subr.mxu0 %v690_v9  ;;  %629 = vmatprep.subr.mxu1 %v690_v9 }
  0x26   : > { %442 = vmatpush1.msra.mxu0 %v383_v37  ;;  %653 = vmatpush1.msra.mxu1 %v383_v37 }
  0x27   : > { %443 = vmatprep.subr.mxu0 %v690_v9  ;;  %630 = vmatprep.subr.mxu1 %v690_v9 }
  0x28   : > { %444 = vmatpush1.msra.mxu0 %v382_v38  ;;  %654 = vmatpush1.msra.mxu1 %v382_v38 }
  0x29   : > { %445 = vmatprep.subr.mxu0 %v690_v9  ;;  %631 = vmatprep.subr.mxu1 %v690_v9 }
  0x2a   : > { %446 = vmatpush1.msra.mxu0 %v381_v39  ;;  %655 = vmatpush1.msra.mxu1 %v381_v39 }
  0x2b   : > { %447 = vmatprep.subr.mxu0 %v690_v9  ;;  %632 = vmatprep.subr.mxu1 %v690_v9 }
  0x2c   : > { %448 = vmatpush1.msra.mxu0 %v380_v40  ;;  %656 = vmatpush1.msra.mxu1 %v380_v40 }
  0x2d   : > { %465 = vmatprep.subr.mxu0 %v690_v9  ;;  %633 = vmatprep.subr.mxu1 %v690_v9 }
  0x2e   : > { %466 = vmatpush2.msra.mxu0 %v403_v41  ;;  %657 = vmatpush2.msra.mxu1 %v403_v41  ;;  %v611_v41 = vld [vmem:[%s951_s5] ss:$0 sm:$0xff] }
  0x2f   : > { %467 = vmatprep.subr.mxu0 %v690_v9  ;;  %634 = vmatprep.subr.mxu1 %v690_v9 }
  0x30   : > { %468 = vmatpush2.msra.mxu0 %v402_v42  ;;  %658 = vmatpush2.msra.mxu1 %v402_v42 }
  0x31   : > { %469 = vmatprep.subr.mxu0 %v690_v9  ;;  %635 = vmatprep.subr.mxu1 %v690_v9 }
  0x32   : > { %470 = vmatpush2.msra.mxu0 %v401_v43  ;;  %659 = vmatpush2.msra.mxu1 %v401_v43  ;;  %v612_v43 = vld [vmem:[%s952_s6] ss:$0 sm:$0xff] }
  0x33   : > { %471 = vmatprep.subr.mxu0 %v690_v9  ;;  %636 = vmatprep.subr.mxu1 %v690_v9 }
  0x34   : > { %472 = vmatpush2.msra.mxu0 %v400_v44  ;;  %660 = vmatpush2.msra.mxu1 %v400_v44 }
  0x35   : > { %473 = vmatprep.subr.mxu0 %v690_v9  ;;  %637 = vmatprep.subr.mxu1 %v690_v9 }
  0x36   : > { %474 = vmatpush2.msra.mxu0 %v399_v45  ;;  %661 = vmatpush2.msra.mxu1 %v399_v45 }
  0x37   : > { %475 = vmatprep.subr.mxu0 %v690_v9  ;;  %638 = vmatprep.subr.mxu1 %v690_v9 }
  0x38   : > { %476 = vmatpush2.msra.mxu0 %v398_v46  ;;  %662 = vmatpush2.msra.mxu1 %v398_v46  ;;  %v538_v46 = vld [vmem:[%s953_s7] sm:$0xff] }
  0x39   : > { %477 = vmatprep.subr.mxu0 %v690_v9  ;;  %639 = vmatprep.subr.mxu1 %v690_v9 }
  0x3a   : > { %478 = vmatpush2.msra.mxu0 %v397_v47  ;;  %663 = vmatpush2.msra.mxu1 %v397_v47 }
  0x3b   : > { %479 = vmatprep.subr.mxu0 %v690_v9  ;;  %640 = vmatprep.subr.mxu1 %v690_v9 }
  0x3c   : > { %480 = vmatpush2.msra.mxu0 %v396_v48  ;;  %664 = vmatpush2.msra.mxu1 %v396_v48 }
  0x9b   : > { %v316_v20 = vpop.xlane.xlu0 %315 }
  0x9c   : > { %v322_v21 = vmul.f32 0.0052083335, %v316_v20 }
  0x9e   : > { %v822_v22 = vsub.f32 %v750_v0, %v322_v21  ;;  %v825_v23 = vsub.f32 %v752_v1, %v322_v21  ;;  %v369_v1 = vrot.slane %v311_v60, %v353_v57 }
  0x9f   : > { %v320_v24 = vpop.xlane.xlu0 %319 }
  0xa0   : > { %v323_v25 = vmul.f32 0.0052083335, %v320_v24  ;;  %v328_v26 = vmul.f32 %v822_v22, %v822_v22  ;;  %v329_v27 = vmul.f32 %v825_v23, %v825_v23 }
  0xa2   : > { %v832_v28 = vsub.f32 %v756_v3, %v323_v25  ;;  %v835_v29 = vsub.f32 %v758_v4, %v323_v25  ;;  %v332_v30 = vsel %vm312_vm0, %v329_v27, 0.0 }
  0xa3   : > { %v333_v31 = vadd.f32 %v332_v30, %v328_v26 }
  0xa4   : > { %v330_v32 = vmul.f32 %v832_v28, %v832_v28  ;;  %v331_v33 = vmul.f32 %v835_v29, %v835_v29 }
  0xa5   : > { %334 = vadd.xlane.f32.xlu1 %v333_v31 }
  0xa6   : > { %v336_v34 = vsel %vm312_vm0, %v331_v33, 0.0 }
  0xa7   : > { %v337_v35 = vadd.f32 %v336_v34, %v330_v32 }
  0xa9   : > { %338 = vadd.xlane.f32.xlu1 %v337_v35 }
 0x12e   : > { %v335_v49 = vpop.xlane.xlu1 %334 }
 0x12f   : > { %v340_v50 = vmul.f32 0.0052083335, %v335_v49 }
 0x131   : > { %v342_v51 = vadd.f32 1e-05, %v340_v50 }
 0x132   : > { %v339_v52 = vpop.xlane.xlu1 %338 }
 0x133   : > { %674 = vrsqrt.f32 %v342_v51  ;;  %v341_v53 = vmul.f32 0.0052083335, %v339_v52  ;;  %v539_v51 = vld [vmem:[%s953_s7 + $0x8] sm:$0xff] }
 0x135   : > { %v343_v55 = vadd.f32 1e-05, %v341_v53 }
 0x137   : > { %676 = vrsqrt.f32 %v343_v55 }
 0x140   : > { %v675_v63 = vpop.eup %674 }
 0x141   : > { %v347_v0 = vmul.f32 %v675_v63, %v825_v23  ;;  %v346_v3 = vmul.f32 %v675_v63, %v822_v22 }
 0x143   : > { %v362_v4 = vmul.f32 %v358_v62, %v347_v0  ;;  %v361_v5 = vmul.f32 %v354_v61, %v346_v3 }
 0x144   : > { %v677_v6 = vpop.eup %676 }
 0x145   : > { %v377_v7 = vadd.f32 %v373_v2, %v362_v4  ;;  %v376_v8 = vadd.f32 %v369_v1, %v361_v5  ;;  %v349_v9 = vmul.f32 %v677_v6, %v835_v29  ;;  %v348_v10 = vmul.f32 %v677_v6, %v832_v28 }
 0x147   : > { %609 = vmatprep.mubr.msk.f32.mxu0 %vm312_vm0, %v377_v7  ;;  %v364_v11 = vmul.f32 %v358_v62, %v349_v9  ;;  %v363_v12 = vmul.f32 %v354_v61, %v348_v10 }
 0x148   : > { %482 = vmatmul.mubr.f32.vlgmr.msra.gmra.mxu0 %v376_v8 }
 0x149   : > { %v379_v13 = vadd.f32 %v373_v2, %v364_v11  ;;  %v378_v14 = vadd.f32 %v369_v1, %v363_v12 }
 0x14b   : > { %610 = vmatprep.mubr.msk.f32.mxu1 %vm312_vm0, %v379_v13 }
 0x14c   : > { %487 = vmatmul.mubr.f32.vlgmr.msra.gmra.mxu1 %v378_v14 }
 0x208   : > { %v483_v16 = vpop.f32.mrf.mxu0 }
 0x209   : > { %v484_v17 = vadd.f32 %v608_v15, %v483_v16 }
 0x20a   : > { %v485_v18 = vpop.f32.mrf.mxu0 }
 0x20b   : > { %v495_v19 = vsel %vm494_vm1, %v484_v17, 0.0 }
 0x20c   : > { %496 = vadd.xlane.f32.xlu0 %v495_v19  ;;  %v488_v20 = vpop.f32.mrf.mxu1 }
 0x20d   : > { %v489_v21 = vadd.f32 %v608_v15, %v488_v20 }
 0x20e   : > { %v490_v22 = vpop.f32.mrf.mxu1 }
 0x20f   : > { %v498_v23 = vsel %vm494_vm1, %v489_v21, 0.0 }
 0x210   : > { %499 = vadd.xlane.f32.xlu1 %v498_v23 }
 0x295   : > { %v497_v24 = vpop.xlane.xlu0 %496 }
 0x296   : > { %v502_v25 = vmul.f32 0.03125, %v497_v24 }
 0x298   : > { %v504_v26 = vsub.f32 %v484_v17, %v502_v25 }
 0x299   : > { %v500_v27 = vpop.xlane.xlu1 %499 }
 0x29a   : > { %v503_v28 = vmul.f32 0.03125, %v500_v27  ;;  %v506_v29 = vmul.f32 %v504_v26, %v504_v26 }
 0x29c   : > { %v505_v30 = vsub.f32 %v489_v21, %v503_v28  ;;  %v508_v31 = vsel %vm494_vm1, %v506_v29, 0.0 }
 0x29d   : > { %509 = vadd.xlane.f32.xlu0 %v508_v31 }
 0x29e   : > { %v507_v32 = vmul.f32 %v505_v30, %v505_v30 }
 0x2a0   : > { %v511_v33 = vsel %vm494_vm1, %v507_v32, 0.0 }
 0x2a1   : > { %512 = vadd.xlane.f32.xlu1 %v511_v33 }
 0x326   : > { %v510_v34 = vpop.xlane.xlu0 %509 }
 0x327   : > { %v514_v35 = vmul.f32 0.03125, %v510_v34 }
 0x329   : > { %v516_v36 = vadd.f32 1e-05, %v514_v35 }
 0x32a   : > { %v513_v37 = vpop.xlane.xlu1 %512 }
 0x32b   : > { %678 = vrsqrt.f32 %v516_v36  ;;  %v515_v38 = vmul.f32 0.03125, %v513_v37 }
 0x32d   : > { %v517_v39 = vadd.f32 1e-05, %v515_v38 }
 0x32f   : > { %680 = vrsqrt.f32 %v517_v39 }
 0x338   : > { %v679_v40 = vpop.eup %678 }
 0x339   : > { %v520_v42 = vmul.f32 %v679_v40, %v504_v26 }
 0x33b   : > { %v528_v44 = vmul.f32 %v611_v41, %v520_v42 }
 0x33c   : > { %v681_v45 = vpop.eup %680 }
 0x33d   : > { %v536_v47 = vadd.f32 %v612_v43, %v528_v44  ;;  %v521_v48 = vmul.f32 %v681_v45, %v505_v30 }
 0x33f   : > { %v540_v49 = vadd.f32 %v538_v46, %v536_v47  ;;  %v529_v50 = vmul.f32 %v611_v41, %v521_v48 }
 0x341   : > { %542 = vst.msk [vmem:[%s305_s14] sm:$0xff] %vm494_vm1, %v540_v49  ;;  %v537_v52 = vadd.f32 %v612_v43, %v529_v50 }
 0x343   : > { %v541_v53 = vadd.f32 %v539_v51, %v537_v52 }
 0x345   : > { %543 = vst.msk [vmem:[%s305_s14 + $0x8] sm:$0xff] %vm494_vm1, %v541_v53 }
 0x346 PF: > { %s18_s27 = sadd.s32 1, %s688_s27  }
 0x347   : > { %p15_p4 = scmp.ge.s32.totalorder %s18_s27, 4  }
 0x349   :  { %17 = sbr.rel (!%p15_p4) target bundleno = 1 (0x1), region = 82 }

// kernel: pali_forward.19
= control target key start
LH: loop header
LB: loop body
LE: loop exit
PB: predicated region body
PF: predicated region fallthrough
CT: control target
= control target key end

     0   :  { %s2009_s24 = smov 0   ;;  %s2202_s0 = inlined_call_operand.vmem [shape: f32[2,16,32], index: 0, kind: input, shape index: {}]   ;;  %s2203_s1 = inlined_call_operand.vmem [shape: f32[1,32], index: 1, kind: input, shape index: {}]   ;;  %s2204_s2 = inlined_call_operand.vmem [shape: f32[1,32], index: 2, kind: input, shape index: {}]   ;;  %s2205_s3 = inlined_call_operand.vmem [shape: f32[32,32], index: 3, kind: input, shape index: {}]   ;;  %s2206_s4 = inlined_call_operand.vmem [shape: f32[32,64], index: 4, kind: input, shape index: {}]   ;;  %s2207_s5 = inlined_call_operand.vmem [shape: f32[32,32], index: 5, kind: input, shape index: {}]   ;;  %s2208_s6 = inlined_call_operand.vmem [shape: f32[1,32], index: 6, kind: input, shape index: {}]   ;;  %s2209_s7 = inlined_call_operand.vmem [shape: f32[2,16,32], index: 7, kind: output, shape index: {}]  }
   0x1 LB: > { %s1697_s25 = sadd.s32 4294967295, %s1960_s24   ;;  %p1701_p0 = scmp.ge.s32.totalorder %s1960_s24, 1  ;;  %s1960_s24 = sphi %s2009_s24, %s17_s24  }
   0x2   : > { %p237_p1 = scmp.lt.s32.totalorder %s1960_s24, 3 }
   0x4   : > { %p238_p2 = pnand %p1701_p0, %p237_p1 }
   0x5   : > { %p269_p3 = scmp.lt.s32.totalorder (!%p238_p2), %s1697_s25, 1  ;;  %s1962_s30 = smov (!%p238_p2), 96  }
   0x6   : > { %241 = sbr.rel (%p238_p2) target bundleno = 2411 (0x96b), region = 48  ;;  %s1963_s8 = smov (!%p238_p2), 120  }
   0x7   : > { %s1964_s9 = smov (!%p238_p2), 88   ;;  %s1965_s12 = smov (!%p238_p2), 112  }
   0x8   : > { %s1966_s13 = smov (!%p238_p2), 104   ;;  %s1967_s14 = smov (!%p238_p2), 80  }
   0x9   : > { %s1968_s19 = smov (!%p238_p2), 72  }
   0xb   : > { %s2211_s25 = smov (!%p269_p3, %s1697_s25), 1  ;;  %vm283_vm0 = vcmask 261120   ;;  %v330_v14 = vld [vmem:[%s2205_s3 + $0x18] sm:$0xff]  ;;  %v329_v16 = vld [vmem:[%s2205_s3 + $0x10] sm:$0xff]  ;;  %v328_v18 = vld [vmem:[%s2205_s3 + $0x8] sm:$0xff]  ;;  %vm495_vm1 = vcmask 64512  }
   0xc   : > { %s1747_s26 = sshll.u32 %s2211_s25, 4  ;;  %v334_v15 = vld [vmem:[%s2206_s4 + $0x18] sm:$0xff]  ;;  %1805 = vmatprep.subr.mxu0 %v330_v14  ;;  %v333_v17 = vld [vmem:[%s2206_s4 + $0x10] sm:$0xff]  ;;  %v332_v19 = vld [vmem:[%s2206_s4 + $0x8] sm:$0xff]  ;;  %vm585_vm2 = vcmask 130048  }
   0xd   : > { %s273_s29 = scalar_lea.vmem %s2202_s0, %s1747_s26  ;;  %1816 = vmatprep.subr.mxu1 %v334_v15  ;;  %1806 = vmatpush3.msra.mxu0 %v330_v14  ;;  %v327_v20 = vld [vmem:[%s2205_s3] sm:$0xff] }
   0xe   : > { %v2025_v0 = vld [vmem:[%s273_s29] sm:$0xff]  ;;  %v2027_v1 = vld [vmem:[%s273_s29 + $0x8] sm:$0xff]  ;;  %1817 = vmatpush3.msra.mxu1 %v334_v15  ;;  %1807 = vmatprep.subr.mxu0 %v329_v16  ;;  %s278_s29 = scalar_lea.vmem %s2209_s7, %s1747_s26 }
   0xf   : > { %v284_v2 = vsel %vm283_vm0, %v2025_v0, 0.0  ;;  %v287_v3 = vsel %vm283_vm0, %v2027_v1, 0.0  ;;  %1818 = vmatprep.subr.mxu1 %v333_v17  ;;  %1808 = vmatpush3.msra.mxu0 %v329_v16  ;;  %v331_v21 = vld [vmem:[%s2206_s4] sm:$0xff] }
  0x10   : > { %285 = vadd.xlane.f32.xlu0 %v284_v2  ;;  %1819 = vmatpush3.msra.mxu1 %v333_v17  ;;  %v1706_v29 = vld [vmem:[%s2203_s1] ss:$0 sm:$0xff] }
  0x11   : > { %1809 = vmatprep.subr.mxu0 %v328_v18  ;;  %1820 = vmatprep.subr.mxu1 %v332_v19  ;;  %v1707_v31 = vld [vmem:[%s2204_s2] ss:$0 sm:$0xff] }
  0x12   : > { %1810 = vmatpush3.msra.mxu0 %v328_v18  ;;  %1821 = vmatpush3.msra.mxu1 %v332_v19 }
  0x13   : > { %1811 = vmatprep.subr.mxu0 %v327_v20  ;;  %1822 = vmatprep.subr.mxu1 %v331_v21 }
  0x14   : > { %288 = vadd.xlane.f32.xlu0 %v287_v3  ;;  %1812 = vmatpush3.msra.mxu0 %v327_v20  ;;  %v336_v20 = vld [vmem:[%s2207_s5 + $0x8] sm:$0xff] }
  0x15   : > { %1823 = vmatpush3.msra.mxu1 %v331_v21 }
  0x99   : > { %v286_v4 = vpop.xlane.xlu0 %285 }
  0x9a   : > { %v291_v5 = vmul.f32 0.03125, %v286_v4 }
  0x9c   : > { %v293_v6 = vsub.f32 %v2025_v0, %v291_v5 }
  0x9d   : > { %v289_v7 = vpop.xlane.xlu0 %288 }
  0x9e   : > { %v292_v8 = vmul.f32 0.03125, %v289_v7  ;;  %v295_v9 = vmul.f32 %v293_v6, %v293_v6 }
  0xa0   : > { %v294_v10 = vsub.f32 %v2027_v1, %v292_v8  ;;  %v297_v11 = vsel %vm283_vm0, %v295_v9, 0.0 }
  0xa1   : > { %298 = vadd.xlane.f32.xlu1 %v297_v11 }
  0xa2   : > { %v296_v12 = vmul.f32 %v294_v10, %v294_v10 }
  0xa4   : > { %v300_v13 = vsel %vm283_vm0, %v296_v12, 0.0 }
  0xa5   : > { %301 = vadd.xlane.f32.xlu1 %v300_v13 }
 0x12a   : > { %v299_v22 = vpop.xlane.xlu1 %298 }
 0x12b   : > { %v303_v23 = vmul.f32 0.03125, %v299_v22 }
 0x12d   : > { %v305_v24 = vadd.f32 1e-05, %v303_v23  ;;  %v335_v23 = vld [vmem:[%s2207_s5] sm:$0xff] }
 0x12e   : > { %v302_v25 = vpop.xlane.xlu1 %301 }
 0x12f   : > { %1918 = vrsqrt.f32 %v305_v24  ;;  %v304_v26 = vmul.f32 0.03125, %v302_v25 }
 0x131   : > { %v306_v27 = vadd.f32 1e-05, %v304_v26 }
 0x133   : > { %1920 = vrsqrt.f32 %v306_v27 }
 0x13c   : > { %v1919_v28 = vpop.eup %1918 }
 0x13d   : > { %v309_v30 = vmul.f32 %v1919_v28, %v293_v6 }
 0x13f   : > { %v317_v32 = vmul.f32 %v1706_v29, %v309_v30 }
 0x140   : > { %v1921_v33 = vpop.eup %1920 }
 0x141   : > { %v310_v34 = vmul.f32 %v1921_v33, %v294_v10  ;;  %v325_v35 = vadd.f32 %v1707_v31, %v317_v32 }
 0x143   : > { %v318_v36 = vmul.f32 %v1706_v29, %v310_v34  ;;  %1813 = vmatprep.mubr.msk.f32.mxu0 %vm283_vm0, %v325_v35  ;;  %1824 = vmatprep.mubr.msk.f32.mxu1 %vm283_vm0, %v325_v35 }
 0x145   : > { %v326_v37 = vadd.f32 %v1707_v31, %v318_v36 }
 0x147   : > { %1814 = vmatmul.mubr.msk.f32.vlgmr.msra.gmra.mxu0 %vm283_vm0, %v326_v37  ;;  %1825 = vmatmul.mubr.msk.f32.vlgmr.msra.gmra.mxu1 %vm283_vm0, %v326_v37 }
 0x207   : > { %v2071_v38 = vpop.f32.mrf.mxu0  ;;  %v2073_v39 = vpop.f32.mrf.mxu1 }
 0x208   : > { %1827 = vmatprep.subr.msk.mxu0 %vm495_vm1, %v2073_v39 }
 0x209   : > { %v2077_v40 = vpop.f32.mrf.mxu0  ;;  %v2079_v41 = vpop.f32.mrf.mxu1  ;;  %1828 = vmatpush3.xpose.msk.msra.mxu0 %vm495_vm1, %v2073_v39 }
 0x20a   : > { %1829 = vmatprep.subr.msk.mxu0 %vm495_vm1, %v2079_v41  ;;  %1831 = vmatprep.mubr.msk.f32.mxu0 %vm495_vm1, %v2077_v40 }
 0x20d   : > { %1830 = vmatpush3.xpose.msk.msra.mxu0 %vm495_vm1, %v2079_v41 }
 0x210   : > { %1832 = vmatmul.mubr.msk.f32.vlgmr.msra.gmra.mxu0 %vm495_vm1, %v2071_v38 }
 0x2d0   : > { %v1833_v42 = vpop.f32.mrf.mxu0 }
 0x2d1   : > { %v584_v43 = vmul.f32 0.35355338, %v1833_v42 }
 0x2d2   : > { %v574_v44 = vpop.f32.mrf.mxu0 }
 0x2d3   : > { %v583_v45 = vmul.f32 0.35355338, %v574_v44  ;;  %v589_v46 = vsel %vm585_vm2, %v584_v43, -inf }
 0x2d4   : > { %590 = vmax.xlane.f32.xlu1 %v589_v46 }
 0x2d5   : > { %v586_v47 = vsel %vm585_vm2, %v583_v45, -inf }
 0x2d6   : > { %587 = vmax.xlane.f32.xlu0 %v586_v47 }
 0x2e5   : > { %606 = vrot.lane.b32.xlu1 %v2079_v41, %s1962_s30 }
 0x2e9   : > { %701 = vrot.lane.b32.xlu1 %v2073_v39, %s1963_s8 }
 0x2ec   : > { %608 = vrot.lane.b32.xlu0 %v2073_v39, %s1962_s30 }
 0x2ed   : > { %699 = vrot.lane.b32.xlu1 %v2079_v41, %s1963_s8 }
 0x2f0   : > { %695 = vrot.lane.b32.xlu0 %v2077_v40, %s1963_s8 }
 0x2f1   : > { %697 = vrot.lane.b32.xlu1 %v2071_v38, %s1963_s8 }
 0x35d   : > { %v591_v48 = vpop.xlane.xlu1 %590 }
 0x35e   : > { %v593_v49 = vsub.f32 %v584_v43, %v591_v48 }
 0x35f   : > { %v588_v50 = vpop.xlane.xlu0 %587 }
 0x360   : > { %v592_v51 = vsub.f32 %v583_v45, %v588_v50  ;;  %v596_v52 = vmul.f32 1.442695, %v593_v49 }
 0x361   : > { %v607_v53 = vpop.permute.xlu1 %606 }
 0x362   : > { %v594_v54 = vmul.f32 1.442695, %v592_v51 }
 0x363   : > { %v609_v55 = vpop.permute.xlu0 %608 }
 0x364   : > { %1922 = vpow2.f32 %v594_v54  ;;  %1834 = vmatprep.subr.mxu1 %v609_v55 }
 0x365   : > { %1924 = vpow2.f32 %v596_v52  ;;  %1835 = vmatpush3.msra.mxu1 %v609_v55  ;;  %v702_v56 = vpop.permute.xlu1 %701 }
 0x366   : > { %1836 = vmatprep.subr.mxu1 %v607_v53 }
 0x367   : > { %1837 = vmatpush3.msra.mxu1 %v607_v53  ;;  %v696_v59 = vpop.permute.xlu0 %695 }
 0x368   : > { %1841 = vmatprep.subr.msk.mxu1 %vm495_vm1, %v702_v56 }
 0x369   : > { %v700_v60 = vpop.permute.xlu1 %699 }
 0x36d   : > { %v698_v61 = vpop.permute.xlu1 %697 }
 0x371   : > { %v1923_v57 = vpop.eup %1922 }
 0x372   : > { %v1925_v58 = vpop.eup %1924  ;;  %1838 = vmatprep.mubr.msk.f32.mxu1 %vm585_vm2, %v1923_v57  ;;  %v598_v22 = vsel %vm585_vm2, %v1923_v57, 0.0 }
 0x373   : > { %1839 = vmatmul.mubr.msk.f32.vlgmr.msra.gmra.mxu1 %vm585_vm2, %v1925_v58  ;;  %v601_v21 = vsel %vm585_vm2, %v1925_v58, 0.0 }
 0x374   : > { %1842 = vmatpush3.xpose.msk.msra.mxu1 %vm495_vm1, %v702_v56  ;;  %1845 = vmatprep.mubr.msk.f32.mxu1 %vm495_vm1, %v696_v59 }
 0x375   : > { %1843 = vmatprep.subr.msk.mxu1 %vm495_vm1, %v700_v60 }
 0x378   : > { %1844 = vmatpush3.xpose.msk.msra.mxu1 %vm495_vm1, %v700_v60 }
 0x379   : > { %1860 = vmatprep.subr.mxu1 %v335_v23 }
 0x37b   : > { %1846 = vmatmul.mubr.msk.f32.vlgmr.msra.gmra.mxu1 %vm495_vm1, %v698_v61 }
 0x37c   : > { %1861 = vmatpush3.msra.mxu1 %v335_v23 }
 0x433   : > { %v2107_v62 = vpop.f32.mrf.mxu1 }
 0x435   : > { %v2109_v63 = vpop.f32.mrf.mxu1 }
 0x43b   : > { %v1847_v2 = vpop.f32.mrf.mxu1 }
 0x43c   : > { %v787_v3 = vmul.f32 0.35355338, %v1847_v2 }
 0x43d   : > { %v777_v4 = vpop.f32.mrf.mxu1 }
 0x43e   : > { %v786_v5 = vmul.f32 0.35355338, %v777_v4  ;;  %v791_v6 = vsel %vm585_vm2, %v787_v3, -inf }
 0x43f   : > { %792 = vmax.xlane.f32.xlu1 %v791_v6 }
 0x440   : > { %v788_v7 = vsel %vm585_vm2, %v786_v5, -inf }
 0x441   : > { %789 = vmax.xlane.f32.xlu0 %v788_v7 }
 0x450   : > { %808 = vrot.lane.b32.xlu1 %v2079_v41, %s1964_s9 }
 0x457   : > { %810 = vrot.lane.b32.xlu0 %v2073_v39, %s1964_s9 }
 0x4c8   : > { %v793_v8 = vpop.xlane.xlu1 %792 }
 0x4c9   : > { %v795_v9 = vsub.f32 %v787_v3, %v793_v8 }
 0x4ca   : > { %v790_v10 = vpop.xlane.xlu0 %789 }
 0x4cb   : > { %v798_v11 = vmul.f32 1.442695, %v795_v9  ;;  %v794_v12 = vsub.f32 %v786_v5, %v790_v10 }
 0x4cc   : > { %v809_v15 = vpop.permute.xlu1 %808 }
 0x4cd   : > { %1926 = vpow2.f32 %v798_v11  ;;  %v796_v13 = vmul.f32 1.442695, %v794_v12 }
 0x4ce   : > { %v811_v14 = vpop.permute.xlu0 %810 }
 0x4cf   : > { %1928 = vpow2.f32 %v796_v13  ;;  %1848 = vmatprep.subr.mxu0 %v811_v14 }
 0x4d0   : > { %1849 = vmatpush3.msra.mxu0 %v811_v14  ;;  %v337_v14 = vld [vmem:[%s2207_s5 + $0x10] sm:$0xff] }
 0x4d1   : > { %1850 = vmatprep.subr.mxu0 %v809_v15 }
 0x4d2   : > { %1851 = vmatpush3.msra.mxu0 %v809_v15 }
 0x4d3   : > { %1855 = vmatprep.subr.mxu0 %v336_v20 }
 0x4da   : > { %v1927_v16 = vpop.eup %1926 }
 0x4db   : > { %v803_v17 = vsel %vm585_vm2, %v1927_v16, 0.0 }
 0x4dc   : > { %v1929_v18 = vpop.eup %1928  ;;  %804 = vadd.xlane.f32.xlu1 %v803_v17 }
 0x4dd   : > { %1852 = vmatprep.mubr.msk.f32.mxu0 %vm585_vm2, %v1929_v18  ;;  %v800_v19 = vsel %vm585_vm2, %v1929_v18, 0.0 }
 0x4de   : > { %801 = vadd.xlane.f32.xlu0 %v800_v19  ;;  %1853 = vmatmul.mubr.msk.f32.vlgmr.msra.gmra.mxu0 %vm585_vm2, %v1927_v16 }
 0x4df   : > { %1856 = vmatpush3.msra.mxu0 %v336_v20 }
 0x4ed   : > { %1063 = vrot.lane.b32.xlu1 %v2079_v41, %s1965_s12 }
 0x4f1   : > { %1061 = vrot.lane.b32.xlu1 %v2071_v38, %s1965_s12 }
 0x4f4   : > { %1065 = vrot.lane.b32.xlu0 %v2073_v39, %s1965_s12 }
 0x4f5   : > { %1348 = vrot.lane.b32.xlu1 %v2079_v41, %s1966_s13 }
 0x4f8   : > { %1059 = vrot.lane.b32.xlu0 %v2077_v40, %s1965_s12 }
 0x4f9   : > { %1346 = vrot.lane.b32.xlu1 %v2071_v38, %s1966_s13 }
 0x4fc   : > { %1350 = vrot.lane.b32.xlu0 %v2073_v39, %s1966_s13 }
 0x500   : > { %1344 = vrot.lane.b32.xlu0 %v2077_v40, %s1966_s13 }
 0x51d   : > { %602 = vadd.xlane.f32.xlu1 %v601_v21 }
 0x51f   : > { %599 = vadd.xlane.f32.xlu0 %v598_v22 }
 0x52e   : > { %1172 = vrot.lane.b32.xlu1 %v2079_v41, %s1967_s14 }
 0x565   : > { %v805_v26 = vpop.xlane.xlu1 %804 }
 0x567   : > { %v802_v24 = vpop.xlane.xlu0 %801 }
 0x568   : > { %1930 = vrcp.f32 %v802_v24 }
 0x569   : > { %v1064_v27 = vpop.permute.xlu1 %1063  ;;  %1932 = vrcp.f32 %v805_v26 }
 0x56b   : > { %v1066_v25 = vpop.permute.xlu0 %1065 }
 0x56c   : > { %1865 = vmatprep.subr.msk.mxu0 %vm495_vm1, %v1066_v25 }
 0x56d   : > { %v1062_v28 = vpop.permute.xlu1 %1061 }
 0x56f   : > { %v1060_v29 = vpop.permute.xlu0 %1059 }
 0x571   : > { %v1349_v30 = vpop.permute.xlu1 %1348 }
 0x573   : > { %v1351_v31 = vpop.permute.xlu0 %1350 }
 0x575   : > { %v1931_v33 = vpop.eup %1930  ;;  %v1347_v37 = vpop.permute.xlu1 %1346 }
 0x576   : > { %v1933_v35 = vpop.eup %1932 }
 0x577   : > { %v1345_v40 = vpop.permute.xlu0 %1344 }
 0x59e   : > { %v1854_v32 = vpop.f32.mrf.mxu0 }
 0x59f   : > { %v896_v38 = vmul.f32 %v1933_v35, %v1854_v32 }
 0x5a0   : > { %v886_v34 = vpop.f32.mrf.mxu0 }
 0x5a1   : > { %v895_v36 = vmul.f32 %v1931_v33, %v886_v34  ;;  %v338_v34 = vld [vmem:[%s2207_s5 + $0x18] sm:$0xff] }
 0x5a3   : > { %1857 = vmatprep.mubr.msk.f32.mxu0 %vm495_vm1, %v895_v36 }
 0x5a4   : > { %1858 = vmatmul.mubr.msk.f32.vlgmr.msra.gmra.mxu0 %vm495_vm1, %v896_v38 }
 0x5a5   : > { %1866 = vmatpush3.xpose.msk.msra.mxu0 %vm495_vm1, %v1066_v25  ;;  %1869 = vmatprep.mubr.msk.f32.mxu0 %vm495_vm1, %v1060_v29 }
 0x5a6   : > { %1867 = vmatprep.subr.msk.mxu0 %vm495_vm1, %v1064_v27  ;;  %v603_v42 = vpop.xlane.xlu1 %602 }
 0x5a7   : > { %1934 = vrcp.f32 %v603_v42 }
 0x5a8   : > { %v600_v43 = vpop.xlane.xlu0 %599 }
 0x5a9   : > { %1868 = vmatpush3.xpose.msk.msra.mxu0 %vm495_vm1, %v1064_v27  ;;  %1936 = vrcp.f32 %v600_v43 }
 0x5aa   : > { %1884 = vmatprep.subr.msk.mxu0 %vm495_vm1, %v1351_v31  ;;  %v1173_v9 = vpop.permute.xlu1 %1172 }
 0x5ac   : > { %1870 = vmatmul.mubr.msk.f32.vlgmr.msra.gmra.mxu0 %vm495_vm1, %v1062_v28 }
 0x5ad   : > { %1885 = vmatpush3.xpose.msk.msra.mxu0 %vm495_vm1, %v1351_v31  ;;  %1888 = vmatprep.mubr.msk.f32.mxu0 %vm495_vm1, %v1345_v40 }
 0x5ae   : > { %1886 = vmatprep.subr.msk.mxu0 %vm495_vm1, %v1349_v30 }
 0x5b1   : > { %1887 = vmatpush3.xpose.msk.msra.mxu0 %vm495_vm1, %v1349_v30 }
 0x5b4   : > { %1889 = vmatmul.mubr.msk.f32.vlgmr.msra.gmra.mxu0 %vm495_vm1, %v1347_v37  ;;  %v1935_v44 = vpop.eup %1934 }
 0x5b5   : > { %v694_v47 = vmul.f32 %v1935_v44, %v2107_v62 }
 0x5b6   : > { %v1937_v45 = vpop.eup %1936 }
 0x5b7   : > { %v693_v46 = vmul.f32 %v1937_v45, %v2109_v63 }
 0x5b9   : > { %1862 = vmatprep.mubr.msk.f32.mxu1 %vm495_vm1, %v693_v46 }
 0x5ba   : > { %1863 = vmatmul.mubr.msk.f32.vlgmr.msra.gmra.mxu1 %vm495_vm1, %v694_v47 }
 0x664   : > { %v1859_v48 = vpop.f32.mrf.mxu0 }
 0x666   : > { %v2155_v49 = vpop.f32.mrf.mxu0 }
 0x66c   : > { %v1871_v50 = vpop.f32.mrf.mxu0 }
 0x66d   : > { %v1151_v51 = vmul.f32 0.35355338, %v1871_v50 }
 0x66e   : > { %v1141_v52 = vpop.f32.mrf.mxu0 }
 0x66f   : > { %v1150_v53 = vmul.f32 0.35355338, %v1141_v52  ;;  %v1155_v54 = vsel %vm585_vm2, %v1151_v51, -inf }
 0x670   : > { %1156 = vmax.xlane.f32.xlu0 %v1155_v54 }
 0x671   : > { %v1152_v55 = vsel %vm585_vm2, %v1150_v53, -inf }
 0x674   : > { %1153 = vmax.xlane.f32.xlu0 %v1152_v55  ;;  %v1890_v56 = vpop.f32.mrf.mxu0 }
 0x675   : > { %v1436_v57 = vmul.f32 0.35355338, %v1890_v56 }
 0x676   : > { %v1426_v61 = vpop.f32.mrf.mxu0 }
 0x677   : > { %v1440_v58 = vsel %vm585_vm2, %v1436_v57, -inf  ;;  %v1435_v62 = vmul.f32 0.35355338, %v1426_v61 }
 0x678   : > { %1441 = vmax.xlane.f32.xlu1 %v1440_v58 }
 0x679   : > { %v1437_v63 = vsel %vm585_vm2, %v1435_v62, -inf }
 0x67a   : > { %v1864_v59 = vpop.f32.mrf.mxu1 }
 0x67b   : > { %v2160_v60 = vadd.f32 %v1864_v59, %v1859_v48 }
 0x67c   : > { %v1050_v26 = vpop.f32.mrf.mxu1 }
 0x67d   : > { %v1051_v38 = vadd.f32 %v1050_v26, %v2155_v49  ;;  %v1744_v49 = vld [vmem:[%s2208_s6] ss:$0 sm:$0xff] }
 0x68a   : > { %1174 = vrot.lane.b32.xlu0 %v2073_v39, %s1967_s14 }
 0x6a9   : > { %1438 = vmax.xlane.f32.xlu0 %v1437_v63 }
 0x6f9   : > { %v1157_v2 = vpop.xlane.xlu0 %1156 }
 0x6fa   : > { %v1159_v3 = vsub.f32 %v1151_v51, %v1157_v2 }
 0x6fc   : > { %v1162_v4 = vmul.f32 1.442695, %v1159_v3 }
 0x6fd   : > { %v1154_v5 = vpop.xlane.xlu0 %1153 }
 0x6fe   : > { %1938 = vpow2.f32 %v1162_v4  ;;  %v1158_v6 = vsub.f32 %v1150_v53, %v1154_v5 }
 0x700   : > { %v1160_v7 = vmul.f32 1.442695, %v1158_v6 }
 0x701   : > { %v1175_v8 = vpop.permute.xlu0 %1174  ;;  %v1442_v15 = vpop.xlane.xlu1 %1441 }
 0x702   : > { %1940 = vpow2.f32 %v1160_v7  ;;  %1872 = vmatprep.subr.mxu1 %v1175_v8  ;;  %v1444_v16 = vsub.f32 %v1436_v57, %v1442_v15 }
 0x703   : > { %1873 = vmatpush3.msra.mxu1 %v1175_v8 }
 0x704   : > { %1874 = vmatprep.subr.mxu1 %v1173_v9  ;;  %v1447_v17 = vmul.f32 1.442695, %v1444_v16 }
 0x705   : > { %1875 = vmatpush3.msra.mxu1 %v1173_v9 }
 0x706   : > { %1879 = vmatprep.subr.mxu1 %v337_v14  ;;  %1942 = vpow2.f32 %v1447_v17 }
 0x70b   : > { %v1939_v10 = vpop.eup %1938 }
 0x70c   : > { %v1167_v11 = vsel %vm585_vm2, %v1939_v10, 0.0 }
 0x70d   : > { %1168 = vadd.xlane.f32.xlu0 %v1167_v11 }
 0x70f   : > { %v1941_v12 = vpop.eup %1940 }
 0x710   : > { %1876 = vmatprep.mubr.msk.f32.mxu1 %vm585_vm2, %v1941_v12  ;;  %v1164_v13 = vsel %vm585_vm2, %v1941_v12, 0.0 }
 0x711   : > { %1165 = vadd.xlane.f32.xlu1 %v1164_v13  ;;  %1877 = vmatmul.mubr.msk.f32.vlgmr.msra.gmra.mxu1 %vm585_vm2, %v1939_v10 }
 0x712   : > { %1880 = vmatpush3.msra.mxu1 %v337_v14 }
 0x713   : > { %v1943_v21 = vpop.eup %1942 }
 0x714   : > { %v1452_v22 = vsel %vm585_vm2, %v1943_v21, 0.0 }
 0x722   : > { %1457 = vrot.lane.b32.xlu1 %v2079_v41, %s1968_s19 }
 0x723   : > { %1459 = vrot.lane.b32.xlu0 %v2073_v39, %s1968_s19 }
 0x732   : > { %v1439_v18 = vpop.xlane.xlu0 %1438 }
 0x733   : > { %v1443_v19 = vsub.f32 %v1435_v62, %v1439_v18 }
 0x735   : > { %v1445_v20 = vmul.f32 1.442695, %v1443_v19 }
 0x737   : > { %1944 = vpow2.f32 %v1445_v20 }
 0x742   : > { %1453 = vadd.xlane.f32.xlu0 %v1452_v22 }
 0x744   : > { %v1945_v23 = vpop.eup %1944 }
 0x745   : > { %v1449_v24 = vsel %vm585_vm2, %v1945_v23, 0.0 }
 0x746   : > { %1450 = vadd.xlane.f32.xlu1 %v1449_v24 }
 0x796   : > { %v1169_v25 = vpop.xlane.xlu0 %1168 }
 0x79a   : > { %v1460_v41 = vpop.permute.xlu0 %1459  ;;  %v1166_v39 = vpop.xlane.xlu1 %1165 }
 0x79b   : > { %1891 = vmatprep.subr.mxu1 %v1460_v41  ;;  %1946 = vrcp.f32 %v1166_v39 }
 0x79c   : > { %1948 = vrcp.f32 %v1169_v25 }
 0x79e   : > { %v1458_v33 = vpop.permute.xlu1 %1457 }
 0x7a8   : > { %v1947_v28 = vpop.eup %1946 }
 0x7a9   : > { %v1949_v30 = vpop.eup %1948 }
 0x7cb   : > { %v1454_v36 = vpop.xlane.xlu0 %1453 }
 0x7cf   : > { %v1451_v35 = vpop.xlane.xlu1 %1450 }
 0x7d0   : > { %1950 = vrcp.f32 %v1451_v35 }
 0x7d1   : > { %v1878_v27 = vpop.f32.mrf.mxu1  ;;  %1952 = vrcp.f32 %v1454_v36 }
 0x7d2   : > { %v1260_v32 = vmul.f32 %v1949_v30, %v1878_v27 }
 0x7d3   : > { %v1250_v29 = vpop.f32.mrf.mxu1 }
 0x7d4   : > { %v1259_v31 = vmul.f32 %v1947_v28, %v1250_v29 }
 0x7d6   : > { %1881 = vmatprep.mubr.msk.f32.mxu1 %vm495_vm1, %v1259_v31 }
 0x7d7   : > { %1882 = vmatmul.mubr.msk.f32.vlgmr.msra.gmra.mxu1 %vm495_vm1, %v1260_v32 }
 0x7d8   : > { %1892 = vmatpush3.msra.mxu1 %v1460_v41  ;;  %1895 = vmatprep.mubr.msk.f32.mxu1 %vm585_vm2, %v1945_v23 }
 0x7d9   : > { %1893 = vmatprep.subr.mxu1 %v1458_v33 }
 0x7da   : > { %1894 = vmatpush3.msra.mxu1 %v1458_v33 }
 0x7db   : > { %1896 = vmatmul.mubr.msk.f32.vlgmr.msra.gmra.mxu1 %vm585_vm2, %v1943_v21  ;;  %1898 = vmatprep.subr.mxu1 %v338_v34 }
 0x7dc   : > { %1899 = vmatpush3.msra.mxu1 %v338_v34 }
 0x7dd   : > { %v1951_v45 = vpop.eup %1950 }
 0x7de   : > { %v1953_v47 = vpop.eup %1952 }
 0x897   : > { %v1883_v37 = vpop.f32.mrf.mxu1 }
 0x898   : > { %v1343_v40 = vadd.f32 %v1883_v37, %v2160_v60 }
 0x899   : > { %v1333_v42 = vpop.f32.mrf.mxu1 }
 0x89a   : > { %v1342_v43 = vadd.f32 %v1333_v42, %v1051_v38 }
 0x89b   : > { %v1897_v44 = vpop.f32.mrf.mxu1 }
 0x89c   : > { %v1545_v50 = vmul.f32 %v1953_v47, %v1897_v44 }
 0x89d   : > { %v1535_v46 = vpop.f32.mrf.mxu1 }
 0x89e   : > { %v1544_v48 = vmul.f32 %v1951_v45, %v1535_v46 }
 0x8a0   : > { %1900 = vmatprep.mubr.msk.f32.mxu1 %vm495_vm1, %v1544_v48 }
 0x8a1   : > { %1901 = vmatmul.mubr.msk.f32.vlgmr.msra.gmra.mxu1 %vm495_vm1, %v1545_v50 }
 0x961   : > { %v1902_v51 = vpop.f32.mrf.mxu1 }
 0x962   : > { %v1628_v52 = vadd.f32 %v1902_v51, %v1343_v40 }
 0x963   : > { %v1618_v53 = vpop.f32.mrf.mxu1 }
 0x964   : > { %v1637_v54 = vadd.f32 %v1744_v49, %v1628_v52  ;;  %v1627_v55 = vadd.f32 %v1618_v53, %v1342_v43 }
 0x966   : > { %v1639_v56 = vadd.f32 %v1637_v54, %v2027_v1  ;;  %v1636_v57 = vadd.f32 %v1744_v49, %v1627_v55 }
 0x968   : > { %1641 = vst.msk [vmem:[%s278_s29 + $0x8] sm:$0xff] %vm283_vm0, %v1639_v56  ;;  %v1638_v58 = vadd.f32 %v1636_v57, %v2025_v0 }
 0x96a   : > { %1640 = vst.msk [vmem:[%s278_s29] sm:$0xff] %vm283_vm0, %v1638_v58 }
 0x96b PF: > { %s17_s24 = sadd.s32 1, %s1960_s24  }
 0x96c   : > { %p14_p4 = scmp.ge.s32.totalorder %s17_s24, 4  }
 0x96e   :  { %16 = sbr.rel (!%p14_p4) target bundleno = 1 (0x1), region = 78 }

// kernel: pali_forward.23
= control target key start
LH: loop header
LB: loop body
LE: loop exit
PB: predicated region body
PF: predicated region fallthrough
CT: control target
= control target key end

     0   :  { %s331_s12 = smov 0   ;;  %s367_s0 = inlined_call_operand.vmem [shape: f32[2,16,32], index: 0, kind: input, shape index: {}]   ;;  %s368_s1 = inlined_call_operand.vmem [shape: f32[1,32], index: 1, kind: input, shape index: {}]   ;;  %s369_s2 = inlined_call_operand.vmem [shape: f32[1,32], index: 2, kind: input, shape index: {}]   ;;  %s370_s3 = inlined_call_operand.vmem [shape: f32[2,16,32], index: 3, kind: output, shape index: {}]  }
   0x1 LB: > { %s276_s13 = sadd.s32 4294967295, %s309_s12   ;;  %p280_p0 = scmp.ge.s32.totalorder %s309_s12, 1  ;;  %s309_s12 = sphi %s331_s12, %s13_s12  }
   0x2   : > { %p137_p1 = scmp.lt.s32.totalorder %s309_s12, 3 }
   0x4   : > { %p138_p2 = pnand %p280_p0, %p137_p1 }
   0x5   : > { %p161_p3 = scmp.lt.s32.totalorder (!%p138_p2), %s276_s13, 1 }
   0x6   : > { %141 = sbr.rel (%p138_p2) target bundleno = 328 (0x148), region = 32 }
   0xb   : > { %s372_s13 = smov (!%p161_p3, %s276_s13), 1  ;;  %vm175_vm0 = vcmask 261120   ;;  %v285_v21 = vld [vmem:[%s368_s1] ss:$0 sm:$0xff] }
   0xc   : > { %s289_s14 = sshll.u32 %s372_s13, 4  ;;  %v286_v23 = vld [vmem:[%s369_s2] ss:$0 sm:$0xff] }
   0xd   : > { %s165_s17 = scalar_lea.vmem %s367_s0, %s289_s14  ;;  %s170_s24 = scalar_lea.vmem %s370_s3, %s289_s14 }
   0xe   : > { %v171_v0 = vld [vmem:[%s165_s17] sm:$0xff]  ;;  %v172_v1 = vld [vmem:[%s165_s17 + $0x8] sm:$0xff] }
   0xf   : > { %v176_v2 = vsel %vm175_vm0, %v171_v0, 0.0  ;;  %v179_v3 = vsel %vm175_vm0, %v172_v1, 0.0 }
  0x10   : > { %177 = vadd.xlane.f32.xlu0 %v176_v2 }
  0x14   : > { %180 = vadd.xlane.f32.xlu0 %v179_v3 }
  0x99   : > { %v178_v4 = vpop.xlane.xlu0 %177 }
  0x9a   : > { %v183_v5 = vmul.f32 0.03125, %v178_v4 }
  0x9c   : > { %v185_v6 = vsub.f32 %v171_v0, %v183_v5 }
  0x9d   : > { %v181_v7 = vpop.xlane.xlu0 %180 }
  0x9e   : > { %v184_v8 = vmul.f32 0.03125, %v181_v7  ;;  %v187_v9 = vmul.f32 %v185_v6, %v185_v6 }
  0xa0   : > { %v186_v10 = vsub.f32 %v172_v1, %v184_v8  ;;  %v189_v11 = vsel %vm175_vm0, %v187_v9, 0.0 }
  0xa1   : > { %190 = vadd.xlane.f32.xlu1 %v189_v11 }
  0xa2   : > { %v188_v12 = vmul.f32 %v186_v10, %v186_v10 }
  0xa4   : > { %v192_v13 = vsel %vm175_vm0, %v188_v12, 0.0 }
  0xa5   : > { %193 = vadd.xlane.f32.xlu1 %v192_v13 }
 0x12a   : > { %v191_v14 = vpop.xlane.xlu1 %190 }
 0x12b   : > { %v195_v15 = vmul.f32 0.03125, %v191_v14 }
 0x12d   : > { %v197_v16 = vadd.f32 1e-05, %v195_v15 }
 0x12e   : > { %v194_v17 = vpop.xlane.xlu1 %193 }
 0x12f   : > { %299 = vrsqrt.f32 %v197_v16  ;;  %v196_v18 = vmul.f32 0.03125, %v194_v17 }
 0x131   : > { %v198_v19 = vadd.f32 1e-05, %v196_v18 }
 0x133   : > { %301 = vrsqrt.f32 %v198_v19 }
 0x13c   : > { %v300_v20 = vpop.eup %299 }
 0x13d   : > { %v201_v22 = vmul.f32 %v300_v20, %v185_v6 }
 0x13f   : > { %v209_v24 = vmul.f32 %v285_v21, %v201_v22 }
 0x140   : > { %v302_v25 = vpop.eup %301 }
 0x141   : > { %v217_v26 = vadd.f32 %v286_v23, %v209_v24  ;;  %v202_v27 = vmul.f32 %v302_v25, %v186_v10 }
 0x143   : > { %219 = vst.msk [vmem:[%s170_s24] sm:$0xff] %vm175_vm0, %v217_v26  ;;  %v210_v28 = vmul.f32 %v285_v21, %v202_v27 }
 0x145   : > { %v218_v29 = vadd.f32 %v286_v23, %v210_v28 }
 0x147   : > { %220 = vst.msk [vmem:[%s170_s24 + $0x8] sm:$0xff] %vm175_vm0, %v218_v29 }
 0x148 PF: > { %s13_s12 = sadd.s32 1, %s309_s12  }
 0x149   : > { %p10_p4 = scmp.ge.s32.totalorder %s13_s12, 4  }
 0x14b   :  { %12 = sbr.rel (!%p10_p4) target bundleno = 1 (0x1), region = 62 }

// kernel: pali_forward.25
= control target key start
LH: loop header
LB: loop body
LE: loop exit
PB: predicated region body
PF: predicated region fallthrough
CT: control target
= control target key end

     0   :  { %s807_s24 = smov 0   ;;  %s962_s0 = inlined_call_operand.vmem [shape: f32[2,24,32], index: 0, kind: input, shape index: {}]   ;;  %s963_s1 = inlined_call_operand.vmem [shape: f32[1,32], index: 1, kind: input, shape index: {}]   ;;  %s964_s2 = inlined_call_operand.vmem [shape: f32[1,32], index: 2, kind: input, shape index: {}]   ;;  %s965_s3 = inlined_call_operand.vmem [shape: f32[32,128], index: 3, kind: input, shape index: {}]   ;;  %s966_s4 = inlined_call_operand.vmem [shape: f32[1,128], index: 4, kind: input, shape index: {}]   ;;  %s967_s5 = inlined_call_operand.vmem [shape: f32[128,32], index: 5, kind: input, shape index: {}]   ;;  %s968_s6 = inlined_call_operand.vmem [shape: f32[1,32], index: 6, kind: input, shape index: {}]   ;;  %s969_s7 = inlined_call_operand.vmem [shape: f32[2,24,32], index: 7, kind: output, shape index: {}]  }
   0x1 LB: > { %s634_s25 = sadd.s32 4294967295, %s763_s24   ;;  %p638_p0 = scmp.ge.s32.totalorder %s763_s24, 1  ;;  %s763_s24 = sphi %s807_s24, %s17_s24  }
   0x2   : > { %p237_p1 = scmp.lt.s32.totalorder %s763_s24, 3 }
   0x4   : > { %p238_p2 = pnand %p638_p0, %p237_p1 }
   0x5   : > { %p269_p3 = scmp.lt.s32.totalorder (!%p238_p2), %s634_s25, 1 }
   0x6   : > { %241 = sbr.rel (%p238_p2) target bundleno = 756 (0x2f4), region = 48 }
   0xb   : > { %s971_s25 = smov (!%p269_p3, %s634_s25), 1  ;;  %vm284_vm0 = vcmask 261120   ;;  %v346_v21 = vld [vmem:[%s965_s3 + $0x18] sm:$0xff]  ;;  %v765_v22 = vmov 0.0   ;;  %v345_v23 = vld [vmem:[%s965_s3 + $0x10] sm:$0xff]  ;;  %vm766_vm1 = vmmov 0  }
   0xc   : > { %s734_s26 = smul.u32 24, %s971_s25  ;;  %676 = vmatprep.subr.mxu0 %v765_v22  ;;  %684 = vmatprep.mubr.msk.f32.mxu0 %vm766_vm1, %v765_v22  ;;  %v344_v24 = vld [vmem:[%s965_s3 + $0x8] sm:$0xff]  ;;  %v343_v25 = vld [vmem:[%s965_s3] sm:$0xff]  ;;  %v485_v49 = vld [vmem:[%s967_s5 + $0x78] sm:$0xff] }
   0xd   : > { %677 = vmatpush3.msra.mxu0 %v346_v21  ;;  %693 = vmatprep.subr.mxu1 %v765_v22  ;;  %v641_v36 = vld [vmem:[%s963_s1] ss:$0 sm:$0xff]  ;;  %v484_v50 = vld [vmem:[%s967_s5 + $0x70] sm:$0xff]  ;;  %v483_v51 = vld [vmem:[%s967_s5 + $0x68] sm:$0xff] }
   0xe   : > { %s273_s29 = scalar_lea.vmem %s962_s0, %s734_s26  ;;  %678 = vmatprep.subr.mxu0 %v765_v22  ;;  %725 = vmatprep.mubr.msk.f32.mxu1 %vm766_vm1, %v765_v22  ;;  %v642_v38 = vld [vmem:[%s964_s2] ss:$0 sm:$0xff]  ;;  %v481_v53 = vld [vmem:[%s967_s5 + $0x58] sm:$0xff]  ;;  %v480_v54 = vld [vmem:[%s967_s5 + $0x50] sm:$0xff]  ;;  %s278_s17 = scalar_lea.vmem %s969_s7, %s734_s26 }
   0xf   : > { %v823_v0 = vld [vmem:[%s273_s29] sm:$0xff]  ;;  %v825_v1 = vld [vmem:[%s273_s29 + $0x10] sm:$0xff]  ;;  %v827_v2 = vld [vmem:[%s273_s29 + $0x8] sm:$0xff]  ;;  %679 = vmatpush3.msra.mxu0 %v345_v23  ;;  %694 = vmatpush3.msra.mxu1 %v485_v49 }
  0x10   : > { %v285_v3 = vsel %vm284_vm0, %v823_v0, 0.0  ;;  %v291_v4 = vsel %vm284_vm0, %v825_v1, 0.0  ;;  %v288_v5 = vsel %vm284_vm0, %v827_v2, 0.0  ;;  %680 = vmatprep.subr.mxu0 %v765_v22  ;;  %695 = vmatprep.subr.mxu1 %v765_v22  ;;  %v482_v52 = vld [vmem:[%s967_s5 + $0x60] sm:$0xff]  ;;  %v479_v55 = vld [vmem:[%s967_s5 + $0x48] sm:$0xff]  ;;  %v477_v57 = vld [vmem:[%s967_s5 + $0x38] sm:$0xff] }
  0x11   : > { %286 = vadd.xlane.f32.xlu0 %v285_v3  ;;  %292 = vadd.xlane.f32.xlu1 %v291_v4  ;;  %v478_v56 = vld [vmem:[%s967_s5 + $0x40] sm:$0xff]  ;;  %v476_v58 = vld [vmem:[%s967_s5 + $0x30] sm:$0xff]  ;;  %v475_v59 = vld [vmem:[%s967_s5 + $0x28] sm:$0xff] }
  0x12   : > { %681 = vmatpush3.msra.mxu0 %v344_v24  ;;  %696 = vmatpush3.msra.mxu1 %v484_v50  ;;  %v474_v60 = vld [vmem:[%s967_s5 + $0x20] sm:$0xff]  ;;  %v473_v61 = vld [vmem:[%s967_s5 + $0x18] sm:$0xff]  ;;  %v472_v62 = vld [vmem:[%s967_s5 + $0x10] sm:$0xff] }
  0x13   : > { %682 = vmatprep.subr.mxu0 %v765_v22  ;;  %697 = vmatprep.subr.mxu1 %v765_v22  ;;  %v471_v63 = vld [vmem:[%s967_s5 + $0x8] sm:$0xff]  ;;  %v470_v3 = vld [vmem:[%s967_s5] sm:$0xff] }
  0x14   : > { %683 = vmatpush3.msra.mxu0 %v343_v25  ;;  %698 = vmatpush3.msra.mxu1 %v483_v51  ;;  %v643_v4 = vld [vmem:[%s966_s4] ss:$0 sm:$0xff] }
  0x15   : > { %289 = vadd.xlane.f32.xlu0 %v288_v5  ;;  %699 = vmatprep.subr.mxu1 %v765_v22 }
  0x16   : > { %700 = vmatpush3.msra.mxu1 %v482_v52 }
  0x17   : > { %701 = vmatprep.subr.mxu1 %v765_v22 }
  0x18   : > { %702 = vmatpush3.msra.mxu1 %v481_v53 }
  0x19   : > { %703 = vmatprep.subr.mxu1 %v765_v22 }
  0x1a   : > { %704 = vmatpush3.msra.mxu1 %v480_v54 }
  0x1b   : > { %705 = vmatprep.subr.mxu1 %v765_v22 }
  0x1c   : > { %706 = vmatpush3.msra.mxu1 %v479_v55 }
  0x1d   : > { %707 = vmatprep.subr.mxu1 %v765_v22 }
  0x1e   : > { %708 = vmatpush3.msra.mxu1 %v478_v56 }
  0x1f   : > { %709 = vmatprep.subr.mxu1 %v765_v22 }
  0x20   : > { %710 = vmatpush3.msra.mxu1 %v477_v57 }
  0x21   : > { %711 = vmatprep.subr.mxu1 %v765_v22 }
  0x22   : > { %712 = vmatpush3.msra.mxu1 %v476_v58 }
  0x23   : > { %713 = vmatprep.subr.mxu1 %v765_v22 }
  0x24   : > { %714 = vmatpush3.msra.mxu1 %v475_v59 }
  0x25   : > { %715 = vmatprep.subr.mxu1 %v765_v22 }
  0x26   : > { %716 = vmatpush3.msra.mxu1 %v474_v60 }
  0x27   : > { %717 = vmatprep.subr.mxu1 %v765_v22 }
  0x28   : > { %718 = vmatpush3.msra.mxu1 %v473_v61 }
  0x29   : > { %719 = vmatprep.subr.mxu1 %v765_v22 }
  0x2a   : > { %720 = vmatpush3.msra.mxu1 %v472_v62 }
  0x2b   : > { %721 = vmatprep.subr.mxu1 %v765_v22 }
  0x2c   : > { %722 = vmatpush3.msra.mxu1 %v471_v63 }
  0x2d   : > { %723 = vmatprep.subr.mxu1 %v765_v22 }
  0x2e   : > { %724 = vmatpush3.msra.mxu1 %v470_v3 }
  0x9a   : > { %v287_v6 = vpop.xlane.xlu0 %286  ;;  %v293_v7 = vpop.xlane.xlu1 %292 }
  0x9b   : > { %v295_v8 = vmul.f32 0.03125, %v287_v6  ;;  %v297_v9 = vmul.f32 0.03125, %v293_v7 }
  0x9d   : > { %v298_v10 = vsub.f32 %v823_v0, %v295_v8  ;;  %v300_v11 = vsub.f32 %v825_v1, %v297_v9 }
  0x9e   : > { %v290_v12 = vpop.xlane.xlu0 %289 }
  0x9f   : > { %v296_v13 = vmul.f32 0.03125, %v290_v12  ;;  %v301_v14 = vmul.f32 %v298_v10, %v298_v10  ;;  %v303_v15 = vmul.f32 %v300_v11, %v300_v11 }
  0xa1   : > { %v299_v16 = vsub.f32 %v827_v2, %v296_v13  ;;  %v304_v17 = vsel %vm284_vm0, %v301_v14, 0.0  ;;  %v310_v18 = vsel %vm284_vm0, %v303_v15, 0.0 }
  0xa2   : > { %305 = vadd.xlane.f32.xlu1 %v304_v17 }
  0xa3   : > { %v302_v19 = vmul.f32 %v299_v16, %v299_v16 }
  0xa5   : > { %v307_v20 = vsel %vm284_vm0, %v302_v19, 0.0 }
  0xa6   : > { %311 = vadd.xlane.f32.xlu1 %v310_v18  ;;  %308 = vadd.xlane.f32.xlu0 %v307_v20 }
 0x12b   : > { %v306_v26 = vpop.xlane.xlu1 %305 }
 0x12c   : > { %v313_v27 = vmul.f32 0.03125, %v306_v26 }
 0x12e   : > { %v316_v28 = vadd.f32 1e-05, %v313_v27 }
 0x12f   : > { %v312_v29 = vpop.xlane.xlu1 %311  ;;  %v309_v30 = vpop.xlane.xlu0 %308 }
 0x130   : > { %745 = vrsqrt.f32 %v316_v28  ;;  %v315_v31 = vmul.f32 0.03125, %v312_v29  ;;  %v314_v32 = vmul.f32 0.03125, %v309_v30 }
 0x132   : > { %v318_v33 = vadd.f32 1e-05, %v315_v31  ;;  %v317_v34 = vadd.f32 1e-05, %v314_v32 }
 0x134   : > { %747 = vrsqrt.f32 %v318_v33 }
 0x135   : > { %749 = vrsqrt.f32 %v317_v34 }
 0x13d   : > { %v746_v35 = vpop.eup %745 }
 0x13e   : > { %v322_v37 = vmul.f32 %v746_v35, %v298_v10 }
 0x140   : > { %v331_v39 = vmul.f32 %v641_v36, %v322_v37 }
 0x141   : > { %v748_v40 = vpop.eup %747 }
 0x142   : > { %v750_v41 = vpop.eup %749  ;;  %v340_v42 = vadd.f32 %v642_v38, %v331_v39  ;;  %v324_v44 = vmul.f32 %v748_v40, %v300_v11 }
 0x143   : > { %v323_v43 = vmul.f32 %v750_v41, %v299_v16 }
 0x144   : > { %685 = vmatmul.mubr.msk.f32.vlgmr.msra.gmra.mxu0 %vm284_vm0, %v340_v42  ;;  %v333_v47 = vmul.f32 %v641_v36, %v324_v44  ;;  %v647_v42 = vld [vmem:[%s968_s6] ss:$0 sm:$0xff] }
 0x145   : > { %687 = vmatprep.mubr.msk.f32.mxu0 %vm766_vm1, %v765_v22  ;;  %v332_v45 = vmul.f32 %v641_v36, %v323_v43 }
 0x146   : > { %v342_v48 = vadd.f32 %v642_v38, %v333_v47 }
 0x147   : > { %v341_v46 = vadd.f32 %v642_v38, %v332_v45 }
 0x149   : > { %688 = vmatmul.mubr.msk.f32.gmra.mxu0 %vm284_vm0, %v341_v46 }
 0x14a   : > { %690 = vmatprep.mubr.msk.f32.mxu0 %vm766_vm1, %v765_v22 }
 0x14d   : > { %691 = vmatmul.mubr.msk.f32.gmra.mxu0 %vm284_vm0, %v342_v48 }
 0x204   : > { %v429_v5 = vpop.f32.mrf.mxu0 }
 0x205   : > { %v430_v6 = vadd.f32 %v643_v4, %v429_v5 }
 0x206   : > { %v686_v7 = vpop.f32.mrf.mxu0 }
 0x207   : > { %v443_v8 = vmul.f32 %v430_v6, %v430_v6 }
 0x209   : > { %v446_v9 = vmul.f32 %v443_v8, %v430_v6  ;;  %v434_v10 = vpop.f32.mrf.mxu0 }
 0x20a   : > { %v435_v11 = vadd.f32 %v643_v4, %v434_v10 }
 0x20b   : > { %v449_v12 = vmul.f32 0.044715, %v446_v9  ;;  %v689_v13 = vpop.f32.mrf.mxu0 }
 0x20c   : > { %v444_v14 = vmul.f32 %v435_v11, %v435_v11 }
 0x20d   : > { %v452_v15 = vadd.f32 %v449_v12, %v430_v6  ;;  %v439_v16 = vpop.f32.mrf.mxu0 }
 0x20e   : > { %v447_v17 = vmul.f32 %v444_v14, %v435_v11  ;;  %v440_v18 = vadd.f32 %v643_v4, %v439_v16 }
 0x20f   : > { %v455_v19 = vmul.f32 0.7978846, %v452_v15  ;;  %v692_v20 = vpop.f32.mrf.mxu0 }
 0x210   : > { %v450_v21 = vmul.f32 0.044715, %v447_v17  ;;  %v445_v23 = vmul.f32 %v440_v18, %v440_v18 }
 0x211   : > { %751 = vtanh.f32 %v455_v19 }
 0x212   : > { %v453_v24 = vadd.f32 %v450_v21, %v435_v11  ;;  %v448_v25 = vmul.f32 %v445_v23, %v440_v18 }
 0x214   : > { %v456_v26 = vmul.f32 0.7978846, %v453_v24  ;;  %v451_v27 = vmul.f32 0.044715, %v448_v25 }
 0x216   : > { %753 = vtanh.f32 %v456_v26  ;;  %v454_v28 = vadd.f32 %v451_v27, %v440_v18 }
 0x218   : > { %v457_v29 = vmul.f32 0.7978846, %v454_v28 }
 0x21a   : > { %755 = vtanh.f32 %v457_v29 }
 0x21e   : > { %v752_v30 = vpop.eup %751 }
 0x21f   : > { %v461_v31 = vadd.f32 1.0, %v752_v30 }
 0x221   : > { %v464_v32 = vmul.f32 0.5, %v461_v31 }
 0x223   : > { %v754_v33 = vpop.eup %753  ;;  %v467_v34 = vmul.f32 %v464_v32, %v430_v6 }
 0x224   : > { %v462_v35 = vadd.f32 1.0, %v754_v33 }
 0x225   : > { %726 = vmatmul.mubr.f32.vlgmr.msra.gmra.mxu1 %v467_v34 }
 0x226   : > { %728 = vmatprep.mubr.msk.f32.mxu1 %vm766_vm1, %v765_v22  ;;  %v465_v36 = vmul.f32 0.5, %v462_v35 }
 0x227   : > { %v756_v37 = vpop.eup %755 }
 0x228   : > { %v468_v38 = vmul.f32 %v465_v36, %v435_v11  ;;  %v463_v39 = vadd.f32 1.0, %v756_v37 }
 0x22a   : > { %729 = vmatmul.mubr.f32.gmra.mxu1 %v468_v38  ;;  %v466_v40 = vmul.f32 0.5, %v463_v39 }
 0x22b   : > { %731 = vmatprep.mubr.msk.f32.mxu1 %vm766_vm1, %v765_v22 }
 0x22c   : > { %v469_v41 = vmul.f32 %v466_v40, %v440_v18 }
 0x22e   : > { %732 = vmatmul.mubr.f32.gmra.mxu1 %v469_v41 }
 0x2e5   : > { %v559_v43 = vpop.f32.mrf.mxu1 }
 0x2e6   : > { %v560_v44 = vadd.f32 %v647_v42, %v559_v43 }
 0x2e7   : > { %v727_v45 = vpop.f32.mrf.mxu1 }
 0x2e8   : > { %v573_v46 = vadd.f32 %v560_v44, %v823_v0 }
 0x2ea   : > { %576 = vst.msk [vmem:[%s278_s17] sm:$0xff] %vm284_vm0, %v573_v46  ;;  %v564_v47 = vpop.f32.mrf.mxu1 }
 0x2eb   : > { %v565_v22 = vadd.f32 %v647_v42, %v564_v47 }
 0x2ec   : > { %v730_v48 = vpop.f32.mrf.mxu1 }
 0x2ed   : > { %v574_v49 = vadd.f32 %v565_v22, %v827_v2 }
 0x2ee   : > { %v569_v50 = vpop.f32.mrf.mxu1 }
 0x2ef   : > { %577 = vst.msk [vmem:[%s278_s17 + $0x8] sm:$0xff] %vm284_vm0, %v574_v49  ;;  %v570_v51 = vadd.f32 %v647_v42, %v569_v50 }
 0x2f0   : > { %v733_v52 = vpop.f32.mrf.mxu1 }
 0x2f1   : > { %v575_v53 = vadd.f32 %v570_v51, %v825_v1 }
 0x2f3   : > { %578 = vst.msk [vmem:[%s278_s17 + $0x10] sm:$0xff] %vm284_vm0, %v575_v53 }
 0x2f4 PF: > { %s17_s24 = sadd.s32 1, %s763_s24  }
 0x2f5   : > { %p14_p4 = scmp.ge.s32.totalorder %s17_s24, 4  }
 0x2f7   :  { %16 = sbr.rel (!%p14_p4) target bundleno = 1 (0x1), region = 78 }

// kernel: pali_forward.28
= control target key start
LH: loop header
LB: loop body
LE: loop exit
PB: predicated region body
PF: predicated region fallthrough
CT: control target
= control target key end

     0   :  { %s347_s12 = smov 0   ;;  %s386_s0 = inlined_call_operand.vmem [shape: f32[2,24,32], index: 0, kind: input, shape index: {}]   ;;  %s387_s1 = inlined_call_operand.vmem [shape: f32[1,32], index: 1, kind: input, shape index: {}]   ;;  %s388_s2 = inlined_call_operand.vmem [shape: f32[1,32], index: 2, kind: input, shape index: {}]   ;;  %s389_s3 = inlined_call_operand.vmem [shape: f32[2,24,32], index: 3, kind: output, shape index: {}]  }
   0x1 LB: > { %s293_s13 = sadd.s32 4294967295, %s325_s12   ;;  %p297_p0 = scmp.ge.s32.totalorder %s325_s12, 1  ;;  %s325_s12 = sphi %s347_s12, %s13_s12  }
   0x2   : > { %p137_p1 = scmp.lt.s32.totalorder %s325_s12, 3 }
   0x4   : > { %p138_p2 = pnand %p297_p0, %p137_p1 }
   0x5   : > { %p161_p3 = scmp.lt.s32.totalorder (!%p138_p2), %s293_s13, 1 }
   0x6   : > { %141 = sbr.rel (%p138_p2) target bundleno = 330 (0x14a), region = 32 }
   0xb   : > { %s391_s13 = smov (!%p161_p3, %s293_s13), 1  ;;  %vm176_vm0 = vcmask 261120   ;;  %v300_v31 = vld [vmem:[%s387_s1] ss:$0 sm:$0xff] }
   0xc   : > { %s304_s14 = smul.u32 24, %s391_s13  ;;  %v301_v33 = vld [vmem:[%s388_s2] ss:$0 sm:$0xff] }
   0xe   : > { %s165_s17 = scalar_lea.vmem %s386_s0, %s304_s14  ;;  %s170_s24 = scalar_lea.vmem %s389_s3, %s304_s14 }
   0xf   : > { %v171_v0 = vld [vmem:[%s165_s17] sm:$0xff]  ;;  %v173_v1 = vld [vmem:[%s165_s17 + $0x10] sm:$0xff]  ;;  %v172_v2 = vld [vmem:[%s165_s17 + $0x8] sm:$0xff] }
  0x10   : > { %v177_v3 = vsel %vm176_vm0, %v171_v0, 0.0  ;;  %v183_v4 = vsel %vm176_vm0, %v173_v1, 0.0  ;;  %v180_v5 = vsel %vm176_vm0, %v172_v2, 0.0 }
  0x11   : > { %178 = vadd.xlane.f32.xlu0 %v177_v3  ;;  %184 = vadd.xlane.f32.xlu1 %v183_v4 }
  0x15   : > { %181 = vadd.xlane.f32.xlu0 %v180_v5 }
  0x9a   : > { %v179_v6 = vpop.xlane.xlu0 %178  ;;  %v185_v7 = vpop.xlane.xlu1 %184 }
  0x9b   : > { %v187_v8 = vmul.f32 0.03125, %v179_v6  ;;  %v189_v9 = vmul.f32 0.03125, %v185_v7 }
  0x9d   : > { %v190_v10 = vsub.f32 %v171_v0, %v187_v8  ;;  %v192_v11 = vsub.f32 %v173_v1, %v189_v9 }
  0x9e   : > { %v182_v12 = vpop.xlane.xlu0 %181 }
  0x9f   : > { %v188_v13 = vmul.f32 0.03125, %v182_v12  ;;  %v193_v14 = vmul.f32 %v190_v10, %v190_v10  ;;  %v195_v15 = vmul.f32 %v192_v11, %v192_v11 }
  0xa1   : > { %v191_v16 = vsub.f32 %v172_v2, %v188_v13  ;;  %v196_v17 = vsel %vm176_vm0, %v193_v14, 0.0  ;;  %v202_v18 = vsel %vm176_vm0, %v195_v15, 0.0 }
  0xa2   : > { %197 = vadd.xlane.f32.xlu1 %v196_v17 }
  0xa3   : > { %v194_v19 = vmul.f32 %v191_v16, %v191_v16 }
  0xa5   : > { %v199_v20 = vsel %vm176_vm0, %v194_v19, 0.0 }
  0xa6   : > { %203 = vadd.xlane.f32.xlu1 %v202_v18  ;;  %200 = vadd.xlane.f32.xlu0 %v199_v20 }
 0x12b   : > { %v198_v21 = vpop.xlane.xlu1 %197 }
 0x12c   : > { %v205_v22 = vmul.f32 0.03125, %v198_v21 }
 0x12e   : > { %v208_v23 = vadd.f32 1e-05, %v205_v22 }
 0x12f   : > { %v204_v24 = vpop.xlane.xlu1 %203  ;;  %v201_v25 = vpop.xlane.xlu0 %200 }
 0x130   : > { %313 = vrsqrt.f32 %v208_v23  ;;  %v207_v26 = vmul.f32 0.03125, %v204_v24  ;;  %v206_v27 = vmul.f32 0.03125, %v201_v25 }
 0x132   : > { %v210_v28 = vadd.f32 1e-05, %v207_v26  ;;  %v209_v29 = vadd.f32 1e-05, %v206_v27 }
 0x134   : > { %315 = vrsqrt.f32 %v210_v28 }
 0x135   : > { %317 = vrsqrt.f32 %v209_v29 }
 0x13d   : > { %v314_v30 = vpop.eup %313 }
 0x13e   : > { %v214_v32 = vmul.f32 %v314_v30, %v190_v10 }
 0x140   : > { %v223_v34 = vmul.f32 %v300_v31, %v214_v32 }
 0x141   : > { %v316_v35 = vpop.eup %315 }
 0x142   : > { %v318_v36 = vpop.eup %317  ;;  %v232_v37 = vadd.f32 %v301_v33, %v223_v34  ;;  %v216_v38 = vmul.f32 %v316_v35, %v192_v11 }
 0x143   : > { %v215_v39 = vmul.f32 %v318_v36, %v191_v16 }
 0x144   : > { %235 = vst.msk [vmem:[%s170_s24] sm:$0xff] %vm176_vm0, %v232_v37  ;;  %v225_v40 = vmul.f32 %v300_v31, %v216_v38 }
 0x145   : > { %v224_v41 = vmul.f32 %v300_v31, %v215_v39 }
 0x146   : > { %v234_v42 = vadd.f32 %v301_v33, %v225_v40 }
 0x147   : > { %v233_v43 = vadd.f32 %v301_v33, %v224_v41 }
 0x148   : > { %237 = vst.msk [vmem:[%s170_s24 + $0x10] sm:$0xff] %vm176_vm0, %v234_v42 }
 0x149   : > { %236 = vst.msk [vmem:[%s170_s24 + $0x8] sm:$0xff] %vm176_vm0, %v233_v43 }
 0x14a PF: > { %s13_s12 = sadd.s32 1, %s325_s12  }
 0x14b   : > { %p10_p4 = scmp.ge.s32.totalorder %s13_s12, 4  }
 0x14d   :  { %12 = sbr.rel (!%p10_p4) target bundleno = 1 (0x1), region = 62 }

// kernel: pali_forward.24
= control target key start
LH: loop header
LB: loop body
LE: loop exit
PB: predicated region body
PF: predicated region fallthrough
CT: control target
= control target key end

     0   :  { %s2454_s27 = smov 0   ;;  %s2848_s0 = inlined_call_operand.vmem [shape: f32[2,24,32], index: 0, kind: input, shape index: {}]   ;;  %s2849_s1 = inlined_call_operand.vmem [shape: f32[2,1,24], index: 1, kind: input, shape index: {}]   ;;  %s2850_s2 = inlined_call_operand.vmem [shape: f32[1,32], index: 2, kind: input, shape index: {}]   ;;  %s2851_s3 = inlined_call_operand.vmem [shape: f32[1,32], index: 3, kind: input, shape index: {}]   ;;  %s2852_s4 = inlined_call_operand.vmem [shape: f32[32,32], index: 4, kind: input, shape index: {}]   ;;  %s2853_s5 = inlined_call_operand.vmem [shape: f32[32,64], index: 5, kind: input, shape index: {}]   ;;  %s2854_s6 = inlined_call_operand.vmem [shape: f32[32,32], index: 6, kind: input, shape index: {}]   ;;  %s2855_s7 = inlined_call_operand.vmem [shape: f32[1,32], index: 7, kind: input, shape index: {}]   ;;  %s2856_s8 = inlined_call_operand.vmem [shape: f32[2,24,32], index: 8, kind: output, shape index: {}]  }
   0x1 LB: > { %s1974_s28 = sadd.s32 4294967295, %s2398_s27   ;;  %p1978_p0 = scmp.ge.s32.totalorder %s2398_s27, 1  ;;  %s2398_s27 = sphi %s2454_s27, %s18_s27  }
   0x2   : > { %p270_p1 = scmp.lt.s32.totalorder %s2398_s27, 3 }
   0x4   : > { %p271_p2 = pnand %p1978_p0, %p270_p1 }
   0x5   : > { %p307_p3 = scmp.lt.s32.totalorder (!%p271_p2), %s1974_s28, 1  ;;  %s2402_s13 = smov (!%p271_p2), 120  }
   0x6   : > { %274 = sbr.rel (%p271_p2) target bundleno = 2381 (0x94d), region = 52  ;;  %s2403_s14 = smov (!%p271_p2), 96  }
   0x7   : > { %s2404_s15 = smov (!%p271_p2), 88   ;;  %s2405_s19 = smov (!%p271_p2), 112  }
   0x8   : > { %s2406_s22 = smov (!%p271_p2), 80   ;;  %s2407_s25 = smov (!%p271_p2), 104  }
   0x9   : > { %s2408_s26 = smov (!%p271_p2), 72  }
   0xb   : > { %s2858_s28 = smov (!%p307_p3, %s1974_s28), 1  ;;  %vm325_vm0 = vcmask 261120   ;;  %v387_v21 = vld [vmem:[%s2852_s4 + $0x18] sm:$0xff]  ;;  %v2400_v23 = vmov 0.0   ;;  %v386_v24 = vld [vmem:[%s2852_s4 + $0x10] sm:$0xff]  ;;  %v385_v26 = vld [vmem:[%s2852_s4 + $0x8] sm:$0xff] }
   0xc   : > { %s2317_s29 = smul.u32 24, %s2858_s28  ;;  %v391_v22 = vld [vmem:[%s2853_s5 + $0x18] sm:$0xff]  ;;  %2119 = vmatprep.subr.mxu0 %v2400_v23  ;;  %2136 = vmatprep.subr.mxu1 %v2400_v23  ;;  %v390_v25 = vld [vmem:[%s2853_s5 + $0x10] sm:$0xff]  ;;  %v389_v27 = vld [vmem:[%s2853_s5 + $0x8] sm:$0xff]  ;;  %vm2401_vm1 = vmmov 0   ;;  %vm566_vm2 = vcmask 64512   ;;  %s314_s18 = scalar_lea.vmem %s2849_s1, %s2858_s28 }
   0xd   : > { %2120 = vmatpush3.msra.mxu0 %v387_v21  ;;  %2137 = vmatpush3.msra.mxu1 %v391_v22  ;;  %v384_v28 = vld [vmem:[%s2852_s4] sm:$0xff]  ;;  %vm677_vm3 = vcmask 195584  }
   0xe   : > { %s2470_s10 = scalar_lea.vmem %s2848_s0, %s2317_s29  ;;  %2121 = vmatprep.subr.mxu0 %v2400_v23  ;;  %2138 = vmatprep.subr.mxu1 %v2400_v23  ;;  %v388_v29 = vld [vmem:[%s2853_s5] sm:$0xff]  ;;  %s319_s17 = scalar_lea.vmem %s2856_s8, %s2317_s29 }
   0xf   : > { %v320_v0 = vld [vmem:[%s2470_s10] sm:$0xff]  ;;  %v322_v1 = vld [vmem:[%s2470_s10 + $0x10] sm:$0xff]  ;;  %v321_v2 = vld [vmem:[%s2470_s10 + $0x8] sm:$0xff]  ;;  %2122 = vmatpush3.msra.mxu0 %v386_v24  ;;  %2139 = vmatpush3.msra.mxu1 %v390_v25 }
  0x10   : > { %v326_v3 = vsel %vm325_vm0, %v320_v0, 0.0  ;;  %v332_v4 = vsel %vm325_vm0, %v322_v1, 0.0  ;;  %v329_v5 = vsel %vm325_vm0, %v321_v2, 0.0  ;;  %2123 = vmatprep.subr.mxu0 %v2400_v23  ;;  %2140 = vmatprep.subr.mxu1 %v2400_v23  ;;  %v1981_v40 = vld [vmem:[%s2850_s2] ss:$0 sm:$0xff] }
  0x11   : > { %327 = vadd.xlane.f32.xlu0 %v326_v3  ;;  %333 = vadd.xlane.f32.xlu1 %v332_v4  ;;  %v1982_v42 = vld [vmem:[%s2851_s3] ss:$0 sm:$0xff] }
  0x12   : > { %2124 = vmatpush3.msra.mxu0 %v385_v26  ;;  %2141 = vmatpush3.msra.mxu1 %v389_v27 }
  0x13   : > { %2125 = vmatprep.subr.mxu0 %v2400_v23  ;;  %2142 = vmatprep.subr.mxu1 %v2400_v23 }
  0x14   : > { %2126 = vmatpush3.msra.mxu0 %v384_v28  ;;  %2127 = vmatprep.mubr.msk.f32.mxu0 %vm2401_vm1, %v2400_v23 }
  0x15   : > { %330 = vadd.xlane.f32.xlu0 %v329_v5  ;;  %2143 = vmatpush3.msra.mxu1 %v388_v29 }
  0x16   : > { %2144 = vmatprep.mubr.msk.f32.mxu1 %vm2401_vm1, %v2400_v23  ;;  %2153 = vmatprep.subr.mxu0 %v2400_v23 }
  0x17   : > { %2168 = vmatprep.subr.mxu1 %v2400_v23 }
  0x9a   : > { %v328_v6 = vpop.xlane.xlu0 %327  ;;  %v334_v7 = vpop.xlane.xlu1 %333 }
  0x9b   : > { %v336_v8 = vmul.f32 0.03125, %v328_v6  ;;  %v338_v9 = vmul.f32 0.03125, %v334_v7 }
  0x9d   : > { %v339_v10 = vsub.f32 %v320_v0, %v336_v8  ;;  %v2478_v11 = vsub.f32 %v322_v1, %v338_v9 }
  0x9e   : > { %v331_v12 = vpop.xlane.xlu0 %330 }
  0x9f   : > { %v337_v13 = vmul.f32 0.03125, %v331_v12  ;;  %v342_v14 = vmul.f32 %v339_v10, %v339_v10  ;;  %v344_v15 = vmul.f32 %v2478_v11, %v2478_v11 }
  0xa1   : > { %v340_v16 = vsub.f32 %v321_v2, %v337_v13  ;;  %v345_v17 = vsel %vm325_vm0, %v342_v14, 0.0  ;;  %v351_v18 = vsel %vm325_vm0, %v344_v15, 0.0 }
  0xa2   : > { %346 = vadd.xlane.f32.xlu1 %v345_v17 }
  0xa3   : > { %v343_v19 = vmul.f32 %v340_v16, %v340_v16 }
  0xa5   : > { %v348_v20 = vsel %vm325_vm0, %v343_v19, 0.0 }
  0xa6   : > { %352 = vadd.xlane.f32.xlu1 %v351_v18  ;;  %349 = vadd.xlane.f32.xlu0 %v348_v20 }
 0x12b   : > { %v347_v30 = vpop.xlane.xlu1 %346 }
 0x12c   : > { %v354_v31 = vmul.f32 0.03125, %v347_v30 }
 0x12e   : > { %v357_v32 = vadd.f32 1e-05, %v354_v31 }
 0x12f   : > { %v353_v33 = vpop.xlane.xlu1 %352  ;;  %v350_v34 = vpop.xlane.xlu0 %349 }
 0x130   : > { %2335 = vrsqrt.f32 %v357_v32  ;;  %v356_v35 = vmul.f32 0.03125, %v353_v33  ;;  %v355_v36 = vmul.f32 0.03125, %v350_v34 }
 0x132   : > { %v359_v37 = vadd.f32 1e-05, %v356_v35  ;;  %v358_v38 = vadd.f32 1e-05, %v355_v36 }
 0x134   : > { %2337 = vrsqrt.f32 %v359_v37 }
 0x135   : > { %2339 = vrsqrt.f32 %v358_v38 }
 0x13d   : > { %v2336_v39 = vpop.eup %2335 }
 0x13e   : > { %v363_v41 = vmul.f32 %v2336_v39, %v339_v10  ;;  %v2614_v10 = vld [vmem:[%s314_s18] ss:$0 sm:$0xff] }
 0x140   : > { %v372_v43 = vmul.f32 %v1981_v40, %v363_v41 }
 0x141   : > { %v2338_v44 = vpop.eup %2337 }
 0x142   : > { %v2340_v45 = vpop.eup %2339  ;;  %v381_v46 = vadd.f32 %v1982_v42, %v372_v43  ;;  %v365_v48 = vmul.f32 %v2338_v44, %v2478_v11 }
 0x143   : > { %v364_v47 = vmul.f32 %v2340_v45, %v340_v16 }
 0x144   : > { %2128 = vmatmul.mubr.msk.f32.vlgmr.msra.gmra.mxu0 %vm325_vm0, %v381_v46  ;;  %2145 = vmatmul.mubr.msk.f32.vlgmr.msra.gmra.mxu1 %vm325_vm0, %v381_v46  ;;  %v374_v51 = vmul.f32 %v1981_v40, %v365_v48 }
 0x145   : > { %2130 = vmatprep.mubr.msk.f32.mxu0 %vm2401_vm1, %v2400_v23  ;;  %2147 = vmatprep.mubr.msk.f32.mxu1 %vm2401_vm1, %v2400_v23  ;;  %v373_v49 = vmul.f32 %v1981_v40, %v364_v47 }
 0x146   : > { %v383_v52 = vadd.f32 %v1982_v42, %v374_v51 }
 0x147   : > { %v382_v50 = vadd.f32 %v1982_v42, %v373_v49 }
 0x149   : > { %2131 = vmatmul.mubr.msk.f32.gmra.mxu0 %vm325_vm0, %v382_v50  ;;  %2148 = vmatmul.mubr.msk.f32.gmra.mxu1 %vm325_vm0, %v382_v50 }
 0x14a   : > { %2133 = vmatprep.mubr.msk.f32.mxu0 %vm2401_vm1, %v2400_v23  ;;  %2150 = vmatprep.mubr.msk.f32.mxu1 %vm2401_vm1, %v2400_v23 }
 0x14d   : > { %2134 = vmatmul.mubr.msk.f32.gmra.mxu0 %vm325_vm0, %v383_v52  ;;  %2151 = vmatmul.mubr.msk.f32.gmra.mxu1 %vm325_vm0, %v383_v52 }
 0x14e   : > { %2159 = vmatprep.mubr.msk.f32.mxu0 %vm2401_vm1, %v2400_v23  ;;  %2174 = vmatprep.mubr.msk.f32.mxu1 %vm2401_vm1, %v2400_v23 }
 0x204   : > { %v2548_v53 = vpop.f32.mrf.mxu0  ;;  %v2550_v54 = vpop.f32.mrf.mxu1 }
 0x206   : > { %v2129_v55 = vpop.f32.mrf.mxu0  ;;  %v2146_v56 = vpop.f32.mrf.mxu1 }
 0x209   : > { %v2552_v57 = vpop.f32.mrf.mxu0  ;;  %v2554_v58 = vpop.f32.mrf.mxu1 }
 0x20a   : > { %817 = vrot.lane.b32.xlu1 %v2554_v58, %s2402_s13 }
 0x20b   : > { %v2132_v59 = vpop.f32.mrf.mxu0  ;;  %v2149_v60 = vpop.f32.mrf.mxu1 }
 0x20d   : > { %v2557_v61 = vpop.f32.mrf.mxu0  ;;  %v2559_v62 = vpop.f32.mrf.mxu1 }
 0x20e   : > { %815 = vrot.lane.b32.xlu1 %v2550_v54, %s2402_s13  ;;  %819 = vrot.lane.b32.xlu0 %v2559_v62, %s2402_s13 }
 0x20f   : > { %2154 = vmatpush3.xpose.msk.msra.mxu0 %vm566_vm2, %v2559_v62  ;;  %v2135_v63 = vpop.f32.mrf.mxu0  ;;  %v2152_v0 = vpop.f32.mrf.mxu1 }
 0x210   : > { %2155 = vmatprep.subr.mxu0 %v2400_v23 }
 0x212   : > { %809 = vrot.lane.b32.xlu1 %v2548_v53, %s2402_s13  ;;  %811 = vrot.lane.b32.xlu0 %v2552_v57, %s2402_s13 }
 0x213   : > { %2156 = vmatpush3.xpose.msk.msra.mxu0 %vm566_vm2, %v2554_v58 }
 0x214   : > { %2157 = vmatprep.subr.mxu0 %v2400_v23 }
 0x216   : > { %712 = vrot.lane.b32.xlu0 %v2559_v62, %s2403_s14  ;;  %813 = vrot.lane.b32.xlu1 %v2557_v61, %s2402_s13 }
 0x217   : > { %2158 = vmatpush3.xpose.msk.msra.mxu0 %vm566_vm2, %v2550_v54 }
 0x218   : > { %2183 = vmatprep.subr.mxu0 %v2400_v23 }
 0x21a   : > { %2160 = vmatmul.mubr.msk.f32.vlgmr.msra.gmra.mxu0 %vm566_vm2, %v2548_v53  ;;  %710 = vrot.lane.b32.xlu1 %v2554_v58, %s2403_s14 }
 0x21b   : > { %2162 = vmatprep.mubr.msk.f32.mxu0 %vm2401_vm1, %v2400_v23 }
 0x21e   : > { %2163 = vmatmul.mubr.msk.f32.gmra.mxu0 %vm566_vm2, %v2552_v57  ;;  %708 = vrot.lane.b32.xlu1 %v2550_v54, %s2403_s14 }
 0x21f   : > { %2165 = vmatprep.mubr.msk.f32.mxu0 %vm2401_vm1, %v2400_v23 }
 0x222   : > { %2166 = vmatmul.mubr.msk.f32.gmra.mxu0 %vm566_vm2, %v2557_v61  ;;  %953 = vrot.lane.b32.xlu1 %v2559_v62, %s2404_s15 }
 0x223   : > { %2189 = vmatprep.mubr.msk.f32.mxu0 %vm2401_vm1, %v2400_v23 }
 0x27c   : > { %v818_v1 = vpop.permute.xlu1 %817 }
 0x280   : > { %v816_v2 = vpop.permute.xlu1 %815  ;;  %v820_v3 = vpop.permute.xlu0 %819 }
 0x281   : > { %2184 = vmatpush3.xpose.msk.msra.mxu0 %vm566_vm2, %v820_v3 }
 0x282   : > { %2185 = vmatprep.subr.mxu0 %v2400_v23 }
 0x284   : > { %v810_v4 = vpop.permute.xlu1 %809  ;;  %v812_v5 = vpop.permute.xlu0 %811 }
 0x285   : > { %2186 = vmatpush3.xpose.msk.msra.mxu0 %vm566_vm2, %v818_v1 }
 0x286   : > { %2187 = vmatprep.subr.mxu0 %v2400_v23 }
 0x288   : > { %v713_v6 = vpop.permute.xlu0 %712  ;;  %v814_v7 = vpop.permute.xlu1 %813 }
 0x289   : > { %2169 = vmatpush3.msra.mxu1 %v713_v6  ;;  %2188 = vmatpush3.xpose.msk.msra.mxu0 %vm566_vm2, %v816_v2 }
 0x28a   : > { %2170 = vmatprep.subr.mxu1 %v2400_v23  ;;  %2213 = vmatprep.subr.mxu0 %v2400_v23 }
 0x28c   : > { %v711_v8 = vpop.permute.xlu1 %710  ;;  %2190 = vmatmul.mubr.msk.f32.vlgmr.msra.gmra.mxu0 %vm566_vm2, %v810_v4 }
 0x28d   : > { %2171 = vmatpush3.msra.mxu1 %v711_v8  ;;  %2192 = vmatprep.mubr.msk.f32.mxu0 %vm2401_vm1, %v2400_v23 }
 0x28e   : > { %2172 = vmatprep.subr.mxu1 %v2400_v23 }
 0x290   : > { %v709_v9 = vpop.permute.xlu1 %708  ;;  %2193 = vmatmul.mubr.msk.f32.gmra.mxu0 %vm566_vm2, %v812_v5 }
 0x291   : > { %2173 = vmatpush3.msra.mxu1 %v709_v9  ;;  %2195 = vmatprep.mubr.msk.f32.mxu0 %vm2401_vm1, %v2400_v23 }
 0x292   : > { %2198 = vmatprep.subr.mxu1 %v2400_v23 }
 0x294   : > { %2196 = vmatmul.mubr.msk.f32.gmra.mxu0 %vm566_vm2, %v814_v7  ;;  %v954_v42 = vpop.permute.xlu1 %953 }
 0x295   : > { %2215 = vmatprep.mubr.msk.f32.mxu0 %vm2401_vm1, %v2400_v23 }
 0x2da   : > { %v651_v11 = vpop.f32.mrf.mxu0 }
 0x2db   : > { %v665_v12 = vmul.f32 0.35355338, %v651_v11 }
 0x2dc   : > { %v2161_v13 = vpop.f32.mrf.mxu0 }
 0x2dd   : > { %v674_v14 = vadd.f32 %v2614_v10, %v665_v12 }
 0x2de   : > { %v656_v15 = vpop.f32.mrf.mxu0 }
 0x2df   : > { %v666_v16 = vmul.f32 0.35355338, %v656_v15  ;;  %v678_v17 = vsel %vm677_vm3, %v674_v14, -inf  ;;  %v393_v15 = vld [vmem:[%s2854_s6 + $0x8] sm:$0xff] }
 0x2e0   : > { %679 = vmax.xlane.f32.xlu0 %v678_v17  ;;  %v2164_v18 = vpop.f32.mrf.mxu0  ;;  %2214 = vmatpush3.msra.mxu0 %v393_v15 }
 0x2e1   : > { %v675_v19 = vadd.f32 %v2614_v10, %v666_v16  ;;  %2235 = vmatprep.subr.mxu0 %v2400_v23 }
 0x2e2   : > { %v661_v20 = vpop.f32.mrf.mxu0 }
 0x2e3   : > { %v667_v21 = vmul.f32 0.35355338, %v661_v20  ;;  %v681_v22 = vsel %vm677_vm3, %v675_v19, -inf }
 0x2e4   : > { %682 = vmax.xlane.f32.xlu1 %v681_v22  ;;  %v2167_v24 = vpop.f32.mrf.mxu0 }
 0x2e5   : > { %v676_v25 = vadd.f32 %v2614_v10, %v667_v21 }
 0x2e7   : > { %v684_v26 = vsel %vm677_vm3, %v676_v25, -inf }
 0x2e8   : > { %685 = vmax.xlane.f32.xlu0 %v684_v26  ;;  %v392_v26 = vld [vmem:[%s2854_s6] sm:$0xff] }
 0x34c   : > { %v899_v27 = vpop.f32.mrf.mxu0 }
 0x34d   : > { %v913_v28 = vmul.f32 0.35355338, %v899_v27 }
 0x34e   : > { %v2191_v29 = vpop.f32.mrf.mxu0 }
 0x34f   : > { %v916_v30 = vadd.f32 %v2614_v10, %v913_v28 }
 0x350   : > { %v904_v31 = vpop.f32.mrf.mxu0 }
 0x351   : > { %v914_v32 = vmul.f32 0.35355338, %v904_v31  ;;  %v919_v33 = vsel %vm677_vm3, %v916_v30, -inf }
 0x352   : > { %920 = vmax.xlane.f32.xlu0 %v919_v33  ;;  %v2194_v34 = vpop.f32.mrf.mxu0 }
 0x353   : > { %v917_v35 = vadd.f32 %v2614_v10, %v914_v32 }
 0x354   : > { %v909_v36 = vpop.f32.mrf.mxu0 }
 0x355   : > { %v915_v37 = vmul.f32 0.35355338, %v909_v36  ;;  %v922_v38 = vsel %vm677_vm3, %v917_v35, -inf }
 0x356   : > { %923 = vmax.xlane.f32.xlu0 %v922_v38  ;;  %v2197_v39 = vpop.f32.mrf.mxu0 }
 0x357   : > { %v918_v40 = vadd.f32 %v2614_v10, %v915_v37 }
 0x359   : > { %v925_v41 = vsel %vm677_vm3, %v918_v40, -inf }
 0x35a   : > { %926 = vmax.xlane.f32.xlu1 %v925_v41 }
 0x369   : > { %v680_v43 = vpop.xlane.xlu0 %679 }
 0x36a   : > { %v687_v44 = vsub.f32 %v674_v14, %v680_v43 }
 0x36b   : > { %949 = vrot.lane.b32.xlu1 %v2550_v54, %s2404_s15 }
 0x36c   : > { %v690_v45 = vmul.f32 1.442695, %v687_v44  ;;  %951 = vrot.lane.b32.xlu0 %v2554_v58, %s2404_s15 }
 0x36d   : > { %v683_v46 = vpop.xlane.xlu1 %682 }
 0x36e   : > { %2341 = vpow2.f32 %v690_v45  ;;  %v688_v47 = vsub.f32 %v675_v19, %v683_v46 }
 0x370   : > { %v692_v48 = vmul.f32 1.442695, %v688_v47 }
 0x371   : > { %v686_v49 = vpop.xlane.xlu0 %685 }
 0x372   : > { %2343 = vpow2.f32 %v692_v48  ;;  %v689_v50 = vsub.f32 %v676_v25, %v686_v49 }
 0x374   : > { %v694_v51 = vmul.f32 1.442695, %v689_v50 }
 0x376   : > { %2345 = vpow2.f32 %v694_v51 }
 0x37b   : > { %v2342_v52 = vpop.eup %2341 }
 0x37c   : > { %2175 = vmatmul.mubr.msk.f32.vlgmr.msra.gmra.mxu1 %vm677_vm3, %v2342_v52  ;;  %v696_v16 = vsel %vm677_vm3, %v2342_v52, 0.0 }
 0x37d   : > { %2199 = vmatpush3.msra.mxu1 %v954_v42  ;;  %2177 = vmatprep.mubr.msk.f32.mxu1 %vm2401_vm1, %v2400_v23 }
 0x37e   : > { %2200 = vmatprep.subr.mxu1 %v2400_v23 }
 0x37f   : > { %v2344_v55 = vpop.eup %2343 }
 0x380   : > { %2178 = vmatmul.mubr.msk.f32.gmra.mxu1 %vm677_vm3, %v2344_v55  ;;  %v699_v17 = vsel %vm677_vm3, %v2344_v55, 0.0 }
 0x381   : > { %2180 = vmatprep.mubr.msk.f32.mxu1 %vm2401_vm1, %v2400_v23 }
 0x383   : > { %v2346_v56 = vpop.eup %2345 }
 0x384   : > { %2181 = vmatmul.mubr.msk.f32.gmra.mxu1 %vm677_vm3, %v2346_v56  ;;  %v702_v18 = vsel %vm677_vm3, %v2346_v56, 0.0 }
 0x385   : > { %2204 = vmatprep.mubr.msk.f32.mxu1 %vm2401_vm1, %v2400_v23 }
 0x3db   : > { %v921_v59 = vpop.xlane.xlu0 %920 }
 0x3dc   : > { %v928_v60 = vsub.f32 %v916_v30, %v921_v59 }
 0x3de   : > { %v931_v63 = vmul.f32 1.442695, %v928_v60 }
 0x3df   : > { %v924_v0 = vpop.xlane.xlu0 %923 }
 0x3e0   : > { %2347 = vpow2.f32 %v931_v63  ;;  %v929_v1 = vsub.f32 %v917_v35, %v924_v0 }
 0x3e2   : > { %v933_v2 = vmul.f32 1.442695, %v929_v1 }
 0x3e3   : > { %v952_v3 = vpop.permute.xlu0 %951  ;;  %v927_v4 = vpop.xlane.xlu1 %926 }
 0x3e4   : > { %2349 = vpow2.f32 %v933_v2  ;;  %v930_v5 = vsub.f32 %v918_v40, %v927_v4  ;;  %2201 = vmatpush3.msra.mxu1 %v952_v3 }
 0x3e5   : > { %2202 = vmatprep.subr.mxu1 %v2400_v23 }
 0x3e6   : > { %v935_v6 = vmul.f32 1.442695, %v930_v5 }
 0x3e7   : > { %v950_v7 = vpop.permute.xlu1 %949 }
 0x3e8   : > { %2351 = vpow2.f32 %v935_v6  ;;  %2203 = vmatpush3.msra.mxu1 %v950_v7 }
 0x3e9   : > { %2224 = vmatprep.subr.mxu1 %v2400_v23 }
 0x3ed   : > { %v2348_v8 = vpop.eup %2347 }
 0x3ee   : > { %2205 = vmatmul.mubr.msk.f32.vlgmr.msra.gmra.mxu1 %vm677_vm3, %v2348_v8  ;;  %v937_v9 = vsel %vm677_vm3, %v2348_v8, 0.0 }
 0x3ef   : > { %938 = vadd.xlane.f32.xlu0 %v937_v9  ;;  %2207 = vmatprep.mubr.msk.f32.mxu1 %vm2401_vm1, %v2400_v23 }
 0x3f0   : > { %2225 = vmatpush3.msra.mxu1 %v392_v26 }
 0x3f1   : > { %v2350_v11 = vpop.eup %2349  ;;  %2250 = vmatprep.subr.mxu1 %v2400_v23 }
 0x3f2   : > { %2208 = vmatmul.mubr.msk.f32.gmra.mxu1 %vm677_vm3, %v2350_v11  ;;  %v940_v12 = vsel %vm677_vm3, %v2350_v11, 0.0 }
 0x3f3   : > { %941 = vadd.xlane.f32.xlu1 %v940_v12  ;;  %2210 = vmatprep.mubr.msk.f32.mxu1 %vm2401_vm1, %v2400_v23 }
 0x3f5   : > { %v2352_v13 = vpop.eup %2351 }
 0x3f6   : > { %2211 = vmatmul.mubr.msk.f32.gmra.mxu1 %vm677_vm3, %v2352_v13  ;;  %v943_v14 = vsel %vm677_vm3, %v2352_v13, 0.0 }
 0x3f7   : > { %944 = vadd.xlane.f32.xlu0 %v943_v14  ;;  %2226 = vmatprep.mubr.msk.f32.mxu1 %vm2401_vm1, %v2400_v23 }
 0x404   : > { %1236 = vrot.lane.b32.xlu1 %v2554_v58, %s2405_s19 }
 0x408   : > { %1234 = vrot.lane.b32.xlu1 %v2550_v54, %s2405_s19 }
 0x40c   : > { %1230 = vrot.lane.b32.xlu1 %v2552_v57, %s2405_s19 }
 0x40d   : > { %1238 = vrot.lane.b32.xlu0 %v2559_v62, %s2405_s19 }
 0x411   : > { %1228 = vrot.lane.b32.xlu0 %v2548_v53, %s2405_s19 }
 0x415   : > { %1232 = vrot.lane.b32.xlu0 %v2557_v61, %s2405_s19 }
 0x430   : > { %697 = vadd.xlane.f32.xlu1 %v696_v16 }
 0x434   : > { %700 = vadd.xlane.f32.xlu0 %v699_v17 }
 0x438   : > { %703 = vadd.xlane.f32.xlu0 %v702_v18 }
 0x43c   : > { %v2669_v19 = vpop.f32.mrf.mxu1 }
 0x43e   : > { %v2176_v20 = vpop.f32.mrf.mxu1 }
 0x440   : > { %v2671_v21 = vpop.f32.mrf.mxu1 }
 0x441   : > { %1372 = vrot.lane.b32.xlu1 %v2559_v62, %s2406_s22 }
 0x442   : > { %v2179_v22 = vpop.f32.mrf.mxu1 }
 0x444   : > { %v2675_v24 = vpop.f32.mrf.mxu1 }
 0x445   : > { %1368 = vrot.lane.b32.xlu1 %v2550_v54, %s2406_s22 }
 0x446   : > { %v2182_v25 = vpop.f32.mrf.mxu1 }
 0x449   : > { %1571 = vrot.lane.b32.xlu1 %v2559_v62, %s2407_s25 }
 0x478   : > { %v939_v27 = vpop.xlane.xlu0 %938 }
 0x479   : > { %2353 = vrcp.f32 %v939_v27 }
 0x47c   : > { %v942_v28 = vpop.xlane.xlu1 %941 }
 0x47d   : > { %2355 = vrcp.f32 %v942_v28 }
 0x480   : > { %v945_v29 = vpop.xlane.xlu0 %944  ;;  %v1237_v30 = vpop.permute.xlu1 %1236 }
 0x481   : > { %2357 = vrcp.f32 %v945_v29 }
 0x484   : > { %v1239_v31 = vpop.permute.xlu0 %1238  ;;  %v1235_v34 = vpop.permute.xlu1 %1234 }
 0x486   : > { %v2354_v32 = vpop.eup %2353 }
 0x488   : > { %v1229_v39 = vpop.permute.xlu0 %1228  ;;  %v1231_v42 = vpop.permute.xlu1 %1230 }
 0x48a   : > { %v2356_v37 = vpop.eup %2355 }
 0x48c   : > { %v1233_v47 = vpop.permute.xlu0 %1232 }
 0x48e   : > { %v2358_v43 = vpop.eup %2357 }
 0x4ae   : > { %v1033_v33 = vpop.f32.mrf.mxu1 }
 0x4af   : > { %v1047_v35 = vmul.f32 %v2354_v32, %v1033_v33 }
 0x4b0   : > { %v2206_v36 = vpop.f32.mrf.mxu1 }
 0x4b1   : > { %2216 = vmatmul.mubr.msk.f32.vlgmr.msra.gmra.mxu0 %vm566_vm2, %v1047_v35 }
 0x4b2   : > { %2236 = vmatpush3.xpose.msk.msra.mxu0 %vm566_vm2, %v1239_v31  ;;  %v1038_v38 = vpop.f32.mrf.mxu1  ;;  %2218 = vmatprep.mubr.msk.f32.mxu0 %vm2401_vm1, %v2400_v23 }
 0x4b3   : > { %v1048_v40 = vmul.f32 %v2356_v37, %v1038_v38  ;;  %2237 = vmatprep.subr.mxu0 %v2400_v23 }
 0x4b4   : > { %v2209_v41 = vpop.f32.mrf.mxu1 }
 0x4b5   : > { %2219 = vmatmul.mubr.msk.f32.gmra.mxu0 %vm566_vm2, %v1048_v40 }
 0x4b6   : > { %2238 = vmatpush3.xpose.msk.msra.mxu0 %vm566_vm2, %v1237_v30  ;;  %v1043_v44 = vpop.f32.mrf.mxu1  ;;  %2221 = vmatprep.mubr.msk.f32.mxu0 %vm2401_vm1, %v2400_v23 }
 0x4b7   : > { %v1049_v45 = vmul.f32 %v2358_v43, %v1043_v44  ;;  %2239 = vmatprep.subr.mxu0 %v2400_v23 }
 0x4b8   : > { %v2212_v46 = vpop.f32.mrf.mxu1 }
 0x4b9   : > { %2222 = vmatmul.mubr.msk.f32.gmra.mxu0 %vm566_vm2, %v1049_v45  ;;  %v698_v48 = vpop.xlane.xlu1 %697 }
 0x4ba   : > { %2240 = vmatpush3.xpose.msk.msra.mxu0 %vm566_vm2, %v1235_v34  ;;  %2359 = vrcp.f32 %v698_v48  ;;  %2241 = vmatprep.mubr.msk.f32.mxu0 %vm2401_vm1, %v2400_v23 }
 0x4bb   : > { %2265 = vmatprep.subr.mxu0 %v2400_v23 }
 0x4bd   : > { %v701_v49 = vpop.xlane.xlu0 %700  ;;  %2242 = vmatmul.mubr.msk.f32.vlgmr.msra.gmra.mxu0 %vm566_vm2, %v1229_v39  ;;  %v1373_v55 = vpop.permute.xlu1 %1372 }
 0x4be   : > { %2361 = vrcp.f32 %v701_v49  ;;  %2244 = vmatprep.mubr.msk.f32.mxu0 %vm2401_vm1, %v2400_v23 }
 0x4c1   : > { %v704_v50 = vpop.xlane.xlu0 %703  ;;  %2245 = vmatmul.mubr.msk.f32.gmra.mxu0 %vm566_vm2, %v1231_v42  ;;  %v1369_v32 = vpop.permute.xlu1 %1368 }
 0x4c2   : > { %2363 = vrcp.f32 %v704_v50  ;;  %2247 = vmatprep.mubr.msk.f32.mxu0 %vm2401_vm1, %v2400_v23 }
 0x4c5   : > { %2248 = vmatmul.mubr.msk.f32.gmra.mxu0 %vm566_vm2, %v1233_v47  ;;  %v1572_v33 = vpop.permute.xlu1 %1571 }
 0x4c6   : > { %2267 = vmatprep.mubr.msk.f32.mxu0 %vm2401_vm1, %v2400_v23 }
 0x4c7   : > { %v2360_v51 = vpop.eup %2359 }
 0x4c8   : > { %v806_v52 = vmul.f32 %v2360_v51, %v2669_v19  ;;  %v394_v51 = vld [vmem:[%s2854_s6 + $0x10] sm:$0xff] }
 0x4c9   : > { %2266 = vmatpush3.msra.mxu0 %v394_v51 }
 0x4ca   : > { %2227 = vmatmul.mubr.msk.f32.vlgmr.msra.gmra.mxu1 %vm566_vm2, %v806_v52  ;;  %2291 = vmatprep.subr.mxu0 %v2400_v23 }
 0x4cb   : > { %v2362_v56 = vpop.eup %2361  ;;  %2251 = vmatpush3.msra.mxu1 %v1373_v55  ;;  %2229 = vmatprep.mubr.msk.f32.mxu1 %vm2401_vm1, %v2400_v23 }
 0x4cc   : > { %v807_v59 = vmul.f32 %v2362_v56, %v2671_v21  ;;  %2252 = vmatprep.subr.mxu1 %v2400_v23 }
 0x4ce   : > { %2230 = vmatmul.mubr.msk.f32.gmra.mxu1 %vm566_vm2, %v807_v59 }
 0x4cf   : > { %v2364_v60 = vpop.eup %2363  ;;  %2232 = vmatprep.mubr.msk.f32.mxu1 %vm2401_vm1, %v2400_v23 }
 0x4d0   : > { %v808_v63 = vmul.f32 %v2364_v60, %v2675_v24 }
 0x4d2   : > { %2233 = vmatmul.mubr.msk.f32.gmra.mxu1 %vm566_vm2, %v808_v63 }
 0x4d3   : > { %2256 = vmatprep.mubr.msk.f32.mxu1 %vm2401_vm1, %v2400_v23 }
 0x571   : > { %v1125_v0 = vpop.f32.mrf.mxu0 }
 0x573   : > { %v2217_v1 = vpop.f32.mrf.mxu0 }
 0x575   : > { %v1130_v2 = vpop.f32.mrf.mxu0 }
 0x577   : > { %v2220_v3 = vpop.f32.mrf.mxu0 }
 0x579   : > { %v1135_v4 = vpop.f32.mrf.mxu0 }
 0x57b   : > { %v2223_v5 = vpop.f32.mrf.mxu0 }
 0x57d   : > { %v1318_v6 = vpop.f32.mrf.mxu0 }
 0x57e   : > { %v1332_v7 = vmul.f32 0.35355338, %v1318_v6 }
 0x57f   : > { %v2243_v8 = vpop.f32.mrf.mxu0 }
 0x580   : > { %v1335_v9 = vadd.f32 %v2614_v10, %v1332_v7 }
 0x581   : > { %v1323_v11 = vpop.f32.mrf.mxu0 }
 0x582   : > { %v1333_v12 = vmul.f32 0.35355338, %v1323_v11  ;;  %v1338_v13 = vsel %vm677_vm3, %v1335_v9, -inf }
 0x583   : > { %1339 = vmax.xlane.f32.xlu0 %v1338_v13  ;;  %v2246_v14 = vpop.f32.mrf.mxu0 }
 0x584   : > { %v1336_v15 = vadd.f32 %v2614_v10, %v1333_v12 }
 0x585   : > { %v1328_v16 = vpop.f32.mrf.mxu0 }
 0x586   : > { %v1341_v17 = vsel %vm677_vm3, %v1336_v15, -inf  ;;  %v1334_v29 = vmul.f32 0.35355338, %v1328_v16 }
 0x587   : > { %1342 = vmax.xlane.f32.xlu1 %v1341_v17  ;;  %v2249_v18 = vpop.f32.mrf.mxu0 }
 0x588   : > { %v1337_v30 = vadd.f32 %v2614_v10, %v1334_v29 }
 0x58a   : > { %v1214_v19 = vpop.f32.mrf.mxu1  ;;  %v1344_v31 = vsel %vm677_vm3, %v1337_v30, -inf }
 0x58b   : > { %v2726_v20 = vadd.f32 %v1214_v19, %v1125_v0 }
 0x58c   : > { %v2228_v21 = vpop.f32.mrf.mxu1 }
 0x58e   : > { %v1219_v22 = vpop.f32.mrf.mxu1 }
 0x58f   : > { %v2728_v24 = vadd.f32 %v1219_v22, %v1130_v2 }
 0x590   : > { %v2231_v25 = vpop.f32.mrf.mxu1 }
 0x592   : > { %v1224_v26 = vpop.f32.mrf.mxu1 }
 0x593   : > { %v2730_v27 = vadd.f32 %v1224_v26, %v1135_v4 }
 0x594   : > { %v2234_v28 = vpop.f32.mrf.mxu1 }
 0x598   : > { %1569 = vrot.lane.b32.xlu1 %v2554_v58, %s2407_s25 }
 0x599   : > { %1370 = vrot.lane.b32.xlu0 %v2554_v58, %s2406_s22 }
 0x59c   : > { %1561 = vrot.lane.b32.xlu1 %v2548_v53, %s2407_s25 }
 0x5a0   : > { %1565 = vrot.lane.b32.xlu1 %v2557_v61, %s2407_s25 }
 0x5b8   : > { %1345 = vmax.xlane.f32.xlu0 %v1344_v31 }
 0x5ce   : > { %1567 = vrot.lane.b32.xlu0 %v2550_v54, %s2407_s25 }
 0x5d2   : > { %1563 = vrot.lane.b32.xlu0 %v2552_v57, %s2407_s25 }
 0x60c   : > { %v1340_v34 = vpop.xlane.xlu0 %1339 }
 0x60d   : > { %v1347_v35 = vsub.f32 %v1335_v9, %v1340_v34 }
 0x60f   : > { %v1350_v53 = vmul.f32 1.442695, %v1347_v35 }
 0x610   : > { %v1371_v36 = vpop.permute.xlu0 %1370  ;;  %v1343_v37 = vpop.xlane.xlu1 %1342 }
 0x611   : > { %2365 = vpow2.f32 %v1350_v53  ;;  %v1348_v61 = vsub.f32 %v1336_v15, %v1343_v37  ;;  %2253 = vmatpush3.msra.mxu1 %v1371_v36 }
 0x612   : > { %2254 = vmatprep.subr.mxu1 %v2400_v23 }
 0x613   : > { %v1352_v38 = vmul.f32 1.442695, %v1348_v61  ;;  %2255 = vmatpush3.msra.mxu1 %v1369_v32 }
 0x614   : > { %2276 = vmatprep.subr.mxu1 %v2400_v23  ;;  %v1570_v41 = vpop.permute.xlu1 %1569 }
 0x615   : > { %2367 = vpow2.f32 %v1352_v38 }
 0x618   : > { %v1562_v49 = vpop.permute.xlu1 %1561 }
 0x61c   : > { %v1566_v50 = vpop.permute.xlu1 %1565 }
 0x61e   : > { %v2366_v39 = vpop.eup %2365 }
 0x61f   : > { %2257 = vmatmul.mubr.msk.f32.vlgmr.msra.gmra.mxu1 %vm677_vm3, %v2366_v39  ;;  %v1356_v57 = vsel %vm677_vm3, %v2366_v39, 0.0 }
 0x620   : > { %2277 = vmatpush3.xpose.msk.msra.mxu1 %vm566_vm2, %v1572_v33  ;;  %1357 = vadd.xlane.f32.xlu0 %v1356_v57 }
 0x621   : > { %2259 = vmatprep.mubr.msk.f32.mxu1 %vm2401_vm1, %v2400_v23  ;;  %2278 = vmatprep.subr.mxu1 %v2400_v23 }
 0x622   : > { %v2368_v40 = vpop.eup %2367 }
 0x623   : > { %2260 = vmatmul.mubr.msk.f32.gmra.mxu1 %vm677_vm3, %v2368_v40  ;;  %v1359_v42 = vsel %vm677_vm3, %v2368_v40, 0.0 }
 0x624   : > { %2279 = vmatpush3.xpose.msk.msra.mxu1 %vm566_vm2, %v1570_v41  ;;  %1360 = vadd.xlane.f32.xlu1 %v1359_v42 }
 0x625   : > { %2280 = vmatprep.subr.mxu1 %v2400_v23  ;;  %2262 = vmatprep.mubr.msk.f32.mxu1 %vm2401_vm1, %v2400_v23 }
 0x635   : > { %1703 = vrot.lane.b32.xlu1 %v2554_v58, %s2408_s26 }
 0x641   : > { %v1346_v43 = vpop.xlane.xlu0 %1345 }
 0x642   : > { %v1349_v44 = vsub.f32 %v1337_v30, %v1346_v43 }
 0x644   : > { %v1354_v45 = vmul.f32 1.442695, %v1349_v44 }
 0x645   : > { %v1568_v46 = vpop.permute.xlu0 %1567 }
 0x646   : > { %2369 = vpow2.f32 %v1354_v45  ;;  %2281 = vmatpush3.xpose.msk.msra.mxu1 %vm566_vm2, %v1568_v46  ;;  %v395_v45 = vld [vmem:[%s2854_s6 + $0x18] sm:$0xff] }
 0x647   : > { %2306 = vmatprep.subr.mxu1 %v2400_v23 }
 0x649   : > { %v1564_v58 = vpop.permute.xlu0 %1563 }
 0x653   : > { %v2370_v47 = vpop.eup %2369 }
 0x654   : > { %2263 = vmatmul.mubr.msk.f32.gmra.mxu1 %vm677_vm3, %v2370_v47  ;;  %v1362_v48 = vsel %vm677_vm3, %v2370_v47, 0.0 }
 0x655   : > { %1363 = vadd.xlane.f32.xlu0 %v1362_v48  ;;  %2282 = vmatprep.mubr.msk.f32.mxu1 %vm2401_vm1, %v2400_v23 }
 0x658   : > { %2283 = vmatmul.mubr.msk.f32.vlgmr.msra.gmra.mxu1 %vm566_vm2, %v1562_v49 }
 0x659   : > { %2285 = vmatprep.mubr.msk.f32.mxu1 %vm2401_vm1, %v2400_v23  ;;  %2307 = vmatpush3.msra.mxu1 %v395_v45 }
 0x65c   : > { %2286 = vmatmul.mubr.msk.f32.gmra.mxu1 %vm566_vm2, %v1564_v58 }
 0x65d   : > { %2288 = vmatprep.mubr.msk.f32.mxu1 %vm2401_vm1, %v2400_v23 }
 0x660   : > { %2289 = vmatmul.mubr.msk.f32.gmra.mxu1 %vm566_vm2, %v1566_v50 }
 0x661   : > { %2308 = vmatprep.mubr.msk.f32.mxu1 %vm2401_vm1, %v2400_v23 }
 0x6a9   : > { %v1358_v52 = vpop.xlane.xlu0 %1357 }
 0x6aa   : > { %2371 = vrcp.f32 %v1358_v52 }
 0x6ad   : > { %v1361_v55 = vpop.xlane.xlu1 %1360 }
 0x6ae   : > { %2373 = vrcp.f32 %v1361_v55 }
 0x6b1   : > { %v1704_v36 = vpop.permute.xlu1 %1703 }
 0x6b7   : > { %v2372_v56 = vpop.eup %2371 }
 0x6bb   : > { %v2374_v0 = vpop.eup %2373 }
 0x6de   : > { %v1364_v4 = vpop.xlane.xlu0 %1363 }
 0x6df   : > { %v1452_v59 = vpop.f32.mrf.mxu1  ;;  %2375 = vrcp.f32 %v1364_v4 }
 0x6e0   : > { %v1466_v60 = vmul.f32 %v2372_v56, %v1452_v59 }
 0x6e1   : > { %v2258_v63 = vpop.f32.mrf.mxu1 }
 0x6e2   : > { %2268 = vmatmul.mubr.msk.f32.vlgmr.msra.gmra.mxu0 %vm566_vm2, %v1466_v60 }
 0x6e3   : > { %v1457_v1 = vpop.f32.mrf.mxu1  ;;  %2270 = vmatprep.mubr.msk.f32.mxu0 %vm2401_vm1, %v2400_v23 }
 0x6e4   : > { %v1467_v2 = vmul.f32 %v2374_v0, %v1457_v1 }
 0x6e5   : > { %v2261_v3 = vpop.f32.mrf.mxu1 }
 0x6e6   : > { %2271 = vmatmul.mubr.msk.f32.gmra.mxu0 %vm566_vm2, %v1467_v2 }
 0x6e7   : > { %2273 = vmatprep.mubr.msk.f32.mxu0 %vm2401_vm1, %v2400_v23 }
 0x6ec   : > { %v2376_v5 = vpop.eup %2375 }
 0x714   : > { %v1462_v6 = vpop.f32.mrf.mxu1 }
 0x715   : > { %v1468_v7 = vmul.f32 %v2376_v5, %v1462_v6  ;;  %v2038_v5 = vld [vmem:[%s2855_s7] ss:$0 sm:$0xff] }
 0x716   : > { %v2264_v8 = vpop.f32.mrf.mxu1 }
 0x717   : > { %2274 = vmatmul.mubr.msk.f32.gmra.mxu0 %vm566_vm2, %v1468_v7 }
 0x718   : > { %v1651_v9 = vpop.f32.mrf.mxu1  ;;  %2297 = vmatprep.mubr.msk.f32.mxu0 %vm2401_vm1, %v2400_v23 }
 0x719   : > { %v1665_v11 = vmul.f32 0.35355338, %v1651_v9  ;;  %v2389_v9 = vld [vmem:[%s2470_s10] sm:$0xff] }
 0x71a   : > { %v2284_v12 = vpop.f32.mrf.mxu1 }
 0x71b   : > { %v1668_v13 = vadd.f32 %v2614_v10, %v1665_v11 }
 0x71c   : > { %v1656_v14 = vpop.f32.mrf.mxu1 }
 0x71d   : > { %v1666_v15 = vmul.f32 0.35355338, %v1656_v14  ;;  %v1671_v16 = vsel %vm677_vm3, %v1668_v13, -inf }
 0x71e   : > { %1672 = vmax.xlane.f32.xlu0 %v1671_v16  ;;  %v2287_v17 = vpop.f32.mrf.mxu1  ;;  %v2390_v16 = vld [vmem:[%s2470_s10 + $0x8] sm:$0xff] }
 0x71f   : > { %v1669_v18 = vadd.f32 %v2614_v10, %v1666_v15 }
 0x720   : > { %v1661_v19 = vpop.f32.mrf.mxu1 }
 0x721   : > { %v1667_v21 = vmul.f32 0.35355338, %v1661_v19  ;;  %v1674_v22 = vsel %vm677_vm3, %v1669_v18, -inf }
 0x722   : > { %1675 = vmax.xlane.f32.xlu0 %v1674_v22  ;;  %v2290_v25 = vpop.f32.mrf.mxu1  ;;  %v2391_v22 = vld [vmem:[%s2470_s10 + $0x10] sm:$0xff] }
 0x723   : > { %v1670_v26 = vadd.f32 %v2614_v10, %v1667_v21 }
 0x725   : > { %v1677_v28 = vsel %vm677_vm3, %v1670_v26, -inf }
 0x726   : > { %1678 = vmax.xlane.f32.xlu1 %v1677_v28 }
 0x737   : > { %1701 = vrot.lane.b32.xlu1 %v2550_v54, %s2408_s26 }
 0x738   : > { %1705 = vrot.lane.b32.xlu0 %v2559_v62, %s2408_s26 }
 0x7a2   : > { %v1544_v29 = vpop.f32.mrf.mxu0 }
 0x7a3   : > { %v2801_v30 = vadd.f32 %v1544_v29, %v2726_v20 }
 0x7a4   : > { %v2269_v31 = vpop.f32.mrf.mxu0 }
 0x7a6   : > { %v1549_v32 = vpop.f32.mrf.mxu0 }
 0x7a7   : > { %v2804_v33 = vadd.f32 %v1549_v32, %v2728_v24  ;;  %v1673_v34 = vpop.xlane.xlu0 %1672 }
 0x7a8   : > { %v1680_v10 = vsub.f32 %v1668_v13, %v1673_v34  ;;  %v2272_v35 = vpop.f32.mrf.mxu0 }
 0x7aa   : > { %v1683_v53 = vmul.f32 1.442695, %v1680_v10 }
 0x7ab   : > { %v1676_v37 = vpop.xlane.xlu0 %1675 }
 0x7ac   : > { %2377 = vpow2.f32 %v1683_v53  ;;  %v1681_v54 = vsub.f32 %v1669_v18, %v1676_v37 }
 0x7ae   : > { %v1685_v61 = vmul.f32 1.442695, %v1681_v54 }
 0x7af   : > { %v1679_v38 = vpop.xlane.xlu1 %1678  ;;  %v1706_v62 = vpop.permute.xlu0 %1705 }
 0x7b0   : > { %2379 = vpow2.f32 %v1685_v61  ;;  %v1682_v39 = vsub.f32 %v1670_v26, %v1679_v38  ;;  %2292 = vmatpush3.msra.mxu0 %v1706_v62 }
 0x7b1   : > { %2293 = vmatprep.subr.mxu0 %v2400_v23 }
 0x7b2   : > { %v1687_v20 = vmul.f32 1.442695, %v1682_v39  ;;  %2294 = vmatpush3.msra.mxu0 %v1704_v36 }
 0x7b3   : > { %v1702_v24 = vpop.permute.xlu1 %1701  ;;  %2295 = vmatprep.subr.mxu0 %v2400_v23 }
 0x7b4   : > { %2381 = vpow2.f32 %v1687_v20  ;;  %2296 = vmatpush3.msra.mxu0 %v1702_v24 }
 0x7b9   : > { %v2378_v57 = vpop.eup %2377 }
 0x7ba   : > { %2298 = vmatmul.mubr.msk.f32.vlgmr.msra.gmra.mxu0 %vm677_vm3, %v2378_v57  ;;  %v1689_v40 = vsel %vm677_vm3, %v2378_v57, 0.0 }
 0x7bb   : > { %1690 = vadd.xlane.f32.xlu1 %v1689_v40  ;;  %2300 = vmatprep.mubr.msk.f32.mxu0 %vm2401_vm1, %v2400_v23 }
 0x7bd   : > { %v2380_v41 = vpop.eup %2379 }
 0x7be   : > { %2301 = vmatmul.mubr.msk.f32.gmra.mxu0 %vm677_vm3, %v2380_v41  ;;  %v1692_v42 = vsel %vm677_vm3, %v2380_v41, 0.0 }
 0x7bf   : > { %1693 = vadd.xlane.f32.xlu0 %v1692_v42  ;;  %2303 = vmatprep.mubr.msk.f32.mxu0 %vm2401_vm1, %v2400_v23 }
 0x7c1   : > { %v2382_v43 = vpop.eup %2381 }
 0x7c2   : > { %2304 = vmatmul.mubr.msk.f32.gmra.mxu0 %vm677_vm3, %v2382_v43  ;;  %v1695_v44 = vsel %vm677_vm3, %v2382_v43, 0.0 }
 0x7c3   : > { %1696 = vadd.xlane.f32.xlu0 %v1695_v44 }
 0x7d7   : > { %v1554_v46 = vpop.f32.mrf.mxu0 }
 0x7d8   : > { %v1560_v47 = vadd.f32 %v1554_v46, %v2730_v27 }
 0x7d9   : > { %v2275_v48 = vpop.f32.mrf.mxu0 }
 0x844   : > { %v1691_v49 = vpop.xlane.xlu1 %1690 }
 0x845   : > { %2383 = vrcp.f32 %v1691_v49 }
 0x848   : > { %v1694_v58 = vpop.xlane.xlu0 %1693 }
 0x849   : > { %2385 = vrcp.f32 %v1694_v58 }
 0x84c   : > { %v1697_v50 = vpop.xlane.xlu0 %1696 }
 0x84d   : > { %2387 = vrcp.f32 %v1697_v50 }
 0x852   : > { %v2384_v51 = vpop.eup %2383 }
 0x856   : > { %v2386_v59 = vpop.eup %2385 }
 0x85a   : > { %v2388_v0 = vpop.eup %2387 }
 0x87a   : > { %v1785_v52 = vpop.f32.mrf.mxu0 }
 0x87b   : > { %v1799_v55 = vmul.f32 %v2384_v51, %v1785_v52 }
 0x87c   : > { %v2299_v56 = vpop.f32.mrf.mxu0 }
 0x87d   : > { %2309 = vmatmul.mubr.msk.f32.vlgmr.msra.gmra.mxu1 %vm566_vm2, %v1799_v55 }
 0x87e   : > { %v1790_v60 = vpop.f32.mrf.mxu0  ;;  %2311 = vmatprep.mubr.msk.f32.mxu1 %vm2401_vm1, %v2400_v23 }
 0x87f   : > { %v1800_v27 = vmul.f32 %v2386_v59, %v1790_v60 }
 0x880   : > { %v2302_v63 = vpop.f32.mrf.mxu0 }
 0x881   : > { %2312 = vmatmul.mubr.msk.f32.gmra.mxu1 %vm566_vm2, %v1800_v27 }
 0x882   : > { %v1795_v1 = vpop.f32.mrf.mxu0  ;;  %2314 = vmatprep.mubr.msk.f32.mxu1 %vm2401_vm1, %v2400_v23 }
 0x883   : > { %v1801_v2 = vmul.f32 %v2388_v0, %v1795_v1 }
 0x884   : > { %v2305_v3 = vpop.f32.mrf.mxu0 }
 0x885   : > { %2315 = vmatmul.mubr.msk.f32.gmra.mxu1 %vm566_vm2, %v1801_v2 }
 0x93d   : > { %v1877_v4 = vpop.f32.mrf.mxu1 }
 0x93e   : > { %v1891_v6 = vadd.f32 %v1877_v4, %v2801_v30 }
 0x93f   : > { %v2310_v7 = vpop.f32.mrf.mxu1 }
 0x940   : > { %v1901_v8 = vadd.f32 %v2038_v5, %v1891_v6 }
 0x941   : > { %v1882_v23 = vpop.f32.mrf.mxu1 }
 0x942   : > { %v1904_v11 = vadd.f32 %v2389_v9, %v1901_v8  ;;  %v1892_v12 = vadd.f32 %v1882_v23, %v2804_v33 }
 0x943   : > { %v2313_v13 = vpop.f32.mrf.mxu1 }
 0x944   : > { %1907 = vst.msk [vmem:[%s319_s17] sm:$0xff] %vm325_vm0, %v1904_v11  ;;  %v1902_v14 = vadd.f32 %v2038_v5, %v1892_v12 }
 0x945   : > { %v1887_v15 = vpop.f32.mrf.mxu1 }
 0x946   : > { %v1905_v17 = vadd.f32 %v2390_v16, %v1902_v14  ;;  %v1893_v18 = vadd.f32 %v1887_v15, %v1560_v47 }
 0x947   : > { %v2316_v19 = vpop.f32.mrf.mxu1 }
 0x948   : > { %1908 = vst.msk [vmem:[%s319_s17 + $0x8] sm:$0xff] %vm325_vm0, %v1905_v17  ;;  %v1903_v21 = vadd.f32 %v2038_v5, %v1893_v18 }
 0x94a   : > { %v1906_v25 = vadd.f32 %v2391_v22, %v1903_v21 }
 0x94c   : > { %1909 = vst.msk [vmem:[%s319_s17 + $0x10] sm:$0xff] %vm325_vm0, %v1906_v25 }
 0x94d PF: > { %s18_s27 = sadd.s32 1, %s2398_s27  }
 0x94e   : > { %p15_p4 = scmp.ge.s32.totalorder %s18_s27, 4  }
 0x950   :  { %17 = sbr.rel (!%p15_p4) target bundleno = 1 (0x1), region = 85 }

// kernel: pali_forward.29
= control target key start
LH: loop header
LB: loop body
LE: loop exit
PB: predicated region body
PF: predicated region fallthrough
CT: control target
= control target key end

     0   :  { %s1728_s24 = smov 0   ;;  %s1913_s0 = inlined_call_operand.vmem [shape: f32[2,8,32], index: 0, kind: input, shape index: {}]   ;;  %s1914_s1 = inlined_call_operand.vmem [shape: f32[1,32], index: 1, kind: input, shape index: {}]   ;;  %s1915_s2 = inlined_call_operand.vmem [shape: f32[1,32], index: 2, kind: input, shape index: {}]   ;;  %s1916_s3 = inlined_call_operand.vmem [shape: f32[32,32], index: 3, kind: input, shape index: {}]   ;;  %s1917_s4 = inlined_call_operand.vmem [shape: f32[32,64], index: 4, kind: input, shape index: {}]   ;;  %s1918_s5 = inlined_call_operand.vmem [shape: f32[32,32], index: 5, kind: input, shape index: {}]   ;;  %s1919_s6 = inlined_call_operand.vmem [shape: f32[1,32], index: 6, kind: input, shape index: {}]   ;;  %s1920_s7 = inlined_call_operand.vmem [shape: f32[2,8,32], index: 7, kind: output, shape index: {}]  }
   0x1 LB: > { %s1490_s25 = sadd.s32 4294967295, %s1677_s24   ;;  %p1494_p0 = scmp.ge.s32.totalorder %s1677_s24, 1  ;;  %s1677_s24 = sphi %s1728_s24, %s17_s24  }
   0x2   : > { %p236_p1 = scmp.lt.s32.totalorder %s1677_s24, 3 }
   0x4   : > { %p237_p2 = pnand %p1494_p0, %p236_p1 }
   0x5   : > { %p266_p3 = scmp.lt.s32.totalorder (!%p237_p2), %s1490_s25, 1  ;;  %s1681_s30 = smov (!%p237_p2), 120  }
   0x6   : > { %240 = sbr.rel (%p237_p2) target bundleno = 2292 (0x8f4), region = 48  ;;  %s1682_s8 = smov (!%p237_p2), 96  }
   0x7   : > { %s1683_s9 = smov (!%p237_p2), 88   ;;  %s1684_s10 = smov (!%p237_p2), 112  }
   0x8   : > { %s1685_s15 = smov (!%p237_p2), 80   ;;  %s1686_s16 = smov (!%p237_p2), 104  }
   0x9   : > { %s1687_s17 = smov (!%p237_p2), 72  }
   0xb   : > { %s1922_s25 = smov (!%p266_p3, %s1490_s25), 1  ;;  %vm277_vm0 = vcmask 261120   ;;  %v309_v7 = vld [vmem:[%s1916_s3 + $0x18] sm:$0xff]  ;;  %v1679_v9 = vmov 0.0   ;;  %v308_v10 = vld [vmem:[%s1916_s3 + $0x10] sm:$0xff]  ;;  %v307_v12 = vld [vmem:[%s1916_s3 + $0x8] sm:$0xff]  ;;  %v461_v31 = vlaneseq }
   0xc   : > { %s1495_s26 = sshll.u32 %s1922_s25, 3  ;;  %v313_v8 = vld [vmem:[%s1917_s4 + $0x18] sm:$0xff]  ;;  %1554 = vmatprep.subr.mxu0 %v1679_v9  ;;  %1565 = vmatprep.subr.mxu1 %v1679_v9  ;;  %v312_v11 = vld [vmem:[%s1917_s4 + $0x10] sm:$0xff]  ;;  %v311_v13 = vld [vmem:[%s1917_s4 + $0x8] sm:$0xff]  ;;  %vm1680_vm1 = vmmov 0   ;;  %vm466_vm2 = vcmask 64512  }
   0xd   : > { %s269_s29 = scalar_lea.vmem %s1913_s0, %s1495_s26  ;;  %1555 = vmatpush3.msra.mxu0 %v309_v7  ;;  %1566 = vmatpush3.msra.mxu1 %v313_v8  ;;  %v306_v14 = vld [vmem:[%s1916_s3] sm:$0xff]  ;;  %v1818_v32 = vshrl.u32 %v461_v31, 7  ;;  %v1820_v33 = vand.u32 127, %v461_v31  ;;  %v315_v57 = vld [vmem:[%s1918_s5 + $0x8] sm:$0xff] }
   0xe   : > { %v1744_v0 = vld [vmem:[%s269_s29] sm:$0xff]  ;;  %1556 = vmatprep.subr.mxu0 %v1679_v9  ;;  %1567 = vmatprep.subr.mxu1 %v1679_v9  ;;  %s273_s29 = scalar_lea.vmem %s1920_s7, %s1495_s26 }
   0xf   : > { %v278_v1 = vsel %vm277_vm0, %v1744_v0, 0.0  ;;  %1557 = vmatpush3.msra.mxu0 %v308_v10  ;;  %1568 = vmatpush3.msra.mxu1 %v312_v11  ;;  %v310_v15 = vld [vmem:[%s1917_s4] sm:$0xff]  ;;  %vm465_vm3 = vcmp.ge.s32.totalorder %v1818_v32, %v1820_v33 }
  0x10   : > { %279 = vadd.xlane.f32.xlu0 %v278_v1  ;;  %1558 = vmatprep.subr.mxu0 %v1679_v9  ;;  %v1497_v20 = vld [vmem:[%s1914_s1] ss:$0 sm:$0xff] }
  0x11   : > { %1569 = vmatprep.subr.mxu1 %v1679_v9  ;;  %1559 = vmatpush3.msra.mxu0 %v307_v12  ;;  %v1498_v22 = vld [vmem:[%s1915_s2] ss:$0 sm:$0xff] }
  0x12   : > { %1570 = vmatpush3.msra.mxu1 %v311_v13  ;;  %1560 = vmatprep.subr.mxu0 %v1679_v9  ;;  %v314_v54 = vld [vmem:[%s1918_s5] sm:$0xff] }
  0x13   : > { %1571 = vmatprep.subr.mxu1 %v1679_v9  ;;  %1561 = vmatpush3.msra.mxu0 %v306_v14 }
  0x14   : > { %1562 = vmatprep.mubr.msk.f32.mxu0 %vm1680_vm1, %v1679_v9  ;;  %1572 = vmatpush3.msra.mxu1 %v310_v15 }
  0x15   : > { %1573 = vmatprep.mubr.msk.f32.mxu1 %vm1680_vm1, %v1679_v9  ;;  %1576 = vmatprep.subr.mxu0 %v1679_v9 }
  0x16   : > { %1581 = vmatprep.subr.mxu1 %v1679_v9 }
  0x99   : > { %v280_v2 = vpop.xlane.xlu0 %279 }
  0x9a   : > { %v282_v3 = vmul.f32 0.03125, %v280_v2 }
  0x9c   : > { %v283_v4 = vsub.f32 %v1744_v0, %v282_v3 }
  0x9e   : > { %v284_v5 = vmul.f32 %v283_v4, %v283_v4 }
  0xa0   : > { %v285_v6 = vsel %vm277_vm0, %v284_v5, 0.0 }
  0xa1   : > { %286 = vadd.xlane.f32.xlu0 %v285_v6 }
 0x12a   : > { %v287_v16 = vpop.xlane.xlu0 %286 }
 0x12b   : > { %v288_v17 = vmul.f32 0.03125, %v287_v16 }
 0x12d   : > { %v289_v18 = vadd.f32 1e-05, %v288_v17 }
 0x12f   : > { %1653 = vrsqrt.f32 %v289_v18 }
 0x13c   : > { %v1654_v19 = vpop.eup %1653 }
 0x13d   : > { %v291_v21 = vmul.f32 %v1654_v19, %v283_v4 }
 0x13f   : > { %v298_v23 = vmul.f32 %v1497_v20, %v291_v21 }
 0x141   : > { %v305_v24 = vadd.f32 %v1498_v22, %v298_v23 }
 0x143   : > { %1563 = vmatmul.mubr.msk.f32.vlgmr.msra.gmra.mxu0 %vm277_vm0, %v305_v24  ;;  %1574 = vmatmul.mubr.msk.f32.vlgmr.msra.gmra.mxu1 %vm277_vm0, %v305_v24 }
 0x144   : > { %1578 = vmatprep.mubr.msk.f32.mxu0 %vm1680_vm1, %v1679_v9  ;;  %1583 = vmatprep.mubr.msk.f32.mxu1 %vm1680_vm1, %v1679_v9 }
 0x203   : > { %v1800_v25 = vpop.f32.mrf.mxu0  ;;  %v1802_v26 = vpop.f32.mrf.mxu1 }
 0x204   : > { %634 = vrot.lane.b32.xlu1 %v1802_v26, %s1681_s30  ;;  %1577 = vmatpush3.xpose.msk.msra.mxu0 %vm466_vm2, %v1802_v26 }
 0x205   : > { %v1564_v27 = vpop.f32.mrf.mxu0  ;;  %v1575_v28 = vpop.f32.mrf.mxu1  ;;  %1586 = vmatprep.subr.mxu0 %v1679_v9 }
 0x207   : > { %1579 = vmatmul.mubr.msk.f32.vlgmr.msra.gmra.mxu0 %vm466_vm2, %v1800_v25 }
 0x208   : > { %632 = vrot.lane.b32.xlu1 %v1800_v25, %s1681_s30  ;;  %1588 = vmatprep.mubr.msk.f32.mxu0 %vm1680_vm1, %v1679_v9 }
 0x276   : > { %v635_v29 = vpop.permute.xlu1 %634 }
 0x277   : > { %1587 = vmatpush3.xpose.msk.msra.mxu0 %vm466_vm2, %v635_v29 }
 0x278   : > { %1596 = vmatprep.subr.mxu0 %v1679_v9 }
 0x27a   : > { %v633_v30 = vpop.permute.xlu1 %632 }
 0x27b   : > { %1589 = vmatmul.mubr.msk.f32.vlgmr.msra.gmra.mxu0 %vm466_vm2, %v633_v30 }
 0x27c   : > { %1598 = vmatprep.mubr.msk.f32.mxu0 %vm1680_vm1, %v1679_v9  ;;  %1597 = vmatpush3.msra.mxu0 %v315_v57 }
 0x27d   : > { %1606 = vmatprep.subr.mxu0 %v1679_v9 }
 0x2c7   : > { %v539_v34 = vpop.f32.mrf.mxu0 }
 0x2c8   : > { %v543_v35 = vmul.f32 0.35355338, %v539_v34 }
 0x2c9   : > { %v1580_v36 = vpop.f32.mrf.mxu0 }
 0x2ca   : > { %v544_v37 = vsel %vm465_vm3, %v543_v35, -1e+30 }
 0x2cb   : > { %v545_v38 = vsel %vm466_vm2, %v544_v37, -inf }
 0x2cc   : > { %546 = vmax.xlane.f32.xlu0 %v545_v38 }
 0x2e2   : > { %555 = vrot.lane.b32.xlu0 %v1802_v26, %s1682_s8 }
 0x2e6   : > { %722 = vrot.lane.b32.xlu0 %v1802_v26, %s1683_s9 }
 0x33b   : > { %v706_v39 = vpop.f32.mrf.mxu0 }
 0x33c   : > { %v710_v40 = vmul.f32 0.35355338, %v706_v39 }
 0x33d   : > { %v1590_v41 = vpop.f32.mrf.mxu0 }
 0x33e   : > { %v711_v42 = vsel %vm465_vm3, %v710_v40, -1e+30 }
 0x33f   : > { %v712_v43 = vsel %vm466_vm2, %v711_v42, -inf }
 0x340   : > { %713 = vmax.xlane.f32.xlu1 %v712_v43 }
 0x351   : > { %947 = vrot.lane.b32.xlu1 %v1802_v26, %s1684_s10 }
 0x355   : > { %v547_v44 = vpop.xlane.xlu0 %546  ;;  %945 = vrot.lane.b32.xlu1 %v1800_v25, %s1684_s10 }
 0x356   : > { %v548_v45 = vsub.f32 %v544_v37, %v547_v44 }
 0x358   : > { %v549_v46 = vmul.f32 1.442695, %v548_v45 }
 0x359   : > { %v556_v47 = vpop.permute.xlu0 %555 }
 0x35a   : > { %1655 = vpow2.f32 %v549_v46  ;;  %1582 = vmatpush3.msra.mxu1 %v556_v47 }
 0x35b   : > { %1591 = vmatprep.subr.mxu1 %v1679_v9 }
 0x35d   : > { %v723_v49 = vpop.permute.xlu0 %722 }
 0x367   : > { %v1656_v48 = vpop.eup %1655 }
 0x368   : > { %1584 = vmatmul.mubr.msk.f32.vlgmr.msra.gmra.mxu1 %vm466_vm2, %v1656_v48  ;;  %v551_v50 = vsel %vm466_vm2, %v1656_v48, 0.0 }
 0x369   : > { %1592 = vmatpush3.msra.mxu1 %v723_v49  ;;  %1593 = vmatprep.mubr.msk.f32.mxu1 %vm1680_vm1, %v1679_v9 }
 0x36a   : > { %1601 = vmatprep.subr.mxu1 %v1679_v9 }
 0x379   : > { %552 = vadd.xlane.f32.xlu1 %v551_v50 }
 0x3c9   : > { %v714_v51 = vpop.xlane.xlu1 %713 }
 0x3ca   : > { %v715_v52 = vsub.f32 %v711_v42, %v714_v51 }
 0x3cc   : > { %v716_v53 = vmul.f32 1.442695, %v715_v52  ;;  %v1517_v52 = vld [vmem:[%s1919_s6] ss:$0 sm:$0xff] }
 0x3cd   : > { %v948_v58 = vpop.permute.xlu1 %947 }
 0x3ce   : > { %1657 = vpow2.f32 %v716_v53 }
 0x3d1   : > { %v946_v59 = vpop.permute.xlu1 %945 }
 0x3db   : > { %v1658_v55 = vpop.eup %1657 }
 0x3dc   : > { %1594 = vmatmul.mubr.msk.f32.vlgmr.msra.gmra.mxu1 %vm466_vm2, %v1658_v55  ;;  %v718_v56 = vsel %vm466_vm2, %v1658_v55, 0.0 }
 0x3dd   : > { %719 = vadd.xlane.f32.xlu0 %v718_v56  ;;  %1602 = vmatpush3.msra.mxu1 %v314_v54 }
 0x3de   : > { %1603 = vmatprep.mubr.msk.f32.mxu1 %vm1680_vm1, %v1679_v9  ;;  %1611 = vmatprep.subr.mxu1 %v1679_v9 }
 0x3f3   : > { %1035 = vrot.lane.b32.xlu0 %v1802_v26, %s1685_s15 }
 0x402   : > { %v553_v60 = vpop.xlane.xlu1 %552 }
 0x403   : > { %1659 = vrcp.f32 %v553_v60 }
 0x410   : > { %v1660_v61 = vpop.eup %1659 }
 0x428   : > { %v627_v62 = vpop.f32.mrf.mxu1 }
 0x429   : > { %v631_v63 = vmul.f32 %v1660_v61, %v627_v62 }
 0x42a   : > { %v1585_v1 = vpop.f32.mrf.mxu1 }
 0x42b   : > { %1604 = vmatmul.mubr.msk.f32.vlgmr.msra.gmra.mxu1 %vm466_vm2, %v631_v63 }
 0x42c   : > { %1613 = vmatprep.mubr.msk.f32.mxu1 %vm1680_vm1, %v1679_v9 }
 0x466   : > { %v720_v2 = vpop.xlane.xlu0 %719 }
 0x467   : > { %1661 = vrcp.f32 %v720_v2 }
 0x46a   : > { %v1036_v3 = vpop.permute.xlu0 %1035 }
 0x46b   : > { %1612 = vmatpush3.msra.mxu1 %v1036_v3 }
 0x46c   : > { %1621 = vmatprep.subr.mxu1 %v1679_v9 }
 0x474   : > { %v1662_v4 = vpop.eup %1661 }
 0x49c   : > { %v794_v5 = vpop.f32.mrf.mxu1 }
 0x49d   : > { %v798_v6 = vmul.f32 %v1662_v4, %v794_v5 }
 0x49e   : > { %v1595_v7 = vpop.f32.mrf.mxu1 }
 0x49f   : > { %1599 = vmatmul.mubr.msk.f32.vlgmr.msra.gmra.mxu0 %vm466_vm2, %v798_v6 }
 0x4a0   : > { %1607 = vmatpush3.xpose.msk.msra.mxu0 %vm466_vm2, %v948_v58  ;;  %1608 = vmatprep.mubr.msk.f32.mxu0 %vm1680_vm1, %v1679_v9 }
 0x4a1   : > { %1616 = vmatprep.subr.mxu0 %v1679_v9 }
 0x4a3   : > { %1609 = vmatmul.mubr.msk.f32.vlgmr.msra.gmra.mxu0 %vm466_vm2, %v946_v59 }
 0x4a4   : > { %1618 = vmatprep.mubr.msk.f32.mxu0 %vm1680_vm1, %v1679_v9 }
 0x4eb   : > { %v941_v8 = vpop.f32.mrf.mxu1 }
 0x4ed   : > { %v1605_v10 = vpop.f32.mrf.mxu1 }
 0x55f   : > { %v868_v11 = vpop.f32.mrf.mxu0 }
 0x560   : > { %v942_v32 = vadd.f32 %v941_v8, %v868_v11 }
 0x561   : > { %v1600_v12 = vpop.f32.mrf.mxu0 }
 0x563   : > { %v1019_v13 = vpop.f32.mrf.mxu0 }
 0x564   : > { %v1023_v14 = vmul.f32 0.35355338, %v1019_v13 }
 0x565   : > { %v1610_v15 = vpop.f32.mrf.mxu0 }
 0x566   : > { %v1024_v16 = vsel %vm465_vm3, %v1023_v14, -1e+30 }
 0x567   : > { %v1025_v17 = vsel %vm466_vm2, %v1024_v16, -inf }
 0x568   : > { %1026 = vmax.xlane.f32.xlu0 %v1025_v17 }
 0x57e   : > { %1188 = vrot.lane.b32.xlu0 %v1802_v26, %s1686_s16 }
 0x582   : > { %1186 = vrot.lane.b32.xlu0 %v1800_v25, %s1686_s16  ;;  %v316_v25 = vld [vmem:[%s1918_s5 + $0x10] sm:$0xff] }
 0x583   : > { %1617 = vmatpush3.msra.mxu0 %v316_v25 }
 0x584   : > { %1626 = vmatprep.subr.mxu0 %v1679_v9 }
 0x5f1   : > { %v1027_v18 = vpop.xlane.xlu0 %1026 }
 0x5f2   : > { %v1028_v19 = vsub.f32 %v1024_v16, %v1027_v18 }
 0x5f4   : > { %v1029_v20 = vmul.f32 1.442695, %v1028_v19 }
 0x5f5   : > { %v1189_v21 = vpop.permute.xlu0 %1188 }
 0x5f6   : > { %1663 = vpow2.f32 %v1029_v20 }
 0x5f9   : > { %v1187_v24 = vpop.permute.xlu0 %1186 }
 0x603   : > { %v1664_v22 = vpop.eup %1663 }
 0x604   : > { %1614 = vmatmul.mubr.msk.f32.vlgmr.msra.gmra.mxu1 %vm466_vm2, %v1664_v22  ;;  %v1031_v23 = vsel %vm466_vm2, %v1664_v22, 0.0 }
 0x605   : > { %1622 = vmatpush3.xpose.msk.msra.mxu1 %vm466_vm2, %v1189_v21  ;;  %1032 = vadd.xlane.f32.xlu1 %v1031_v23 }
 0x606   : > { %1623 = vmatprep.mubr.msk.f32.mxu1 %vm1680_vm1, %v1679_v9  ;;  %1631 = vmatprep.subr.mxu1 %v1679_v9 }
 0x608   : > { %1624 = vmatmul.mubr.msk.f32.vlgmr.msra.gmra.mxu1 %vm466_vm2, %v1187_v24 }
 0x609   : > { %1633 = vmatprep.mubr.msk.f32.mxu1 %vm1680_vm1, %v1679_v9 }
 0x616   : > { %1276 = vrot.lane.b32.xlu1 %v1802_v26, %s1687_s17 }
 0x68e   : > { %v1033_v27 = vpop.xlane.xlu1 %1032 }
 0x68f   : > { %1665 = vrcp.f32 %v1033_v27 }
 0x692   : > { %v1277_v34 = vpop.permute.xlu1 %1276 }
 0x69c   : > { %v1666_v28 = vpop.eup %1665 }
 0x6c4   : > { %v1107_v29 = vpop.f32.mrf.mxu1 }
 0x6c5   : > { %v1111_v30 = vmul.f32 %v1666_v28, %v1107_v29 }
 0x6c6   : > { %v1615_v31 = vpop.f32.mrf.mxu1 }
 0x6c7   : > { %1619 = vmatmul.mubr.msk.f32.vlgmr.msra.gmra.mxu0 %vm466_vm2, %v1111_v30 }
 0x6c8   : > { %1627 = vmatpush3.msra.mxu0 %v1277_v34  ;;  %v1260_v35 = vpop.f32.mrf.mxu1  ;;  %1628 = vmatprep.mubr.msk.f32.mxu0 %vm1680_vm1, %v1679_v9  ;;  %v317_v9 = vld [vmem:[%s1918_s5 + $0x18] sm:$0xff] }
 0x6c9   : > { %v1264_v26 = vmul.f32 0.35355338, %v1260_v35  ;;  %1632 = vmatpush3.msra.mxu1 %v317_v9 }
 0x6ca   : > { %v1625_v36 = vpop.f32.mrf.mxu1 }
 0x6cb   : > { %v1265_v37 = vsel %vm465_vm3, %v1264_v26, -1e+30 }
 0x6cc   : > { %v1266_v38 = vsel %vm466_vm2, %v1265_v37, -inf }
 0x6cd   : > { %1267 = vmax.xlane.f32.xlu0 %v1266_v38 }
 0x756   : > { %v1268_v39 = vpop.xlane.xlu0 %1267 }
 0x757   : > { %v1269_v40 = vsub.f32 %v1265_v37, %v1268_v39 }
 0x759   : > { %v1270_v41 = vmul.f32 1.442695, %v1269_v40 }
 0x75b   : > { %1667 = vpow2.f32 %v1270_v41 }
 0x768   : > { %v1668_v42 = vpop.eup %1667 }
 0x769   : > { %1629 = vmatmul.mubr.msk.f32.vlgmr.msra.gmra.mxu0 %vm466_vm2, %v1668_v42  ;;  %v1272_v43 = vsel %vm466_vm2, %v1668_v42, 0.0 }
 0x76a   : > { %1273 = vadd.xlane.f32.xlu1 %v1272_v43 }
 0x787   : > { %v1181_v33 = vpop.f32.mrf.mxu0 }
 0x788   : > { %v1185_v44 = vadd.f32 %v1181_v33, %v942_v32 }
 0x789   : > { %v1620_v45 = vpop.f32.mrf.mxu0 }
 0x7f3   : > { %v1274_v46 = vpop.xlane.xlu1 %1273 }
 0x7f4   : > { %1669 = vrcp.f32 %v1274_v46 }
 0x801   : > { %v1670_v47 = vpop.eup %1669 }
 0x829   : > { %v1348_v48 = vpop.f32.mrf.mxu0 }
 0x82a   : > { %v1352_v49 = vmul.f32 %v1670_v47, %v1348_v48 }
 0x82b   : > { %v1630_v50 = vpop.f32.mrf.mxu0 }
 0x82c   : > { %1634 = vmatmul.mubr.msk.f32.vlgmr.msra.gmra.mxu1 %vm466_vm2, %v1352_v49 }
 0x8ec   : > { %v1422_v51 = vpop.f32.mrf.mxu1 }
 0x8ed   : > { %v1426_v53 = vadd.f32 %v1422_v51, %v1185_v44 }
 0x8ee   : > { %v1635_v54 = vpop.f32.mrf.mxu1 }
 0x8ef   : > { %v1434_v55 = vadd.f32 %v1517_v52, %v1426_v53 }
 0x8f1   : > { %v1435_v56 = vadd.f32 %v1434_v55, %v1744_v0 }
 0x8f3   : > { %1436 = vst.msk [vmem:[%s273_s29] sm:$0xff] %vm277_vm0, %v1435_v56 }
 0x8f4 PF: > { %s17_s24 = sadd.s32 1, %s1677_s24  }
 0x8f5   : > { %p14_p4 = scmp.ge.s32.totalorder %s17_s24, 4  }
 0x8f7   :  { %16 = sbr.rel (!%p14_p4) target bundleno = 1 (0x1), region = 78 }

// kernel: pali_forward.31
= control target key start
LH: loop header
LB: loop body
LE: loop exit
PB: predicated region body
PF: predicated region fallthrough
CT: control target
= control target key end

     0   :  { %s693_s24 = smov 0   ;;  %s820_s0 = inlined_call_operand.vmem [shape: f32[2,8,32], index: 0, kind: input, shape index: {}]   ;;  %s821_s1 = inlined_call_operand.vmem [shape: f32[1,32], index: 1, kind: input, shape index: {}]   ;;  %s822_s2 = inlined_call_operand.vmem [shape: f32[1,32], index: 2, kind: input, shape index: {}]   ;;  %s823_s3 = inlined_call_operand.vmem [shape: f32[32,128], index: 3, kind: input, shape index: {}]   ;;  %s824_s4 = inlined_call_operand.vmem [shape: f32[1,128], index: 4, kind: input, shape index: {}]   ;;  %s825_s5 = inlined_call_operand.vmem [shape: f32[128,32], index: 5, kind: input, shape index: {}]   ;;  %s826_s6 = inlined_call_operand.vmem [shape: f32[1,32], index: 6, kind: input, shape index: {}]   ;;  %s827_s7 = inlined_call_operand.vmem [shape: f32[2,8,32], index: 7, kind: output, shape index: {}]  }
   0x1 LB: > { %s547_s25 = sadd.s32 4294967295, %s649_s24   ;;  %p551_p0 = scmp.ge.s32.totalorder %s649_s24, 1  ;;  %s649_s24 = sphi %s693_s24, %s17_s24  }
   0x2   : > { %p236_p1 = scmp.lt.s32.totalorder %s649_s24, 3 }
   0x4   : > { %p237_p2 = pnand %p551_p0, %p236_p1 }
   0x5   : > { %p266_p3 = scmp.lt.s32.totalorder (!%p237_p2), %s547_s25, 1 }
   0x6   : > { %240 = sbr.rel (%p237_p2) target bundleno = 746 (0x2ea), region = 48 }
   0xb   : > { %s829_s25 = smov (!%p266_p3, %s547_s25), 1  ;;  %vm277_vm0 = vcmask 261120   ;;  %v309_v7 = vld [vmem:[%s823_s3 + $0x18] sm:$0xff]  ;;  %v651_v8 = vmov 0.0   ;;  %v308_v9 = vld [vmem:[%s823_s3 + $0x10] sm:$0xff]  ;;  %vm652_vm1 = vmmov 0  }
   0xc   : > { %s552_s26 = sshll.u32 %s829_s25, 3  ;;  %583 = vmatprep.subr.mxu0 %v651_v8  ;;  %591 = vmatprep.mubr.msk.f32.mxu0 %vm652_vm1, %v651_v8  ;;  %v307_v10 = vld [vmem:[%s823_s3 + $0x8] sm:$0xff]  ;;  %v306_v11 = vld [vmem:[%s823_s3] sm:$0xff]  ;;  %v414_v21 = vld [vmem:[%s825_s5 + $0x78] sm:$0xff] }
   0xd   : > { %s269_s29 = scalar_lea.vmem %s820_s0, %s552_s26  ;;  %584 = vmatpush3.msra.mxu0 %v309_v7  ;;  %594 = vmatprep.subr.mxu1 %v651_v8  ;;  %v554_v16 = vld [vmem:[%s821_s1] ss:$0 sm:$0xff]  ;;  %v413_v22 = vld [vmem:[%s825_s5 + $0x70] sm:$0xff]  ;;  %v412_v23 = vld [vmem:[%s825_s5 + $0x68] sm:$0xff]  ;;  %s273_s17 = scalar_lea.vmem %s827_s7, %s552_s26 }
   0xe   : > { %v709_v0 = vld [vmem:[%s269_s29] sm:$0xff]  ;;  %585 = vmatprep.subr.mxu0 %v651_v8  ;;  %626 = vmatprep.mubr.msk.f32.mxu1 %vm652_vm1, %v651_v8  ;;  %v410_v25 = vld [vmem:[%s825_s5 + $0x58] sm:$0xff]  ;;  %v409_v26 = vld [vmem:[%s825_s5 + $0x50] sm:$0xff] }
   0xf   : > { %v278_v1 = vsel %vm277_vm0, %v709_v0, 0.0  ;;  %586 = vmatpush3.msra.mxu0 %v308_v9  ;;  %v555_v18 = vld [vmem:[%s822_s2] ss:$0 sm:$0xff]  ;;  %595 = vmatpush3.msra.mxu1 %v414_v21  ;;  %v408_v27 = vld [vmem:[%s825_s5 + $0x48] sm:$0xff]  ;;  %v406_v29 = vld [vmem:[%s825_s5 + $0x38] sm:$0xff] }
  0x10   : > { %279 = vadd.xlane.f32.xlu0 %v278_v1  ;;  %587 = vmatprep.subr.mxu0 %v651_v8  ;;  %v411_v24 = vld [vmem:[%s825_s5 + $0x60] sm:$0xff]  ;;  %v405_v30 = vld [vmem:[%s825_s5 + $0x30] sm:$0xff]  ;;  %v404_v31 = vld [vmem:[%s825_s5 + $0x28] sm:$0xff] }
  0x11   : > { %588 = vmatpush3.msra.mxu0 %v307_v10  ;;  %596 = vmatprep.subr.mxu1 %v651_v8  ;;  %v407_v28 = vld [vmem:[%s825_s5 + $0x40] sm:$0xff]  ;;  %v402_v33 = vld [vmem:[%s825_s5 + $0x18] sm:$0xff]  ;;  %v401_v34 = vld [vmem:[%s825_s5 + $0x10] sm:$0xff] }
  0x12   : > { %589 = vmatprep.subr.mxu0 %v651_v8  ;;  %597 = vmatpush3.msra.mxu1 %v413_v22  ;;  %v403_v32 = vld [vmem:[%s825_s5 + $0x20] sm:$0xff]  ;;  %v400_v35 = vld [vmem:[%s825_s5 + $0x8] sm:$0xff] }
  0x13   : > { %590 = vmatpush3.msra.mxu0 %v306_v11  ;;  %598 = vmatprep.subr.mxu1 %v651_v8  ;;  %v399_v36 = vld [vmem:[%s825_s5] sm:$0xff] }
  0x14   : > { %599 = vmatpush3.msra.mxu1 %v412_v23  ;;  %v556_v37 = vld [vmem:[%s824_s4] ss:$0 sm:$0xff] }
  0x15   : > { %600 = vmatprep.subr.mxu1 %v651_v8  ;;  %v558_v50 = vld [vmem:[%s826_s6] ss:$0 sm:$0xff] }
  0x16   : > { %601 = vmatpush3.msra.mxu1 %v411_v24 }
  0x17   : > { %602 = vmatprep.subr.mxu1 %v651_v8 }
  0x18   : > { %603 = vmatpush3.msra.mxu1 %v410_v25 }
  0x19   : > { %604 = vmatprep.subr.mxu1 %v651_v8 }
  0x1a   : > { %605 = vmatpush3.msra.mxu1 %v409_v26 }
  0x1b   : > { %606 = vmatprep.subr.mxu1 %v651_v8 }
  0x1c   : > { %607 = vmatpush3.msra.mxu1 %v408_v27 }
  0x1d   : > { %608 = vmatprep.subr.mxu1 %v651_v8 }
  0x1e   : > { %609 = vmatpush3.msra.mxu1 %v407_v28 }
  0x1f   : > { %610 = vmatprep.subr.mxu1 %v651_v8 }
  0x20   : > { %611 = vmatpush3.msra.mxu1 %v406_v29 }
  0x21   : > { %612 = vmatprep.subr.mxu1 %v651_v8 }
  0x22   : > { %613 = vmatpush3.msra.mxu1 %v405_v30 }
  0x23   : > { %614 = vmatprep.subr.mxu1 %v651_v8 }
  0x24   : > { %615 = vmatpush3.msra.mxu1 %v404_v31 }
  0x25   : > { %616 = vmatprep.subr.mxu1 %v651_v8 }
  0x26   : > { %617 = vmatpush3.msra.mxu1 %v403_v32 }
  0x27   : > { %618 = vmatprep.subr.mxu1 %v651_v8 }
  0x28   : > { %619 = vmatpush3.msra.mxu1 %v402_v33 }
  0x29   : > { %620 = vmatprep.subr.mxu1 %v651_v8 }
  0x2a   : > { %621 = vmatpush3.msra.mxu1 %v401_v34 }
  0x2b   : > { %622 = vmatprep.subr.mxu1 %v651_v8 }
  0x2c   : > { %623 = vmatpush3.msra.mxu1 %v400_v35 }
  0x2d   : > { %624 = vmatprep.subr.mxu1 %v651_v8 }
  0x2e   : > { %625 = vmatpush3.msra.mxu1 %v399_v36 }
  0x99   : > { %v280_v2 = vpop.xlane.xlu0 %279 }
  0x9a   : > { %v282_v3 = vmul.f32 0.03125, %v280_v2 }
  0x9c   : > { %v283_v4 = vsub.f32 %v709_v0, %v282_v3 }
  0x9e   : > { %v284_v5 = vmul.f32 %v283_v4, %v283_v4 }
  0xa0   : > { %v285_v6 = vsel %vm277_vm0, %v284_v5, 0.0 }
  0xa1   : > { %286 = vadd.xlane.f32.xlu0 %v285_v6 }
 0x12a   : > { %v287_v12 = vpop.xlane.xlu0 %286 }
 0x12b   : > { %v288_v13 = vmul.f32 0.03125, %v287_v12 }
 0x12d   : > { %v289_v14 = vadd.f32 1e-05, %v288_v13 }
 0x12f   : > { %639 = vrsqrt.f32 %v289_v14 }
 0x13c   : > { %v640_v15 = vpop.eup %639 }
 0x13d   : > { %v291_v17 = vmul.f32 %v640_v15, %v283_v4 }
 0x13f   : > { %v298_v19 = vmul.f32 %v554_v16, %v291_v17 }
 0x141   : > { %v305_v20 = vadd.f32 %v555_v18, %v298_v19 }
 0x143   : > { %592 = vmatmul.mubr.msk.f32.vlgmr.msra.gmra.mxu0 %vm277_vm0, %v305_v20 }
 0x203   : > { %v386_v38 = vpop.f32.mrf.mxu0 }
 0x204   : > { %v387_v39 = vadd.f32 %v556_v37, %v386_v38 }
 0x205   : > { %v593_v40 = vpop.f32.mrf.mxu0 }
 0x206   : > { %v390_v41 = vmul.f32 %v387_v39, %v387_v39 }
 0x208   : > { %v391_v42 = vmul.f32 %v390_v41, %v387_v39 }
 0x20a   : > { %v392_v43 = vmul.f32 0.044715, %v391_v42 }
 0x20c   : > { %v393_v44 = vadd.f32 %v392_v43, %v387_v39 }
 0x20e   : > { %v394_v45 = vmul.f32 0.7978846, %v393_v44 }
 0x210   : > { %641 = vtanh.f32 %v394_v45 }
 0x21d   : > { %v642_v46 = vpop.eup %641 }
 0x21e   : > { %v396_v47 = vadd.f32 1.0, %v642_v46 }
 0x220   : > { %v397_v48 = vmul.f32 0.5, %v396_v47 }
 0x222   : > { %v398_v49 = vmul.f32 %v397_v48, %v387_v39 }
 0x224   : > { %627 = vmatmul.mubr.f32.vlgmr.msra.gmra.mxu1 %v398_v49 }
 0x2e4   : > { %v488_v51 = vpop.f32.mrf.mxu1 }
 0x2e5   : > { %v489_v52 = vadd.f32 %v558_v50, %v488_v51 }
 0x2e6   : > { %v628_v53 = vpop.f32.mrf.mxu1 }
 0x2e7   : > { %v492_v54 = vadd.f32 %v489_v52, %v709_v0 }
 0x2e9   : > { %493 = vst.msk [vmem:[%s273_s17] sm:$0xff] %vm277_vm0, %v492_v54 }
 0x2ea PF: > { %s17_s24 = sadd.s32 1, %s649_s24  }
 0x2eb   : > { %p14_p4 = scmp.ge.s32.totalorder %s17_s24, 4  }
 0x2ed   :  { %16 = sbr.rel (!%p14_p4) target bundleno = 1 (0x1), region = 78 }

// kernel: pali_forward.30
= control target key start
LH: loop header
LB: loop body
LE: loop exit
PB: predicated region body
PF: predicated region fallthrough
CT: control target
= control target key end

     0   :  { %s1995_s30 = smov 0   ;;  %s2242_s0 = inlined_call_operand.vmem [shape: f32[2,8,32], index: 0, kind: input, shape index: {}]   ;;  %s2243_s1 = inlined_call_operand.vmem [shape: f32[2,24,32], index: 1, kind: input, shape index: {}]   ;;  %s2244_s2 = inlined_call_operand.vmem [shape: f32[2,1,24], index: 2, kind: input, shape index: {}]   ;;  %s2245_s3 = inlined_call_operand.vmem [shape: f32[1,32], index: 3, kind: input, shape index: {}]   ;;  %s2246_s4 = inlined_call_operand.vmem [shape: f32[1,32], index: 4, kind: input, shape index: {}]   ;;  %s2247_s5 = inlined_call_operand.vmem [shape: f32[32,32], index: 5, kind: input, shape index: {}]   ;;  %s2248_s6 = inlined_call_operand.vmem [shape: f32[32,64], index: 6, kind: input, shape index: {}]   ;;  %s2249_s7 = inlined_call_operand.vmem [shape: f32[32,32], index: 7, kind: input, shape index: {}]   ;;  %s2250_s8 = inlined_call_operand.vmem [shape: f32[1,32], index: 8, kind: input, shape index: {}]   ;;  %s2251_s9 = inlined_call_operand.vmem [shape: f32[2,8,32], index: 9, kind: output, shape index: {}]  }
   0x1 LB: > { %s1678_s10 = sadd.s32 4294967295, %s1934_s30   ;;  %p1682_p0 = scmp.ge.s32.totalorder %s1934_s30, 1  ;;  %s1934_s30 = sphi %s1995_s30, %s19_s30  }
   0x2   : > { %p304_p1 = scmp.lt.s32.totalorder %s1934_s30, 3 }
   0x4   : > { %p305_p2 = pnand %p1682_p0, %p304_p1 }
   0x5   : > { %p346_p3 = scmp.lt.s32.totalorder (!%p305_p2), %s1678_s10, 1  ;;  %s1939_s18 = smov (!%p305_p2), 96  }
   0x6   : > { %308 = sbr.rel (%p305_p2) target bundleno = 1786 (0x6fa), region = 56  ;;  %s1940_s19 = smov (!%p305_p2), 88  }
   0x7   : > { %s1942_s28 = smov (!%p305_p2), 104   ;;  %s1943_s29 = smov (!%p305_p2), 80  }
   0x8   : > { %s1944_s12 = smov (!%p305_p2), 72  }
   0xb   : > { %s2253_s10 = smov (!%p346_p3, %s1678_s10), 1  ;;  %vm365_vm0 = vcmask 261120   ;;  %v401_v2 = vld [vmem:[%s2248_s6 + $0x18] sm:$0xff]  ;;  %v1936_v3 = vmov 0.0   ;;  %v400_v4 = vld [vmem:[%s2248_s6 + $0x10] sm:$0xff]  ;;  %vm1937_vm1 = vmmov 0  }
   0xc   : > { %s1683_s11 = sshll.u32 %s2253_s10, 3  ;;  %s1892_s17 = smul.u32 24, %s2253_s10  ;;  %1783 = vmatprep.subr.mxu1 %v1936_v3  ;;  %1791 = vmatprep.mubr.msk.f32.mxu1 %vm1937_vm1, %v1936_v3  ;;  %v399_v5 = vld [vmem:[%s2248_s6 + $0x8] sm:$0xff]  ;;  %v398_v6 = vld [vmem:[%s2248_s6] sm:$0xff]  ;;  %v397_v15 = vld [vmem:[%s2247_s5 + $0x18] sm:$0xff]  ;;  %vm572_vm2 = vcmask 64512  }
   0xd   : > { %s349_s14 = scalar_lea.vmem %s2242_s0, %s1683_s11  ;;  %1784 = vmatpush3.msra.mxu1 %v401_v2  ;;  %1772 = vmatprep.subr.mxu0 %v1936_v3  ;;  %v396_v16 = vld [vmem:[%s2247_s5 + $0x10] sm:$0xff]  ;;  %v395_v17 = vld [vmem:[%s2247_s5 + $0x8] sm:$0xff]  ;;  %v394_v18 = vld [vmem:[%s2247_s5] sm:$0xff]  ;;  %s357_s27 = scalar_lea.vmem %s2244_s2, %s2253_s10  ;;  %vm663_vm3 = vcmask 195584  }
   0xe   : > { %v2011_v0 = vld [vmem:[%s349_s14] sm:$0xff]  ;;  %1785 = vmatprep.subr.mxu1 %v1936_v3  ;;  %s354_s24 = scalar_lea.vmem %s2243_s1, %s1892_s17  ;;  %1780 = vmatprep.mubr.msk.f32.mxu0 %vm1937_vm1, %v1936_v3  ;;  %s1938_s17 = smov 120  }
   0xf   : > { %v366_v1 = vsel %vm365_vm0, %v2011_v0, 0.0  ;;  %1786 = vmatpush3.msra.mxu1 %v400_v4  ;;  %v479_v7 = vld [vmem:[%s354_s24] sm:$0xff]  ;;  %v480_v8 = vld [vmem:[%s354_s24 + $0x8] sm:$0xff]  ;;  %v481_v9 = vld [vmem:[%s354_s24 + $0x10] sm:$0xff]  ;;  %1773 = vmatpush3.msra.mxu0 %v397_v15  ;;  %s1941_s24 = smov 112   ;;  %s361_s25 = scalar_lea.vmem %s2251_s9, %s1683_s11 }
  0x10   : > { %367 = vadd.xlane.f32.xlu0 %v366_v1  ;;  %1787 = vmatprep.subr.mxu1 %v1936_v3  ;;  %v1686_v29 = vld [vmem:[%s2245_s3] ss:$0 sm:$0xff] }
  0x11   : > { %1788 = vmatpush3.msra.mxu1 %v399_v5  ;;  %1774 = vmatprep.subr.mxu0 %v1936_v3  ;;  %v1687_v31 = vld [vmem:[%s2246_s4] ss:$0 sm:$0xff] }
  0x12   : > { %1789 = vmatprep.subr.mxu1 %v1936_v3  ;;  %1775 = vmatpush3.msra.mxu0 %v396_v16  ;;  %v2143_v48 = vld [vmem:[%s357_s27] ss:$0 sm:$0xff] }
  0x13   : > { %1790 = vmatpush3.msra.mxu1 %v398_v6  ;;  %1776 = vmatprep.subr.mxu0 %v1936_v3 }
  0x14   : > { %1792 = vmatmul.mubr.msk.f32.vlgmr.msra.gmra.mxu1 %vm365_vm0, %v479_v7  ;;  %1809 = vmatprep.subr.mxu1 %v1936_v3 }
  0x15   : > { %1794 = vmatprep.mubr.msk.f32.mxu1 %vm1937_vm1, %v1936_v3  ;;  %1777 = vmatpush3.msra.mxu0 %v395_v17 }
  0x16   : > { %1778 = vmatprep.subr.mxu0 %v1936_v3 }
  0x17   : > { %1779 = vmatpush3.msra.mxu0 %v394_v18 }
  0x18   : > { %1795 = vmatmul.mubr.msk.f32.gmra.mxu1 %vm365_vm0, %v480_v8  ;;  %1800 = vmatprep.subr.mxu0 %v1936_v3 }
  0x19   : > { %1797 = vmatprep.mubr.msk.f32.mxu1 %vm1937_vm1, %v1936_v3 }
  0x1c   : > { %1798 = vmatmul.mubr.msk.f32.gmra.mxu1 %vm365_vm0, %v481_v9 }
  0x1d   : > { %1815 = vmatprep.mubr.msk.f32.mxu1 %vm1937_vm1, %v1936_v3 }
  0x99   : > { %v368_v10 = vpop.xlane.xlu0 %367 }
  0x9a   : > { %v370_v11 = vmul.f32 0.03125, %v368_v10 }
  0x9c   : > { %v371_v12 = vsub.f32 %v2011_v0, %v370_v11 }
  0x9e   : > { %v372_v13 = vmul.f32 %v371_v12, %v371_v12 }
  0xa0   : > { %v373_v14 = vsel %vm365_vm0, %v372_v13, 0.0 }
  0xa1   : > { %374 = vadd.xlane.f32.xlu0 %v373_v14 }
  0xd4   : > { %v2068_v19 = vpop.f32.mrf.mxu1 }
  0xd5   : > { %759 = vrot.lane.b32.xlu0 %v2068_v19, %s1938_s17 }
  0xd6   : > { %v1793_v20 = vpop.f32.mrf.mxu1 }
  0xd8   : > { %v2072_v21 = vpop.f32.mrf.mxu1 }
  0xda   : > { %v1796_v22 = vpop.f32.mrf.mxu1 }
  0xdc   : > { %v2074_v23 = vpop.f32.mrf.mxu1 }
  0xdd   : > { %763 = vrot.lane.b32.xlu1 %v2074_v23, %s1938_s17  ;;  %678 = vrot.lane.b32.xlu0 %v2074_v23, %s1939_s18 }
  0xde   : > { %v1799_v24 = vpop.f32.mrf.mxu1 }
  0xe1   : > { %761 = vrot.lane.b32.xlu1 %v2072_v21, %s1938_s17  ;;  %859 = vrot.lane.b32.xlu0 %v2074_v23, %s1940_s19 }
 0x12a   : > { %v375_v25 = vpop.xlane.xlu0 %374 }
 0x12b   : > { %v376_v26 = vmul.f32 0.03125, %v375_v25 }
 0x12d   : > { %v377_v27 = vadd.f32 1e-05, %v376_v26  ;;  %v403_v26 = vld [vmem:[%s2249_s7 + $0x8] sm:$0xff] }
 0x12f   : > { %1910 = vrsqrt.f32 %v377_v27 }
 0x13c   : > { %v1911_v28 = vpop.eup %1910 }
 0x13d   : > { %v379_v30 = vmul.f32 %v1911_v28, %v371_v12 }
 0x13f   : > { %v386_v32 = vmul.f32 %v1686_v29, %v379_v30 }
 0x141   : > { %v393_v33 = vadd.f32 %v1687_v31, %v386_v32 }
 0x143   : > { %1781 = vmatmul.mubr.msk.f32.vlgmr.msra.gmra.mxu0 %vm365_vm0, %v393_v33 }
 0x144   : > { %1801 = vmatpush3.xpose.msk.msra.mxu0 %vm572_vm2, %v2074_v23  ;;  %1806 = vmatprep.mubr.msk.f32.mxu0 %vm1937_vm1, %v1936_v3 }
 0x145   : > { %1802 = vmatprep.subr.mxu0 %v1936_v3 }
 0x147   : > { %v760_v34 = vpop.permute.xlu0 %759 }
 0x148   : > { %1803 = vmatpush3.xpose.msk.msra.mxu0 %vm572_vm2, %v2072_v21 }
 0x149   : > { %1804 = vmatprep.subr.mxu0 %v1936_v3 }
 0x14c   : > { %1805 = vmatpush3.xpose.msk.msra.mxu0 %vm572_vm2, %v2068_v19 }
 0x14d   : > { %1818 = vmatprep.subr.mxu0 %v1936_v3 }
 0x14f   : > { %v679_v35 = vpop.permute.xlu0 %678  ;;  %v764_v36 = vpop.permute.xlu1 %763 }
 0x150   : > { %1810 = vmatpush3.msra.mxu1 %v679_v35 }
 0x151   : > { %1811 = vmatprep.subr.mxu1 %v1936_v3 }
 0x153   : > { %v762_v39 = vpop.permute.xlu1 %761  ;;  %v860_v4 = vpop.permute.xlu0 %859 }
 0x203   : > { %v2103_v37 = vpop.f32.mrf.mxu0 }
 0x204   : > { %757 = vrot.lane.b32.xlu1 %v2103_v37, %s1938_s17  ;;  %1807 = vmatmul.mubr.msk.f32.vlgmr.msra.gmra.mxu0 %vm572_vm2, %v2103_v37 }
 0x205   : > { %v1782_v38 = vpop.f32.mrf.mxu0  ;;  %1819 = vmatpush3.xpose.msk.msra.mxu0 %vm572_vm2, %v764_v36  ;;  %1824 = vmatprep.mubr.msk.f32.mxu0 %vm1937_vm1, %v1936_v3 }
 0x206   : > { %1820 = vmatprep.subr.mxu0 %v1936_v3  ;;  %v402_v38 = vld [vmem:[%s2249_s7] sm:$0xff] }
 0x208   : > { %1090 = vrot.lane.b32.xlu1 %v2074_v23, %s1941_s24 }
 0x209   : > { %1821 = vmatpush3.xpose.msk.msra.mxu0 %vm572_vm2, %v762_v39 }
 0x20a   : > { %1822 = vmatprep.subr.mxu0 %v1936_v3 }
 0x20c   : > { %1088 = vrot.lane.b32.xlu1 %v2072_v21, %s1941_s24 }
 0x20d   : > { %1823 = vmatpush3.xpose.msk.msra.mxu0 %vm572_vm2, %v760_v34 }
 0x20e   : > { %1846 = vmatprep.subr.mxu0 %v1936_v3 }
 0x210   : > { %1086 = vrot.lane.b32.xlu1 %v2068_v19, %s1941_s24 }
 0x214   : > { %1084 = vrot.lane.b32.xlu1 %v2103_v37, %s1941_s24 }
 0x218   : > { %676 = vrot.lane.b32.xlu1 %v2072_v21, %s1939_s18 }
 0x21c   : > { %674 = vrot.lane.b32.xlu1 %v2068_v19, %s1939_s18 }
 0x276   : > { %v758_v40 = vpop.permute.xlu1 %757 }
 0x277   : > { %1825 = vmatmul.mubr.msk.f32.vlgmr.msra.gmra.mxu0 %vm572_vm2, %v758_v40 }
 0x278   : > { %1852 = vmatprep.mubr.msk.f32.mxu0 %vm1937_vm1, %v1936_v3 }
 0x27a   : > { %v1091_v41 = vpop.permute.xlu1 %1090 }
 0x27b   : > { %1847 = vmatpush3.xpose.msk.msra.mxu0 %vm572_vm2, %v1091_v41 }
 0x27c   : > { %1848 = vmatprep.subr.mxu0 %v1936_v3 }
 0x27e   : > { %v1089_v42 = vpop.permute.xlu1 %1088 }
 0x27f   : > { %1849 = vmatpush3.xpose.msk.msra.mxu0 %vm572_vm2, %v1089_v42 }
 0x280   : > { %1850 = vmatprep.subr.mxu0 %v1936_v3 }
 0x282   : > { %v1087_v43 = vpop.permute.xlu1 %1086 }
 0x283   : > { %1851 = vmatpush3.xpose.msk.msra.mxu0 %vm572_vm2, %v1087_v43 }
 0x284   : > { %1869 = vmatprep.subr.mxu0 %v1936_v3 }
 0x286   : > { %v1085_v44 = vpop.permute.xlu1 %1084 }
 0x287   : > { %1853 = vmatmul.mubr.msk.f32.vlgmr.msra.gmra.mxu0 %vm572_vm2, %v1085_v44  ;;  %v404_v44 = vld [vmem:[%s2249_s7 + $0x10] sm:$0xff] }
 0x288   : > { %1875 = vmatprep.mubr.msk.f32.mxu0 %vm1937_vm1, %v1936_v3 }
 0x28a   : > { %v677_v45 = vpop.permute.xlu1 %676 }
 0x28b   : > { %1812 = vmatpush3.msra.mxu1 %v677_v45 }
 0x28c   : > { %1813 = vmatprep.subr.mxu1 %v1936_v3 }
 0x28e   : > { %v675_v46 = vpop.permute.xlu1 %674 }
 0x28f   : > { %1814 = vmatpush3.msra.mxu1 %v675_v46 }
 0x290   : > { %1827 = vmatprep.subr.mxu1 %v1936_v3 }
 0x2c4   : > { %v651_v47 = vpop.f32.mrf.mxu0 }
 0x2c5   : > { %v655_v49 = vmul.f32 0.35355338, %v651_v47 }
 0x2c6   : > { %v1808_v50 = vpop.f32.mrf.mxu0 }
 0x2c7   : > { %v662_v51 = vadd.f32 %v2143_v48, %v655_v49 }
 0x2c9   : > { %v664_v52 = vsel %vm663_vm3, %v662_v51, -inf }
 0x2ca   : > { %665 = vmax.xlane.f32.xlu1 %v664_v52 }
 0x2db   : > { %857 = vrot.lane.b32.xlu1 %v2072_v21, %s1940_s19 }
 0x2df   : > { %1345 = vrot.lane.b32.xlu1 %v2074_v23, %s1942_s28 }
 0x2e3   : > { %1341 = vrot.lane.b32.xlu1 %v2068_v19, %s1942_s28 }
 0x2e7   : > { %1186 = vrot.lane.b32.xlu1 %v2074_v23, %s1943_s29 }
 0x337   : > { %v839_v53 = vpop.f32.mrf.mxu0 }
 0x338   : > { %v843_v54 = vmul.f32 0.35355338, %v839_v53 }
 0x339   : > { %v1826_v55 = vpop.f32.mrf.mxu0 }
 0x33a   : > { %v844_v56 = vadd.f32 %v2143_v48, %v843_v54 }
 0x33c   : > { %v845_v57 = vsel %vm663_vm3, %v844_v56, -inf }
 0x33d   : > { %846 = vmax.xlane.f32.xlu0 %v845_v57 }
 0x347   : > { %v1166_v58 = vpop.f32.mrf.mxu0 }
 0x348   : > { %v1170_v5 = vmul.f32 0.35355338, %v1166_v58 }
 0x349   : > { %v1854_v59 = vpop.f32.mrf.mxu0 }
 0x34a   : > { %v1171_v6 = vadd.f32 %v2143_v48, %v1170_v5 }
 0x34c   : > { %v1172_v7 = vsel %vm663_vm3, %v1171_v6, -inf }
 0x353   : > { %v666_v60 = vpop.xlane.xlu1 %665  ;;  %855 = vrot.lane.b32.xlu0 %v2068_v19, %s1940_s19 }
 0x354   : > { %v667_v61 = vsub.f32 %v662_v51, %v666_v60 }
 0x356   : > { %v668_v62 = vmul.f32 1.442695, %v667_v61 }
 0x357   : > { %v858_v63 = vpop.permute.xlu1 %857  ;;  %1343 = vrot.lane.b32.xlu0 %v2072_v21, %s1942_s28 }
 0x358   : > { %1912 = vpow2.f32 %v668_v62  ;;  %v405_v62 = vld [vmem:[%s2249_s7 + $0x18] sm:$0xff] }
 0x35b   : > { %v1346_v1 = vpop.permute.xlu1 %1345  ;;  %1339 = vrot.lane.b32.xlu0 %v2103_v37, %s1942_s28 }
 0x35c   : > { %1870 = vmatpush3.xpose.msk.msra.mxu0 %vm572_vm2, %v1346_v1 }
 0x35d   : > { %1871 = vmatprep.subr.mxu0 %v1936_v3 }
 0x35f   : > { %v1342_v14 = vpop.permute.xlu1 %1341 }
 0x365   : > { %v1913_v2 = vpop.eup %1912 }
 0x366   : > { %1816 = vmatmul.mubr.msk.f32.vlgmr.msra.gmra.mxu1 %vm663_vm3, %v1913_v2  ;;  %v670_v8 = vsel %vm663_vm3, %v1913_v2, 0.0 }
 0x367   : > { %1828 = vmatpush3.msra.mxu1 %v860_v4  ;;  %1833 = vmatprep.mubr.msk.f32.mxu1 %vm1937_vm1, %v1936_v3 }
 0x368   : > { %1829 = vmatprep.subr.mxu1 %v1936_v3 }
 0x369   : > { %1830 = vmatpush3.msra.mxu1 %v858_v63 }
 0x36a   : > { %1831 = vmatprep.subr.mxu1 %v1936_v3 }
 0x37a   : > { %1173 = vmax.xlane.f32.xlu0 %v1172_v7 }
 0x37e   : > { %671 = vadd.xlane.f32.xlu0 %v670_v8 }
 0x394   : > { %1184 = vrot.lane.b32.xlu0 %v2072_v21, %s1943_s29 }
 0x3c6   : > { %v847_v9 = vpop.xlane.xlu0 %846 }
 0x3c7   : > { %v848_v10 = vsub.f32 %v844_v56, %v847_v9 }
 0x3c9   : > { %v849_v11 = vmul.f32 1.442695, %v848_v10 }
 0x3ca   : > { %v856_v12 = vpop.permute.xlu0 %855 }
 0x3cb   : > { %1914 = vpow2.f32 %v849_v11  ;;  %1832 = vmatpush3.msra.mxu1 %v856_v12 }
 0x3cc   : > { %1836 = vmatprep.subr.mxu1 %v1936_v3 }
 0x3ce   : > { %v1344_v13 = vpop.permute.xlu0 %1343 }
 0x3cf   : > { %1872 = vmatpush3.xpose.msk.msra.mxu0 %vm572_vm2, %v1344_v13 }
 0x3d0   : > { %1873 = vmatprep.subr.mxu0 %v1936_v3 }
 0x3d2   : > { %v1340_v15 = vpop.permute.xlu0 %1339 }
 0x3d3   : > { %1874 = vmatpush3.xpose.msk.msra.mxu0 %vm572_vm2, %v1342_v14 }
 0x3d6   : > { %1876 = vmatmul.mubr.msk.f32.vlgmr.msra.gmra.mxu0 %vm572_vm2, %v1340_v15 }
 0x3d8   : > { %v1915_v16 = vpop.eup %1914 }
 0x3d9   : > { %1834 = vmatmul.mubr.msk.f32.vlgmr.msra.gmra.mxu1 %vm663_vm3, %v1915_v16  ;;  %v851_v17 = vsel %vm663_vm3, %v1915_v16, 0.0 }
 0x3da   : > { %852 = vadd.xlane.f32.xlu1 %v851_v17  ;;  %1838 = vmatprep.mubr.msk.f32.mxu1 %vm1937_vm1, %v1936_v3 }
 0x3db   : > { %1837 = vmatpush3.msra.mxu1 %v403_v26 }
 0x3dc   : > { %1841 = vmatprep.subr.mxu1 %v1936_v3 }
 0x3eb   : > { %1182 = vrot.lane.b32.xlu1 %v2068_v19, %s1943_s29 }
 0x3ef   : > { %1439 = vrot.lane.b32.xlu1 %v2072_v21, %s1944_s12  ;;  %v1187_v21 = vpop.permute.xlu1 %1186 }
 0x403   : > { %v1174_v18 = vpop.xlane.xlu0 %1173 }
 0x404   : > { %v1175_v20 = vsub.f32 %v1171_v6, %v1174_v18 }
 0x406   : > { %v1176_v22 = vmul.f32 1.442695, %v1175_v20 }
 0x407   : > { %v672_v30 = vpop.xlane.xlu0 %671 }
 0x408   : > { %1916 = vpow2.f32 %v1176_v22 }
 0x40b   : > { %v1185_v42 = vpop.permute.xlu0 %1184 }
 0x415   : > { %v1917_v24 = vpop.eup %1916 }
 0x416   : > { %v1178_v25 = vsel %vm663_vm3, %v1917_v24, 0.0 }
 0x417   : > { %1179 = vadd.xlane.f32.xlu1 %v1178_v25 }
 0x426   : > { %v752_v27 = vpop.f32.mrf.mxu1 }
 0x428   : > { %v1817_v28 = vpop.f32.mrf.mxu1  ;;  %1437 = vrot.lane.b32.xlu1 %v2068_v19, %s1944_s12 }
 0x463   : > { %v853_v29 = vpop.xlane.xlu1 %852 }
 0x464   : > { %1918 = vrcp.f32 %v853_v29 }
 0x465   : > { %1920 = vrcp.f32 %v672_v30 }
 0x467   : > { %v1183_v43 = vpop.permute.xlu1 %1182 }
 0x46b   : > { %v1440_v50 = vpop.permute.xlu1 %1439 }
 0x471   : > { %v1919_v34 = vpop.eup %1918 }
 0x472   : > { %v1921_v40 = vpop.eup %1920 }
 0x473   : > { %v756_v41 = vmul.f32 %v1921_v40, %v752_v27 }
 0x496   : > { %v1421_v31 = vpop.f32.mrf.mxu0 }
 0x497   : > { %v1425_v32 = vmul.f32 0.35355338, %v1421_v31 }
 0x498   : > { %v1877_v33 = vpop.f32.mrf.mxu0 }
 0x499   : > { %v933_v35 = vpop.f32.mrf.mxu1  ;;  %v1426_v36 = vadd.f32 %v2143_v48, %v1425_v32 }
 0x49a   : > { %v937_v37 = vmul.f32 %v1919_v34, %v933_v35 }
 0x49b   : > { %v1835_v39 = vpop.f32.mrf.mxu1  ;;  %v1427_v19 = vsel %vm663_vm3, %v1426_v36, -inf }
 0x49c   : > { %1839 = vmatmul.mubr.msk.f32.vlgmr.msra.gmra.mxu1 %vm572_vm2, %v937_v37  ;;  %1428 = vmax.xlane.f32.xlu0 %v1427_v19 }
 0x49d   : > { %1842 = vmatpush3.msra.mxu1 %v402_v38  ;;  %1843 = vmatprep.mubr.msk.f32.mxu1 %vm1937_vm1, %v1936_v3 }
 0x49e   : > { %1855 = vmatprep.subr.mxu1 %v1936_v3 }
 0x4a0   : > { %1844 = vmatmul.mubr.msk.f32.vlgmr.msra.gmra.mxu1 %vm572_vm2, %v756_v41  ;;  %v1180_v51 = vpop.xlane.xlu1 %1179 }
 0x4a1   : > { %1856 = vmatpush3.msra.mxu1 %v1187_v21  ;;  %1861 = vmatprep.mubr.msk.f32.mxu1 %vm1937_vm1, %v1936_v3 }
 0x4a2   : > { %1857 = vmatprep.subr.mxu1 %v1936_v3 }
 0x4a3   : > { %1858 = vmatpush3.msra.mxu1 %v1185_v42 }
 0x4a4   : > { %1859 = vmatprep.subr.mxu1 %v1936_v3  ;;  %v1438_v61 = vpop.permute.xlu1 %1437 }
 0x4a5   : > { %1860 = vmatpush3.msra.mxu1 %v1183_v43 }
 0x4a6   : > { %1862 = vmatmul.mubr.msk.f32.vlgmr.msra.gmra.mxu1 %vm663_vm3, %v1917_v24  ;;  %1864 = vmatprep.subr.mxu1 %v1936_v3 }
 0x4a7   : > { %1866 = vmatprep.mubr.msk.f32.mxu1 %vm1937_vm1, %v1936_v3  ;;  %1865 = vmatpush3.msra.mxu1 %v404_v44 }
 0x4a8   : > { %1878 = vmatprep.subr.mxu1 %v1936_v3 }
 0x4b2   : > { %1441 = vrot.lane.b32.xlu0 %v2074_v23, %s1944_s12 }
 0x525   : > { %v1429_v45 = vpop.xlane.xlu0 %1428 }
 0x526   : > { %v1430_v46 = vsub.f32 %v1426_v36, %v1429_v45 }
 0x528   : > { %v1431_v47 = vmul.f32 1.442695, %v1430_v46 }
 0x529   : > { %v1442_v60 = vpop.permute.xlu0 %1441 }
 0x52a   : > { %1922 = vpow2.f32 %v1431_v47 }
 0x52b   : > { %1924 = vrcp.f32 %v1180_v51 }
 0x537   : > { %v1923_v48 = vpop.eup %1922 }
 0x538   : > { %v1433_v49 = vsel %vm663_vm3, %v1923_v48, 0.0  ;;  %v1925_v56 = vpop.eup %1924 }
 0x539   : > { %1434 = vadd.xlane.f32.xlu0 %v1433_v49 }
 0x55c   : > { %v1007_v52 = vpop.f32.mrf.mxu1 }
 0x55e   : > { %v1840_v23 = vpop.f32.mrf.mxu1 }
 0x560   : > { %v1080_v53 = vpop.f32.mrf.mxu1 }
 0x561   : > { %v1081_v54 = vadd.f32 %v1080_v53, %v1007_v52 }
 0x562   : > { %v1845_v55 = vpop.f32.mrf.mxu1 }
 0x566   : > { %v1260_v57 = vpop.f32.mrf.mxu1 }
 0x567   : > { %v1264_v58 = vmul.f32 %v1925_v56, %v1260_v57 }
 0x568   : > { %v1863_v59 = vpop.f32.mrf.mxu1 }
 0x569   : > { %1867 = vmatmul.mubr.msk.f32.vlgmr.msra.gmra.mxu1 %vm572_vm2, %v1264_v58 }
 0x56a   : > { %1879 = vmatpush3.msra.mxu1 %v1442_v60  ;;  %1884 = vmatprep.mubr.msk.f32.mxu1 %vm1937_vm1, %v1936_v3 }
 0x56b   : > { %1880 = vmatprep.subr.mxu1 %v1936_v3 }
 0x56c   : > { %1881 = vmatpush3.msra.mxu1 %v1440_v50 }
 0x56d   : > { %1882 = vmatprep.subr.mxu1 %v1936_v3 }
 0x56e   : > { %1883 = vmatpush3.msra.mxu1 %v1438_v61 }
 0x56f   : > { %1885 = vmatmul.mubr.msk.f32.vlgmr.msra.gmra.mxu1 %vm663_vm3, %v1923_v48  ;;  %1887 = vmatprep.subr.mxu1 %v1936_v3 }
 0x570   : > { %1889 = vmatprep.mubr.msk.f32.mxu1 %vm1937_vm1, %v1936_v3  ;;  %1888 = vmatpush3.msra.mxu1 %v405_v62  ;;  %v1717_v3 = vld [vmem:[%s2250_s8] ss:$0 sm:$0xff] }
 0x5c2   : > { %v1435_v63 = vpop.xlane.xlu0 %1434 }
 0x5c3   : > { %1926 = vrcp.f32 %v1435_v63 }
 0x5d0   : > { %v1927_v5 = vpop.eup %1926 }
 0x629   : > { %v1334_v1 = vpop.f32.mrf.mxu1 }
 0x62a   : > { %v1338_v2 = vadd.f32 %v1334_v1, %v1081_v54 }
 0x62b   : > { %v1868_v4 = vpop.f32.mrf.mxu1 }
 0x62f   : > { %v1515_v6 = vpop.f32.mrf.mxu1 }
 0x630   : > { %v1519_v7 = vmul.f32 %v1927_v5, %v1515_v6 }
 0x631   : > { %v1886_v8 = vpop.f32.mrf.mxu1 }
 0x632   : > { %1890 = vmatmul.mubr.msk.f32.vlgmr.msra.gmra.mxu1 %vm572_vm2, %v1519_v7 }
 0x6f2   : > { %v1589_v9 = vpop.f32.mrf.mxu1 }
 0x6f3   : > { %v1593_v10 = vadd.f32 %v1589_v9, %v1338_v2 }
 0x6f4   : > { %v1891_v11 = vpop.f32.mrf.mxu1 }
 0x6f5   : > { %v1601_v12 = vadd.f32 %v1717_v3, %v1593_v10 }
 0x6f7   : > { %v1602_v13 = vadd.f32 %v1601_v12, %v2011_v0 }
 0x6f9   : > { %1603 = vst.msk [vmem:[%s361_s25] sm:$0xff] %vm365_vm0, %v1602_v13 }
 0x6fa PF: > { %s19_s30 = sadd.s32 1, %s1934_s30  }
 0x6fb   : > { %p16_p4 = scmp.ge.s32.totalorder %s19_s30, 4  }
 0x6fd   :  { %18 = sbr.rel (!%p16_p4) target bundleno = 1 (0x1), region = 92 }

// kernel: pali_forward.35
= control target key start
LH: loop header
LB: loop body
LE: loop exit
PB: predicated region body
PF: predicated region fallthrough
CT: control target
= control target key end

     0   :  { %9 = vsyncpa [#allocation3], 0  ;;  %s655_s0 = inlined_call_operand.vmem [shape: f32[2,8,32], index: 0, kind: input, shape index: {}]   ;;  %s656_s1 = inlined_call_operand.vmem [shape: f32[1,32], index: 1, kind: input, shape index: {}]   ;;  %s657_s2 = inlined_call_operand.vmem [shape: f32[1,32], index: 2, kind: input, shape index: {}]   ;;  %s658_s3 = inlined_call_operand.vmem [shape: f32[32,256], index: 3, kind: input, shape index: {}]   ;;  %s659_s4 = inlined_call_operand.hbm [shape: f32[2,8,256], index: 4, kind: output, shape index: {}]  }
   0x1   :  { %11 = vsyncpa [#allocation3 + $0x1], 0  ;;  %s529_s15 = smov 0   ;;  %s531_s16 = smov 0  }
   0x2   :  { %s533_s17 = smov 0   ;;  %s535_s18 = smov 0  }
   0x3 LB: > { %s550_s19 = sadd.s32 4294967295, %s500_s18   ;;  %s383_s20 = sadd.s32 4294967294, %s500_s18   ;;  %s500_s18 = sphi %s535_s18, %s665_s18   ;;  %s496_s17 = sphi %s533_s17, %s664_s17   ;;  %s492_s16 = sphi %s531_s16, %s663_s16   ;;  %s488_s15 = sphi %s529_s15, %s662_s15  }
   0x4   : > { %s554_s21 = sadd.s32 1, %s500_s18   ;;  %s113_s22 = sadd.s32 1, %s496_s17 }
   0x5   : > { %s110_s23 = ssub.s32 %s500_s18, %s554_s21  ;;  %p123_p0 = scmp.ne.s32.totalorder %s496_s17, %s492_s16 }
   0x6   : > { %p111_p1 = scmp.eq.s32.totalorder %s110_s23, 0  ;;  %p124_p2 = scmp.eq.s32.totalorder %s550_s19, 1 }
   0x7   : > { %p129_p3 = scmp.ne.s32.totalorder %s492_s16, %s488_s15  ;;  %p130_p4 = scmp.eq.s32.totalorder %s383_s20, 1 }
   0x8   : > { %s565_s24 = scalar_select %p111_p1, %s496_s17, %s113_s22  }
   0x9   : > { %p567_p5 = por %p124_p2, %p123_p0  ;;  %p571_p6 = por %p130_p4, %p129_p3 }
   0xa   : > { %p386_p7 = scmp.ge.s32.totalorder %s500_s18, 1  ;;  %p164_p8 = scmp.lt.s32.totalorder %s500_s18, 3 }
   0xc   : > { %p165_p9 = pnand %p386_p7, %p164_p8 }
   0xd   : > { %p189_p10 = scmp.lt.s32.totalorder (!%p165_p9), %s550_s19, 1  ;;  %s186_s9 = sand.u32 (!%p165_p9), 1, %s492_s16  }
   0xe   : > { %168 = sbr.rel (%p165_p9) target bundleno = 540 (0x21c), region = 36  ;;  %s387_s10 = sshll.u32 (!%p165_p9), %s186_s9, 4 }
   0xf   : > { %s188_s11 = scalar_lea.vmem (!%p165_p9), [#allocation2], %s387_s10  ;;  %s397_s13 = sshll.u32 (!%p165_p9), %s550_s19, 8 }
  0x10   : > { %s324_s12 = sshll.u32 (!%p165_p9), %s188_s11, 4  ;;  %s322_s22 = scalar_lea.hbm (!%p165_p9), %s659_s4, %s397_s13  ;;  %s617_s12 = int_to_ptr.vmem [resolvable:$true] %s324_s12 }
  0x11   : > { %s310_s23 = scalar_lea.sflag (!%p165_p9), [#allocation3], %s186_s9 }
  0x13   : > { %s190_s27 = scalar_select %p189_p10, %s550_s19, 1  ;;  %vm196_vm0 = vcmask 261120   ;;  %v232_v7 = vld [vmem:[%s658_s3 + $0x38] sm:$0xff]  ;;  %v231_v8 = vld [vmem:[%s658_s3 + $0x30] sm:$0xff]  ;;  %v230_v9 = vld [vmem:[%s658_s3 + $0x28] sm:$0xff]  ;;  %v502_v11 = vmov 0.0  }
  0x14   : > { %260 = vmatprep.subr.mxu0 %v232_v7  ;;  %v229_v10 = vld [vmem:[%s658_s3 + $0x20] sm:$0xff]  ;;  %300 = vmatprep.mubr.f32.mxu0 %v502_v11  ;;  %v228_v12 = vld [vmem:[%s658_s3 + $0x18] sm:$0xff]  ;;  %v227_v13 = vld [vmem:[%s658_s3 + $0x10] sm:$0xff]  ;;  %s503_s19 = smov [#allocation2]  }
  0x15   : > { %s388_s28 = sshll.u32 %s190_s27, 3  ;;  %261 = vmatpush1.msra.mxu0 %v231_v8  ;;  %v226_v14 = vld [vmem:[%s658_s3 + $0x8] sm:$0xff]  ;;  %v225_v15 = vld [vmem:[%s658_s3] sm:$0xff]  ;;  %s440_s27 = scalar_lea.vmem %s617_s12, 256 }
  0x16   : > { %s192_s5 = scalar_lea.vmem %s655_s0, %s388_s28  ;;  %262 = vmatprep.subr.mxu0 %v230_v9  ;;  %v389_v20 = vld [vmem:[%s656_s1] ss:$0 sm:$0xff]  ;;  %p441_p11 = scmp.ne.s32.totalorder %s617_s12, %s440_s27 }
  0x17   : > { %v193_v0 = vld [vmem:[%s192_s5] sm:$0xff]  ;;  %263 = vmatpush1.msra.mxu0 %v229_v10  ;;  %s444_s28 = sshll.u32 %s503_s19, 4  ;;  %s445_s28 = int_to_ptr.vmem [resolvable:$false] %s444_s28 }
  0x18   : > { %v197_v1 = vsel %vm196_vm0, %v193_v0, 0.0  ;;  %264 = vmatprep.subr.mxu0 %v228_v12  ;;  %v390_v22 = vld [vmem:[%s657_s2] ss:$0 sm:$0xff]  ;;  %p442_p12 = pnand %p441_p11, %p567_p5  ;;  %s446_s29 = scalar_lea.vmem %s445_s28, 512 }
  0x19   : > { %198 = vadd.xlane.f32.xlu0 %v197_v1  ;;  %265 = vmatpush1.msra.mxu0 %v227_v13  ;;  %p447_p0 = scmp.lt.s32.totalorder %s617_s12, %s445_s28  ;;  %p448_p1 = scmp.lt.s32.totalorder %s446_s29, %s440_s27 }
  0x1a   : > { %266 = vmatprep.subr.mxu0 %v226_v14  ;;  %p443_p13 = pneg %p442_p12 }
  0x1b   : > { %267 = vmatpush1.msra.mxu0 %v225_v15  ;;  %p449_p2 = por %p448_p1, %p447_p0 }
  0x1d   : > { %p450_p3 = pnand %p449_p2, %p443_p13 }
  0xa2   : > { %v199_v2 = vpop.xlane.xlu0 %198 }
  0xa3   : > { %v201_v3 = vmul.f32 0.03125, %v199_v2 }
  0xa5   : > { %v202_v4 = vsub.f32 %v193_v0, %v201_v3 }
  0xa7   : > { %v203_v5 = vmul.f32 %v202_v4, %v202_v4 }
  0xa9   : > { %v204_v6 = vsel %vm196_vm0, %v203_v5, 0.0 }
  0xaa   : > { %205 = vadd.xlane.f32.xlu0 %v204_v6 }
 0x133   : > { %v206_v16 = vpop.xlane.xlu0 %205 }
 0x134   : > { %v207_v17 = vmul.f32 0.03125, %v206_v16 }
 0x136   : > { %v208_v18 = vadd.f32 1e-05, %v207_v17 }
 0x138   : > { %438 = vrsqrt.f32 %v208_v18 }
 0x145   : > { %v439_v19 = vpop.eup %438 }
 0x146   : > { %v210_v21 = vmul.f32 %v439_v19, %v202_v4 }
 0x148   : > { %v217_v23 = vmul.f32 %v389_v20, %v210_v21 }
 0x14a   : > { %v224_v24 = vadd.f32 %v390_v22, %v217_v23 }
 0x14c   : > { %391 = vmatmul.mubr.msk.f32.vlgmr.msra.gmra.mxu0 %vm196_vm0, %v224_v24 }
 0x20c   : > { %v302_v25 = vpop.f32.mrf.mxu0 }
 0x20d   : > { %307 = vst [vmem:[%s188_s11] sm:$0xff] %v302_v25 }
 0x20e   : > { %v304_v26 = vpop.f32.mrf.mxu0 }
 0x20f   : > { %308 = vst [vmem:[%s188_s11 + $0x8] sm:$0xff] %v304_v26 }
 0x210   : > { %453 = shalt.err (!%p450_p3)
}
 0x211   : > { %s454_s30 = scalar_lea.hbm %s322_s22, 256  ;;  %s458_s7 = scalar_lea.hbm %s659_s4, 512 }
 0x212   : > { %p455_p4 = scmp.ne.s32.totalorder %s322_s22, %s454_s30  ;;  %p459_p9 = scmp.lt.s32.totalorder %s322_s22, %s659_s4 }
 0x213   : > { %p460_p10 = scmp.lt.s32.totalorder %s458_s7, %s454_s30 }
 0x214   : > { %p456_p7 = pnand %p455_p4, %p567_p5 }
 0x215   : > { %p461_p11 = por %p460_p10, %p459_p9 }
 0x216   : > { %p457_p8 = pneg %p456_p7 }
 0x218   : > { %p462_p12 = pnand %p461_p11, %p457_p8 }
 0x21a   : > { %465 = shalt.err (!%p462_p12)
}
 0x21b   : > { %398 = dma.vmem_to_hbm [thread:$0]  (%p567_p5), %s617_s12, 256, %s322_s22, %s310_s23  }
 0x21c PF: > { %p404_p13 = scmp.ge.s32.totalorder %s500_s18, 2  ;;  %s336_s10 = sand.u32 1, %s488_s15  }
 0x21d   : > { %s337_s11 = scalar_lea.sflag [#allocation3], %s336_s10 }
 0x21e   : > { %p401_p0 = pnand %p404_p13, %p571_p6 }
 0x220   : > { %p402_p1 = pneg %p401_p0 }
 0x222   : > { %483 = dma.done.wait (%p402_p1), %s337_s11, 256  }
 0x223   : > { %485 = vsyncadd (%p402_p1), %s337_s11, 4294967040  ;;  %p14_p2 = scmp.ge.s32.totalorder %s554_s21, 4   ;;  %s662_s15 = smov %s492_s16 }
 0x224   : > { %s663_s16 = smov %s496_s17  ;;  %s664_s17 = smov %s565_s24 }
 0x225   : > { %s665_s18 = smov %s554_s21  ;;  %16 = sbr.rel (!%p14_p2) target bundleno = 3 (0x3), region = 71 }
 0x22a   :  { %342 = vsyncpa [#allocation3], 1 }
 0x22b   :  { %344 = vsyncpa [#allocation3 + $0x1], 1 }

</bundles_post_ra>
